<compile_context>
chip_gen: v7x
topology: tpu7x:2x2x1
jax: 0.10.0
libtpu: 0.0.40
codegen_flags: <defaults>
</compile_context>

<pallas_src>
import jax
import jax.numpy as jnp
from jax.experimental import pallas as pl
from jax.experimental.pallas import tpu as pltpu


# ----------------------------- weight standardization -----------------------

def weight_standardize(w):
    """Exactly as the PyTorch WS-Conv2d.forward: subtract mean over (Cin, kh, kw);
    divide by unbiased std (of the mean-subtracted weight) + 1e-5."""
    mean = jnp.mean(w, axis=(1, 2, 3), keepdims=True)
    wc = w - mean
    std = jnp.std(wc.reshape(w.shape[0], -1), axis=1, ddof=1).reshape(-1, 1, 1, 1) + 1e-5
    return wc / std


# ----------------------------- Pallas wrapper + kernel -----------------------

def basic_block_forward(x_nchw, params):
    N, C, H, W = x_nchw.shape
    P = params["w1"].shape[0]                               # planes
    assert C == P, "downsample=None with expansion=1 requires inplanes == planes"
    CP = ((max(C, P) + 127) // 128) * 128                   # lane-dense channel padding

    # ---- host-side prep: f32 weight standardization, bf16 MXU operands ----
    x = jnp.transpose(x_nchw, (0, 2, 3, 1)).astype(jnp.float32)            # NHWC
    xp = jnp.pad(x, ((0, 0), (1, 1), (1, 1), (0, CP - C))).astype(jnp.bfloat16)

    def prep_weight(w, cin):                                # (O,Cin,3,3) -> (3,3,CP,CP) bf16
        wt = jnp.transpose(w, (2, 3, 1, 0))
        wt = jnp.pad(wt, ((0, 0), (0, 0), (0, CP - cin), (0, CP - w.shape[0])))
        return wt.astype(jnp.bfloat16)

    w1m = prep_weight(weight_standardize(params["w1"]), C)  # WS conv1 (bias handled below)
    w2m = prep_weight(params["w2"], P)                      # plain conv2 (no WS, no bias)

    # packed per-channel vectors: rows 0=b1, 1=g1, 2=be1, 3=g2, 4=be2 (padded lanes stay 0)
    sb = jnp.zeros((8, CP), jnp.float32)
    for r, k in enumerate(("b1", "g1", "be1", "g2", "be2")):
        sb = sb.at[r, :P].set(params[k].astype(jnp.float32))

    inv_p = 1.0 / float(P)

    def kernel(x_ref, w1_ref, w2_ref, sb_ref, out_ref, h1p_ref):
        lane = jax.lax.broadcasted_iota(jnp.int32, (1, CP), 1)
        lmask = (lane < P).astype(jnp.float32)              # real-channel mask for LN stats

        def layernorm(h, g, b):
            mu = jnp.sum(h * lmask, axis=-1, keepdims=True) * inv_p
            d = h - mu
            var = jnp.sum(d * d * lmask, axis=-1, keepdims=True) * inv_p
            return d * jax.lax.rsqrt(var + 1e-5) * g + b

        def conv3x3_dots(src_ref, w_ref):
            # in-kernel im2col: 9 shifted windows, 9 accumulating bf16 MXU dots (f32 acc)
            acc = jnp.zeros((H * W, CP), jnp.float32)
            for kh in range(3):
                for kw in range(3):
                    patch = src_ref[kh:kh + H, kw:kw + W, :]
                    patch = patch.reshape(H * W, CP).astype(jnp.bfloat16)
                    acc = acc + jnp.dot(patch, w_ref[kh, kw],
                                        preferred_element_type=jnp.float32)
            return acc

        # stage 1: weight-standardized 3x3 conv (pad 1) + bias + LayerNorm(C) + ReLU
        h = conv3x3_dots(x_ref, w1_ref) + sb_ref[0:1, :]
        h = jnp.maximum(layernorm(h, sb_ref[1:2, :], sb_ref[2:3, :]), 0.0)

        # stage 2: plain 3x3 conv (pad 1, no bias) on zero-padded h1, then LayerNorm(C)
        h1p_ref[...] = jnp.zeros((H + 2, W + 2, CP), jnp.float32)
        h1p_ref[1:H + 1, 1:W + 1, :] = h.reshape(H, W, CP)
        h2 = layernorm(conv3x3_dots(h1p_ref, w2_ref), sb_ref[3:4, :], sb_ref[4:5, :])

        # residual (identity = interior of the padded input) + ReLU, all f32
        iden = x_ref[1:H + 1, 1:W + 1, :].reshape(H * W, CP).astype(jnp.float32)
        out_ref[...] = jnp.maximum(h2 + iden, 0.0).reshape(H, W, CP)

    out_nhwc = pl.pallas_call(
        kernel,
        out_shape=jax.ShapeDtypeStruct((N, H, W, CP), jnp.float32),
        grid_spec=pltpu.PrefetchScalarGridSpec(
            num_scalar_prefetch=0,
            grid=(N,),                                       # one image per step (>= 2 steps)
            in_specs=[
                pl.BlockSpec((None, H + 2, W + 2, CP), lambda n: (n, 0, 0, 0)),  # x (bf16)
                pl.BlockSpec((3, 3, CP, CP), lambda n: (0, 0, 0, 0)),            # w1 (resident)
                pl.BlockSpec((3, 3, CP, CP), lambda n: (0, 0, 0, 0)),            # w2 (resident)
                pl.BlockSpec((8, CP), lambda n: (0, 0)),                         # packed b/gamma/beta
            ],
            out_specs=pl.BlockSpec((None, H, W, CP), lambda n: (n, 0, 0, 0)),
            scratch_shapes=[pltpu.VMEM((H + 2, W + 2, CP), jnp.float32)],        # zero-padded h1
        ),
        compiler_params=pltpu.CompilerParams(
            dimension_semantics=("parallel",),               # megacore split over images
            vmem_limit_bytes=48 * 1024 * 1024,               # fits v7x 64 MiB / v5e-v6e 128 MiB
        ),
    )(xp, w1m, w2m, sb)

    # drop channel padding, back to NCHW
    return jnp.transpose(out_nhwc[..., :P], (0, 3, 1, 2))


# ----------------------------- pure-JAX reference ----------------------------

def reference_forward(x_nchw, params):
    """Same math as the module (with the TODO-noted fixes); conv operands rounded to
    bf16 exactly as the kernel does, so the comparison isolates kernel bugs."""
    x = jnp.transpose(x_nchw, (0, 2, 3, 1)).astype(jnp.float32)
    xb = x.astype(jnp.bfloat16).astype(jnp.float32)

    def ln(h, g, b):
        mu = jnp.mean(h, axis=-1, keepdims=True)
        var = jnp.mean((h - mu) ** 2, axis=-1, keepdims=True)
        return (h - mu) * jax.lax.rsqrt(var + 1e-5) * g + b

    def conv3x3(h, w):  # w: (O, Cin, 3, 3)
        return jax.lax.conv_general_dilated(
            h, jnp.transpose(w, (2, 3, 1, 0)), (1, 1), ((1, 1), (1, 1)),
            dimension_numbers=("NHWC", "HWIO", "NHWC"),
            precision=jax.lax.Precision.HIGHEST)

    w1 = weight_standardize(params["w1"]).astype(jnp.bfloat16).astype(jnp.float32)
    w2 = params["w2"].astype(jnp.bfloat16).astype(jnp.float32)

    h = conv3x3(xb, w1) + params["b1"]
    h = jnp.maximum(ln(h, params["g1"], params["be1"]), 0.0)
    h = h.astype(jnp.bfloat16).astype(jnp.float32)   # kernel feeds conv2 bf16-rounded h1
    h = conv3x3(h, w2)
    h = jnp.maximum(ln(h, params["g2"], params["be2"]) + xb, 0.0)
    return jnp.transpose(h, (0, 3, 1, 2))


# ----------------------------- main ------------------------------------------

if __name__ == "__main__":
    key = jax.random.PRNGKey(0)
    ks = jax.random.split(key, 8)

    inplanes = planes = 16        # expansion = 1, downsample = None -> inplanes == planes
    N, H, W = 2, 16, 16

    params = dict(
        w1=jax.random.normal(ks[0], (planes, inplanes, 3, 3), jnp.float32) * 0.1,
        b1=jax.random.normal(ks[1], (planes,), jnp.float32) * 0.1,
        g1=1.0 + 0.1 * jax.random.normal(ks[2], (planes,), jnp.float32),
        be1=0.1 * jax.random.normal(ks[3], (planes,), jnp.float32),
        w2=jax.random.normal(ks[4], (planes, planes, 3, 3), jnp.float32) * 0.1,
        g2=1.0 + 0.1 * jax.random.normal(ks[5], (planes,), jnp.float32),
        be2=0.1 * jax.random.normal(ks[6], (planes,), jnp.float32),
    )
    x = jax.random.normal(ks[7], (N, inplanes, H, W), jnp.float32)

    out = jax.block_until_ready(jax.jit(basic_block_forward)(x, params))
    ref = jax.block_until_ready(reference_forward(x, params))

    assert out.shape == (N, planes, H, W)
    # Tolerance accounts for bf16 MXU operands (f32 accumulation) vs the f32-structured
    # reference: occasional double-rounding of the bf16 intermediate gives a few-1e-3 spread.
    assert jnp.allclose(out, ref, atol=1e-2, rtol=1e-2), "mismatch vs pure-JAX reference"
    print("KERNEL_OK")
</pallas_src>

<mosaic_0001>
module attributes {stable_mosaic.version = 11 : i64} {
  func.func @kernel(%arg0: i32, %arg1: memref<1x18x18x128xbf16, #tpu.memory_space<vmem>>, %arg2: memref<3x3x128x128xbf16, #tpu.memory_space<vmem>>, %arg3: memref<3x3x128x128xbf16, #tpu.memory_space<vmem>>, %arg4: memref<8x128xf32, #tpu.memory_space<vmem>>, %arg5: memref<1x16x16x128xf32, #tpu.memory_space<vmem>>, %arg6: memref<18x18x128xf32, #tpu.memory_space<vmem>>) attributes {dimension_semantics = [#tpu.dimension_semantics<parallel>], iteration_bounds = array<i64: 2>, scalar_prefetch = 0 : i64, scratch_operands = 1 : i64, tpu.core_type = #tpu.core_type<tc>, window_params = [{transform_indices = @transform_0, window_bounds = array<i64: 1, 18, 18, 128>}, {pipeline_mode = #tpu.pipeline_mode<synchronous>, transform_indices = @transform_1, window_bounds = array<i64: 3, 3, 128, 128>}, {pipeline_mode = #tpu.pipeline_mode<synchronous>, transform_indices = @transform_2, window_bounds = array<i64: 3, 3, 128, 128>}, {pipeline_mode = #tpu.pipeline_mode<synchronous>, transform_indices = @transform_3, window_bounds = array<i64: 8, 128>}, {transform_indices = @transform_4, window_bounds = array<i64: 1, 16, 16, 128>}]} {
    %0 = tpu.iota {dimensions = array<i32: 1>} : vector<1x128xi32>
    %c16_i32 = arith.constant 16 : i32
    %1 = vector.broadcast %c16_i32 : i32 to vector<1x128xi32>
    %2 = arith.cmpi slt, %0, %1 : vector<1x128xi32>
    %3 = arith.extui %2 : vector<1x128xi1> to vector<1x128xi32>
    %4 = arith.sitofp %3 : vector<1x128xi32> to vector<1x128xf32>
    %cst = arith.constant 0.000000e+00 : f32
    %5 = vector.broadcast %cst : f32 to vector<256x128xf32>
    %c0 = arith.constant 0 : index
    %c0_0 = arith.constant 0 : index
    %c0_1 = arith.constant 0 : index
    %c0_2 = arith.constant 0 : index
    %6 = vector.load %arg1[%c0, %c0_0, %c0_1, %c0_2] : memref<1x18x18x128xbf16, #tpu.memory_space<vmem>>, vector<1x16x16x128xbf16>
    %7 = vector.shape_cast %6 : vector<1x16x16x128xbf16> to vector<16x16x128xbf16>
    %8 = vector.shape_cast %7 : vector<16x16x128xbf16> to vector<256x128xbf16>
    %c0_3 = arith.constant 0 : index
    %c0_4 = arith.constant 0 : index
    %c0_5 = arith.constant 0 : index
    %c0_6 = arith.constant 0 : index
    %9 = vector.load %arg2[%c0_3, %c0_4, %c0_5, %c0_6] : memref<3x3x128x128xbf16, #tpu.memory_space<vmem>>, vector<1x1x128x128xbf16>
    %10 = vector.shape_cast %9 : vector<1x1x128x128xbf16> to vector<128x128xbf16>
    %cst_7 = arith.constant dense<0.000000e+00> : vector<256x128xf32>
    %11 = tpu.matmul %8, %10, %cst_7 {dimension_numbers = #tpu.dot_dimension_numbers<[1], [0], [0], [1], [0, 0, 1, 1], [], []>} : vector<256x128xbf16>, vector<128x128xbf16>, vector<256x128xf32> -> vector<256x128xf32>
    %12 = arith.addf %5, %11 : vector<256x128xf32>
    %c0_8 = arith.constant 0 : index
    %c0_9 = arith.constant 0 : index
    %c1 = arith.constant 1 : index
    %c0_10 = arith.constant 0 : index
    %13 = vector.load %arg1[%c0_8, %c0_9, %c1, %c0_10] : memref<1x18x18x128xbf16, #tpu.memory_space<vmem>>, vector<1x16x16x128xbf16>
    %14 = vector.shape_cast %13 : vector<1x16x16x128xbf16> to vector<16x16x128xbf16>
    %15 = vector.shape_cast %14 : vector<16x16x128xbf16> to vector<256x128xbf16>
    %c0_11 = arith.constant 0 : index
    %c1_12 = arith.constant 1 : index
    %c0_13 = arith.constant 0 : index
    %c0_14 = arith.constant 0 : index
    %16 = vector.load %arg2[%c0_11, %c1_12, %c0_13, %c0_14] : memref<3x3x128x128xbf16, #tpu.memory_space<vmem>>, vector<1x1x128x128xbf16>
    %17 = vector.shape_cast %16 : vector<1x1x128x128xbf16> to vector<128x128xbf16>
    %cst_15 = arith.constant dense<0.000000e+00> : vector<256x128xf32>
    %18 = tpu.matmul %15, %17, %cst_15 {dimension_numbers = #tpu.dot_dimension_numbers<[1], [0], [0], [1], [0, 0, 1, 1], [], []>} : vector<256x128xbf16>, vector<128x128xbf16>, vector<256x128xf32> -> vector<256x128xf32>
    %19 = arith.addf %12, %18 : vector<256x128xf32>
    %c0_16 = arith.constant 0 : index
    %c0_17 = arith.constant 0 : index
    %c2 = arith.constant 2 : index
    %c0_18 = arith.constant 0 : index
    %20 = vector.load %arg1[%c0_16, %c0_17, %c2, %c0_18] : memref<1x18x18x128xbf16, #tpu.memory_space<vmem>>, vector<1x16x16x128xbf16>
    %21 = vector.shape_cast %20 : vector<1x16x16x128xbf16> to vector<16x16x128xbf16>
    %22 = vector.shape_cast %21 : vector<16x16x128xbf16> to vector<256x128xbf16>
    %c0_19 = arith.constant 0 : index
    %c2_20 = arith.constant 2 : index
    %c0_21 = arith.constant 0 : index
    %c0_22 = arith.constant 0 : index
    %23 = vector.load %arg2[%c0_19, %c2_20, %c0_21, %c0_22] : memref<3x3x128x128xbf16, #tpu.memory_space<vmem>>, vector<1x1x128x128xbf16>
    %24 = vector.shape_cast %23 : vector<1x1x128x128xbf16> to vector<128x128xbf16>
    %cst_23 = arith.constant dense<0.000000e+00> : vector<256x128xf32>
    %25 = tpu.matmul %22, %24, %cst_23 {dimension_numbers = #tpu.dot_dimension_numbers<[1], [0], [0], [1], [0, 0, 1, 1], [], []>} : vector<256x128xbf16>, vector<128x128xbf16>, vector<256x128xf32> -> vector<256x128xf32>
    %26 = arith.addf %19, %25 : vector<256x128xf32>
    %c0_24 = arith.constant 0 : index
    %c1_25 = arith.constant 1 : index
    %c0_26 = arith.constant 0 : index
    %c0_27 = arith.constant 0 : index
    %27 = vector.load %arg1[%c0_24, %c1_25, %c0_26, %c0_27] : memref<1x18x18x128xbf16, #tpu.memory_space<vmem>>, vector<1x16x16x128xbf16>
    %28 = vector.shape_cast %27 : vector<1x16x16x128xbf16> to vector<16x16x128xbf16>
    %29 = vector.shape_cast %28 : vector<16x16x128xbf16> to vector<256x128xbf16>
    %c1_28 = arith.constant 1 : index
    %c0_29 = arith.constant 0 : index
    %c0_30 = arith.constant 0 : index
    %c0_31 = arith.constant 0 : index
    %30 = vector.load %arg2[%c1_28, %c0_29, %c0_30, %c0_31] : memref<3x3x128x128xbf16, #tpu.memory_space<vmem>>, vector<1x1x128x128xbf16>
    %31 = vector.shape_cast %30 : vector<1x1x128x128xbf16> to vector<128x128xbf16>
    %cst_32 = arith.constant dense<0.000000e+00> : vector<256x128xf32>
    %32 = tpu.matmul %29, %31, %cst_32 {dimension_numbers = #tpu.dot_dimension_numbers<[1], [0], [0], [1], [0, 0, 1, 1], [], []>} : vector<256x128xbf16>, vector<128x128xbf16>, vector<256x128xf32> -> vector<256x128xf32>
    %33 = arith.addf %26, %32 : vector<256x128xf32>
    %c0_33 = arith.constant 0 : index
    %c1_34 = arith.constant 1 : index
    %c1_35 = arith.constant 1 : index
    %c0_36 = arith.constant 0 : index
    %34 = vector.load %arg1[%c0_33, %c1_34, %c1_35, %c0_36] : memref<1x18x18x128xbf16, #tpu.memory_space<vmem>>, vector<1x16x16x128xbf16>
    %35 = vector.shape_cast %34 : vector<1x16x16x128xbf16> to vector<16x16x128xbf16>
    %36 = vector.shape_cast %35 : vector<16x16x128xbf16> to vector<256x128xbf16>
    %c1_37 = arith.constant 1 : index
    %c1_38 = arith.constant 1 : index
    %c0_39 = arith.constant 0 : index
    %c0_40 = arith.constant 0 : index
    %37 = vector.load %arg2[%c1_37, %c1_38, %c0_39, %c0_40] : memref<3x3x128x128xbf16, #tpu.memory_space<vmem>>, vector<1x1x128x128xbf16>
    %38 = vector.shape_cast %37 : vector<1x1x128x128xbf16> to vector<128x128xbf16>
    %cst_41 = arith.constant dense<0.000000e+00> : vector<256x128xf32>
    %39 = tpu.matmul %36, %38, %cst_41 {dimension_numbers = #tpu.dot_dimension_numbers<[1], [0], [0], [1], [0, 0, 1, 1], [], []>} : vector<256x128xbf16>, vector<128x128xbf16>, vector<256x128xf32> -> vector<256x128xf32>
    %40 = arith.addf %33, %39 : vector<256x128xf32>
    %c0_42 = arith.constant 0 : index
    %c1_43 = arith.constant 1 : index
    %c2_44 = arith.constant 2 : index
    %c0_45 = arith.constant 0 : index
    %41 = vector.load %arg1[%c0_42, %c1_43, %c2_44, %c0_45] : memref<1x18x18x128xbf16, #tpu.memory_space<vmem>>, vector<1x16x16x128xbf16>
    %42 = vector.shape_cast %41 : vector<1x16x16x128xbf16> to vector<16x16x128xbf16>
    %43 = vector.shape_cast %42 : vector<16x16x128xbf16> to vector<256x128xbf16>
    %c1_46 = arith.constant 1 : index
    %c2_47 = arith.constant 2 : index
    %c0_48 = arith.constant 0 : index
    %c0_49 = arith.constant 0 : index
    %44 = vector.load %arg2[%c1_46, %c2_47, %c0_48, %c0_49] : memref<3x3x128x128xbf16, #tpu.memory_space<vmem>>, vector<1x1x128x128xbf16>
    %45 = vector.shape_cast %44 : vector<1x1x128x128xbf16> to vector<128x128xbf16>
    %cst_50 = arith.constant dense<0.000000e+00> : vector<256x128xf32>
    %46 = tpu.matmul %43, %45, %cst_50 {dimension_numbers = #tpu.dot_dimension_numbers<[1], [0], [0], [1], [0, 0, 1, 1], [], []>} : vector<256x128xbf16>, vector<128x128xbf16>, vector<256x128xf32> -> vector<256x128xf32>
    %47 = arith.addf %40, %46 : vector<256x128xf32>
    %c0_51 = arith.constant 0 : index
    %c2_52 = arith.constant 2 : index
    %c0_53 = arith.constant 0 : index
    %c0_54 = arith.constant 0 : index
    %48 = vector.load %arg1[%c0_51, %c2_52, %c0_53, %c0_54] : memref<1x18x18x128xbf16, #tpu.memory_space<vmem>>, vector<1x16x16x128xbf16>
    %49 = vector.shape_cast %48 : vector<1x16x16x128xbf16> to vector<16x16x128xbf16>
    %50 = vector.shape_cast %49 : vector<16x16x128xbf16> to vector<256x128xbf16>
    %c2_55 = arith.constant 2 : index
    %c0_56 = arith.constant 0 : index
    %c0_57 = arith.constant 0 : index
    %c0_58 = arith.constant 0 : index
    %51 = vector.load %arg2[%c2_55, %c0_56, %c0_57, %c0_58] : memref<3x3x128x128xbf16, #tpu.memory_space<vmem>>, vector<1x1x128x128xbf16>
    %52 = vector.shape_cast %51 : vector<1x1x128x128xbf16> to vector<128x128xbf16>
    %cst_59 = arith.constant dense<0.000000e+00> : vector<256x128xf32>
    %53 = tpu.matmul %50, %52, %cst_59 {dimension_numbers = #tpu.dot_dimension_numbers<[1], [0], [0], [1], [0, 0, 1, 1], [], []>} : vector<256x128xbf16>, vector<128x128xbf16>, vector<256x128xf32> -> vector<256x128xf32>
    %54 = arith.addf %47, %53 : vector<256x128xf32>
    %c0_60 = arith.constant 0 : index
    %c2_61 = arith.constant 2 : index
    %c1_62 = arith.constant 1 : index
    %c0_63 = arith.constant 0 : index
    %55 = vector.load %arg1[%c0_60, %c2_61, %c1_62, %c0_63] : memref<1x18x18x128xbf16, #tpu.memory_space<vmem>>, vector<1x16x16x128xbf16>
    %56 = vector.shape_cast %55 : vector<1x16x16x128xbf16> to vector<16x16x128xbf16>
    %57 = vector.shape_cast %56 : vector<16x16x128xbf16> to vector<256x128xbf16>
    %c2_64 = arith.constant 2 : index
    %c1_65 = arith.constant 1 : index
    %c0_66 = arith.constant 0 : index
    %c0_67 = arith.constant 0 : index
    %58 = vector.load %arg2[%c2_64, %c1_65, %c0_66, %c0_67] : memref<3x3x128x128xbf16, #tpu.memory_space<vmem>>, vector<1x1x128x128xbf16>
    %59 = vector.shape_cast %58 : vector<1x1x128x128xbf16> to vector<128x128xbf16>
    %cst_68 = arith.constant dense<0.000000e+00> : vector<256x128xf32>
    %60 = tpu.matmul %57, %59, %cst_68 {dimension_numbers = #tpu.dot_dimension_numbers<[1], [0], [0], [1], [0, 0, 1, 1], [], []>} : vector<256x128xbf16>, vector<128x128xbf16>, vector<256x128xf32> -> vector<256x128xf32>
    %61 = arith.addf %54, %60 : vector<256x128xf32>
    %c0_69 = arith.constant 0 : index
    %c2_70 = arith.constant 2 : index
    %c2_71 = arith.constant 2 : index
    %c0_72 = arith.constant 0 : index
    %62 = vector.load %arg1[%c0_69, %c2_70, %c2_71, %c0_72] : memref<1x18x18x128xbf16, #tpu.memory_space<vmem>>, vector<1x16x16x128xbf16>
    %63 = vector.shape_cast %62 : vector<1x16x16x128xbf16> to vector<16x16x128xbf16>
    %64 = vector.shape_cast %63 : vector<16x16x128xbf16> to vector<256x128xbf16>
    %c2_73 = arith.constant 2 : index
    %c2_74 = arith.constant 2 : index
    %c0_75 = arith.constant 0 : index
    %c0_76 = arith.constant 0 : index
    %65 = vector.load %arg2[%c2_73, %c2_74, %c0_75, %c0_76] : memref<3x3x128x128xbf16, #tpu.memory_space<vmem>>, vector<1x1x128x128xbf16>
    %66 = vector.shape_cast %65 : vector<1x1x128x128xbf16> to vector<128x128xbf16>
    %cst_77 = arith.constant dense<0.000000e+00> : vector<256x128xf32>
    %67 = tpu.matmul %64, %66, %cst_77 {dimension_numbers = #tpu.dot_dimension_numbers<[1], [0], [0], [1], [0, 0, 1, 1], [], []>} : vector<256x128xbf16>, vector<128x128xbf16>, vector<256x128xf32> -> vector<256x128xf32>
    %68 = arith.addf %61, %67 : vector<256x128xf32>
    %c0_78 = arith.constant 0 : index
    %c0_79 = arith.constant 0 : index
    %69 = vector.load %arg4[%c0_78, %c0_79] : memref<8x128xf32, #tpu.memory_space<vmem>>, vector<1x128xf32>
    %70 = vector.broadcast %69 : vector<1x128xf32> to vector<256x128xf32>
    %71 = arith.addf %68, %70 : vector<256x128xf32>
    %c1_80 = arith.constant 1 : index
    %c0_81 = arith.constant 0 : index
    %72 = vector.load %arg4[%c1_80, %c0_81] : memref<8x128xf32, #tpu.memory_space<vmem>>, vector<1x128xf32>
    %c2_82 = arith.constant 2 : index
    %c0_83 = arith.constant 0 : index
    %73 = vector.load %arg4[%c2_82, %c0_83] : memref<8x128xf32, #tpu.memory_space<vmem>>, vector<1x128xf32>
    %74 = vector.broadcast %4 : vector<1x128xf32> to vector<256x128xf32>
    %75 = arith.mulf %71, %74 : vector<256x128xf32>
    %cst_84 = arith.constant dense<0.000000e+00> : vector<256xf32>
    %76 = vector.multi_reduction <add>, %75, %cst_84 [1] : vector<256x128xf32> to vector<256xf32>
    %77 = vector.shape_cast %76 : vector<256xf32> to vector<256x1xf32>
    %cst_85 = arith.constant 6.250000e-02 : f32
    %78 = vector.broadcast %cst_85 : f32 to vector<256x1xf32>
    %79 = arith.mulf %77, %78 : vector<256x1xf32>
    %80 = vector.broadcast %79 : vector<256x1xf32> to vector<256x128xf32>
    %81 = arith.subf %71, %80 : vector<256x128xf32>
    %82 = arith.mulf %81, %81 : vector<256x128xf32>
    %83 = vector.broadcast %4 : vector<1x128xf32> to vector<256x128xf32>
    %84 = arith.mulf %82, %83 : vector<256x128xf32>
    %cst_86 = arith.constant dense<0.000000e+00> : vector<256xf32>
    %85 = vector.multi_reduction <add>, %84, %cst_86 [1] : vector<256x128xf32> to vector<256xf32>
    %86 = vector.shape_cast %85 : vector<256xf32> to vector<256x1xf32>
    %cst_87 = arith.constant 6.250000e-02 : f32
    %87 = vector.broadcast %cst_87 : f32 to vector<256x1xf32>
    %88 = arith.mulf %86, %87 : vector<256x1xf32>
    %cst_88 = arith.constant 9.99999974E-6 : f32
    %89 = vector.broadcast %cst_88 : f32 to vector<256x1xf32>
    %90 = arith.addf %88, %89 : vector<256x1xf32>
    %91 = math.rsqrt %90 : vector<256x1xf32>
    %92 = vector.broadcast %91 : vector<256x1xf32> to vector<256x128xf32>
    %93 = arith.mulf %81, %92 : vector<256x128xf32>
    %94 = vector.broadcast %72 : vector<1x128xf32> to vector<256x128xf32>
    %95 = arith.mulf %93, %94 : vector<256x128xf32>
    %96 = vector.broadcast %73 : vector<1x128xf32> to vector<256x128xf32>
    %97 = arith.addf %95, %96 : vector<256x128xf32>
    %cst_89 = arith.constant 0.000000e+00 : f32
    %98 = vector.broadcast %cst_89 : f32 to vector<256x128xf32>
    %99 = arith.maximumf %97, %98 : vector<256x128xf32>
    %cst_90 = arith.constant 0.000000e+00 : f32
    %100 = vector.broadcast %cst_90 : f32 to vector<18x18x128xf32>
    %c0_91 = arith.constant 0 : index
    %c0_92 = arith.constant 0 : index
    %c0_93 = arith.constant 0 : index
    %101 = vector.load %arg6[%c0_91, %c0_92, %c0_93] : memref<18x18x128xf32, #tpu.memory_space<vmem>>, vector<18x18x128xf32>
    tpu.vector_store %arg6[%c0_91, %c0_92, %c0_93], %100 {strides = array<i32>} : memref<18x18x128xf32, #tpu.memory_space<vmem>>, vector<18x18x128xf32>,
    %102 = vector.shape_cast %99 : vector<256x128xf32> to vector<16x16x128xf32>
    %c1_94 = arith.constant 1 : index
    %c1_95 = arith.constant 1 : index
    %c0_96 = arith.constant 0 : index
    %103 = vector.load %arg6[%c1_94, %c1_95, %c0_96] : memref<18x18x128xf32, #tpu.memory_space<vmem>>, vector<16x16x128xf32>
    tpu.vector_store %arg6[%c1_94, %c1_95, %c0_96], %102 {strides = array<i32>} : memref<18x18x128xf32, #tpu.memory_space<vmem>>, vector<16x16x128xf32>,
    %cst_97 = arith.constant 0.000000e+00 : f32
    %104 = vector.broadcast %cst_97 : f32 to vector<256x128xf32>
    %c0_98 = arith.constant 0 : index
    %c0_99 = arith.constant 0 : index
    %c0_100 = arith.constant 0 : index
    %105 = vector.load %arg6[%c0_98, %c0_99, %c0_100] : memref<18x18x128xf32, #tpu.memory_space<vmem>>, vector<16x16x128xf32>
    %106 = vector.shape_cast %105 : vector<16x16x128xf32> to vector<256x128xf32>
    %107 = arith.truncf %106 : vector<256x128xf32> to vector<256x128xbf16>
    %c0_101 = arith.constant 0 : index
    %c0_102 = arith.constant 0 : index
    %c0_103 = arith.constant 0 : index
    %c0_104 = arith.constant 0 : index
    %108 = vector.load %arg3[%c0_101, %c0_102, %c0_103, %c0_104] : memref<3x3x128x128xbf16, #tpu.memory_space<vmem>>, vector<1x1x128x128xbf16>
    %109 = vector.shape_cast %108 : vector<1x1x128x128xbf16> to vector<128x128xbf16>
    %cst_105 = arith.constant dense<0.000000e+00> : vector<256x128xf32>
    %110 = tpu.matmul %107, %109, %cst_105 {dimension_numbers = #tpu.dot_dimension_numbers<[1], [0], [0], [1], [0, 0, 1, 1], [], []>} : vector<256x128xbf16>, vector<128x128xbf16>, vector<256x128xf32> -> vector<256x128xf32>
    %111 = arith.addf %104, %110 : vector<256x128xf32>
    %c0_106 = arith.constant 0 : index
    %c1_107 = arith.constant 1 : index
    %c0_108 = arith.constant 0 : index
    %112 = vector.load %arg6[%c0_106, %c1_107, %c0_108] : memref<18x18x128xf32, #tpu.memory_space<vmem>>, vector<16x16x128xf32>
    %113 = vector.shape_cast %112 : vector<16x16x128xf32> to vector<256x128xf32>
    %114 = arith.truncf %113 : vector<256x128xf32> to vector<256x128xbf16>
    %c0_109 = arith.constant 0 : index
    %c1_110 = arith.constant 1 : index
    %c0_111 = arith.constant 0 : index
    %c0_112 = arith.constant 0 : index
    %115 = vector.load %arg3[%c0_109, %c1_110, %c0_111, %c0_112] : memref<3x3x128x128xbf16, #tpu.memory_space<vmem>>, vector<1x1x128x128xbf16>
    %116 = vector.shape_cast %115 : vector<1x1x128x128xbf16> to vector<128x128xbf16>
    %cst_113 = arith.constant dense<0.000000e+00> : vector<256x128xf32>
    %117 = tpu.matmul %114, %116, %cst_113 {dimension_numbers = #tpu.dot_dimension_numbers<[1], [0], [0], [1], [0, 0, 1, 1], [], []>} : vector<256x128xbf16>, vector<128x128xbf16>, vector<256x128xf32> -> vector<256x128xf32>
    %118 = arith.addf %111, %117 : vector<256x128xf32>
    %c0_114 = arith.constant 0 : index
    %c2_115 = arith.constant 2 : index
    %c0_116 = arith.constant 0 : index
    %119 = vector.load %arg6[%c0_114, %c2_115, %c0_116] : memref<18x18x128xf32, #tpu.memory_space<vmem>>, vector<16x16x128xf32>
    %120 = vector.shape_cast %119 : vector<16x16x128xf32> to vector<256x128xf32>
    %121 = arith.truncf %120 : vector<256x128xf32> to vector<256x128xbf16>
    %c0_117 = arith.constant 0 : index
    %c2_118 = arith.constant 2 : index
    %c0_119 = arith.constant 0 : index
    %c0_120 = arith.constant 0 : index
    %122 = vector.load %arg3[%c0_117, %c2_118, %c0_119, %c0_120] : memref<3x3x128x128xbf16, #tpu.memory_space<vmem>>, vector<1x1x128x128xbf16>
    %123 = vector.shape_cast %122 : vector<1x1x128x128xbf16> to vector<128x128xbf16>
    %cst_121 = arith.constant dense<0.000000e+00> : vector<256x128xf32>
    %124 = tpu.matmul %121, %123, %cst_121 {dimension_numbers = #tpu.dot_dimension_numbers<[1], [0], [0], [1], [0, 0, 1, 1], [], []>} : vector<256x128xbf16>, vector<128x128xbf16>, vector<256x128xf32> -> vector<256x128xf32>
    %125 = arith.addf %118, %124 : vector<256x128xf32>
    %c1_122 = arith.constant 1 : index
    %c0_123 = arith.constant 0 : index
    %c0_124 = arith.constant 0 : index
    %126 = vector.load %arg6[%c1_122, %c0_123, %c0_124] : memref<18x18x128xf32, #tpu.memory_space<vmem>>, vector<16x16x128xf32>
    %127 = vector.shape_cast %126 : vector<16x16x128xf32> to vector<256x128xf32>
    %128 = arith.truncf %127 : vector<256x128xf32> to vector<256x128xbf16>
    %c1_125 = arith.constant 1 : index
    %c0_126 = arith.constant 0 : index
    %c0_127 = arith.constant 0 : index
    %c0_128 = arith.constant 0 : index
    %129 = vector.load %arg3[%c1_125, %c0_126, %c0_127, %c0_128] : memref<3x3x128x128xbf16, #tpu.memory_space<vmem>>, vector<1x1x128x128xbf16>
    %130 = vector.shape_cast %129 : vector<1x1x128x128xbf16> to vector<128x128xbf16>
    %cst_129 = arith.constant dense<0.000000e+00> : vector<256x128xf32>
    %131 = tpu.matmul %128, %130, %cst_129 {dimension_numbers = #tpu.dot_dimension_numbers<[1], [0], [0], [1], [0, 0, 1, 1], [], []>} : vector<256x128xbf16>, vector<128x128xbf16>, vector<256x128xf32> -> vector<256x128xf32>
    %132 = arith.addf %125, %131 : vector<256x128xf32>
    %c1_130 = arith.constant 1 : index
    %c1_131 = arith.constant 1 : index
    %c0_132 = arith.constant 0 : index
    %133 = vector.load %arg6[%c1_130, %c1_131, %c0_132] : memref<18x18x128xf32, #tpu.memory_space<vmem>>, vector<16x16x128xf32>
    %134 = vector.shape_cast %133 : vector<16x16x128xf32> to vector<256x128xf32>
    %135 = arith.truncf %134 : vector<256x128xf32> to vector<256x128xbf16>
    %c1_133 = arith.constant 1 : index
    %c1_134 = arith.constant 1 : index
    %c0_135 = arith.constant 0 : index
    %c0_136 = arith.constant 0 : index
    %136 = vector.load %arg3[%c1_133, %c1_134, %c0_135, %c0_136] : memref<3x3x128x128xbf16, #tpu.memory_space<vmem>>, vector<1x1x128x128xbf16>
    %137 = vector.shape_cast %136 : vector<1x1x128x128xbf16> to vector<128x128xbf16>
    %cst_137 = arith.constant dense<0.000000e+00> : vector<256x128xf32>
    %138 = tpu.matmul %135, %137, %cst_137 {dimension_numbers = #tpu.dot_dimension_numbers<[1], [0], [0], [1], [0, 0, 1, 1], [], []>} : vector<256x128xbf16>, vector<128x128xbf16>, vector<256x128xf32> -> vector<256x128xf32>
    %139 = arith.addf %132, %138 : vector<256x128xf32>
    %c1_138 = arith.constant 1 : index
    %c2_139 = arith.constant 2 : index
    %c0_140 = arith.constant 0 : index
    %140 = vector.load %arg6[%c1_138, %c2_139, %c0_140] : memref<18x18x128xf32, #tpu.memory_space<vmem>>, vector<16x16x128xf32>
    %141 = vector.shape_cast %140 : vector<16x16x128xf32> to vector<256x128xf32>
    %142 = arith.truncf %141 : vector<256x128xf32> to vector<256x128xbf16>
    %c1_141 = arith.constant 1 : index
    %c2_142 = arith.constant 2 : index
    %c0_143 = arith.constant 0 : index
    %c0_144 = arith.constant 0 : index
    %143 = vector.load %arg3[%c1_141, %c2_142, %c0_143, %c0_144] : memref<3x3x128x128xbf16, #tpu.memory_space<vmem>>, vector<1x1x128x128xbf16>
    %144 = vector.shape_cast %143 : vector<1x1x128x128xbf16> to vector<128x128xbf16>
    %cst_145 = arith.constant dense<0.000000e+00> : vector<256x128xf32>
    %145 = tpu.matmul %142, %144, %cst_145 {dimension_numbers = #tpu.dot_dimension_numbers<[1], [0], [0], [1], [0, 0, 1, 1], [], []>} : vector<256x128xbf16>, vector<128x128xbf16>, vector<256x128xf32> -> vector<256x128xf32>
    %146 = arith.addf %139, %145 : vector<256x128xf32>
    %c2_146 = arith.constant 2 : index
    %c0_147 = arith.constant 0 : index
    %c0_148 = arith.constant 0 : index
    %147 = vector.load %arg6[%c2_146, %c0_147, %c0_148] : memref<18x18x128xf32, #tpu.memory_space<vmem>>, vector<16x16x128xf32>
    %148 = vector.shape_cast %147 : vector<16x16x128xf32> to vector<256x128xf32>
    %149 = arith.truncf %148 : vector<256x128xf32> to vector<256x128xbf16>
    %c2_149 = arith.constant 2 : index
    %c0_150 = arith.constant 0 : index
    %c0_151 = arith.constant 0 : index
    %c0_152 = arith.constant 0 : index
    %150 = vector.load %arg3[%c2_149, %c0_150, %c0_151, %c0_152] : memref<3x3x128x128xbf16, #tpu.memory_space<vmem>>, vector<1x1x128x128xbf16>
    %151 = vector.shape_cast %150 : vector<1x1x128x128xbf16> to vector<128x128xbf16>
    %cst_153 = arith.constant dense<0.000000e+00> : vector<256x128xf32>
    %152 = tpu.matmul %149, %151, %cst_153 {dimension_numbers = #tpu.dot_dimension_numbers<[1], [0], [0], [1], [0, 0, 1, 1], [], []>} : vector<256x128xbf16>, vector<128x128xbf16>, vector<256x128xf32> -> vector<256x128xf32>
    %153 = arith.addf %146, %152 : vector<256x128xf32>
    %c2_154 = arith.constant 2 : index
    %c1_155 = arith.constant 1 : index
    %c0_156 = arith.constant 0 : index
    %154 = vector.load %arg6[%c2_154, %c1_155, %c0_156] : memref<18x18x128xf32, #tpu.memory_space<vmem>>, vector<16x16x128xf32>
    %155 = vector.shape_cast %154 : vector<16x16x128xf32> to vector<256x128xf32>
    %156 = arith.truncf %155 : vector<256x128xf32> to vector<256x128xbf16>
    %c2_157 = arith.constant 2 : index
    %c1_158 = arith.constant 1 : index
    %c0_159 = arith.constant 0 : index
    %c0_160 = arith.constant 0 : index
    %157 = vector.load %arg3[%c2_157, %c1_158, %c0_159, %c0_160] : memref<3x3x128x128xbf16, #tpu.memory_space<vmem>>, vector<1x1x128x128xbf16>
    %158 = vector.shape_cast %157 : vector<1x1x128x128xbf16> to vector<128x128xbf16>
    %cst_161 = arith.constant dense<0.000000e+00> : vector<256x128xf32>
    %159 = tpu.matmul %156, %158, %cst_161 {dimension_numbers = #tpu.dot_dimension_numbers<[1], [0], [0], [1], [0, 0, 1, 1], [], []>} : vector<256x128xbf16>, vector<128x128xbf16>, vector<256x128xf32> -> vector<256x128xf32>
    %160 = arith.addf %153, %159 : vector<256x128xf32>
    %c2_162 = arith.constant 2 : index
    %c2_163 = arith.constant 2 : index
    %c0_164 = arith.constant 0 : index
    %161 = vector.load %arg6[%c2_162, %c2_163, %c0_164] : memref<18x18x128xf32, #tpu.memory_space<vmem>>, vector<16x16x128xf32>
    %162 = vector.shape_cast %161 : vector<16x16x128xf32> to vector<256x128xf32>
    %163 = arith.truncf %162 : vector<256x128xf32> to vector<256x128xbf16>
    %c2_165 = arith.constant 2 : index
    %c2_166 = arith.constant 2 : index
    %c0_167 = arith.constant 0 : index
    %c0_168 = arith.constant 0 : index
    %164 = vector.load %arg3[%c2_165, %c2_166, %c0_167, %c0_168] : memref<3x3x128x128xbf16, #tpu.memory_space<vmem>>, vector<1x1x128x128xbf16>
    %165 = vector.shape_cast %164 : vector<1x1x128x128xbf16> to vector<128x128xbf16>
    %cst_169 = arith.constant dense<0.000000e+00> : vector<256x128xf32>
    %166 = tpu.matmul %163, %165, %cst_169 {dimension_numbers = #tpu.dot_dimension_numbers<[1], [0], [0], [1], [0, 0, 1, 1], [], []>} : vector<256x128xbf16>, vector<128x128xbf16>, vector<256x128xf32> -> vector<256x128xf32>
    %167 = arith.addf %160, %166 : vector<256x128xf32>
    %c3 = arith.constant 3 : index
    %c0_170 = arith.constant 0 : index
    %168 = vector.load %arg4[%c3, %c0_170] : memref<8x128xf32, #tpu.memory_space<vmem>>, vector<1x128xf32>
    %c4 = arith.constant 4 : index
    %c0_171 = arith.constant 0 : index
    %169 = vector.load %arg4[%c4, %c0_171] : memref<8x128xf32, #tpu.memory_space<vmem>>, vector<1x128xf32>
    %170 = vector.broadcast %4 : vector<1x128xf32> to vector<256x128xf32>
    %171 = arith.mulf %167, %170 : vector<256x128xf32>
    %cst_172 = arith.constant dense<0.000000e+00> : vector<256xf32>
    %172 = vector.multi_reduction <add>, %171, %cst_172 [1] : vector<256x128xf32> to vector<256xf32>
    %173 = vector.shape_cast %172 : vector<256xf32> to vector<256x1xf32>
    %cst_173 = arith.constant 6.250000e-02 : f32
    %174 = vector.broadcast %cst_173 : f32 to vector<256x1xf32>
    %175 = arith.mulf %173, %174 : vector<256x1xf32>
    %176 = vector.broadcast %175 : vector<256x1xf32> to vector<256x128xf32>
    %177 = arith.subf %167, %176 : vector<256x128xf32>
    %178 = arith.mulf %177, %177 : vector<256x128xf32>
    %179 = vector.broadcast %4 : vector<1x128xf32> to vector<256x128xf32>
    %180 = arith.mulf %178, %179 : vector<256x128xf32>
    %cst_174 = arith.constant dense<0.000000e+00> : vector<256xf32>
    %181 = vector.multi_reduction <add>, %180, %cst_174 [1] : vector<256x128xf32> to vector<256xf32>
    %182 = vector.shape_cast %181 : vector<256xf32> to vector<256x1xf32>
    %cst_175 = arith.constant 6.250000e-02 : f32
    %183 = vector.broadcast %cst_175 : f32 to vector<256x1xf32>
    %184 = arith.mulf %182, %183 : vector<256x1xf32>
    %cst_176 = arith.constant 9.99999974E-6 : f32
    %185 = vector.broadcast %cst_176 : f32 to vector<256x1xf32>
    %186 = arith.addf %184, %185 : vector<256x1xf32>
    %187 = math.rsqrt %186 : vector<256x1xf32>
    %188 = vector.broadcast %187 : vector<256x1xf32> to vector<256x128xf32>
    %189 = arith.mulf %177, %188 : vector<256x128xf32>
    %190 = vector.broadcast %168 : vector<1x128xf32> to vector<256x128xf32>
    %191 = arith.mulf %189, %190 : vector<256x128xf32>
    %192 = vector.broadcast %169 : vector<1x128xf32> to vector<256x128xf32>
    %193 = arith.addf %191, %192 : vector<256x128xf32>
    %c0_177 = arith.constant 0 : index
    %c1_178 = arith.constant 1 : index
    %c1_179 = arith.constant 1 : index
    %c0_180 = arith.constant 0 : index
    %194 = vector.load %arg1[%c0_177, %c1_178, %c1_179, %c0_180] : memref<1x18x18x128xbf16, #tpu.memory_space<vmem>>, vector<1x16x16x128xbf16>
    %195 = vector.shape_cast %194 : vector<1x16x16x128xbf16> to vector<16x16x128xbf16>
    %196 = vector.shape_cast %195 : vector<16x16x128xbf16> to vector<256x128xbf16>
    %197 = arith.extf %196 : vector<256x128xbf16> to vector<256x128xf32>
    %198 = arith.addf %193, %197 : vector<256x128xf32>
    %cst_181 = arith.constant 0.000000e+00 : f32
    %199 = vector.broadcast %cst_181 : f32 to vector<256x128xf32>
    %200 = arith.maximumf %198, %199 : vector<256x128xf32>
    %201 = vector.shape_cast %200 : vector<256x128xf32> to vector<16x16x128xf32>
    %c0_182 = arith.constant 0 : index
    %c0_183 = arith.constant 0 : index
    %c0_184 = arith.constant 0 : index
    %c0_185 = arith.constant 0 : index
    %202 = vector.load %arg5[%c0_182, %c0_183, %c0_184, %c0_185] : memref<1x16x16x128xf32, #tpu.memory_space<vmem>>, vector<1x16x16x128xf32>
    %203 = vector.shape_cast %202 : vector<1x16x16x128xf32> to vector<16x16x128xf32>
    %204 = vector.shape_cast %201 : vector<16x16x128xf32> to vector<1x16x16x128xf32>
    tpu.vector_store %arg5[%c0_182, %c0_183, %c0_184, %c0_185], %204 {strides = array<i32>} : memref<1x16x16x128xf32, #tpu.memory_space<vmem>>, vector<1x16x16x128xf32>,
    return
  }
  func.func @transform_0(%arg0: i32) -> (i32, i32, i32, i32) {
    %c0_i32 = arith.constant 0 : i32
    %c0_i32_0 = arith.constant 0 : i32
    %c0_i32_1 = arith.constant 0 : i32
    %c0_i32_2 = arith.constant 0 : i32
    return %arg0, %c0_i32, %c0_i32_0, %c0_i32_1 : i32, i32, i32, i32
  }
  func.func @transform_1(%arg0: i32) -> (i32, i32, i32, i32) {
    %c0_i32 = arith.constant 0 : i32
    %c0_i32_0 = arith.constant 0 : i32
    %c0_i32_1 = arith.constant 0 : i32
    %c0_i32_2 = arith.constant 0 : i32
    %c0_i32_3 = arith.constant 0 : i32
    return %c0_i32, %c0_i32_0, %c0_i32_1, %c0_i32_2 : i32, i32, i32, i32
  }
  func.func @transform_2(%arg0: i32) -> (i32, i32, i32, i32) {
    %c0_i32 = arith.constant 0 : i32
    %c0_i32_0 = arith.constant 0 : i32
    %c0_i32_1 = arith.constant 0 : i32
    %c0_i32_2 = arith.constant 0 : i32
    %c0_i32_3 = arith.constant 0 : i32
    return %c0_i32, %c0_i32_0, %c0_i32_1, %c0_i32_2 : i32, i32, i32, i32
  }
  func.func @transform_3(%arg0: i32) -> (i32, i32) {
    %c0_i32 = arith.constant 0 : i32
    %c0_i32_0 = arith.constant 0 : i32
    %c0_i32_1 = arith.constant 0 : i32
    return %c0_i32, %c0_i32_0 : i32, i32
  }
  func.func @transform_4(%arg0: i32) -> (i32, i32, i32, i32) {
    %c0_i32 = arith.constant 0 : i32
    %c0_i32_0 = arith.constant 0 : i32
    %c0_i32_1 = arith.constant 0 : i32
    %c0_i32_2 = arith.constant 0 : i32
    return %arg0, %c0_i32, %c0_i32_0, %c0_i32_1 : i32, i32, i32, i32
  }
}

</mosaic_0001>

<bundles_post_ra>
// kernel: basic_block_forward.1
= control target key start
LH: loop header
LB: loop body
LE: loop exit
PB: predicated region body
PF: predicated region fallthrough
CT: control target
= control target key end

     0   :  { %s12523_s15 = smov 0   ;;  %s16090_s0 = inlined_call_operand.vmem [shape: bf16[2,18,18,128], index: 0, kind: input, shape index: {}]   ;;  %s16091_s1 = inlined_call_operand.vmem [shape: bf16[3,3,128,128], index: 1, kind: input, shape index: {}]   ;;  %s16092_s2 = inlined_call_operand.vmem [shape: bf16[3,3,128,128], index: 2, kind: input, shape index: {}]   ;;  %s16093_s3 = inlined_call_operand.vmem [shape: f32[8,128], index: 3, kind: input, shape index: {}]   ;;  %s16094_s4 = inlined_call_operand.vmem [shape: f32[2,16,16,128], index: 4, kind: output, shape index: {}]  }
   0x1 LB: > { %s9486_s16 = sadd.s32 4294967295, %s12495_s15   ;;  %p9490_p0 = scmp.ge.s32.totalorder %s12495_s15, 1  ;;  %s12495_s15 = sphi %s12523_s15, %s14_s15  }
   0x2   : > { %p162_p1 = scmp.lt.s32.totalorder %s12495_s15, 3 }
   0x4   : > { %p163_p2 = pnand %p9490_p0, %p162_p1 }
   0x6   : > { %166 = sbr.rel (%p163_p2) target bundleno = 2208 (0x8a0), region = 36 }
   0xd   : > { %v12153_v0 = vld [vmem:[%s16091_s1 + $0x40] sm:$0xff]   ;;  %p188_p3 = scmp.lt.s32.totalorder %s9486_s16, 1  ;;  %v12154_v1 = vld [vmem:[%s16091_s1 + $0x48] sm:$0xff]   ;;  %v12155_v2 = vld [vmem:[%s16091_s1 + $0x50] sm:$0xff]   ;;  %vm268_vm0 = vsmask.f32 3328 }
   0xe   : > { %10767 = vmatprep.subr.bf16.mxu0 %v12153_v0  ;;  %v12156_v3 = vld [vmem:[%s16091_s1 + $0x58] sm:$0xff]   ;;  %vm269_vm1 = vsmask.f32 7440  ;;  %v12157_v17 = vld [vmem:[%s16091_s1 + $0x60] sm:$0xff]   ;;  %v16159_v25 = vmov 0  ;;  %v12158_v36 = vld [vmem:[%s16091_s1 + $0x68] sm:$0xff]  }
   0xf   : > { %s16342_s16 = smov (!%p188_p3, %s9486_s16), 1  ;;  %10768 = vmatpush3.bf16.msra.mxu0 %v12153_v0  ;;  %vm12578_vm2 = vmor %vm268_vm0, %vm269_vm1  ;;  %v12159_v56 = vld [vmem:[%s16091_s1 + $0x70] sm:$0xff]   ;;  %vm1298_vm3 = vcmask 1042432   ;;  %vm1299_vm4 = vcmask 1046532  }
  0x10   : > { %10769 = vmatprep.subr.bf16.mxu0 %v12154_v1  ;;  %s12143_s23 = smul.u32 216, %s16342_s16  ;;  %v16160_v25 = vsel %vm12578_vm2, 4294967295, %v16159_v25  ;;  %vm12911_vm5 = vmor %vm1298_vm3, %vm1299_vm4 }
  0x11   : > { %16161 = vst [vmem:[#allocation3_spill] sm:$0xff] %v16160_v25 }
  0x12   : > { %s12546_s26 = scalar_lea.vmem %s16090_s0, %s12143_s23  ;;  %s10334_s23 = sshll.u32 %s16342_s16, 8 }
  0x13   : > { %10770 = vmatpush3.bf16.msra.mxu0 %v12154_v1  ;;  %v12552_v4 = vld [vmem:[%s12546_s26] sm:$0xf]  ;;  %v12555_v5 = vld [vmem:[%s12546_s26 + $0x4] sm:$0xf]  ;;  %v252_v6 = vld [vmem:[%s12546_s26 + $0x8] sm:$0x1]  ;;  %s15903_s25 = scalar_lea.vmem %s16094_s4, %s10334_s23 }
  0x14   : > { %10771 = vmatprep.subr.bf16.mxu0 %v12155_v2  ;;  %v272_v7 = vshrl.u32 %v12552_v4, 16  ;;  %v275_v8 = vshll.u32 %v12552_v4, 16  ;;  %v281_v9 = vshll.u32 %v12555_v5, 16  ;;  %v285_v10 = vshrl.u32 %v12555_v5, 16  ;;  %v12563_v12 = vld [vmem:[%s12546_s26 + $0xc] sm:$0xf] }
  0x15   : > { %v291_v11 = vshll.u32 %v252_v6, 16  ;;  %v12566_v15 = vld [vmem:[%s12546_s26 + $0x10] sm:$0xf]  ;;  %v253_v16 = vld [vmem:[%s12546_s26 + $0x14] sm:$0x1]  ;;  %v296_v20 = vshrl.u32 %v12563_v12, 16 }
  0x16   : > { %v274_v13 = vrot.slane %v272_v7, 4  ;;  %v277_v14 = vrot.slane %v275_v8, 5  ;;  %v283_v18 = vrot.slane %v281_v9, 5  ;;  %v287_v19 = vrot.slane %v285_v10, 4  ;;  %v12583_v30 = vld [vmem:[%s12546_s26 + $0x18] sm:$0xf] }
  0x17   : > { %10772 = vmatpush3.bf16.msra.mxu0 %v12155_v2  ;;  %v299_v22 = vshll.u32 %v12563_v12, 16  ;;  %v305_v23 = vshll.u32 %v12566_v15, 16  ;;  %v309_v24 = vshrl.u32 %v12566_v15, 16  ;;  %v293_v27 = vrot.slane %v291_v11, 5  ;;  %v12586_v35 = vld [vmem:[%s12546_s26 + $0x1c] sm:$0xf] }
  0x18   : > { %10773 = vmatprep.subr.bf16.mxu0 %v12156_v3  ;;  %v278_v21 = vor.u32 %v277_v14, %v274_v13  ;;  %v288_v26 = vor.u32 %v287_v19, %v283_v18  ;;  %v298_v28 = vrot.slane %v296_v20, 4  ;;  %v315_v29 = vshll.u32 %v253_v16, 16  ;;  %v254_v44 = vld [vmem:[%s12546_s26 + $0x20] sm:$0x1]  ;;  %v12598_v46 = vld [vmem:[%s12546_s26 + $0x24] sm:$0xf] }
  0x19   : > { %v301_v32 = vrot.slane %v299_v22, 5  ;;  %v307_v33 = vrot.slane %v305_v23, 5  ;;  %v311_v34 = vrot.slane %v309_v24, 4  ;;  %v320_v39 = vshrl.u32 %v12583_v30, 16  ;;  %v12604_v51 = vld [vmem:[%s12546_s26 + $0x28] sm:$0xf] }
  0x1a   : > { %v279_v31 = vrot.slane %v278_v21, 4  ;;  %v289_v37 = vrot.slane %v288_v26, 4  ;;  %v317_v38 = vrot.slane %v315_v29, 5  ;;  %v323_v40 = vshll.u32 %v12583_v30, 16  ;;  %v12615_v63 = vld [vmem:[%s12546_s26 + $0x2c] sm:$0x1] }
  0x1b   : > { %10774 = vmatpush3.bf16.msra.mxu0 %v12156_v3  ;;  %v302_v42 = vor.u32 %v301_v32, %v298_v28  ;;  %v312_v43 = vor.u32 %v311_v34, %v307_v33  ;;  %v329_v45 = vshll.u32 %v12586_v35, 16  ;;  %v322_v48 = vrot.slane %v320_v39, 4  ;;  %v12620_v2 = vld [vmem:[%s12546_s26 + $0x30] sm:$0xf]  ;;  %v12625_v9 = vld [vmem:[%s12546_s26 + $0x34] sm:$0xf] }
  0x1c   : > { %10775 = vmatprep.subr.bf16.mxu0 %v12157_v17  ;;  %v284_v41 = vsel %vm12578_vm2, %v279_v31, %v283_v18  ;;  %v294_v47 = vsel %vm12578_vm2, %v289_v37, %v293_v27  ;;  %v325_v49 = vrot.slane %v323_v40, 5  ;;  %v333_v50 = vshrl.u32 %v12586_v35, 16  ;;  %v12629_v16 = vld [vmem:[%s12546_s26 + $0x38] sm:$0x1]  ;;  %v12639_v22 = vld [vmem:[%s12546_s26 + $0x3c] sm:$0xf] }
  0x1d   : > { %v9511_v52 = vcombine.low %v284_v41, %v294_v47  ;;  %v303_v53 = vrot.slane %v302_v42, 4  ;;  %v313_v54 = vrot.slane %v312_v43, 4  ;;  %v331_v55 = vrot.slane %v329_v45, 5  ;;  %v12161_v39 = vld [vmem:[%s16091_s1] sm:$0xff]  }
  0x1e   : > { %v326_v57 = vor.u32 %v325_v49, %v322_v48  ;;  %v335_v58 = vrot.slane %v333_v50, 4  ;;  %v339_v59 = vshll.u32 %v254_v44, 16  ;;  %v344_v60 = vshrl.u32 %v12598_v46, 16  ;;  %v12657_v48 = vld [vmem:[%s12546_s26 + $0x44] sm:$0x1] }
  0x1f   : > { %10776 = vmatpush3.bf16.msra.mxu0 %v12157_v17  ;;  %10783 = vmatprep.mubr.bf16.mxu0 %v9511_v52  ;;  %v308_v61 = vsel %vm12578_vm2, %v303_v53, %v307_v33  ;;  %v318_v62 = vsel %vm12578_vm2, %v313_v54, %v317_v38  ;;  %v347_v0 = vshll.u32 %v12598_v46, 16  ;;  %v353_v1 = vshll.u32 %v12604_v51, 16  ;;  %v12160_v17 = vld [vmem:[%s16091_s1 + $0x78] sm:$0xff]   ;;  %v12647_v38 = vld [vmem:[%s12546_s26 + $0x40] sm:$0xf] }
  0x20   : > { %10777 = vmatprep.subr.bf16.mxu0 %v12158_v36  ;;  %v12622_v3 = vcombine.low %v308_v61, %v318_v62  ;;  %v327_v6 = vrot.slane %v326_v57, 4  ;;  %v336_v7 = vor.u32 %v335_v58, %v331_v55  ;;  %v341_v8 = vrot.slane %v339_v59, 5  ;;  %v12661_v50 = vld [vmem:[%s12546_s26 + $0x48] sm:$0xf] }
  0x21   : > { %v346_v10 = vrot.slane %v344_v60, 4  ;;  %v349_v11 = vrot.slane %v347_v0, 5  ;;  %v355_v13 = vrot.slane %v353_v1, 5  ;;  %v357_v14 = vshrl.u32 %v12604_v51, 16  ;;  %v12162_v62 = vld [vmem:[%s16091_s1 + $0x8] sm:$0xff]  }
  0x22   : > { %v332_v18 = vsel %vm12578_vm2, %v327_v6, %v331_v55  ;;  %v337_v19 = vrot.slane %v336_v7, 4  ;;  %v363_v20 = vshll.u32 %v12615_v63, 16  ;;  %v368_v21 = vshrl.u32 %v12620_v2, 16 }
  0x23   : > { %10778 = vmatpush3.bf16.msra.mxu0 %v12158_v36  ;;  %v350_v23 = vor.u32 %v349_v11, %v346_v10  ;;  %v359_v24 = vrot.slane %v357_v14, 4  ;;  %v371_v26 = vshll.u32 %v12620_v2, 16  ;;  %v377_v27 = vshll.u32 %v12625_v9, 16  ;;  %v12677_v11 = vld [vmem:[%s12546_s26 + $0x50] sm:$0x1] }
  0x24   : > { %10779 = vmatprep.subr.bf16.mxu0 %v12159_v56  ;;  %v342_v28 = vsel %vm12578_vm2, %v337_v19, %v341_v8  ;;  %v365_v29 = vrot.slane %v363_v20, 5  ;;  %v370_v31 = vrot.slane %v368_v21, 4  ;;  %v381_v32 = vshrl.u32 %v12625_v9, 16  ;;  %v12686_v20 = vld [vmem:[%s12546_s26 + $0x54] sm:$0xf] }
  0x25   : > { %v9513_v33 = vcombine.low %v332_v18, %v342_v28  ;;  %v351_v34 = vrot.slane %v350_v23, 4  ;;  %v360_v36 = vor.u32 %v359_v24, %v355_v13  ;;  %v373_v37 = vrot.slane %v371_v26, 5 }
  0x26   : > { %v379_v40 = vrot.slane %v377_v27, 5  ;;  %v383_v41 = vrot.slane %v381_v32, 4  ;;  %v387_v42 = vshll.u32 %v12629_v16, 16  ;;  %v392_v43 = vshrl.u32 %v12639_v22, 16  ;;  %v12692_v27 = vld [vmem:[%s12546_s26 + $0x58] sm:$0xf] }
  0x27   : > { %10780 = vmatpush3.bf16.msra.mxu0 %v12159_v56  ;;  %v356_v44 = vsel %vm12578_vm2, %v351_v34, %v355_v13  ;;  %v361_v45 = vrot.slane %v360_v36, 4  ;;  %v374_v47 = vor.u32 %v373_v37, %v370_v31  ;;  %v395_v49 = vshll.u32 %v12639_v22, 16  ;;  %v12665_v56 = vld [vmem:[%s12546_s26 + $0x4c] sm:$0xf]  ;;  %v12697_v34 = vld [vmem:[%s12546_s26 + $0x5c] sm:$0x1] }
  0x28   : > { %10781 = vmatprep.subr.bf16.mxu0 %v12160_v17  ;;  %v384_v52 = vor.u32 %v383_v41, %v379_v40  ;;  %v389_v53 = vrot.slane %v387_v42, 5  ;;  %v394_v54 = vrot.slane %v392_v43, 4  ;;  %v401_v55 = vshll.u32 %v12647_v38, 16 }
  0x29   : > { %v366_v57 = vsel %vm12578_vm2, %v361_v45, %v365_v29  ;;  %v375_v58 = vrot.slane %v374_v47, 4  ;;  %v397_v59 = vrot.slane %v395_v49, 5  ;;  %v405_v60 = vshrl.u32 %v12647_v38, 16 }
  0x2a   : > { %v9514_v61 = vcombine.low %v356_v44, %v366_v57  ;;  %v385_v0 = vrot.slane %v384_v52, 4  ;;  %v403_v1 = vrot.slane %v401_v55, 5  ;;  %v411_v6 = vshll.u32 %v12657_v48, 16 }
  0x2b   : > { %10782 = vmatpush3.bf16.msra.mxu0 %v12160_v17  ;;  %v380_v7 = vsel %vm12578_vm2, %v375_v58, %v379_v40  ;;  %v398_v8 = vor.u32 %v397_v59, %v394_v54  ;;  %v407_v10 = vrot.slane %v405_v60, 4  ;;  %v416_v13 = vshrl.u32 %v12661_v50, 16  ;;  %v12164_v59 = vld [vmem:[%s16091_s1 + $0x18] sm:$0xff]  }
  0x2c   : > { %10815 = vmatprep.subr.bf16.mxu0 %v12161_v39  ;;  %v390_v14 = vsel %vm12578_vm2, %v385_v0, %v389_v53  ;;  %v413_v17 = vrot.slane %v411_v6, 5  ;;  %v419_v18 = vshll.u32 %v12661_v50, 16  ;;  %v425_v19 = vshll.u32 %v12665_v56, 16  ;;  %v12711_v53 = vld [vmem:[%s12546_s26 + $0x64] sm:$0xf] }
  0x2d   : > { %v9515_v21 = vcombine.low %v380_v7, %v390_v14  ;;  %v399_v23 = vrot.slane %v398_v8, 4  ;;  %v408_v24 = vor.u32 %v407_v10, %v403_v1  ;;  %v418_v26 = vrot.slane %v416_v13, 4  ;;  %v12726_v14 = vld [vmem:[%s12546_s26 + $0x6c] sm:$0xf] }
  0x2e   : > { %10784 = vmatmul.mubr.bf16.vlgmr.msra.gmra.mrb[0].mxu0 %v12622_v3  ;;  %v12163_v3 = vld [vmem:[%s16091_s1 + $0x10] sm:$0xff]   ;;  %v421_v28 = vrot.slane %v419_v18, 5  ;;  %v427_v29 = vrot.slane %v425_v19, 5  ;;  %v429_v31 = vshrl.u32 %v12665_v56, 16  ;;  %v435_v32 = vshll.u32 %v12677_v11, 16 }
  0x2f   : > { %10816 = vmatpush3.bf16.msra.mxu0 %v12161_v39  ;;  %10787 = vmatprep.mubr.bf16.mxu0 %v9513_v33  ;;  %v12700_v33 = vld [vmem:[%s12546_s26 + $0x60] sm:$0xf]  ;;  %v404_v36 = vsel %vm12578_vm2, %v399_v23, %v403_v1  ;;  %v409_v37 = vrot.slane %v408_v24, 4  ;;  %v440_v39 = vshrl.u32 %v12686_v20, 16  ;;  %v443_v40 = vshll.u32 %v12686_v20, 16 }
  0x30   : > { %10817 = vmatprep.subr.bf16.mxu0 %v12162_v62  ;;  %v422_v41 = vor.u32 %v421_v28, %v418_v26  ;;  %v431_v42 = vrot.slane %v429_v31, 4  ;;  %v437_v43 = vrot.slane %v435_v32, 5  ;;  %v449_v44 = vshll.u32 %v12692_v27, 16  ;;  %v12718_v1 = vld [vmem:[%s12546_s26 + $0x68] sm:$0x1] }
  0x31   : > { %v414_v45 = vsel %vm12578_vm2, %v409_v37, %v413_v17  ;;  %v442_v47 = vrot.slane %v440_v39, 4  ;;  %v445_v49 = vrot.slane %v443_v40, 5  ;;  %v453_v52 = vshrl.u32 %v12692_v27, 16  ;;  %16162 = vst [vmem:[#allocation4_spill] sm:$0xff] %v12718_v1  ;;  %v12729_v24 = vld [vmem:[%s12546_s26 + $0x70] sm:$0xf] }
  0x32   : > { %v9516_v54 = vcombine.low %v404_v36, %v414_v45  ;;  %v423_v55 = vrot.slane %v422_v41, 4  ;;  %v432_v57 = vor.u32 %v431_v42, %v427_v29  ;;  %v451_v58 = vrot.slane %v449_v44, 5  ;;  %v12741_v40 = vld [vmem:[%s12546_s26 + $0x74] sm:$0x1] }
  0x33   : > { %10818 = vmatpush3.bf16.msra.mxu0 %v12162_v62  ;;  %v446_v60 = vor.u32 %v445_v49, %v442_v47  ;;  %v455_v62 = vrot.slane %v453_v52, 4  ;;  %v459_v0 = vshll.u32 %v12697_v34, 16  ;;  %v464_v6 = vshrl.u32 %v12700_v33, 16  ;;  %16163 = vst [vmem:[#allocation5_spill] sm:$0xff] %v12741_v40  ;;  %v12750_v49 = vld [vmem:[%s12546_s26 + $0x78] sm:$0xf] }
  0x34   : > { %10819 = vmatprep.subr.bf16.mxu0 %v12163_v3  ;;  %v428_v7 = vsel %vm12578_vm2, %v423_v55, %v427_v29  ;;  %v433_v8 = vrot.slane %v432_v57, 4  ;;  %v467_v10 = vshll.u32 %v12700_v33, 16  ;;  %v473_v13 = vshll.u32 %v12711_v53, 16 }
  0x35   : > { %v447_v17 = vrot.slane %v446_v60, 4  ;;  %v456_v18 = vor.u32 %v455_v62, %v451_v58  ;;  %v461_v19 = vrot.slane %v459_v0, 5  ;;  %v466_v23 = vrot.slane %v464_v6, 4  ;;  %v12753_v60 = vld [vmem:[%s12546_s26 + $0x7c] sm:$0xf]  ;;  %v12166_v62 = vld [vmem:[%s16091_s1 + $0x28] sm:$0xff]  }
  0x36   : > { %10788 = vmatmul.mubr.bf16.gmra.mrb[4].mxu0 %v9514_v61  ;;  %v438_v61 = vsel %vm12578_vm2, %v433_v8, %v437_v43  ;;  %v469_v26 = vrot.slane %v467_v10, 5  ;;  %v475_v28 = vrot.slane %v473_v13, 5  ;;  %v477_v29 = vshrl.u32 %v12711_v53, 16  ;;  %v12760_v8 = vld [vmem:[%s12546_s26 + $0x80] sm:$0x1] }
  0x37   : > { %10791 = vmatprep.mubr.bf16.mxu0 %v9515_v21  ;;  %10820 = vmatpush3.bf16.msra.mxu0 %v12163_v3  ;;  %v12165_v21 = vld [vmem:[%s16091_s1 + $0x20] sm:$0xff]   ;;  %v9517_v3 = vcombine.low %v428_v7, %v438_v61  ;;  %v452_v31 = vsel %vm12578_vm2, %v447_v17, %v451_v58  ;;  %v457_v32 = vrot.slane %v456_v18, 4  ;;  %v483_v36 = vshll.u32 %v12718_v1, 16  ;;  %16164 = vst [vmem:[#allocation6_spill] sm:$0xff] %v12760_v8 }
  0x38   : > { %10821 = vmatprep.subr.bf16.mxu0 %v12164_v59  ;;  %v470_v37 = vor.u32 %v469_v26, %v466_v23  ;;  %v479_v39 = vrot.slane %v477_v29, 4  ;;  %v488_v41 = vshrl.u32 %v12726_v14, 16  ;;  %v491_v42 = vshll.u32 %v12726_v14, 16  ;;  %v12768_v29 = vld [vmem:[%s12546_s26 + $0x84] sm:$0xf] }
  0x39   : > { %v462_v43 = vsel %vm12578_vm2, %v457_v32, %v461_v19  ;;  %v485_v44 = vrot.slane %v483_v36, 5  ;;  %v497_v45 = vshll.u32 %v12729_v24, 16  ;;  %v501_v47 = vshrl.u32 %v12729_v24, 16  ;;  %v12774_v36 = vld [vmem:[%s12546_s26 + $0x88] sm:$0xf] }
  0x3a   : > { %v9518_v52 = vcombine.low %v452_v31, %v462_v43  ;;  %v471_v55 = vrot.slane %v470_v37, 4  ;;  %v480_v57 = vor.u32 %v479_v39, %v475_v28  ;;  %v490_v58 = vrot.slane %v488_v41, 4 }
  0x3b   : > { %10822 = vmatpush3.bf16.msra.mxu0 %v12164_v59  ;;  %v493_v59 = vrot.slane %v491_v42, 5  ;;  %v499_v0 = vrot.slane %v497_v45, 5  ;;  %v503_v6 = vrot.slane %v501_v47, 4  ;;  %v507_v7 = vshll.u32 %v12741_v40, 16  ;;  %v12781_v45 = vld [vmem:[%s12546_s26 + $0x8c] sm:$0x1] }
  0x3c   : > { %10823 = vmatprep.subr.bf16.mxu0 %v12165_v21  ;;  %v476_v10 = vsel %vm12578_vm2, %v471_v55, %v475_v28  ;;  %v481_v13 = vrot.slane %v480_v57, 4  ;;  %v512_v17 = vshrl.u32 %v12750_v49, 16  ;;  %v515_v18 = vshll.u32 %v12750_v49, 16  ;;  %16165 = vst [vmem:[#allocation7_spill] sm:$0xff] %v12781_v45  ;;  %v12168_v55 = vld [vmem:[%s16091_s1 + $0x38] sm:$0xff]  }
  0x3d   : > { %v494_v19 = vor.u32 %v493_v59, %v490_v58  ;;  %v504_v23 = vor.u32 %v503_v6, %v499_v0  ;;  %v509_v61 = vrot.slane %v507_v7, 5  ;;  %v521_v26 = vshll.u32 %v12753_v60, 16  ;;  %v12794_v7 = vld [vmem:[%s12546_s26 + $0x90] sm:$0xf] }
  0x3e   : > { %10792 = vmatmul.mubr.bf16.gmra.mrb[8].mxu0 %v9516_v54  ;;  %v486_v54 = vsel %vm12578_vm2, %v481_v13, %v485_v44  ;;  %v514_v31 = vrot.slane %v512_v17, 4  ;;  %v517_v28 = vrot.slane %v515_v18, 5  ;;  %v525_v32 = vshrl.u32 %v12753_v60, 16 }
  0x3f   : > { %10795 = vmatprep.mubr.bf16.mxu0 %v9517_v3  ;;  %10824 = vmatpush3.bf16.msra.mxu0 %v12165_v21  ;;  %v12167_v3 = vld [vmem:[%s16091_s1 + $0x30] sm:$0xff]   ;;  %v9519_v21 = vcombine.low %v476_v10, %v486_v54  ;;  %v495_v37 = vrot.slane %v494_v19, 4  ;;  %v505_v39 = vrot.slane %v504_v23, 4  ;;  %v523_v41 = vrot.slane %v521_v26, 5  ;;  %v12801_v54 = vld [vmem:[%s12546_s26 + $0x98] sm:$0x1] }
  0x40   : > { %10825 = vmatprep.subr.bf16.mxu0 %v12166_v62  ;;  %v518_v42 = vor.u32 %v517_v28, %v514_v31  ;;  %v527_v43 = vrot.slane %v525_v32, 4  ;;  %v531_v44 = vshll.u32 %v12760_v8, 16  ;;  %v536_v47 = vshrl.u32 %v12768_v29, 16  ;;  %v12797_v10 = vld [vmem:[%s12546_s26 + $0x94] sm:$0xf]  ;;  %16166 = vst [vmem:[#allocation8_spill] sm:$0xff] %v12801_v54 }
  0x41   : > { %v500_v57 = vsel %vm12578_vm2, %v495_v37, %v499_v0  ;;  %v510_v58 = vsel %vm12578_vm2, %v505_v39, %v509_v61  ;;  %v539_v59 = vshll.u32 %v12768_v29, 16  ;;  %v545_v6 = vshll.u32 %v12774_v36, 16  ;;  %v12804_v31 = vld [vmem:[%s12546_s26 + $0x9c] sm:$0xf] }
  0x42   : > { %v9520_v13 = vcombine.low %v500_v57, %v510_v58  ;;  %v519_v17 = vrot.slane %v518_v42, 4  ;;  %v528_v18 = vor.u32 %v527_v43, %v523_v41  ;;  %v533_v19 = vrot.slane %v531_v44, 5 }
  0x43   : > { %10826 = vmatpush3.bf16.msra.mxu0 %v12166_v62  ;;  %v538_v0 = vrot.slane %v536_v47, 4  ;;  %v541_v23 = vrot.slane %v539_v59, 5  ;;  %v547_v26 = vrot.slane %v545_v6, 5  ;;  %v549_v61 = vshrl.u32 %v12774_v36, 16  ;;  %v12813_v47 = vld [vmem:[%s12546_s26 + $0xa0] sm:$0xf] }
  0x44   : > { %10827 = vmatprep.subr.bf16.mxu0 %v12167_v3  ;;  %v524_v62 = vsel %vm12578_vm2, %v519_v17, %v523_v41  ;;  %v529_v28 = vrot.slane %v528_v18, 4  ;;  %v555_v32 = vshll.u32 %v12781_v45, 16  ;;  %v560_v37 = vshrl.u32 %v12794_v7, 16 }
  0x45   : > { %v542_v39 = vor.u32 %v541_v23, %v538_v0  ;;  %v551_v42 = vrot.slane %v549_v61, 4  ;;  %v563_v43 = vshll.u32 %v12794_v7, 16  ;;  %v569_v44 = vshll.u32 %v12797_v10, 16 }
  0x46   : > { %10796 = vmatmul.mubr.bf16.gmra.mrb[12].mxu0 %v9518_v52  ;;  %v534_v52 = vsel %vm12578_vm2, %v529_v28, %v533_v19  ;;  %v557_v41 = vrot.slane %v555_v32, 5  ;;  %v562_v57 = vrot.slane %v560_v37, 4  ;;  %v573_v58 = vshrl.u32 %v12797_v10, 16  ;;  %v12829_v28 = vld [vmem:[%s12546_s26 + $0xa8] sm:$0xf] }
  0x47   : > { %10799 = vmatprep.mubr.bf16.mxu0 %v9519_v21  ;;  %10828 = vmatpush3.bf16.msra.mxu0 %v12167_v3  ;;  %v12821_v21 = vld [vmem:[%s16091_s1 + $0x80] sm:$0xff]   ;;  %v9521_v59 = vcombine.low %v524_v62, %v534_v52  ;;  %v543_v6 = vrot.slane %v542_v39, 4  ;;  %v552_v17 = vor.u32 %v551_v42, %v547_v26  ;;  %v565_v18 = vrot.slane %v563_v43, 5  ;;  %v12835_v39 = vld [vmem:[%s12546_s26 + $0xac] sm:$0xf] }
  0x48   : > { %10829 = vmatprep.subr.bf16.mxu0 %v12168_v55  ;;  %16167 = vst [vmem:[#allocation9_spill] sm:$0xff] %v12821_v21  ;;  %v12824_v3 = vld [vmem:[%s12546_s26 + $0xa4] sm:$0x1]  ;;  %v571_v0 = vrot.slane %v569_v44, 5  ;;  %v575_v23 = vrot.slane %v573_v58, 4  ;;  %v579_v19 = vshll.u32 %v12801_v54, 16 }
  0x49   : > { %16168 = vst [vmem:[#allocation10_spill] sm:$0xff] %v12824_v3  ;;  %v584_v61 = vshrl.u32 %v12804_v31, 16  ;;  %v548_v32 = vsel %vm12578_vm2, %v543_v6, %v547_v26  ;;  %v553_v37 = vrot.slane %v552_v17, 4  ;;  %v566_v45 = vor.u32 %v565_v18, %v562_v57  ;;  %v12843_v6 = vld [vmem:[%s12546_s26 + $0xb0] sm:$0x1] }
  0x4a   : > { %v587_v62 = vshll.u32 %v12804_v31, 16  ;;  %v576_v42 = vor.u32 %v575_v23, %v571_v0  ;;  %v581_v43 = vrot.slane %v579_v19, 5  ;;  %v593_v52 = vshll.u32 %v12813_v47, 16  ;;  %16169 = vst [vmem:[#allocation11_spill] sm:$0xff] %v12843_v6  ;;  %v12847_v23 = vld [vmem:[%s12546_s26 + $0xb4] sm:$0xf] }
  0x4b   : > { %10830 = vmatpush3.bf16.msra.mxu0 %v12168_v55  ;;  %v586_v44 = vrot.slane %v584_v61, 4  ;;  %v558_v58 = vsel %vm12578_vm2, %v553_v37, %v557_v41  ;;  %v567_v54 = vrot.slane %v566_v45, 4  ;;  %v597_v57 = vshrl.u32 %v12813_v47, 16 }
  0x4c   : > { %10863 = vmatprep.subr.bf16.mxu0 %v12821_v21  ;;  %v589_v26 = vrot.slane %v587_v62, 5  ;;  %v577_v17 = vrot.slane %v576_v42, 4  ;;  %v595_v55 = vrot.slane %v593_v52, 5  ;;  %v603_v18 = vshll.u32 %v12824_v3, 16  ;;  %v12857_v42 = vld [vmem:[%s12546_s26 + $0xb8] sm:$0xf] }
  0x4d   : > { %v9522_v19 = vcombine.low %v548_v32, %v558_v58  ;;  %v599_v8 = vrot.slane %v597_v57, 4  ;;  %v608_v41 = vshrl.u32 %v12829_v28, 16  ;;  %v572_v45 = vsel %vm12578_vm2, %v567_v54, %v571_v0 }
  0x4e   : > { %10800 = vmatmul.mubr.bf16.gmra.mrb[16].mxu0 %v9520_v13  ;;  %v590_v61 = vor.u32 %v589_v26, %v586_v44  ;;  %v582_v37 = vsel %vm12578_vm2, %v577_v17, %v581_v43  ;;  %v611_v13 = vshll.u32 %v12829_v28, 16  ;;  %v617_v62 = vshll.u32 %v12835_v39, 16 }
  0x4f   : > { %10803 = vmatprep.mubr.bf16.mxu0 %v9521_v59  ;;  %v600_v59 = vor.u32 %v599_v8, %v595_v55  ;;  %v605_v32 = vrot.slane %v603_v18, 5  ;;  %v610_v44 = vrot.slane %v608_v41, 4  ;;  %v621_v57 = vshrl.u32 %v12835_v39, 16  ;;  %v12866_v8 = vld [vmem:[%s12546_s26 + $0xbc] sm:$0x1] }
  0x50   : > { %v591_v52 = vrot.slane %v590_v61, 4  ;;  %v613_v58 = vrot.slane %v611_v13, 5  ;;  %v619_v26 = vrot.slane %v617_v62, 5  ;;  %v627_v54 = vshll.u32 %v12843_v6, 16 }
  0x51   : > { %v9523_v0 = vcombine.low %v572_v45, %v582_v37  ;;  %v601_v3 = vrot.slane %v600_v59, 4  ;;  %v632_v43 = vshrl.u32 %v12847_v23, 16  ;;  %v635_v17 = vshll.u32 %v12847_v23, 16 }
  0x52   : > { %v596_v21 = vsel %vm12578_vm2, %v591_v52, %v595_v55  ;;  %v614_v40 = vor.u32 %v613_v58, %v610_v44  ;;  %v623_v61 = vrot.slane %v621_v57, 4  ;;  %v641_v18 = vshll.u32 %v12857_v42, 16 }
  0x53   : > { %v629_v41 = vrot.slane %v627_v54, 5  ;;  %v634_v13 = vrot.slane %v632_v43, 4  ;;  %v637_v62 = vrot.slane %v635_v17, 5  ;;  %v645_v6 = vshrl.u32 %v12857_v42, 16  ;;  %v1265_v54 = vld [vmem:[%s12546_s26 + $0xb4] sm:$0xe] }
  0x54   : > { %v606_v45 = vsel %vm12578_vm2, %v601_v3, %v605_v32  ;;  %v615_v37 = vrot.slane %v614_v40, 4  ;;  %v624_v59 = vor.u32 %v623_v61, %v619_v26  ;;  %v643_v1 = vrot.slane %v641_v18, 5 }
  0x55   : > { %v638_v55 = vor.u32 %v637_v62, %v634_v13  ;;  %v647_v52 = vrot.slane %v645_v6, 4  ;;  %v651_v44 = vshll.u32 %v12866_v8, 16  ;;  %v9524_v43 = vcombine.low %v596_v21, %v606_v45 }
  0x56   : > { %10804 = vmatmul.mubr.bf16.gmra.mrb[20].mxu0 %v9522_v19  ;;  %v620_v58 = vsel %vm12578_vm2, %v615_v37, %v619_v26  ;;  %v625_v57 = vrot.slane %v624_v59, 4  ;;  %v1255_v59 = vld [vmem:[%s12546_s26 + $0x3c] sm:$0xe]  ;;  %v9537_v45 = vcombine.low %v12583_v30, %v12586_v35  ;;  %v1341_v30 = vrot.slane %v12657_v48, 5  ;;  %v12174_v48 = vld [vmem:[%s16091_s1 + $0x88] sm:$0xff]  }
  0x57   : > { %10807 = vmatprep.mubr.bf16.mxu0 %v9523_v0  ;;  %v639_v19 = vrot.slane %v638_v55, 4  ;;  %v648_v17 = vor.u32 %v647_v52, %v643_v1  ;;  %v653_v61 = vrot.slane %v651_v44, 5  ;;  %v1253_v52 = vld [vmem:[%s12546_s26 + $0x24] sm:$0xe]  ;;  %v1387_v6 = vrot.slane %v12797_v10, 5 }
  0x58   : > { %v630_v3 = vsel %vm12578_vm2, %v625_v57, %v629_v41  ;;  %v9562_v57 = vrot.slane %v1253_v52, 9  ;;  %v1257_v52 = vld [vmem:[%s12546_s26 + $0x54] sm:$0xe]  ;;  %v1401_v25 = vrot.slane %v12835_v39, 5 }
  0x59   : > { %v9525_v0 = vcombine.low %v620_v58, %v630_v3  ;;  %v649_v21 = vrot.slane %v648_v17, 4  ;;  %v644_v44 = vsel %vm12578_vm2, %v639_v19, %v643_v1  ;;  %v1324_v17 = vrot.slane %v12604_v51, 5  ;;  %v1254_v3 = vld [vmem:[%s12546_s26 + $0x30] sm:$0xe] }
  0x5a   : > { %v9535_v1 = vcombine.low %v12552_v4, %v12555_v5  ;;  %v1334_v5 = vrot.slane %v12629_v16, 5  ;;  %v1345_v16 = vrot.slane %v12665_v56, 5 }
  0x5b   : > { %v654_v58 = vsel %vm12578_vm2, %v649_v21, %v653_v61  ;;  %v12920_v19 = vsel %vm12911_vm5, %v9562_v57, %v1324_v17  ;;  %v1327_v21 = vrot.slane %v12615_v63, 5  ;;  %v9563_v61 = vrot.slane %v1254_v3, 9 }
  0x5c   : > { %v9526_v37 = vcombine.low %v644_v44, %v654_v58  ;;  %v9536_v44 = vcombine.low %v12563_v12, %v12566_v15  ;;  %v1331_v58 = vrot.slane %v12625_v9, 5  ;;  %v9564_v57 = vrot.slane %v1255_v59, 9 }
  0x5d   : > { %v1348_v59 = vrot.slane %v12677_v11, 5  ;;  %v1347_v11 = vrot.slane %v1345_v16, 4 }
  0x5e   : > { %10808 = vmatmul.mubr.bf16.gmra.mrb[24].mxu0 %v9524_v43  ;;  %v1326_v43 = vrot.slane %v1324_v17, 4  ;;  %v12938_v12 = vsel %vm12911_vm5, %v9563_v61, %v1331_v58  ;;  %v1333_v15 = vrot.slane %v1331_v58, 4  ;;  %v1338_v17 = vrot.slane %v12647_v38, 5 }
  0x5f   : > { %10811 = vmatprep.mubr.bf16.mxu0 %v9525_v0  ;;  %v1256_v0 = vld [vmem:[%s12546_s26 + $0x48] sm:$0xe]  ;;  %v9566_v61 = vrot.slane %v1257_v52, 9  ;;  %v1352_v58 = vrot.slane %v12692_v27, 5 }
  0x60   : > { %v12931_v4 = vsel %vm12911_vm5, %v1326_v43, %v1327_v21  ;;  %v9565_v35 = vrot.slane %v1256_v0, 9  ;;  %v12947_v3 = vsel %vm12911_vm5, %v1333_v15, %v1334_v5  ;;  %v12951_v43 = vsel %vm12911_vm5, %v9564_v57, %v1338_v17  ;;  %v1260_v5 = vld [vmem:[%s12546_s26 + $0x78] sm:$0xe] }
  0x61   : > { %v1340_v21 = vrot.slane %v1338_v17, 4  ;;  %v1355_v57 = vrot.slane %v12697_v34, 5  ;;  %v1359_v17 = vrot.slane %v12711_v53, 5  ;;  %v1354_v34 = vrot.slane %v1352_v58, 4 }
  0x62   : > { %v12958_v0 = vsel %vm12911_vm5, %v9565_v35, %v1345_v16  ;;  %v12975_v16 = vsel %vm12911_vm5, %v1347_v11, %v1348_v59  ;;  %v16172_v35 = vld [vmem:[#allocation4_spill] sm:$0xff]  ;;  %v1366_v11 = vrot.slane %v12729_v24, 5 }
  0x63   : > { %v12964_v15 = vsel %vm12911_vm5, %v1340_v21, %v1341_v30  ;;  %v12979_v30 = vsel %vm12911_vm5, %v9566_v61, %v1352_v58  ;;  %v1361_v62 = vrot.slane %v1359_v17, 4  ;;  %v1362_v41 = vrot.slane %v16172_v35, 5  ;;  %v16173_v58 = vld [vmem:[#allocation5_spill] sm:$0xff]  ;;  %v16175_v21 = vld [vmem:[#allocation6_spill] sm:$0xff] }
  0x64   : > { %v12991_v59 = vsel %vm12911_vm5, %v1354_v34, %v1355_v57  ;;  %v1369_v13 = vrot.slane %v16173_v58, 5  ;;  %v1373_v35 = vrot.slane %v12753_v60, 5  ;;  %v1262_v57 = vld [vmem:[%s12546_s26 + $0x90] sm:$0xe]  ;;  %v16174_v34 = vld [vmem:[#allocation9_spill] sm:$0xff]  ;;  %v1368_v58 = vrot.slane %v1366_v11, 4 }
  0x65   : > { %v1376_v18 = vrot.slane %v16175_v21, 5  ;;  %v16176_v21 = vld [vmem:[#allocation7_spill] sm:$0xff]  ;;  %v9571_v32 = vrot.slane %v1262_v57, 9 }
  0x66   : > { %10812 = vmatmul.mubr.bf16.gmra.mrb[28].mxu0 %v9526_v37  ;;  %v1258_v37 = vld [vmem:[%s12546_s26 + $0x60] sm:$0xe]  ;;  %v1383_v26 = vrot.slane %v16176_v21, 5  ;;  %v16178_v21 = vld [vmem:[#allocation8_spill] sm:$0xff] }
  0x67   : > { %10831 = vmatprep.mubr.bf16.mxu0 %v9535_v1  ;;  %v1259_v1 = vld [vmem:[%s12546_s26 + $0x6c] sm:$0xe]  ;;  %v9567_v52 = vrot.slane %v1258_v37, 9  ;;  %v1261_v37 = vld [vmem:[%s12546_s26 + $0x84] sm:$0xe]  ;;  %v13042_v57 = vsel %vm12911_vm5, %v9571_v32, %v1387_v6  ;;  %v1390_v40 = vrot.slane %v16178_v21, 5 }
  0x68   : > { %v9568_v61 = vrot.slane %v1259_v1, 9  ;;  %v1380_v1 = vrot.slane %v12774_v36, 5 }
  0x69   : > { %v12986_v63 = vsel %vm12911_vm5, %v9567_v52, %v1359_v17  ;;  %v12999_v52 = vsel %vm12911_vm5, %v1361_v62, %v1362_v41  ;;  %v9569_v17 = vrot.slane %v1260_v5, 9  ;;  %v1263_v41 = vld [vmem:[%s12546_s26 + $0x9c] sm:$0xe]  ;;  %v12177_v62 = vld [vmem:[%s16091_s1 + $0x90] sm:$0xff]   ;;  %v1375_v5 = vrot.slane %v1373_v35, 4 }
  0x6e   : > { %10832 = vmatmul.mubr.bf16.vlgmr.msra.gmra.mrb[0].mxu0 %v9536_v44  ;;  %v13008_v44 = vsel %vm12911_vm5, %v9568_v61, %v1366_v11  ;;  %v1264_v61 = vld [vmem:[%s12546_s26 + $0xa8] sm:$0xe]  ;;  %v13023_v11 = vsel %vm12911_vm5, %v1368_v58, %v1369_v13  ;;  %v1389_v58 = vrot.slane %v1387_v6, 4 }
  0x6f   : > { %10864 = vmatpush3.bf16.msra.mxu0 %v16174_v34  ;;  %10835 = vmatprep.mubr.bf16.mxu0 %v9537_v45  ;;  %v13017_v45 = vsel %vm12911_vm5, %v9569_v17, %v1373_v35  ;;  %v9570_v34 = vrot.slane %v1261_v37, 9  ;;  %v13031_v17 = vsel %vm12911_vm5, %v1375_v5, %v1376_v18  ;;  %v1382_v35 = vrot.slane %v1380_v1, 4  ;;  %v12180_v18 = vld [vmem:[%s16091_s1 + $0x98] sm:$0xff]  }
  0x70   : > { %10865 = vmatprep.subr.bf16.mxu0 %v12174_v48  ;;  %16177 = vst [vmem:[#allocation4_spill] sm:$0xff] %v13031_v17  ;;  %v1394_v5 = vrot.slane %v12813_v47, 5  ;;  %v13058_v6 = vsel %vm12911_vm5, %v1389_v58, %v1390_v40  ;;  %v9573_v21 = vrot.slane %v1264_v61, 9  ;;  %v16180_v17 = vcombine.low %v12598_v46, %v12604_v51  ;;  %v12183_v58 = vld [vmem:[%s16091_s1 + $0xa0] sm:$0xff]  }
  0x71   : > { %v13035_v37 = vsel %vm12911_vm5, %v9570_v34, %v1380_v1  ;;  %v13050_v1 = vsel %vm12911_vm5, %v1382_v35, %v1383_v26  ;;  %v16179_v34 = vld [vmem:[#allocation10_spill] sm:$0xff]  ;;  %v9603_v26 = vcombine.low %v13042_v57, %v13058_v6  ;;  %v16182_v40 = vcombine.low %v12620_v2, %v12625_v9 }
  0x72   : > { %v1397_v13 = vrot.slane %v16179_v34, 5  ;;  %v1396_v35 = vrot.slane %v1394_v5, 4  ;;  %v16181_v34 = vld [vmem:[#allocation11_spill] sm:$0xff]  ;;  %v13076_v61 = vsel %vm12911_vm5, %v9573_v21, %v1401_v25  ;;  %v1403_v46 = vrot.slane %v1401_v25, 4 }
  0x73   : > { %10866 = vmatpush3.bf16.msra.mxu0 %v12174_v48  ;;  %v9572_v48 = vrot.slane %v1263_v41, 9  ;;  %v1404_v32 = vrot.slane %v16181_v34, 5  ;;  %v9574_v51 = vrot.slane %v1265_v54, 9  ;;  %v1411_v2 = vrot.slane %v12866_v8, 5  ;;  %v12192_v34 = vld [vmem:[%s16091_s1 + $0xb8] sm:$0xff]   ;;  %v12201_v57 = vld [vmem:[%s12546_s26 + $0xc] sm:$0xff]  }
  0x74   : > { %10867 = vmatprep.subr.bf16.mxu0 %v12177_v62  ;;  %v16183_v21 = vcombine.low %v12639_v22, %v12647_v38  ;;  %v16185_v22 = vcombine.low %v12686_v20, %v12692_v27  ;;  %v16186_v38 = vcombine.low %v12700_v33, %v12711_v53  ;;  %v16188_v20 = vcombine.low %v12750_v49, %v12753_v60  ;;  %v12473_v27 = vld [vmem:[%s12546_s26 + $0x4] sm:$0xf]  ;;  %v1250_v53 = vld [vmem:[%s12546_s26] sm:$0xe]  ;;  %v1251_v60 = vld [vmem:[%s12546_s26 + $0xc] sm:$0xe] }
  0x75   : > { %v13068_v41 = vsel %vm12911_vm5, %v9572_v48, %v1394_v5  ;;  %v13084_v48 = vsel %vm12911_vm5, %v1396_v35, %v1397_v13  ;;  %v13091_v25 = vsel %vm12911_vm5, %v1403_v46, %v1404_v32  ;;  %v12186_v5 = vld [vmem:[%s16091_s1 + $0xa8] sm:$0xff]   ;;  %v16184_v35 = vcombine.low %v12661_v50, %v12665_v56  ;;  %v12193_v50 = vld [vmem:[%s16091_s1 + $0xc0] sm:$0xff]  }
  0x76   : > { %10836 = vmatmul.mubr.bf16.gmra.mrb[4].mxu0 %v16180_v17  ;;  %v1408_v17 = vrot.slane %v12857_v42, 5  ;;  %v9604_v9 = vcombine.low %v13068_v41, %v13084_v48  ;;  %v9605_v13 = vcombine.low %v13076_v61, %v13091_v25  ;;  %v16187_v56 = vcombine.low %v12726_v14, %v12729_v24  ;;  %v9692_v61 = vld [vmem:[%s12546_s26 + $0x20] sm:$0x1] }
  0x77   : > { %10839 = vmatprep.mubr.bf16.mxu0 %v16182_v40  ;;  %10868 = vmatpush3.bf16.msra.mxu0 %v12177_v62  ;;  %v1303_v33 = vrot.slane %v12473_v27, 5  ;;  %v12474_v40 = vld [vmem:[%s12546_s26 + $0x8] sm:$0x1]  ;;  %v16190_v14 = vcombine.low %v12794_v7, %v12797_v10  ;;  %v9559_v24 = vrot.slane %v1250_v53, 9  ;;  %v16191_v49 = vcombine.low %v12804_v31, %v12813_v47 }
  0x78   : > { %10869 = vmatprep.subr.bf16.mxu0 %v12180_v18  ;;  %v13095_v54 = vsel %vm12911_vm5, %v9574_v51, %v1408_v17  ;;  %v1410_v62 = vrot.slane %v1408_v17, 4  ;;  %v1306_v46 = vrot.slane %v12474_v40, 5  ;;  %v16189_v51 = vcombine.low %v12768_v29, %v12774_v36  ;;  %v12476_v29 = vld [vmem:[%s12546_s26 + $0x1c] sm:$0xf] }
  0x79   : > { %v1305_v17 = vrot.slane %v1303_v33, 4  ;;  %v1317_v36 = vrot.slane %v12476_v29, 5  ;;  %v1304_v7 = vsel %vm12911_vm5, %v9559_v24, %v1303_v33  ;;  %v12198_v24 = vld [vmem:[%s16091_s1 + $0xe8] sm:$0xff]  }
  0x7a   : > { %v13104_v8 = vsel %vm12911_vm5, %v1410_v62, %v1411_v2  ;;  %v12475_v2 = vld [vmem:[%s12546_s26 + $0x10] sm:$0xf] }
  0x7b   : > { %10870 = vmatpush3.bf16.msra.mxu0 %v12180_v18  ;;  %v9606_v32 = vcombine.low %v13095_v54, %v13104_v8  ;;  %v12189_v18 = vld [vmem:[%s16091_s1 + $0xb0] sm:$0xff]   ;;  %v1310_v62 = vrot.slane %v12475_v2, 5  ;;  %v1307_v10 = vsel %vm12911_vm5, %v1305_v17, %v1306_v46  ;;  %v12196_v46 = vld [vmem:[%s16091_s1 + $0xd8] sm:$0xff]   ;;  %v2214_v54 = vshll.u32 %v9692_v61, 16  ;;  %v12206_v8 = vld [vmem:[%s16091_s1 + $0x108] sm:$0xff]  }
  0x7c   : > { %10871 = vmatprep.subr.bf16.mxu0 %v12183_v58  ;;  %v9591_v47 = vcombine.low %v1304_v7, %v1307_v10  ;;  %v9689_v2 = vld [vmem:[%s12546_s26 + $0x14] sm:$0x1]  ;;  %v12202_v7 = vld [vmem:[%s12546_s26 + $0x18] sm:$0xff]   ;;  %v13325_v61 = vld [vmem:[%s12546_s26 + $0x68] sm:$0x1] }
  0x7d   : > { %v2190_v10 = vshll.u32 %v9689_v2, 16  ;;  %v12221_v2 = vld [vmem:[%s16091_s1 + $0x130] sm:$0xff]  }
  0x7e   : > { %10840 = vmatmul.mubr.bf16.gmra.mrb[8].mxu0 %v16183_v21  ;;  %v12477_v21 = vld [vmem:[%s12546_s26 + $0x14] sm:$0x1] }
  0x7f   : > { %10843 = vmatprep.mubr.bf16.mxu0 %v16184_v35  ;;  %10872 = vmatpush3.bf16.msra.mxu0 %v12183_v58  ;;  %v16192_v58 = vcombine.low %v12829_v28, %v12835_v39  ;;  %v1313_v31 = vrot.slane %v12477_v21, 5  ;;  %v9560_v35 = vrot.slane %v1251_v60, 9  ;;  %v1319_v28 = vrot.slane %v1317_v36, 4  ;;  %v12478_v39 = vld [vmem:[%s12546_s26 + $0x20] sm:$0x1] }
  0x80   : > { %10873 = vmatprep.subr.bf16.mxu0 %v12186_v5 }
  0x83   : > { %10874 = vmatpush3.bf16.msra.mxu0 %v12186_v5  ;;  %v1252_v5 = vld [vmem:[%s12546_s26 + $0x18] sm:$0xe] }
  0x84   : > { %10875 = vmatprep.subr.bf16.mxu0 %v12189_v18 }
  0x86   : > { %10844 = vmatmul.mubr.bf16.gmra.mrb[12].mxu0 %v16185_v22  ;;  %v1320_v22 = vrot.slane %v12478_v39, 5 }
  0x87   : > { %10847 = vmatprep.mubr.bf16.mxu0 %v16186_v38  ;;  %10876 = vmatpush3.bf16.msra.mxu0 %v12189_v18  ;;  %v1312_v18 = vrot.slane %v1310_v62, 4  ;;  %v16193_v38 = vcombine.low %v12847_v23, %v12857_v42  ;;  %v12194_v23 = vld [vmem:[%s16091_s1 + $0xc8] sm:$0xff]   ;;  %v12195_v42 = vld [vmem:[%s16091_s1 + $0xd0] sm:$0xff]  }
  0x88   : > { %10877 = vmatprep.subr.bf16.mxu0 %v12192_v34  ;;  %v1321_v33 = vsel %vm12911_vm5, %v1319_v28, %v1320_v22  ;;  %v9694_v28 = vld [vmem:[%s12546_s26 + $0x28] sm:$0xf]  ;;  %v9696_v22 = vld [vmem:[%s12546_s26 + $0x30] sm:$0xf] }
  0x8b   : > { %10878 = vmatpush3.bf16.msra.mxu0 %v12192_v34  ;;  %v9561_v34 = vrot.slane %v1252_v5, 9 }
  0x8c   : > { %10911 = vmatprep.subr.bf16.mxu0 %v12193_v50 }
  0x8d   : > { %v1318_v27 = vsel %vm12911_vm5, %v9561_v34, %v1317_v36  ;;  %v9693_v36 = vld [vmem:[%s12546_s26 + $0x24] sm:$0xf] }
  0x8e   : > { %10848 = vmatmul.mubr.bf16.gmra.mrb[16].mxu0 %v16187_v56  ;;  %v1311_v56 = vsel %vm12911_vm5, %v9560_v35, %v1310_v62  ;;  %v9593_v40 = vcombine.low %v1318_v27, %v1321_v33  ;;  %v2222_v35 = vshll.u32 %v9693_v36, 16  ;;  %v13266_v33 = vrot.slane %v2214_v54, 5  ;;  %v12213_v54 = vld [vmem:[%s12546_s26 + $0x6c] sm:$0xff]  }
  0x8f   : > { %10851 = vmatprep.mubr.bf16.mxu0 %v16188_v20  ;;  %v1314_v20 = vsel %vm12911_vm5, %v1312_v18, %v1313_v31  ;;  %v12204_v31 = vld [vmem:[%s12546_s26 + $0x24] sm:$0xff]  }
  0x90   : > { %v9592_v53 = vcombine.low %v1311_v56, %v1314_v20  ;;  %v13262_v20 = vrot.slane %v2190_v10, 5  ;;  %v12211_v10 = vld [vmem:[%s12546_s26 + $0x60] sm:$0xff]  }
  0x96   : > { %10852 = vmatmul.mubr.bf16.gmra.mrb[20].mxu0 %v16189_v51  ;;  %v16194_v51 = vcombine.low %v12920_v19, %v12931_v4  ;;  %v16196_v19 = vcombine.low %v12951_v43, %v12964_v15  ;;  %v16197_v4 = vcombine.low %v12958_v0, %v12975_v16  ;;  %v16198_v43 = vcombine.low %v12979_v30, %v12991_v59  ;;  %v12203_v15 = vld [vmem:[%s16091_s1 + $0x100] sm:$0xff]   ;;  %v16201_v30 = vld [vmem:[#allocation4_spill] sm:$0xff] }
  0x97   : > { %10855 = vmatprep.mubr.bf16.mxu0 %v16190_v14  ;;  %v16195_v14 = vcombine.low %v12938_v12, %v12947_v3  ;;  %v12199_v12 = vld [vmem:[%s16091_s1 + $0xf0] sm:$0xff]   ;;  %v12200_v3 = vld [vmem:[%s16091_s1 + $0xf8] sm:$0xff]   ;;  %v16199_v0 = vcombine.low %v12986_v63, %v12999_v52  ;;  %v16200_v16 = vcombine.low %v13008_v44, %v13023_v11  ;;  %v16202_v63 = vcombine.low %v13017_v45, %v16201_v30  ;;  %v9687_v52 = vld [vmem:[%s12546_s26 + $0xc] sm:$0xf] }
  0x98   : > { %v16203_v59 = vcombine.low %v13035_v37, %v13050_v1  ;;  %v2171_v17 = vshrl.u32 %v9687_v52, 16  ;;  %v9688_v44 = vld [vmem:[%s12546_s26 + $0x10] sm:$0xf]  ;;  %v9690_v45 = vld [vmem:[%s12546_s26 + $0x18] sm:$0xf] }
  0x99   : > { %v9691_v11 = vld [vmem:[%s12546_s26 + $0x1c] sm:$0xf]  ;;  %v2180_v6 = vshll.u32 %v9688_v44, 16  ;;  %v2195_v60 = vshrl.u32 %v9690_v45, 16 }
  0x9a   : > { %v2173_v37 = vrot.slane %v2171_v17, 4  ;;  %v2204_v41 = vshll.u32 %v9691_v11, 16  ;;  %v2208_v48 = vshrl.u32 %v9691_v11, 16  ;;  %v12208_v17 = vld [vmem:[%s12546_s26 + $0x48] sm:$0xff]  }
  0x9b   : > { %v13241_v25 = vrot.slane %v2180_v6, 5  ;;  %v2197_v62 = vrot.slane %v2195_v60, 4  ;;  %v13310_v60 = vld [vmem:[%s12546_s26 + $0x38] sm:$0x1] }
  0x9c   : > { %v13245_v5 = vrot.slane %v2204_v41, 5  ;;  %v2210_v21 = vrot.slane %v2208_v48, 4 }
  0x9e   : > { %10856 = vmatmul.mubr.bf16.gmra.mrb[24].mxu0 %v16191_v49  ;;  %v2174_v49 = vshll.u32 %v9687_v52, 16  ;;  %v2211_v39 = vor.u32 %v2210_v21, %v13245_v5 }
  0x9f   : > { %10859 = vmatprep.mubr.bf16.mxu0 %v16192_v58  ;;  %v2198_v58 = vshll.u32 %v9690_v45, 16  ;;  %v12210_v45 = vld [vmem:[%s12546_s26 + $0x54] sm:$0xff]  }
  0xa0   : > { %v2176_v1 = vrot.slane %v2174_v49, 5 }
  0xa1   : > { %v2200_v29 = vrot.slane %v2198_v58, 5 }
  0xa3   : > { %v2201_v34 = vor.u32 %v2200_v29, %v2197_v62  ;;  %v9782_v29 = vld [vmem:[%s12546_s26 + $0x60] sm:$0xe] }
  0xa5   : > { %v13264_v27 = vrot.slane %v2201_v34, 4 }
  0xa6   : > { %10860 = vmatmul.mubr.bf16.gmra.mrb[28].mxu0 %v16193_v38  ;;  %v12209_v38 = vld [vmem:[%s16091_s1 + $0x110] sm:$0xff]  }
  0xa7   : > { %10879 = vmatprep.mubr.bf16.mxu0 %v9591_v47 }
  0xae   : > { %10880 = vmatmul.mubr.bf16.vlgmr.msra.gmra.mrb[0].mxu0 %v9592_v53  ;;  %v12205_v53 = vld [vmem:[%s12546_s26 + $0x30] sm:$0xff]  }
  0xaf   : > { %10912 = vmatpush3.bf16.msra.mxu0 %v12193_v50  ;;  %10883 = vmatprep.mubr.bf16.mxu0 %v9593_v40  ;;  %v12197_v50 = vld [vmem:[%s16091_s1 + $0xe0] sm:$0xff]   ;;  %v13269_v40 = vrot.slane %v2211_v39, 4 }
  0xb0   : > { %10913 = vmatprep.subr.bf16.mxu0 %v12194_v23 }
  0xb3   : > { %10914 = vmatpush3.bf16.msra.mxu0 %v12194_v23 }
  0xb4   : > { %10915 = vmatprep.subr.bf16.mxu0 %v12195_v42 }
  0xb6   : > { %10884 = vmatmul.mubr.bf16.gmra.mrb[4].mxu0 %v16194_v51  ;;  %v12207_v51 = vld [vmem:[%s12546_s26 + $0x3c] sm:$0xff]  }
  0xb7   : > { %10887 = vmatprep.mubr.bf16.mxu0 %v16195_v14  ;;  %10916 = vmatpush3.bf16.msra.mxu0 %v12195_v42  ;;  %v2224_v42 = vrot.slane %v2222_v35, 5  ;;  %v2232_v14 = vshrl.u32 %v9694_v28, 16  ;;  %v12224_v35 = vld [vmem:[%s16091_s1 + $0x138] sm:$0xff]  }
  0xb8   : > { %10917 = vmatprep.subr.bf16.mxu0 %v12196_v46 }
  0xbb   : > { %10918 = vmatpush3.bf16.msra.mxu0 %v12196_v46  ;;  %v2228_v46 = vshll.u32 %v9694_v28, 16 }
  0xbc   : > { %10919 = vmatprep.subr.bf16.mxu0 %v12197_v50 }
  0xbe   : > { %10888 = vmatmul.mubr.bf16.gmra.mrb[8].mxu0 %v16196_v19  ;;  %v13276_v19 = vld [vmem:[%s12546_s26 + $0x34] sm:$0xf] }
  0xbf   : > { %10891 = vmatprep.mubr.bf16.mxu0 %v16197_v4  ;;  %10920 = vmatpush3.bf16.msra.mxu0 %v12197_v50  ;;  %v2243_v50 = vshrl.u32 %v9696_v22, 16  ;;  %v9695_v4 = vld [vmem:[%s12546_s26 + $0x2c] sm:$0x1]  ;;  %v2252_v30 = vshll.u32 %v13276_v19, 16  ;;  %v2256_v62 = vshrl.u32 %v13276_v19, 16 }
  0xc0   : > { %10921 = vmatprep.subr.bf16.mxu0 %v12198_v24  ;;  %v2238_v49 = vshll.u32 %v9695_v4, 16 }
  0xc1   : > { %v13296_v11 = vrot.slane %v2243_v50, 4  ;;  %v13319_v48 = vrot.slane %v2252_v30, 5 }
  0xc2   : > { %v13334_v21 = vrot.slane %v2238_v49, 5  ;;  %v13397_v49 = vld [vmem:[%s12546_s26 + $0x94] sm:$0xf] }
  0xc3   : > { %10922 = vmatpush3.bf16.msra.mxu0 %v12198_v24  ;;  %v12212_v24 = vld [vmem:[%s16091_s1 + $0x118] sm:$0xff]  }
  0xc4   : > { %10923 = vmatprep.subr.bf16.mxu0 %v12199_v12 }
  0xc6   : > { %10892 = vmatmul.mubr.bf16.gmra.mrb[12].mxu0 %v16198_v43  ;;  %v2246_v43 = vshll.u32 %v9696_v22, 16  ;;  %v13355_v22 = vld [vmem:[%s16091_s1 + $0x140] sm:$0xff]  }
  0xc7   : > { %10895 = vmatprep.mubr.bf16.mxu0 %v16199_v0  ;;  %10924 = vmatpush3.bf16.msra.mxu0 %v12199_v12  ;;  %v12215_v12 = vld [vmem:[%s16091_s1 + $0x120] sm:$0xff]   ;;  %v13285_v0 = vld [vmem:[%s12546_s26 + $0x4c] sm:$0xf] }
  0xc8   : > { %10925 = vmatprep.subr.bf16.mxu0 %v12200_v3  ;;  %v13317_v41 = vrot.slane %v2246_v43, 5 }
  0xcb   : > { %10926 = vmatpush3.bf16.msra.mxu0 %v12200_v3  ;;  %v13282_v3 = vrot.slane %v2228_v46, 5  ;;  %v13368_v46 = vrot.slane %v2256_v62, 4 }
  0xcc   : > { %10959 = vmatprep.subr.bf16.mxu0 %v12203_v15 }
  0xce   : > { %10896 = vmatmul.mubr.bf16.gmra.mrb[16].mxu0 %v16200_v16  ;;  %v2234_v16 = vrot.slane %v2232_v14, 4 }
  0xcf   : > { %10899 = vmatprep.mubr.bf16.mxu0 %v16202_v63  ;;  %v9780_v63 = vld [vmem:[%s12546_s26 + $0x48] sm:$0xe] }
  0xd0   : > { %v2235_v34 = vor.u32 %v2234_v16, %v13282_v3 }
  0xd6   : > { %10900 = vmatmul.mubr.bf16.gmra.mrb[20].mxu0 %v16203_v59  ;;  %v2977_v59 = vrot.slane %v13285_v0, 5 }
  0xd7   : > { %10903 = vmatprep.mubr.bf16.mxu0 %v9603_v26  ;;  %v2184_v26 = vshrl.u32 %v9688_v44, 16  ;;  %v9796_v44 = vrot.slane %v9780_v63, 9  ;;  %v13383_v63 = vld [vmem:[%s12546_s26 + $0x88] sm:$0xf] }
  0xde   : > { %10904 = vmatmul.mubr.bf16.gmra.mrb[24].mxu0 %v9604_v9  ;;  %v2177_v9 = vor.u32 %v2176_v1, %v2173_v37  ;;  %v2979_v37 = vrot.slane %v2977_v59, 4  ;;  %v12218_v1 = vld [vmem:[%s16091_s1 + $0x128] sm:$0xff]  }
  0xdf   : > { %10907 = vmatprep.mubr.bf16.mxu0 %v9605_v13  ;;  %v2186_v13 = vrot.slane %v2184_v26, 4 }
  0xe0   : > { %v13248_v47 = vrot.slane %v2177_v9, 4  ;;  %v13322_v9 = vld [vmem:[%s12546_s26 + $0x64] sm:$0xf] }
  0xe1   : > { %v2187_v18 = vor.u32 %v2186_v13, %v13241_v25 }
  0xe2   : > { %v2183_v58 = vsel %vm12578_vm2, %v13248_v47, %v13241_v25  ;;  %v9705_v25 = vld [vmem:[%s12546_s26 + $0x54] sm:$0xf] }
  0xe3   : > { %v13260_v56 = vrot.slane %v2187_v18, 4 }
  0xe6   : > { %10908 = vmatmul.mubr.bf16.gmra.mrb[28].mxu0 %v9606_v32  ;;  %v2219_v32 = vshrl.u32 %v9693_v36, 16  ;;  %v2991_v36 = vrot.slane %v13322_v9, 5 }
  0xe7   : > { %10927 = vmatprep.mubr.bf16.mxu0 %v12201_v57  ;;  %v13303_v57 = vsel %vm12911_vm5, %v9796_v44, %v2977_v59  ;;  %v13386_v59 = vld [vmem:[%s12546_s26 + $0x8c] sm:$0x1] }
  0xe8   : > { %v2221_v23 = vrot.slane %v2219_v32, 4  ;;  %v2993_v32 = vrot.slane %v2991_v36, 4 }
  0xea   : > { %v2225_v6 = vor.u32 %v2224_v42, %v2221_v23  ;;  %v13364_v23 = vld [vmem:[%s12546_s26 + $0x80] sm:$0x1]  ;;  %v13366_v42 = vrot.slane %v2235_v34, 4 }
  0xeb   : > { %v3008_v50 = vrot.slane %v13364_v23, 5 }
  0xec   : > { %v13327_v13 = vrot.slane %v2225_v6, 4  ;;  %v3015_v6 = vrot.slane %v13386_v59, 5 }
  0xee   : > { %10928 = vmatmul.mubr.bf16.vlgmr.msra.gmra.mrb[0].mxu0 %v12202_v7  ;;  %v2994_v7 = vrot.slane %v13325_v61, 5 }
  0xef   : > { %10960 = vmatpush3.bf16.msra.mxu0 %v12203_v15  ;;  %10931 = vmatprep.mubr.bf16.mxu0 %v12204_v31  ;;  %v13288_v15 = vld [vmem:[%s12546_s26 + $0x50] sm:$0x1]  ;;  %v9798_v31 = vrot.slane %v9782_v29, 9  ;;  %v9786_v29 = vld [vmem:[%s12546_s26 + $0x90] sm:$0xe] }
  0xf0   : > { %10961 = vmatprep.subr.bf16.mxu0 %v12206_v8  ;;  %v2980_v52 = vrot.slane %v13288_v15, 5  ;;  %v13348_v28 = vsel %vm12911_vm5, %v2993_v32, %v2994_v7 }
  0xf1   : > { %v13343_v18 = vsel %vm12911_vm5, %v9798_v31, %v2991_v36  ;;  %v3019_v36 = vrot.slane %v13397_v49, 5 }
  0xf2   : > { %v13307_v26 = vsel %vm12911_vm5, %v2979_v37, %v2980_v52  ;;  %v9785_v37 = vld [vmem:[%s12546_s26 + $0x84] sm:$0xe] }
  0xf3   : > { %10962 = vmatpush3.bf16.msra.mxu0 %v12206_v8  ;;  %v2262_v8 = vshll.u32 %v13310_v60, 16  ;;  %v9801_v62 = vrot.slane %v9785_v37, 9  ;;  %v3021_v34 = vrot.slane %v3019_v36, 4  ;;  %v13444_v37 = vld [vmem:[%s12546_s26 + $0xb0] sm:$0x1] }
  0xf4   : > { %10963 = vmatprep.subr.bf16.mxu0 %v12209_v38 }
  0xf5   : > { %v13374_v19 = vrot.slane %v2262_v8, 5  ;;  %v12219_v8 = vld [vmem:[%s12546_s26 + $0x9c] sm:$0xff]  }
  0xf6   : > { %10932 = vmatmul.mubr.bf16.gmra.mrb[4].mxu0 %v12205_v53  ;;  %v13361_v53 = vld [vmem:[%s12546_s26 + $0x7c] sm:$0xf] }
  0xf7   : > { %10935 = vmatprep.mubr.bf16.mxu0 %v12207_v51  ;;  %10964 = vmatpush3.bf16.msra.mxu0 %v12209_v38  ;;  %v13358_v38 = vld [vmem:[%s12546_s26 + $0x3c] sm:$0xf]  ;;  %v9784_v51 = vld [vmem:[%s12546_s26 + $0x78] sm:$0xe]  ;;  %v3005_v14 = vrot.slane %v13361_v53, 5 }
  0xf8   : > { %10965 = vmatprep.subr.bf16.mxu0 %v12212_v24  ;;  %v9800_v4 = vrot.slane %v9784_v51, 9  ;;  %v2267_v43 = vshrl.u32 %v13358_v38, 16 }
  0xf9   : > { %v3007_v16 = vrot.slane %v3005_v14, 4 }
  0xfa   : > { %v13380_v30 = vsel %vm12911_vm5, %v9800_v4, %v3005_v14  ;;  %v13427_v14 = vld [vmem:[%s12546_s26 + $0xa0] sm:$0xf]  ;;  %v13455_v44 = vrot.slane %v2267_v43, 4 }
  0xfb   : > { %10966 = vmatpush3.bf16.msra.mxu0 %v12212_v24  ;;  %v12214_v24 = vld [vmem:[%s12546_s26 + $0x78] sm:$0xff]   ;;  %16204 = vst [vmem:[#allocation5_spill] sm:$0xff] %v13380_v30  ;;  %v13390_v52 = vsel %vm12911_vm5, %v3007_v16, %v3008_v50  ;;  %v13430_v50 = vld [vmem:[%s12546_s26 + $0xa4] sm:$0x1] }
  0xfc   : > { %10967 = vmatprep.subr.bf16.mxu0 %v12215_v12  ;;  %16205 = vst [vmem:[#allocation9_spill] sm:$0xff] %v13390_v52 }
  0xfe   : > { %10936 = vmatmul.mubr.bf16.gmra.mrb[8].mxu0 %v12208_v17  ;;  %v13394_v17 = vld [vmem:[%s12546_s26 + $0x40] sm:$0xf] }
  0xff   : > { %10939 = vmatprep.mubr.bf16.mxu0 %v12210_v45  ;;  %10968 = vmatpush3.bf16.msra.mxu0 %v12215_v12  ;;  %v12216_v12 = vld [vmem:[%s12546_s26 + $0x84] sm:$0xff]   ;;  %v13402_v45 = vld [vmem:[%s12546_s26 + $0x98] sm:$0x1]  ;;  %v2276_v32 = vshll.u32 %v13394_v17, 16 }
 0x100   : > { %10969 = vmatprep.subr.bf16.mxu0 %v12218_v1  ;;  %v3022_v7 = vrot.slane %v13402_v45, 5 }
 0x102   : > { %v13436_v4 = vsel %vm12911_vm5, %v3021_v34, %v3022_v7  ;;  %v9788_v7 = vld [vmem:[%s12546_s26 + $0xa8] sm:$0xe] }
 0x103   : > { %10970 = vmatpush3.bf16.msra.mxu0 %v12218_v1  ;;  %v3012_v1 = vrot.slane %v13383_v63, 5  ;;  %16209 = vst [vmem:[#allocation10_spill] sm:$0xff] %v13436_v4  ;;  %v12220_v34 = vld [vmem:[%s12546_s26 + $0xa8] sm:$0xff]   ;;  %v9804_v16 = vrot.slane %v9788_v7, 9  ;;  %v2193_v4 = vsel %vm12578_vm2, %v13260_v56, %v13262_v20  ;;  %v13487_v20 = vrot.slane %v2276_v32, 5 }
 0x104   : > { %10971 = vmatprep.subr.bf16.mxu0 %v12221_v2  ;;  %v9702_v7 = vld [vmem:[%s12546_s26 + $0x48] sm:$0xf]  ;;  %v13502_v32 = vld [vmem:[%s12546_s26 + $0xb8] sm:$0xf] }
 0x105   : > { %v3014_v31 = vrot.slane %v3012_v1, 4 }
 0x106   : > { %10940 = vmatmul.mubr.bf16.gmra.mrb[12].mxu0 %v12211_v10  ;;  %v12217_v10 = vld [vmem:[%s12546_s26 + $0x90] sm:$0xff]  }
 0x107   : > { %10943 = vmatprep.mubr.bf16.mxu0 %v12213_v54  ;;  %10972 = vmatpush3.bf16.msra.mxu0 %v12221_v2  ;;  %v2270_v2 = vshll.u32 %v13358_v38, 16  ;;  %v9802_v54 = vrot.slane %v9786_v29, 9  ;;  %v13420_v38 = vsel %vm12911_vm5, %v3014_v31, %v3015_v6  ;;  %v3026_v6 = vrot.slane %v13427_v14, 5 }
 0x108   : > { %10973 = vmatprep.subr.bf16.mxu0 %v12224_v35  ;;  %16207 = vst [vmem:[#allocation7_spill] sm:$0xff] %v13420_v38  ;;  %v2280_v29 = vshrl.u32 %v13394_v17, 16  ;;  %v12223_v38 = vld [vmem:[%s12546_s26 + $0xc0] sm:$0xff]  }
 0x109   : > { %v13424_v51 = vsel %vm12911_vm5, %v9802_v54, %v3019_v36  ;;  %v3036_v54 = vrot.slane %v13444_v37, 5  ;;  %v2272_v56 = vrot.slane %v2270_v2, 5  ;;  %v2249_v2 = vor.u32 %v13317_v41, %v13296_v11 }
 0x10a   : > { %16208 = vst [vmem:[#allocation8_spill] sm:$0xff] %v13424_v51  ;;  %v3040_v11 = vrot.slane %v13502_v32, 5  ;;  %v2291_v41 = vshrl.u32 %v9702_v7, 16  ;;  %v13530_v51 = vld [vmem:[%s12546_s26 + $0x58] sm:$0xf] }
 0x10b   : > { %10974 = vmatpush3.bf16.msra.mxu0 %v12224_v35  ;;  %v13416_v35 = vsel %vm12911_vm5, %v9801_v62, %v3012_v1  ;;  %v9787_v1 = vld [vmem:[%s12546_s26 + $0x9c] sm:$0xe]  ;;  %v3029_v62 = vrot.slane %v13430_v50, 5 }
 0x10c   : > { %11007 = vmatprep.subr.bf16.mxu0 %v13355_v22  ;;  %16206 = vst [vmem:[#allocation6_spill] sm:$0xff] %v13416_v35  ;;  %v9803_v36 = vrot.slane %v9787_v1, 9  ;;  %v2300_v35 = vshll.u32 %v13285_v0, 16 }
 0x10e   : > { %10944 = vmatmul.mubr.bf16.gmra.mrb[16].mxu0 %v12214_v24  ;;  %v12222_v24 = vld [vmem:[%s12546_s26 + $0xb4] sm:$0xff]   ;;  %v13459_v39 = vsel %vm12911_vm5, %v9803_v36, %v3026_v6  ;;  %v13479_v36 = vld [vmem:[%s12546_s26 + $0x44] sm:$0x1] }
 0x10f   : > { %10947 = vmatprep.mubr.bf16.mxu0 %v12216_v12  ;;  %v13439_v12 = vld [vmem:[%s12546_s26 + $0xac] sm:$0xf]  ;;  %16210 = vst [vmem:[#allocation11_spill] sm:$0xff] %v13459_v39  ;;  %v2294_v39 = vshll.u32 %v9702_v7, 16 }
 0x110   : > { %v3033_v31 = vrot.slane %v13439_v12, 5 }
 0x116   : > { %10948 = vmatmul.mubr.bf16.gmra.mrb[20].mxu0 %v12217_v10  ;;  %v3028_v10 = vrot.slane %v3026_v6, 4  ;;  %v13476_v6 = vsel %vm12911_vm5, %v9804_v16, %v3033_v31  ;;  %v9751_v16 = vcombine.low %v2183_v58, %v2193_v4 }
 0x117   : > { %10951 = vmatprep.mubr.bf16.mxu0 %v12219_v8  ;;  %v3035_v8 = vrot.slane %v3033_v31, 4  ;;  %16213 = vst [vmem:[#allocation3_spill] sm:$0xff] %v13476_v6  ;;  %v2207_v31 = vsel %vm12578_vm2, %v13264_v27, %v13245_v5  ;;  %v2231_v5 = vsel %vm12578_vm2, %v13327_v13, %v13282_v3  ;;  %v2259_v27 = vor.u32 %v13368_v46, %v13319_v48 }
 0x118   : > { %v13472_v43 = vsel %vm12911_vm5, %v3028_v10, %v3029_v62  ;;  %v2282_v62 = vrot.slane %v2280_v29, 4  ;;  %v13505_v29 = vld [vmem:[%s12546_s26 + $0xbc] sm:$0x1]  ;;  %v2273_v13 = vor.u32 %v2272_v56, %v13455_v44  ;;  %v2286_v46 = vshll.u32 %v13479_v36, 16 }
 0x119   : > { %16212 = vst [vmem:[#allocation4_spill] sm:$0xff] %v13472_v43  ;;  %v13485_v47 = vsel %vm12911_vm5, %v3035_v8, %v3036_v54  ;;  %v2217_v54 = vsel %vm12578_vm2, %v13269_v40, %v13266_v33  ;;  %v13508_v8 = vld [vmem:[%s12546_s26 + $0xc4] sm:$0xf]  ;;  %v13517_v33 = vld [vmem:[%s12546_s26 + $0xc8] sm:$0x1]  ;;  %v3043_v58 = vrot.slane %v13505_v29, 5 }
 0x11a   : > { %16214 = vst [vmem:[#allocation12_spill] sm:$0xff] %v13485_v47  ;;  %v9789_v40 = vld [vmem:[%s12546_s26 + $0xb4] sm:$0xe]  ;;  %v3047_v10 = vrot.slane %v13508_v8, 5  ;;  %v3050_v3 = vrot.slane %v13517_v33, 5  ;;  %v3042_v47 = vrot.slane %v3040_v11, 4  ;;  %v2283_v43 = vor.u32 %v2282_v62, %v13487_v20 }
 0x11b   : > { %v9805_v4 = vrot.slane %v9789_v40, 9  ;;  %v2304_v44 = vshrl.u32 %v13285_v0, 16  ;;  %v2315_v62 = vshrl.u32 %v9705_v25, 16  ;;  %v2241_v0 = vsel %vm12578_vm2, %v13366_v42, %v13334_v21 }
 0x11c   : > { %v3049_v40 = vrot.slane %v3047_v10, 4  ;;  %v13541_v56 = vsel %vm12911_vm5, %v3042_v47, %v3043_v58  ;;  %v13557_v47 = vrot.slane %v2249_v2, 4  ;;  %v2324_v58 = vshll.u32 %v13530_v51, 16 }
 0x11d   : > { %16216 = vst [vmem:[#allocation14_spill] sm:$0xff] %v13541_v56  ;;  %v2274_v56 = vrot.slane %v2273_v13, 4  ;;  %v2296_v21 = vrot.slane %v2294_v39, 5  ;;  %v13568_v42 = vrot.slane %v2300_v35, 5  ;;  %v2306_v2 = vrot.slane %v2304_v44, 4 }
 0x11e   : > { %10952 = vmatmul.mubr.bf16.gmra.mrb[24].mxu0 %v12220_v34  ;;  %v9790_v34 = vld [vmem:[%s12546_s26 + $0xc0] sm:$0xe]  ;;  %v13574_v52 = vrot.slane %v2324_v58, 5  ;;  %v2348_v35 = vshll.u32 %v13322_v9, 16 }
 0x11f   : > { %10955 = vmatprep.mubr.bf16.mxu0 %v12222_v24  ;;  %v9806_v6 = vrot.slane %v9790_v34, 9  ;;  %v13534_v24 = vsel %vm12911_vm5, %v9805_v4, %v3040_v11  ;;  %v2318_v34 = vshll.u32 %v9705_v25, 16  ;;  %v13551_v4 = vsel %vm12911_vm5, %v3049_v40, %v3050_v3  ;;  %v9708_v40 = vld [vmem:[%s12546_s26 + $0x60] sm:$0xf] }
 0x120   : > { %16215 = vst [vmem:[#allocation13_spill] sm:$0xff] %v13534_v24  ;;  %16218 = vst [vmem:[#allocation16_spill] sm:$0xff] %v13551_v4  ;;  %v13562_v25 = vrot.slane %v2259_v27, 4  ;;  %v2293_v11 = vrot.slane %v2291_v41, 4  ;;  %v2328_v3 = vshrl.u32 %v13530_v51, 16  ;;  %v2284_v24 = vrot.slane %v2283_v43, 4 }
 0x121   : > { %v13545_v7 = vsel %vm12911_vm5, %v9806_v6, %v3047_v10  ;;  %v13564_v10 = vrot.slane %v2286_v46, 5  ;;  %v2310_v6 = vshll.u32 %v13288_v15, 16  ;;  %v2317_v27 = vrot.slane %v2315_v62, 4  ;;  %v13572_v41 = vld [vmem:[%s12546_s26 + $0x5c] sm:$0x1] }
 0x122   : > { %16217 = vst [vmem:[#allocation15_spill] sm:$0xff] %v13545_v7  ;;  %v2320_v4 = vrot.slane %v2318_v34, 5  ;;  %v9752_v46 = vcombine.low %v2207_v31, %v2217_v54  ;;  %v9753_v7 = vcombine.low %v2231_v5, %v2241_v0  ;;  %v2339_v30 = vshrl.u32 %v9708_v40, 16  ;;  %v13590_v62 = vld [vmem:[%s12546_s26 + $0x70] sm:$0xf] }
 0x123   : > { %v2330_v13 = vrot.slane %v2328_v3, 4  ;;  %v2342_v39 = vshll.u32 %v9708_v40, 16  ;;  %v2255_v15 = vsel %vm12578_vm2, %v13557_v47, %v13319_v48  ;;  %v2265_v43 = vsel %vm12578_vm2, %v13562_v25, %v13374_v19  ;;  %v12226_v48 = vld [vmem:[%s16091_s1 + $0x148] sm:$0xff]   ;;  %v9714_v40 = vld [vmem:[%s12546_s26 + $0x78] sm:$0xf] }
 0x124   : > { %v2297_v31 = vor.u32 %v2296_v21, %v2293_v11  ;;  %v2307_v54 = vor.u32 %v2306_v2, %v13568_v42  ;;  %v2321_v5 = vor.u32 %v2320_v4, %v2317_v27  ;;  %v2334_v44 = vshll.u32 %v13572_v41, 16 }
 0x125   : > { %v2279_v0 = vsel %vm12578_vm2, %v2274_v56, %v13487_v20  ;;  %v2289_v19 = vsel %vm12578_vm2, %v2284_v24, %v13564_v10  ;;  %v13601_v11 = vrot.slane %v2310_v6, 5  ;;  %v2341_v4 = vrot.slane %v2339_v30, 4  ;;  %v12227_v10 = vld [vmem:[%s16091_s1 + $0x150] sm:$0xff]  }
 0x126   : > { %10956 = vmatmul.mubr.bf16.gmra.mrb[28].mxu0 %v12223_v38  ;;  %v9711_v38 = vld [vmem:[%s12546_s26 + $0x6c] sm:$0xf]  ;;  %v2331_v47 = vor.u32 %v2330_v13, %v13574_v52  ;;  %v2344_v58 = vrot.slane %v2342_v39, 5  ;;  %v13604_v25 = vrot.slane %v2348_v35, 5  ;;  %v2298_v21 = vrot.slane %v2297_v31, 4 }
 0x127   : > { %10975 = vmatprep.mubr.bf16.mxu0 %v9751_v16  ;;  %v2352_v16 = vshrl.u32 %v13322_v9, 16  ;;  %v2363_v9 = vshrl.u32 %v9711_v38, 16  ;;  %v2366_v34 = vshll.u32 %v9711_v38, 16  ;;  %v2308_v2 = vrot.slane %v2307_v54, 4 }
 0x128   : > { %v2372_v27 = vshll.u32 %v13590_v62, 16  ;;  %v2376_v20 = vshrl.u32 %v13590_v62, 16  ;;  %v2322_v24 = vrot.slane %v2321_v5, 4  ;;  %v2336_v56 = vrot.slane %v2334_v44, 5 }
 0x129   : > { %v2354_v3 = vrot.slane %v2352_v16, 4  ;;  %v2365_v30 = vrot.slane %v2363_v9, 4  ;;  %v2368_v6 = vrot.slane %v2366_v34, 5  ;;  %v2387_v38 = vshrl.u32 %v9714_v40, 16 }
 0x12a   : > { %v2396_v13 = vshll.u32 %v13361_v53, 16  ;;  %v2400_v39 = vshrl.u32 %v13361_v53, 16  ;;  %v2332_v35 = vrot.slane %v2331_v47, 4  ;;  %v2358_v16 = vshll.u32 %v13325_v61, 16 }
 0x12b   : > { %v9754_v31 = vcombine.low %v2255_v15, %v2265_v43  ;;  %v9755_v54 = vcombine.low %v2279_v0, %v2289_v19  ;;  %v13617_v5 = vrot.slane %v2372_v27, 5  ;;  %v2378_v44 = vrot.slane %v2376_v20, 4  ;;  %v9717_v15 = vld [vmem:[%s12546_s26 + $0x84] sm:$0xf]  ;;  %v12228_v43 = vld [vmem:[%s16091_s1 + $0x158] sm:$0xff]  }
 0x12c   : > { %v2303_v9 = vsel %vm12578_vm2, %v2298_v21, %v13568_v42  ;;  %v2313_v53 = vsel %vm12578_vm2, %v2308_v2, %v13601_v11  ;;  %v2327_v34 = vsel %vm12578_vm2, %v2322_v24, %v13574_v52  ;;  %v2369_v61 = vor.u32 %v2368_v6, %v2365_v30 }
 0x12d   : > { %v13635_v42 = vrot.slane %v2396_v13, 5  ;;  %v2402_v19 = vrot.slane %v2400_v39, 4  ;;  %v2337_v11 = vsel %vm12578_vm2, %v2332_v35, %v2336_v56  ;;  %v2360_v52 = vrot.slane %v2358_v16, 5 }
 0x12e   : > { %10976 = vmatmul.mubr.bf16.vlgmr.msra.gmra.mrb[0].mxu0 %v9752_v46  ;;  %v2390_v46 = vshll.u32 %v9714_v40, 16  ;;  %v2411_v21 = vshrl.u32 %v9717_v15, 16  ;;  %v2414_v2 = vshll.u32 %v9717_v15, 16  ;;  %v2420_v27 = vshll.u32 %v13383_v63, 16  ;;  %v12230_v15 = vld [vmem:[%s16091_s1 + $0x168] sm:$0xff]  }
 0x12f   : > { %11008 = vmatpush3.bf16.msra.mxu0 %v13355_v22  ;;  %10979 = vmatprep.mubr.bf16.mxu0 %v9753_v7  ;;  %v2345_v22 = vor.u32 %v2344_v58, %v2341_v4  ;;  %v2355_v7 = vor.u32 %v2354_v3, %v13604_v25  ;;  %v13629_v4 = vld [vmem:[%s12546_s26 + $0x74] sm:$0x1]  ;;  %v2379_v3 = vor.u32 %v2378_v44, %v13617_v5  ;;  %v2424_v20 = vshrl.u32 %v13383_v63, 16 }
 0x130   : > { %11009 = vmatprep.subr.bf16.mxu0 %v12226_v48  ;;  %v2392_v0 = vrot.slane %v2390_v46, 5  ;;  %v2382_v40 = vshll.u32 %v13629_v4, 16  ;;  %v2370_v24 = vrot.slane %v2369_v61, 4  ;;  %v2403_v30 = vor.u32 %v2402_v19, %v13635_v42  ;;  %v9720_v46 = vld [vmem:[%s12546_s26 + $0x90] sm:$0xf] }
 0x131   : > { %v2346_v47 = vrot.slane %v2345_v22, 4  ;;  %v2356_v58 = vrot.slane %v2355_v7, 4  ;;  %v2406_v6 = vshll.u32 %v13364_v23, 16  ;;  %v9756_v13 = vcombine.low %v2303_v9, %v2313_v53 }
 0x132   : > { %v9757_v39 = vcombine.low %v2327_v34, %v2337_v11  ;;  %v2380_v35 = vrot.slane %v2379_v3, 4  ;;  %v2384_v22 = vrot.slane %v2382_v40, 5  ;;  %v2413_v7 = vrot.slane %v2411_v21, 4 }
 0x133   : > { %11010 = vmatpush3.bf16.msra.mxu0 %v12226_v48  ;;  %v2389_v48 = vrot.slane %v2387_v38, 4  ;;  %v12229_v38 = vld [vmem:[%s16091_s1 + $0x160] sm:$0xff]   ;;  %v2361_v63 = vsel %vm12578_vm2, %v2356_v58, %v2360_v52  ;;  %v2416_v16 = vrot.slane %v2414_v2, 5  ;;  %v13655_v23 = vrot.slane %v2420_v27, 5 }
 0x134   : > { %11011 = vmatprep.subr.bf16.mxu0 %v12227_v10  ;;  %v2435_v44 = vshrl.u32 %v9720_v46, 16  ;;  %v2438_v61 = vshll.u32 %v9720_v46, 16  ;;  %v2375_v9 = vsel %vm12578_vm2, %v2370_v24, %v13617_v5  ;;  %v2408_v34 = vrot.slane %v2406_v6, 5 }
 0x135   : > { %v2393_v56 = vor.u32 %v2392_v0, %v2389_v48  ;;  %v2444_v48 = vshll.u32 %v13397_v49, 16  ;;  %v2385_v11 = vsel %vm12578_vm2, %v2380_v35, %v2384_v22  ;;  %v2430_v5 = vshll.u32 %v13386_v59, 16  ;;  %v12232_v22 = vld [vmem:[%s16091_s1 + $0x178] sm:$0xff]  }
 0x136   : > { %10980 = vmatmul.mubr.bf16.gmra.mrb[4].mxu0 %v9754_v31  ;;  %v9723_v31 = vld [vmem:[%s12546_s26 + $0x9c] sm:$0xf]  ;;  %v2472_v58 = vshrl.u32 %v13427_v14, 16  ;;  %v2417_v52 = vor.u32 %v2416_v16, %v2413_v7  ;;  %v2437_v40 = vrot.slane %v2435_v44, 4  ;;  %v9729_v44 = vld [vmem:[%s12546_s26 + $0xb4] sm:$0xf] }
 0x137   : > { %10983 = vmatprep.mubr.bf16.mxu0 %v9755_v54  ;;  %11012 = vmatpush3.bf16.msra.mxu0 %v12227_v10  ;;  %v2351_v10 = vsel %vm12578_vm2, %v2346_v47, %v13604_v25  ;;  %v2426_v54 = vrot.slane %v2424_v20, 4  ;;  %v2394_v53 = vrot.slane %v2393_v56, 4  ;;  %v2404_v25 = vrot.slane %v2403_v30, 4 }
 0x138   : > { %11013 = vmatprep.subr.bf16.mxu0 %v12228_v43  ;;  %v2459_v0 = vshrl.u32 %v9723_v31, 16  ;;  %v2462_v19 = vshll.u32 %v9723_v31, 16  ;;  %v2468_v47 = vshll.u32 %v13427_v14, 16  ;;  %v9758_v21 = vcombine.low %v2351_v10, %v2361_v63  ;;  %v12231_v14 = vld [vmem:[%s16091_s1 + $0x170] sm:$0xff]  }
 0x139   : > { %v2427_v3 = vor.u32 %v2426_v54, %v13655_v23  ;;  %v2399_v2 = vsel %vm12578_vm2, %v2394_v53, %v13635_v42  ;;  %v2409_v59 = vsel %vm12578_vm2, %v2404_v25, %v2408_v34  ;;  %v13679_v27 = vrot.slane %v2444_v48, 5  ;;  %v9726_v42 = vld [vmem:[%s12546_s26 + $0xa8] sm:$0xf] }
 0x13a   : > { %v2461_v24 = vrot.slane %v2459_v0, 4  ;;  %v2464_v56 = vrot.slane %v2462_v19, 5  ;;  %v9759_v30 = vcombine.low %v2375_v9, %v2385_v11  ;;  %v2432_v6 = vrot.slane %v2430_v5, 5 }
 0x13b   : > { %11014 = vmatpush3.bf16.msra.mxu0 %v12228_v43  ;;  %v2448_v43 = vshrl.u32 %v13397_v49, 16  ;;  %v2440_v49 = vrot.slane %v2438_v61, 5  ;;  %v2474_v46 = vrot.slane %v2472_v58, 4  ;;  %v2454_v63 = vshll.u32 %v13402_v45, 16 }
 0x13c   : > { %11015 = vmatprep.subr.bf16.mxu0 %v12229_v38  ;;  %v9760_v35 = vcombine.low %v2399_v2, %v2409_v59  ;;  %v2465_v16 = vor.u32 %v2464_v56, %v2461_v24  ;;  %v2478_v31 = vshll.u32 %v13430_v50, 16  ;;  %v2483_v54 = vshrl.u32 %v9726_v42, 16 }
 0x13d   : > { %v2450_v20 = vrot.slane %v2448_v43, 4  ;;  %v2441_v10 = vor.u32 %v2440_v49, %v2437_v40  ;;  %v2486_v9 = vshll.u32 %v9726_v42, 16  ;;  %v2492_v45 = vshll.u32 %v13439_v12, 16 }
 0x13e   : > { %10984 = vmatmul.mubr.bf16.gmra.mrb[8].mxu0 %v9756_v13  ;;  %v2418_v13 = vrot.slane %v2417_v52, 4  ;;  %v2496_v53 = vshrl.u32 %v13439_v12, 16  ;;  %v2456_v50 = vrot.slane %v2454_v63, 5  ;;  %v2507_v48 = vshrl.u32 %v9729_v44, 16  ;;  %v13704_v12 = vld [vmem:[%s16091_s1 + $0x180] sm:$0xff]  }
 0x13f   : > { %10987 = vmatprep.mubr.bf16.mxu0 %v9757_v39  ;;  %11016 = vmatpush3.bf16.msra.mxu0 %v12229_v38  ;;  %v13681_v38 = vrot.slane %v2468_v47, 5  ;;  %v2428_v39 = vrot.slane %v2427_v3, 4  ;;  %v2451_v7 = vor.u32 %v2450_v20, %v13679_v27  ;;  %v2510_v43 = vshll.u32 %v9729_v44, 16 }
 0x140   : > { %11017 = vmatprep.subr.bf16.mxu0 %v12230_v15  ;;  %v2423_v25 = vsel %vm12578_vm2, %v2418_v13, %v13655_v23  ;;  %v2516_v0 = vshll.u32 %v13502_v32, 16  ;;  %v2520_v19 = vshrl.u32 %v13502_v32, 16  ;;  %v2466_v11 = vrot.slane %v2465_v16, 4 }
 0x141   : > { %v2475_v61 = vor.u32 %v2474_v46, %v13681_v38  ;;  %v2433_v34 = vsel %vm12578_vm2, %v2428_v39, %v2432_v6  ;;  %v2452_v23 = vrot.slane %v2451_v7, 4  ;;  %v2480_v5 = vrot.slane %v2478_v31, 5 }
 0x142   : > { %v2485_v47 = vrot.slane %v2483_v54, 4  ;;  %v2488_v52 = vrot.slane %v2486_v9, 5  ;;  %v2494_v3 = vrot.slane %v2492_v45, 5  ;;  %v2498_v40 = vrot.slane %v2496_v53, 4 }
 0x143   : > { %11018 = vmatpush3.bf16.msra.mxu0 %v12230_v15  ;;  %v2442_v15 = vrot.slane %v2441_v10, 4  ;;  %v2476_v58 = vrot.slane %v2475_v61, 4  ;;  %v9761_v49 = vcombine.low %v2423_v25, %v2433_v34  ;;  %v2512_v2 = vrot.slane %v2510_v43, 5 }
 0x144   : > { %11019 = vmatprep.subr.bf16.mxu0 %v12231_v14  ;;  %v2518_v32 = vrot.slane %v2516_v0, 5  ;;  %v2522_v59 = vrot.slane %v2520_v19, 4  ;;  %v2457_v24 = vsel %vm12578_vm2, %v2452_v23, %v2456_v50  ;;  %v2502_v56 = vshll.u32 %v13444_v37, 16  ;;  %v12479_v0 = vld [vmem:[%s12546_s26 + $0x10] sm:$0xf] }
 0x145   : > { %v2447_v20 = vsel %vm12578_vm2, %v2442_v15, %v13679_v27  ;;  %v2481_v6 = vsel %vm12578_vm2, %v2476_v58, %v2480_v5  ;;  %v2489_v46 = vor.u32 %v2488_v52, %v2485_v47  ;;  %v2499_v42 = vor.u32 %v2498_v40, %v2494_v3  ;;  %v9775_v23 = vld [vmem:[%s12546_s26 + $0xc] sm:$0xe]  ;;  %v12480_v40 = vld [vmem:[%s12546_s26 + $0x14] sm:$0x1] }
 0x146   : > { %10988 = vmatmul.mubr.bf16.gmra.mrb[12].mxu0 %v9758_v21  ;;  %v2509_v21 = vrot.slane %v2507_v48, 4  ;;  %v2540_v27 = vshll.u32 %v13508_v8, 16  ;;  %v2544_v10 = vshrl.u32 %v13508_v8, 16  ;;  %v2526_v37 = vshll.u32 %v13505_v29, 16 }
 0x147   : > { %10991 = vmatprep.mubr.bf16.mxu0 %v9759_v30  ;;  %11020 = vmatpush3.bf16.msra.mxu0 %v12231_v14  ;;  %v9732_v14 = vld [vmem:[%s12546_s26 + $0xc0] sm:$0xf]  ;;  %v2471_v30 = vsel %vm12578_vm2, %v2466_v11, %v13681_v38  ;;  %v2490_v16 = vrot.slane %v2489_v46, 4  ;;  %v2500_v38 = vrot.slane %v2499_v42, 4  ;;  %v2504_v31 = vrot.slane %v2502_v56, 5 }
 0x148   : > { %11021 = vmatprep.subr.bf16.mxu0 %v12232_v22  ;;  %v2531_v13 = vshrl.u32 %v9732_v14, 16  ;;  %v2534_v39 = vshll.u32 %v9732_v14, 16  ;;  %v2513_v63 = vor.u32 %v2512_v2, %v2509_v21  ;;  %v9763_v7 = vcombine.low %v2471_v30, %v2481_v6  ;;  %v12482_v56 = vld [vmem:[%s12546_s26 + $0x28] sm:$0xf]  ;;  %v9777_v6 = vld [vmem:[%s12546_s26 + $0x24] sm:$0xe] }
 0x149   : > { %v2542_v61 = vrot.slane %v2540_v27, 5  ;;  %v2546_v9 = vrot.slane %v2544_v10, 4  ;;  %v2528_v25 = vrot.slane %v2526_v37, 5  ;;  %v2495_v8 = vsel %vm12578_vm2, %v2490_v16, %v2494_v3  ;;  %v12483_v27 = vld [vmem:[%s12546_s26 + $0x20] sm:$0x1] }
 0x14a   : > { %v2533_v54 = vrot.slane %v2531_v13, 4  ;;  %v2536_v44 = vrot.slane %v2534_v39, 5  ;;  %v2514_v45 = vrot.slane %v2513_v63, 4  ;;  %v2505_v29 = vsel %vm12578_vm2, %v2500_v38, %v2504_v31  ;;  %v12484_v37 = vld [vmem:[%s12546_s26 + $0x2c] sm:$0x1] }
 0x14b   : > { %11022 = vmatpush3.bf16.msra.mxu0 %v12232_v22  ;;  %v2523_v22 = vor.u32 %v2522_v59, %v2518_v32  ;;  %v2547_v15 = vor.u32 %v2546_v9, %v2542_v61  ;;  %v2550_v50 = vshll.u32 %v13517_v33, 16  ;;  %v2942_v19 = vrot.slane %v12479_v0, 5  ;;  %v12485_v38 = vld [vmem:[%s12546_s26 + $0x34] sm:$0xf] }
 0x14c   : > { %11055 = vmatprep.subr.bf16.mxu0 %v13704_v12  ;;  %v2537_v34 = vor.u32 %v2536_v44, %v2533_v54  ;;  %v2519_v48 = vsel %vm12578_vm2, %v2514_v45, %v2518_v32  ;;  %v9764_v11 = vcombine.low %v2495_v8, %v2505_v29  ;;  %v9791_v3 = vrot.slane %v9775_v23, 9  ;;  %v12481_v32 = vld [vmem:[%s12546_s26 + $0x1c] sm:$0xf]  ;;  %v9781_v23 = vld [vmem:[%s12546_s26 + $0x54] sm:$0xe] }
 0x14d   : > { %v2524_v53 = vrot.slane %v2523_v22, 4  ;;  %v2548_v58 = vrot.slane %v2547_v15, 4  ;;  %v2552_v52 = vrot.slane %v2550_v50, 5  ;;  %v2944_v33 = vrot.slane %v2942_v19, 4  ;;  %v9779_v45 = vld [vmem:[%s12546_s26 + $0x3c] sm:$0xe] }
 0x14e   : > { %10992 = vmatmul.mubr.bf16.gmra.mrb[16].mxu0 %v9760_v35  ;;  %v9762_v35 = vcombine.low %v2447_v20, %v2457_v24  ;;  %v2538_v47 = vrot.slane %v2537_v34, 4  ;;  %v2949_v59 = vrot.slane %v12481_v32, 5  ;;  %v2943_v14 = vsel %vm12911_vm5, %v9791_v3, %v2942_v19  ;;  %v9776_v24 = vld [vmem:[%s12546_s26 + $0x18] sm:$0xe]  ;;  %v12234_v15 = vld [vmem:[%s16091_s1 + $0x188] sm:$0xff]  }
 0x14f   : > { %10995 = vmatprep.mubr.bf16.mxu0 %v9761_v49  ;;  %v2529_v43 = vsel %vm12578_vm2, %v2524_v53, %v2528_v25  ;;  %v2945_v49 = vrot.slane %v12480_v40, 5  ;;  %v2553_v2 = vsel %vm12578_vm2, %v2548_v58, %v2552_v52  ;;  %v2956_v30 = vrot.slane %v12482_v56, 5  ;;  %v12236_v3 = vld [vmem:[%s16091_s1 + $0x198] sm:$0xff]  }
 0x150   : > { %v9765_v5 = vcombine.low %v2519_v48, %v2529_v43  ;;  %v2543_v21 = vsel %vm12578_vm2, %v2538_v47, %v2542_v61  ;;  %v9792_v13 = vrot.slane %v9776_v24, 9  ;;  %v2951_v39 = vrot.slane %v2949_v59, 4  ;;  %v9778_v61 = vld [vmem:[%s12546_s26 + $0x30] sm:$0xe] }
 0x151   : > { %v2946_v20 = vsel %vm12911_vm5, %v2944_v33, %v2945_v49  ;;  %v9766_v46 = vcombine.low %v2543_v21, %v2553_v2  ;;  %v2952_v10 = vrot.slane %v12483_v27, 5  ;;  %v9793_v63 = vrot.slane %v9777_v6, 9  ;;  %v9783_v49 = vld [vmem:[%s12546_s26 + $0x6c] sm:$0xe]  ;;  %v16221_v6 = vld [vmem:[#allocation5_spill] sm:$0xff] }
 0x152   : > { %v9823_v42 = vcombine.low %v2943_v14, %v2946_v20  ;;  %v2958_v22 = vrot.slane %v2956_v30, 4  ;;  %v2963_v31 = vrot.slane %v12485_v38, 5  ;;  %v2970_v9 = vrot.slane %v13394_v17, 5  ;;  %v12238_v14 = vld [vmem:[%s16091_s1 + $0x1a8] sm:$0xff]   ;;  %v16236_v38 = vld [vmem:[#allocation13_spill] sm:$0xff] }
 0x153   : > { %v2953_v16 = vsel %vm12911_vm5, %v2951_v39, %v2952_v10  ;;  %v2957_v54 = vsel %vm12911_vm5, %v9793_v63, %v2956_v30  ;;  %v9794_v8 = vrot.slane %v9778_v61, 9  ;;  %v2966_v34 = vrot.slane %v13310_v60, 5  ;;  %v12243_v30 = vld [vmem:[%s16091_s1 + $0x1c0] sm:$0xff]   ;;  %v16225_v39 = vld [vmem:[#allocation7_spill] sm:$0xff] }
 0x154   : > { %v2965_v29 = vrot.slane %v2963_v31, 4  ;;  %v9795_v50 = vrot.slane %v9779_v45, 9  ;;  %v2972_v48 = vrot.slane %v2970_v9, 4  ;;  %v2973_v43 = vrot.slane %v13479_v36, 5  ;;  %v12235_v36 = vld [vmem:[%s16091_s1 + $0x190] sm:$0xff]  }
 0x155   : > { %v2964_v17 = vsel %vm12911_vm5, %v9794_v8, %v2963_v31  ;;  %v9797_v47 = vrot.slane %v9781_v23, 9  ;;  %v2987_v52 = vrot.slane %v13572_v41, 5  ;;  %v2998_v40 = vrot.slane %v13590_v62, 5  ;;  %v12237_v41 = vld [vmem:[%s16091_s1 + $0x1a0] sm:$0xff]   ;;  %v16230_v63 = vld [vmem:[#allocation11_spill] sm:$0xff]  ;;  %v16237_v31 = vld [vmem:[#allocation14_spill] sm:$0xff] }
 0x156   : > { %10996 = vmatmul.mubr.bf16.gmra.mrb[20].mxu0 %v9762_v35  ;;  %v2959_v35 = vrot.slane %v12484_v37, 5  ;;  %v2967_v0 = vsel %vm12911_vm5, %v2965_v29, %v2966_v34  ;;  %v2971_v60 = vsel %vm12911_vm5, %v9795_v50, %v2970_v9  ;;  %v2974_v19 = vsel %vm12911_vm5, %v2972_v48, %v2973_v43  ;;  %v16239_v61 = vld [vmem:[#allocation15_spill] sm:$0xff]  ;;  %v16240_v9 = vld [vmem:[#allocation16_spill] sm:$0xff]  ;;  %v12246_v8 = vld [vmem:[%s16091_s1 + $0x1c8] sm:$0xff]  }
 0x157   : > { %10999 = vmatprep.mubr.bf16.mxu0 %v9763_v7  ;;  %v2950_v7 = vsel %vm12911_vm5, %v9792_v13, %v2949_v59  ;;  %v9799_v2 = vrot.slane %v9783_v49, 9  ;;  %v3000_v32 = vrot.slane %v2998_v40, 4  ;;  %v3001_v59 = vrot.slane %v13629_v4, 5  ;;  %v12239_v4 = vld [vmem:[%s16091_s1 + $0x1b0] sm:$0xff]   ;;  %v16224_v13 = vld [vmem:[#allocation6_spill] sm:$0xff]  ;;  %v12245_v34 = vld [vmem:[%s12546_s26 + $0x3c] sm:$0xff]  }
 0x158   : > { %v2960_v44 = vsel %vm12911_vm5, %v2958_v22, %v2959_v35  ;;  %v9824_v53 = vcombine.low %v2950_v7, %v2953_v16  ;;  %v16219_v20 = vcombine.low %v13303_v57, %v13307_v26  ;;  %v12240_v57 = vld [vmem:[%s16091_s1 + $0x1b8] sm:$0xff]   ;;  %v16220_v26 = vcombine.low %v13343_v18, %v13348_v28  ;;  %v16228_v28 = vld [vmem:[#allocation10_spill] sm:$0xff]  ;;  %v16233_v35 = vld [vmem:[#allocation3_spill] sm:$0xff] }
 0x159   : > { %v9825_v25 = vcombine.low %v2957_v54, %v2960_v44  ;;  %v2999_v62 = vsel %vm12911_vm5, %v9799_v2, %v2998_v40  ;;  %v3002_v24 = vsel %vm12911_vm5, %v3000_v32, %v3001_v59  ;;  %v16226_v27 = vcombine.low %v16224_v13, %v16225_v39  ;;  %v16227_v18 = vld [vmem:[#allocation8_spill] sm:$0xff]  ;;  %v12249_v29 = vld [vmem:[%s16091_s1 + $0x1d0] sm:$0xff]   ;;  %v13881_v40 = vld [vmem:[%s12546_s26 + $0x28] sm:$0xf] }
 0x15a   : > { %v9831_v56 = vcombine.low %v2999_v62, %v3002_v24  ;;  %v16229_v10 = vcombine.low %v16227_v18, %v16228_v28  ;;  %v16231_v22 = vld [vmem:[#allocation4_spill] sm:$0xff]  ;;  %v16238_v54 = vcombine.low %v16236_v38, %v16237_v31  ;;  %v16241_v45 = vcombine.low %v16239_v61, %v16240_v9  ;;  %v13905_v18 = vld [vmem:[%s12546_s26 + $0x20] sm:$0x1]  ;;  %v9925_v31 = vld [vmem:[%s12546_s26 + $0x30] sm:$0xf] }
 0x15b   : > { %v16232_v37 = vcombine.low %v16230_v63, %v16231_v22  ;;  %v16234_v7 = vld [vmem:[#allocation12_spill] sm:$0xff]  ;;  %v3843_v62 = vshll.u32 %v13881_v40, 16  ;;  %v3847_v24 = vshrl.u32 %v13881_v40, 16  ;;  %v3829_v9 = vshll.u32 %v13905_v18, 16 }
 0x15c   : > { %v16235_v16 = vcombine.low %v16233_v35, %v16234_v7  ;;  %v12241_v44 = vld [vmem:[%s12546_s26 + $0x18] sm:$0xff]  }
 0x15d   : > { %v12252_v50 = vld [vmem:[%s16091_s1 + $0x1d8] sm:$0xff]   ;;  %v13915_v35 = vrot.slane %v3843_v62, 5  ;;  %v3849_v7 = vrot.slane %v3847_v24, 4 }
 0x15e   : > { %11000 = vmatmul.mubr.bf16.gmra.mrb[24].mxu0 %v9764_v11  ;;  %v9826_v11 = vcombine.low %v2964_v17, %v2967_v0  ;;  %v13851_v48 = vld [vmem:[%s12546_s26 + $0x58] sm:$0xf]  ;;  %v13854_v43 = vld [vmem:[%s12546_s26 + $0x5c] sm:$0x1]  ;;  %v10012_v17 = vld [vmem:[%s12546_s26 + $0x54] sm:$0xe] }
 0x15f   : > { %11003 = vmatprep.mubr.bf16.mxu0 %v9765_v5  ;;  %v9827_v5 = vcombine.low %v2971_v60, %v2974_v19  ;;  %v4616_v0 = vrot.slane %v13851_v48, 5  ;;  %v4619_v60 = vrot.slane %v13854_v43, 5  ;;  %v12255_v19 = vld [vmem:[%s16091_s1 + $0x1e0] sm:$0xff]   ;;  %v12253_v22 = vld [vmem:[%s12546_s26 + $0x78] sm:$0xff]  }
 0x160   : > { %v12264_v38 = vld [vmem:[%s16091_s1 + $0x1f8] sm:$0xff]  }
 0x161   : > { %v4618_v23 = vrot.slane %v4616_v0, 4 }
 0x166   : > { %11004 = vmatmul.mubr.bf16.gmra.mrb[28].mxu0 %v9766_v46  ;;  %v16222_v46 = vld [vmem:[#allocation9_spill] sm:$0xff] }
 0x167   : > { %11023 = vmatprep.mubr.bf16.mxu0 %v9823_v42  ;;  %v16223_v42 = vcombine.low %v16221_v6, %v16222_v46 }
 0x16e   : > { %11024 = vmatmul.mubr.bf16.vlgmr.msra.gmra.mrb[0].mxu0 %v9824_v53  ;;  %v12242_v53 = vld [vmem:[%s12546_s26 + $0x24] sm:$0xff]  }
 0x16f   : > { %11056 = vmatpush3.bf16.msra.mxu0 %v13704_v12  ;;  %11027 = vmatprep.mubr.bf16.mxu0 %v9825_v25  ;;  %v2984_v12 = vrot.slane %v13530_v51, 5  ;;  %v12244_v25 = vld [vmem:[%s12546_s26 + $0x30] sm:$0xff]  }
 0x170   : > { %11057 = vmatprep.subr.bf16.mxu0 %v12234_v15 }
 0x171   : > { %v2986_v58 = vrot.slane %v2984_v12, 4  ;;  %v2985_v51 = vsel %vm12911_vm5, %v9797_v47, %v2984_v12  ;;  %v9919_v12 = vld [vmem:[%s12546_s26 + $0x18] sm:$0xf] }
 0x172   : > { %v3813_v49 = vshll.u32 %v9919_v12, 16 }
 0x173   : > { %11058 = vmatpush3.bf16.msra.mxu0 %v12234_v15  ;;  %v2988_v33 = vsel %vm12911_vm5, %v2986_v58, %v2987_v52  ;;  %v12247_v15 = vld [vmem:[%s12546_s26 + $0x48] sm:$0xff]   ;;  %v12250_v58 = vld [vmem:[%s12546_s26 + $0x60] sm:$0xff]  }
 0x174   : > { %11059 = vmatprep.subr.bf16.mxu0 %v12235_v36  ;;  %v9829_v21 = vcombine.low %v2985_v51, %v2988_v33  ;;  %v9922_v52 = vld [vmem:[%s12546_s26 + $0x24] sm:$0xf]  ;;  %v12258_v51 = vld [vmem:[%s16091_s1 + $0x1e8] sm:$0xff]   ;;  %v3810_v33 = vshrl.u32 %v9919_v12, 16  ;;  %v3815_v46 = vrot.slane %v3813_v49, 5  ;;  %v3861_v49 = vshll.u32 %v9925_v31, 16 }
 0x175   : > { %v3834_v32 = vshrl.u32 %v9922_v52, 16  ;;  %v3837_v59 = vshll.u32 %v9922_v52, 16  ;;  %v12254_v52 = vld [vmem:[%s12546_s26 + $0x84] sm:$0xff]  }
 0x176   : > { %11028 = vmatmul.mubr.bf16.gmra.mrb[4].mxu0 %v9826_v11  ;;  %v12248_v11 = vld [vmem:[%s12546_s26 + $0x54] sm:$0xff]  }
 0x177   : > { %11031 = vmatprep.mubr.bf16.mxu0 %v9827_v5  ;;  %11060 = vmatpush3.bf16.msra.mxu0 %v12235_v36  ;;  %v10028_v36 = vrot.slane %v10012_v17, 9  ;;  %v13865_v5 = vld [vmem:[%s12546_s26 + $0x1c] sm:$0xf]  ;;  %v3836_v28 = vrot.slane %v3834_v32, 4 }
 0x178   : > { %11061 = vmatprep.subr.bf16.mxu0 %v12236_v3  ;;  %v3823_v2 = vshrl.u32 %v13865_v5, 16 }
 0x179   : > { %v13869_v47 = vsel %vm12911_vm5, %v10028_v36, %v4616_v0  ;;  %v13943_v0 = vld [vmem:[%s16091_s1 + $0x200] sm:$0xff]  }
 0x17a   : > { %16242 = vst [vmem:[#allocation5_spill] sm:$0xff] %v13869_v47  ;;  %v3825_v13 = vrot.slane %v3823_v2, 4  ;;  %v12256_v2 = vld [vmem:[%s12546_s26 + $0x90] sm:$0xff]  }
 0x17b   : > { %11062 = vmatpush3.bf16.msra.mxu0 %v12236_v3  ;;  %v13875_v3 = vsel %vm12911_vm5, %v4618_v23, %v4619_v60  ;;  %v13946_v60 = vld [vmem:[%s12546_s26 + $0x34] sm:$0xf]  ;;  %v13952_v23 = vrot.slane %v3829_v9, 5  ;;  %v3863_v9 = vrot.slane %v3861_v49, 5  ;;  %v12263_v47 = vld [vmem:[%s12546_s26 + $0xcc] sm:$0xff]  }
 0x17c   : > { %11063 = vmatprep.subr.bf16.mxu0 %v12237_v41  ;;  %16243 = vst [vmem:[#allocation9_spill] sm:$0xff] %v13875_v3  ;;  %v3867_v62 = vshll.u32 %v13946_v60, 16  ;;  %v14146_v3 = vld [vmem:[%s12546_s26 + $0x64] sm:$0xf] }
 0x17d   : > { %16258 = vst [vmem:[#allocation19_spill] sm:$0xff] %v14146_v3 }
 0x17e   : > { %11032 = vmatmul.mubr.bf16.gmra.mrb[8].mxu0 %v16219_v20  ;;  %v13891_v20 = vld [vmem:[%s12546_s26 + $0x74] sm:$0x1] }
 0x17f   : > { %11035 = vmatprep.mubr.bf16.mxu0 %v9829_v21  ;;  %11064 = vmatpush3.bf16.msra.mxu0 %v12237_v41  ;;  %v3819_v21 = vshll.u32 %v13865_v5, 16  ;;  %v10020_v41 = vld [vmem:[%s12546_s26 + $0xb4] sm:$0xe] }
 0x180   : > { %11065 = vmatprep.subr.bf16.mxu0 %v12238_v14 }
 0x183   : > { %11066 = vmatpush3.bf16.msra.mxu0 %v12238_v14  ;;  %v13888_v14 = vld [vmem:[%s12546_s26 + $0x70] sm:$0xf] }
 0x184   : > { %11067 = vmatprep.subr.bf16.mxu0 %v12239_v4 }
 0x186   : > { %11036 = vmatmul.mubr.bf16.gmra.mrb[12].mxu0 %v16220_v26  ;;  %v12261_v26 = vld [vmem:[%s16091_s1 + $0x1f0] sm:$0xff]  }
 0x187   : > { %11039 = vmatprep.mubr.bf16.mxu0 %v9831_v56  ;;  %11068 = vmatpush3.bf16.msra.mxu0 %v12239_v4  ;;  %v10014_v4 = vld [vmem:[%s12546_s26 + $0x6c] sm:$0xe]  ;;  %v4630_v56 = vrot.slane %v13888_v14, 5 }
 0x188   : > { %11069 = vmatprep.subr.bf16.mxu0 %v12240_v57  ;;  %v10030_v6 = vrot.slane %v10014_v4, 9  ;;  %v3871_v4 = vshrl.u32 %v13946_v60, 16 }
 0x189   : > { %v4632_v39 = vrot.slane %v4630_v56, 4 }
 0x18a   : > { %v13909_v63 = vsel %vm12911_vm5, %v10030_v6, %v4630_v56  ;;  %v13977_v56 = vld [vmem:[%s12546_s26 + $0x40] sm:$0xf]  ;;  %v13982_v6 = vld [vmem:[%s12546_s26 + $0x38] sm:$0x1] }
 0x18b   : > { %11070 = vmatpush3.bf16.msra.mxu0 %v12240_v57  ;;  %v4633_v57 = vrot.slane %v13891_v20, 5  ;;  %16244 = vst [vmem:[#allocation6_spill] sm:$0xff] %v13909_v63 }
 0x18c   : > { %11103 = vmatprep.subr.bf16.mxu0 %v12243_v30 }
 0x18e   : > { %11040 = vmatmul.mubr.bf16.gmra.mrb[16].mxu0 %v16223_v42  ;;  %v13901_v42 = vrot.slane %v3819_v21, 5 }
 0x18f   : > { %11043 = vmatprep.mubr.bf16.mxu0 %v16226_v27  ;;  %v12251_v27 = vld [vmem:[%s12546_s26 + $0x6c] sm:$0xff]  }
 0x190   : > { %v3826_v61 = vor.u32 %v3825_v13, %v13901_v42  ;;  %v13988_v13 = vld [vmem:[%s12546_s26 + $0x98] sm:$0x1] }
 0x192   : > { %v13950_v12 = vrot.slane %v3826_v61, 4 }
 0x196   : > { %11044 = vmatmul.mubr.bf16.gmra.mrb[20].mxu0 %v16229_v10  ;;  %v3839_v10 = vrot.slane %v3837_v59, 5 }
 0x197   : > { %11047 = vmatprep.mubr.bf16.mxu0 %v16232_v37  ;;  %v13913_v37 = vld [vmem:[%s12546_s26 + $0x2c] sm:$0x1] }
 0x19e   : > { %11048 = vmatmul.mubr.bf16.gmra.mrb[24].mxu0 %v16235_v16  ;;  %v13919_v16 = vsel %vm12911_vm5, %v4632_v39, %v4633_v57  ;;  %v13991_v39 = vld [vmem:[%s12546_s26 + $0xa0] sm:$0xf] }
 0x19f   : > { %11051 = vmatprep.mubr.bf16.mxu0 %v16238_v54  ;;  %16245 = vst [vmem:[#allocation7_spill] sm:$0xff] %v13919_v16  ;;  %v10019_v54 = vld [vmem:[%s12546_s26 + $0xa8] sm:$0xe] }
 0x1a6   : > { %11052 = vmatmul.mubr.bf16.gmra.mrb[28].mxu0 %v16241_v45  ;;  %v3840_v45 = vor.u32 %v3839_v10, %v3836_v28  ;;  %v10017_v28 = vld [vmem:[%s12546_s26 + $0x90] sm:$0xe] }
 0x1a7   : > { %11071 = vmatprep.mubr.bf16.mxu0 %v12241_v44 }
 0x1ae   : > { %11072 = vmatmul.mubr.bf16.vlgmr.msra.gmra.mrb[0].mxu0 %v12242_v53  ;;  %v3853_v53 = vshll.u32 %v13913_v37, 16 }
 0x1af   : > { %11104 = vmatpush3.bf16.msra.mxu0 %v12243_v30  ;;  %11075 = vmatprep.mubr.bf16.mxu0 %v12244_v25  ;;  %v3812_v30 = vrot.slane %v3810_v33, 4  ;;  %v13931_v25 = vld [vmem:[%s12546_s26 + $0x88] sm:$0xf] }
 0x1b0   : > { %11105 = vmatprep.subr.bf16.mxu0 %v12246_v8  ;;  %v13958_v33 = vrot.slane %v3853_v53, 5 }
 0x1b1   : > { %v3816_v44 = vor.u32 %v3815_v46, %v3812_v30  ;;  %v13985_v46 = vld [vmem:[%s12546_s26 + $0x94] sm:$0xf]  ;;  %v14063_v30 = vld [vmem:[%s12546_s26 + $0xbc] sm:$0x1] }
 0x1b2   : > { %v4651_v10 = vrot.slane %v13985_v46, 5 }
 0x1b3   : > { %11106 = vmatpush3.bf16.msra.mxu0 %v12246_v8  ;;  %v13934_v8 = vld [vmem:[%s12546_s26 + $0x8c] sm:$0x1]  ;;  %v13948_v36 = vrot.slane %v3816_v44, 4  ;;  %v4658_v44 = vrot.slane %v13991_v39, 5 }
 0x1b4   : > { %11107 = vmatprep.subr.bf16.mxu0 %v12249_v29  ;;  %v4647_v17 = vrot.slane %v13934_v8, 5  ;;  %v4653_v53 = vrot.slane %v4651_v10, 4 }
 0x1b6   : > { %11076 = vmatmul.mubr.bf16.gmra.mrb[4].mxu0 %v12245_v34  ;;  %v3858_v34 = vshrl.u32 %v9925_v31, 16  ;;  %v10018_v31 = vld [vmem:[%s12546_s26 + $0x9c] sm:$0xe] }
 0x1b7   : > { %11079 = vmatprep.mubr.bf16.mxu0 %v12247_v15  ;;  %11108 = vmatpush3.bf16.msra.mxu0 %v12249_v29  ;;  %v3850_v29 = vor.u32 %v3849_v7, %v13915_v35  ;;  %v10016_v15 = vld [vmem:[%s12546_s26 + $0x84] sm:$0xe]  ;;  %v3891_v7 = vshll.u32 %v13977_v56, 16 }
 0x1b8   : > { %11109 = vmatprep.subr.bf16.mxu0 %v12252_v50  ;;  %v13967_v59 = vrot.slane %v3858_v34, 4  ;;  %v3873_v34 = vrot.slane %v3871_v4, 4 }
 0x1b9   : > { %v13965_v32 = vrot.slane %v3850_v29, 4  ;;  %v10034_v29 = vrot.slane %v10018_v31, 9  ;;  %v14039_v31 = vld [vmem:[%s12546_s26 + $0x4c] sm:$0xf] }
 0x1bb   : > { %11110 = vmatpush3.bf16.msra.mxu0 %v12252_v50  ;;  %v4644_v50 = vrot.slane %v13931_v25, 5 }
 0x1bc   : > { %11111 = vmatprep.subr.bf16.mxu0 %v12255_v19 }
 0x1be   : > { %11080 = vmatmul.mubr.bf16.gmra.mrb[8].mxu0 %v12248_v11  ;;  %v9928_v11 = vld [vmem:[%s12546_s26 + $0x3c] sm:$0xf] }
 0x1bf   : > { %11083 = vmatprep.mubr.bf16.mxu0 %v12250_v58  ;;  %11112 = vmatpush3.bf16.msra.mxu0 %v12255_v19  ;;  %v10032_v19 = vrot.slane %v10016_v15, 9  ;;  %v4646_v58 = vrot.slane %v4644_v50, 4  ;;  %v3882_v57 = vshrl.u32 %v9928_v11, 16  ;;  %v14006_v15 = vld [vmem:[%s12546_s26 + $0x44] sm:$0x1] }
 0x1c0   : > { %11113 = vmatprep.subr.bf16.mxu0 %v12258_v51  ;;  %16248 = vst [vmem:[#allocation11_spill] sm:$0xff] %v14006_v15 }
 0x1c1   : > { %v13962_v21 = vsel %vm12911_vm5, %v10032_v19, %v4644_v50  ;;  %v13972_v24 = vsel %vm12911_vm5, %v4646_v58, %v4647_v17  ;;  %v9931_v50 = vld [vmem:[%s12546_s26 + $0x48] sm:$0xf]  ;;  %v4660_v19 = vrot.slane %v4658_v44, 4  ;;  %v3877_v58 = vshll.u32 %v13982_v6, 16 }
 0x1c2   : > { %16246 = vst [vmem:[#allocation8_spill] sm:$0xff] %v13962_v21  ;;  %16247 = vst [vmem:[#allocation10_spill] sm:$0xff] %v13972_v24 }
 0x1c3   : > { %11114 = vmatpush3.bf16.msra.mxu0 %v12258_v51  ;;  %v13956_v51 = vrot.slane %v3840_v45, 4  ;;  %v14003_v45 = vrot.slane %v3867_v62, 5  ;;  %v12259_v62 = vld [vmem:[%s12546_s26 + $0xa8] sm:$0xff]  }
 0x1c4   : > { %11115 = vmatprep.subr.bf16.mxu0 %v12261_v26 }
 0x1c6   : > { %11084 = vmatmul.mubr.bf16.gmra.mrb[12].mxu0 %v12251_v27  ;;  %v13994_v27 = vld [vmem:[%s12546_s26 + $0xa4] sm:$0x1] }
 0x1c7   : > { %11087 = vmatprep.mubr.bf16.mxu0 %v12253_v22  ;;  %11116 = vmatpush3.bf16.msra.mxu0 %v12261_v26  ;;  %v3885_v26 = vshll.u32 %v9928_v11, 16  ;;  %v4654_v22 = vrot.slane %v13988_v13, 5  ;;  %v4661_v61 = vrot.slane %v13994_v27, 5  ;;  %v12257_v11 = vld [vmem:[%s12546_s26 + $0x9c] sm:$0xff]  }
 0x1c8   : > { %11117 = vmatprep.subr.bf16.mxu0 %v12264_v38 }
 0x1c9   : > { %v14019_v49 = vsel %vm12911_vm5, %v4653_v53, %v4654_v22  ;;  %v14026_v4 = vrot.slane %v3885_v26, 5  ;;  %v3895_v22 = vshrl.u32 %v13977_v56, 16  ;;  %v3864_v53 = vor.u32 %v3863_v9, %v13967_v59 }
 0x1ca   : > { %16250 = vst [vmem:[#allocation3_spill] sm:$0xff] %v14019_v49  ;;  %v3832_v26 = vsel %vm12578_vm2, %v13950_v12, %v13952_v23  ;;  %v3909_v59 = vshll.u32 %v9931_v50, 16  ;;  %v10035_v9 = vrot.slane %v10019_v54, 9  ;;  %v3915_v12 = vshll.u32 %v14039_v31, 16 }
 0x1cb   : > { %11118 = vmatpush3.bf16.msra.mxu0 %v12264_v38  ;;  %v10033_v38 = vrot.slane %v10017_v28, 9  ;;  %v14028_v28 = vrot.slane %v3891_v7, 5  ;;  %v3822_v7 = vsel %vm12578_vm2, %v13948_v36, %v13901_v42  ;;  %v3919_v23 = vshrl.u32 %v14039_v31, 16 }
 0x1cc   : > { %11151 = vmatprep.subr.bf16.mxu0 %v13943_v0  ;;  %v14073_v49 = vrot.slane %v3864_v53, 4  ;;  %v3897_v21 = vrot.slane %v3895_v22, 4 }
 0x1cd   : > { %v14011_v17 = vsel %vm12911_vm5, %v10033_v38, %v4651_v10  ;;  %v14034_v10 = vsel %vm12911_vm5, %v4660_v19, %v4661_v61  ;;  %v3901_v38 = vshll.u32 %v14006_v15, 16  ;;  %v14049_v61 = vld [vmem:[%s12546_s26 + $0xac] sm:$0xf]  ;;  %v14055_v19 = vld [vmem:[%s12546_s26 + $0xb8] sm:$0xf]  ;;  %v3939_v15 = vshll.u32 %v13851_v48, 16 }
 0x1ce   : > { %11088 = vmatmul.mubr.bf16.gmra.mrb[16].mxu0 %v12254_v52  ;;  %16249 = vst [vmem:[#allocation4_spill] sm:$0xff] %v14011_v17  ;;  %v14015_v52 = vrot.slane %v3882_v57, 4  ;;  %16252 = vst [vmem:[#allocation13_spill] sm:$0xff] %v14034_v10  ;;  %v3874_v57 = vor.u32 %v3873_v34, %v14003_v45  ;;  %v4665_v42 = vrot.slane %v14049_v61, 5  ;;  %v4675_v10 = vrot.slane %v14063_v30, 5 }
 0x1cf   : > { %11091 = vmatprep.mubr.bf16.mxu0 %v12256_v2  ;;  %v14023_v2 = vsel %vm12911_vm5, %v10034_v29, %v4658_v44  ;;  %v3906_v44 = vshrl.u32 %v9931_v50, 16  ;;  %v14052_v29 = vld [vmem:[%s12546_s26 + $0xb0] sm:$0x1]  ;;  %v14075_v17 = vrot.slane %v3877_v58, 5  ;;  %v12262_v58 = vld [vmem:[%s12546_s26 + $0xc0] sm:$0xff]   ;;  %v14093_v53 = vrot.slane %v3901_v38, 5 }
 0x1d0   : > { %16251 = vst [vmem:[#allocation12_spill] sm:$0xff] %v14023_v2  ;;  %v4668_v36 = vrot.slane %v14052_v29, 5  ;;  %v4667_v34 = vrot.slane %v4665_v42, 4  ;;  %v10036_v2 = vrot.slane %v10020_v41, 9  ;;  %v14079_v54 = vsel %vm12911_vm5, %v10035_v9, %v4665_v42  ;;  %v9934_v9 = vld [vmem:[%s12546_s26 + $0x54] sm:$0xf] }
 0x1d1   : > { %16253 = vst [vmem:[#allocation14_spill] sm:$0xff] %v14079_v54  ;;  %v14082_v24 = vrot.slane %v3874_v57, 4  ;;  %v3908_v42 = vrot.slane %v3906_v44, 4  ;;  %v9983_v44 = vcombine.low %v3822_v7, %v3832_v26  ;;  %v3846_v57 = vsel %vm12578_vm2, %v13956_v51, %v13915_v35  ;;  %v14134_v26 = vld [vmem:[%s12546_s26 + $0xd4] sm:$0x1] }
 0x1d2   : > { %v14086_v16 = vsel %vm12911_vm5, %v4667_v34, %v4668_v36  ;;  %v14103_v36 = vld [vmem:[%s12546_s26 + $0x50] sm:$0x1]  ;;  %v3921_v34 = vrot.slane %v3919_v23, 4  ;;  %v14123_v23 = vld [vmem:[%s12546_s26 + $0xc8] sm:$0x1]  ;;  %v3870_v35 = vsel %vm12578_vm2, %v14073_v49, %v14003_v45  ;;  %v3898_v51 = vor.u32 %v3897_v21, %v14028_v28 }
 0x1d3   : > { %16254 = vst [vmem:[#allocation15_spill] sm:$0xff] %v14086_v16  ;;  %16257 = vst [vmem:[#allocation18_spill] sm:$0xff] %v14103_v36  ;;  %v3925_v21 = vshll.u32 %v14103_v36, 16  ;;  %v9937_v49 = vld [vmem:[%s12546_s26 + $0x60] sm:$0xf]  ;;  %v3933_v63 = vshll.u32 %v9934_v9, 16 }
 0x1d6   : > { %11092 = vmatmul.mubr.bf16.gmra.mrb[20].mxu0 %v12257_v11  ;;  %v4672_v11 = vrot.slane %v14055_v19, 5 }
 0x1d7   : > { %11095 = vmatprep.mubr.bf16.mxu0 %v12259_v62  ;;  %v12260_v62 = vld [vmem:[%s12546_s26 + $0xb4] sm:$0xff]  }
 0x1d8   : > { %v4674_v50 = vrot.slane %v4672_v11, 4  ;;  %v14090_v41 = vsel %vm12911_vm5, %v10036_v2, %v4672_v11  ;;  %v3911_v2 = vrot.slane %v3909_v59, 5  ;;  %v14105_v11 = vrot.slane %v3915_v12, 5  ;;  %v14120_v12 = vld [vmem:[%s12546_s26 + $0xc4] sm:$0xf]  ;;  %v16281_v55 = vld [vmem:[#allocation14_spill] sm:$0xff] }
 0x1d9   : > { %16255 = vst [vmem:[#allocation16_spill] sm:$0xff] %v14090_v41  ;;  %v3888_v59 = vor.u32 %v14026_v4, %v14015_v52  ;;  %v4682_v52 = vrot.slane %v14123_v23, 5  ;;  %v3930_v4 = vshrl.u32 %v9934_v9, 16 }
 0x1da   : > { %v14100_v22 = vsel %vm12911_vm5, %v4674_v50, %v4675_v10  ;;  %v3856_v10 = vsel %vm12578_vm2, %v13965_v32, %v13958_v33  ;;  %v14126_v50 = vld [vmem:[%s12546_s26 + $0xd0] sm:$0xf]  ;;  %v10021_v33 = vld [vmem:[%s12546_s26 + $0xc0] sm:$0xe]  ;;  %v4679_v32 = vrot.slane %v14120_v12, 5  ;;  %v3912_v45 = vor.u32 %v3911_v2, %v3908_v42 }
 0x1db   : > { %16256 = vst [vmem:[#allocation17_spill] sm:$0xff] %v14100_v22  ;;  %v10037_v7 = vrot.slane %v10021_v33, 9  ;;  %v4686_v38 = vrot.slane %v14126_v50, 5  ;;  %v4689_v22 = vrot.slane %v14134_v26, 5  ;;  %v3922_v54 = vor.u32 %v3921_v34, %v14105_v11 }
 0x1dc   : > { %v4681_v41 = vrot.slane %v4679_v32, 4  ;;  %v3943_v42 = vshrl.u32 %v13851_v48, 16  ;;  %v3954_v34 = vshrl.u32 %v9937_v49, 16  ;;  %v3880_v48 = vsel %vm12578_vm2, %v14082_v24, %v14075_v17 }
 0x1dd   : > { %v4688_v33 = vrot.slane %v4686_v38, 4  ;;  %v3935_v24 = vrot.slane %v3933_v63, 5  ;;  %v14184_v17 = vrot.slane %v3939_v15, 5  ;;  %v3987_v15 = vshll.u32 %v13888_v14, 16 }
 0x1de   : > { %11096 = vmatmul.mubr.bf16.gmra.mrb[24].mxu0 %v12260_v62  ;;  %v10022_v62 = vld [vmem:[%s12546_s26 + $0xcc] sm:$0xe]  ;;  %v14157_v2 = vsel %vm12911_vm5, %v4681_v41, %v4682_v52  ;;  %v14173_v41 = vrot.slane %v3888_v59, 4  ;;  %v3963_v52 = vshll.u32 %v14146_v3, 16  ;;  %v3945_v59 = vrot.slane %v3943_v42, 4 }
 0x1df   : > { %11099 = vmatprep.mubr.bf16.mxu0 %v12262_v58  ;;  %v10038_v16 = vrot.slane %v10022_v62, 9  ;;  %v14150_v58 = vsel %vm12911_vm5, %v10037_v7, %v4679_v32  ;;  %16260 = vst [vmem:[#allocation21_spill] sm:$0xff] %v14157_v2  ;;  %v3957_v62 = vshll.u32 %v9937_v49, 16  ;;  %v14167_v7 = vsel %vm12911_vm5, %v4688_v33, %v4689_v22  ;;  %v9940_v33 = vld [vmem:[%s12546_s26 + $0x6c] sm:$0xf] }
 0x1e0   : > { %16259 = vst [vmem:[#allocation20_spill] sm:$0xff] %v14150_v58  ;;  %16262 = vst [vmem:[#allocation23_spill] sm:$0xff] %v14167_v7  ;;  %v14180_v49 = vrot.slane %v3925_v21, 5  ;;  %v3932_v32 = vrot.slane %v3930_v4, 4  ;;  %v3967_v22 = vshrl.u32 %v14146_v3, 16  ;;  %v3913_v2 = vrot.slane %v3912_v45, 4 }
 0x1e1   : > { %v14161_v9 = vsel %vm12911_vm5, %v10038_v16, %v4686_v38  ;;  %v14178_v38 = vrot.slane %v3898_v51, 4  ;;  %v3923_v58 = vrot.slane %v3922_v54, 4  ;;  %v3949_v16 = vshll.u32 %v13854_v43, 16  ;;  %v14188_v4 = vld [vmem:[%s12546_s26 + $0x68] sm:$0x1] }
 0x1e2   : > { %16261 = vst [vmem:[#allocation22_spill] sm:$0xff] %v14161_v9  ;;  %v3956_v51 = vrot.slane %v3954_v34, 4  ;;  %v3959_v7 = vrot.slane %v3957_v62, 5  ;;  %v9984_v21 = vcombine.low %v3846_v57, %v3856_v10  ;;  %v9985_v9 = vcombine.low %v3870_v35, %v3880_v48  ;;  %v14206_v34 = vld [vmem:[%s12546_s26 + $0x7c] sm:$0xf] }
 0x1e3   : > { %v14190_v3 = vrot.slane %v3963_v52, 5  ;;  %v3978_v36 = vshrl.u32 %v9940_v33, 16  ;;  %v3969_v45 = vrot.slane %v3967_v22, 4  ;;  %v3981_v63 = vshll.u32 %v9940_v33, 16  ;;  %v9946_v33 = vld [vmem:[%s12546_s26 + $0x84] sm:$0xf] }
 0x1e4   : > { %v3894_v43 = vsel %vm12578_vm2, %v14173_v41, %v14028_v28  ;;  %v3904_v54 = vsel %vm12578_vm2, %v14178_v38, %v14093_v53  ;;  %v3936_v57 = vor.u32 %v3935_v24, %v3932_v32  ;;  %v3946_v10 = vor.u32 %v3945_v59, %v14184_v17  ;;  %v12266_v28 = vld [vmem:[%s16091_s1 + $0x208] sm:$0xff]  }
 0x1e5   : > { %v3960_v35 = vor.u32 %v3959_v7, %v3956_v51  ;;  %v3973_v42 = vshll.u32 %v14188_v4, 16  ;;  %v3918_v48 = vsel %vm12578_vm2, %v3913_v2, %v14105_v11  ;;  %v3928_v53 = vsel %vm12578_vm2, %v3923_v58, %v14180_v49  ;;  %v12267_v49 = vld [vmem:[%s16091_s1 + $0x210] sm:$0xff]  }
 0x1e6   : > { %11100 = vmatmul.mubr.bf16.gmra.mrb[28].mxu0 %v12263_v47  ;;  %v9943_v47 = vld [vmem:[%s12546_s26 + $0x78] sm:$0xf]  ;;  %v14217_v32 = vrot.slane %v3949_v16, 5  ;;  %v3980_v7 = vrot.slane %v3978_v36, 4  ;;  %v3970_v41 = vor.u32 %v3969_v45, %v14190_v3  ;;  %v3983_v52 = vrot.slane %v3981_v63, 5 }
 0x1e7   : > { %11119 = vmatprep.mubr.bf16.mxu0 %v9983_v44  ;;  %v3991_v44 = vshrl.u32 %v13888_v14, 16  ;;  %v4002_v14 = vshrl.u32 %v9943_v47, 16  ;;  %v4005_v62 = vshll.u32 %v9943_v47, 16  ;;  %v14220_v38 = vrot.slane %v3987_v15, 5 }
 0x1e8   : > { %v3937_v24 = vrot.slane %v3936_v57, 4  ;;  %v3947_v59 = vrot.slane %v3946_v10, 4  ;;  %v4011_v51 = vshll.u32 %v14206_v34, 16  ;;  %v4015_v11 = vshrl.u32 %v14206_v34, 16 }
 0x1e9   : > { %v3993_v22 = vrot.slane %v3991_v44, 4  ;;  %v3961_v58 = vrot.slane %v3960_v35, 4  ;;  %v3975_v2 = vrot.slane %v3973_v42, 5  ;;  %v4004_v36 = vrot.slane %v4002_v14, 4 }
 0x1ea   : > { %v4007_v16 = vrot.slane %v4005_v62, 5  ;;  %v4026_v47 = vshrl.u32 %v9946_v33, 16  ;;  %v4035_v45 = vshll.u32 %v13931_v25, 16  ;;  %v4039_v63 = vshrl.u32 %v13931_v25, 16 }
 0x1eb   : > { %v3971_v15 = vrot.slane %v3970_v41, 4  ;;  %v3997_v44 = vshll.u32 %v13891_v20, 16  ;;  %v9986_v57 = vcombine.low %v3894_v43, %v3904_v54  ;;  %v9987_v10 = vcombine.low %v3918_v48, %v3928_v53  ;;  %v9949_v43 = vld [vmem:[%s12546_s26 + $0x90] sm:$0xf]  ;;  %v12268_v54 = vld [vmem:[%s16091_s1 + $0x218] sm:$0xff]  }
 0x1ec   : > { %v14233_v35 = vrot.slane %v4011_v51, 5  ;;  %v4017_v42 = vrot.slane %v4015_v11, 4  ;;  %v3942_v14 = vsel %vm12578_vm2, %v3937_v24, %v14184_v17  ;;  %v3952_v25 = vsel %vm12578_vm2, %v3947_v59, %v14217_v32 }
 0x1ed   : > { %v3966_v62 = vsel %vm12578_vm2, %v3961_v58, %v14190_v3  ;;  %v4008_v20 = vor.u32 %v4007_v16, %v4004_v36  ;;  %v14251_v17 = vrot.slane %v4035_v45, 5  ;;  %v4041_v53 = vrot.slane %v4039_v63, 4 }
 0x1ee   : > { %11120 = vmatmul.mubr.bf16.vlgmr.msra.gmra.mrb[0].mxu0 %v9984_v21  ;;  %v4029_v21 = vshll.u32 %v9946_v33, 16  ;;  %v3976_v32 = vsel %vm12578_vm2, %v3971_v15, %v3975_v2  ;;  %v3999_v3 = vrot.slane %v3997_v44, 5  ;;  %v4050_v24 = vshrl.u32 %v9949_v43, 16 }
 0x1ef   : > { %11152 = vmatpush3.bf16.msra.mxu0 %v13943_v0  ;;  %11123 = vmatprep.mubr.bf16.mxu0 %v9985_v9  ;;  %v3984_v0 = vor.u32 %v3983_v52, %v3980_v7  ;;  %v3994_v9 = vor.u32 %v3993_v22, %v14220_v38  ;;  %v14245_v7 = vld [vmem:[%s12546_s26 + $0x80] sm:$0x1]  ;;  %v4018_v22 = vor.u32 %v4017_v42, %v14233_v35  ;;  %v4053_v59 = vshll.u32 %v9949_v43, 16  ;;  %v12270_v43 = vld [vmem:[%s16091_s1 + $0x228] sm:$0xff]  }
 0x1f0   : > { %11153 = vmatprep.subr.bf16.mxu0 %v12266_v28  ;;  %v4031_v48 = vrot.slane %v4029_v21, 5  ;;  %v4021_v33 = vshll.u32 %v14245_v7, 16  ;;  %v4059_v51 = vshll.u32 %v13985_v46, 16  ;;  %v4063_v11 = vshrl.u32 %v13985_v46, 16  ;;  %v9952_v21 = vld [vmem:[%s12546_s26 + $0x9c] sm:$0xf] }
 0x1f1   : > { %v3985_v41 = vrot.slane %v3984_v0, 4  ;;  %v3995_v52 = vrot.slane %v3994_v9, 4  ;;  %v4009_v58 = vrot.slane %v4008_v20, 4  ;;  %v4042_v36 = vor.u32 %v4041_v53, %v14251_v17 }
 0x1f2   : > { %v4045_v16 = vshll.u32 %v13934_v8, 16  ;;  %v9988_v45 = vcombine.low %v3942_v14, %v3952_v25  ;;  %v9989_v63 = vcombine.low %v3966_v62, %v3976_v32  ;;  %v4019_v15 = vrot.slane %v4018_v22, 4 }
 0x1f3   : > { %11154 = vmatpush3.bf16.msra.mxu0 %v12266_v28  ;;  %v4028_v28 = vrot.slane %v4026_v47, 4  ;;  %v12269_v47 = vld [vmem:[%s16091_s1 + $0x220] sm:$0xff]   ;;  %v4000_v46 = vsel %vm12578_vm2, %v3995_v52, %v3999_v3  ;;  %v4023_v0 = vrot.slane %v4021_v33, 5  ;;  %v4052_v9 = vrot.slane %v4050_v24, 4 }
 0x1f4   : > { %11155 = vmatprep.subr.bf16.mxu0 %v12267_v49  ;;  %v4055_v44 = vrot.slane %v4053_v59, 5  ;;  %v14271_v8 = vrot.slane %v4059_v51, 5  ;;  %v4074_v42 = vshrl.u32 %v9952_v21, 16  ;;  %v4077_v20 = vshll.u32 %v9952_v21, 16 }
 0x1f5   : > { %v4032_v2 = vor.u32 %v4031_v48, %v4028_v28  ;;  %v4014_v14 = vsel %vm12578_vm2, %v4009_v58, %v14233_v35  ;;  %v4047_v62 = vrot.slane %v4045_v16, 5  ;;  %v4083_v28 = vshll.u32 %v13991_v39, 16 }
 0x1f6   : > { %11124 = vmatmul.mubr.bf16.gmra.mrb[4].mxu0 %v9986_v57  ;;  %v9955_v57 = vld [vmem:[%s12546_s26 + $0xa8] sm:$0xf]  ;;  %v4024_v32 = vsel %vm12578_vm2, %v4019_v15, %v4023_v0  ;;  %v4069_v35 = vshll.u32 %v13988_v13, 16  ;;  %v4111_v52 = vshrl.u32 %v14049_v61, 16  ;;  %v4056_v3 = vor.u32 %v4055_v44, %v4052_v9  ;;  %v12272_v0 = vld [vmem:[%s16091_s1 + $0x238] sm:$0xff]  }
 0x1f7   : > { %11127 = vmatprep.mubr.bf16.mxu0 %v9987_v10  ;;  %11156 = vmatpush3.bf16.msra.mxu0 %v12267_v49  ;;  %v3990_v49 = vsel %vm12578_vm2, %v3985_v41, %v14220_v38  ;;  %v4065_v10 = vrot.slane %v4063_v11, 4  ;;  %v4033_v25 = vrot.slane %v4032_v2, 4  ;;  %v4043_v38 = vrot.slane %v4042_v36, 4 }
 0x1f8   : > { %11157 = vmatprep.subr.bf16.mxu0 %v12268_v54  ;;  %v4098_v48 = vshrl.u32 %v9955_v57, 16  ;;  %v4101_v53 = vshll.u32 %v9955_v57, 16  ;;  %v4107_v41 = vshll.u32 %v14049_v61, 16  ;;  %v4076_v33 = vrot.slane %v4074_v42, 4  ;;  %v12271_v61 = vld [vmem:[%s16091_s1 + $0x230] sm:$0xff]  }
 0x1f9   : > { %v4066_v22 = vor.u32 %v4065_v10, %v14271_v8  ;;  %v9990_v24 = vcombine.low %v3990_v49, %v4000_v46  ;;  %v4038_v59 = vsel %vm12578_vm2, %v4033_v25, %v14251_v17  ;;  %v4048_v13 = vsel %vm12578_vm2, %v4043_v38, %v4047_v62  ;;  %v9958_v17 = vld [vmem:[%s12546_s26 + $0xb4] sm:$0xf]  ;;  %v9961_v42 = vld [vmem:[%s12546_s26 + $0xc0] sm:$0xf] }
 0x1fa   : > { %v14295_v51 = vrot.slane %v4083_v28, 5  ;;  %v4100_v58 = vrot.slane %v4098_v48, 4  ;;  %v4103_v2 = vrot.slane %v4101_v53, 5  ;;  %v9991_v36 = vcombine.low %v4014_v14, %v4024_v32 }
 0x1fb   : > { %11158 = vmatpush3.bf16.msra.mxu0 %v12268_v54  ;;  %v4087_v54 = vshrl.u32 %v13991_v39, 16  ;;  %v4079_v39 = vrot.slane %v4077_v20, 5  ;;  %v4071_v16 = vrot.slane %v4069_v35, 5  ;;  %v4113_v21 = vrot.slane %v4111_v52, 4 }
 0x1fc   : > { %11159 = vmatprep.subr.bf16.mxu0 %v12269_v47  ;;  %v4093_v46 = vshll.u32 %v13994_v27, 16  ;;  %v9992_v15 = vcombine.low %v4038_v59, %v4048_v13  ;;  %v4104_v44 = vor.u32 %v4103_v2, %v4100_v58  ;;  %v4117_v57 = vshll.u32 %v14052_v29, 16 }
 0x1fd   : > { %v4089_v11 = vrot.slane %v4087_v54, 4  ;;  %v4080_v49 = vor.u32 %v4079_v39, %v4076_v33  ;;  %v4122_v10 = vshrl.u32 %v9958_v17, 16  ;;  %v4125_v14 = vshll.u32 %v9958_v17, 16 }
 0x1fe   : > { %11128 = vmatmul.mubr.bf16.gmra.mrb[8].mxu0 %v9988_v45  ;;  %v4057_v45 = vrot.slane %v4056_v3, 4  ;;  %v4131_v27 = vshll.u32 %v14055_v19, 16  ;;  %v4135_v25 = vshrl.u32 %v14055_v19, 16  ;;  %v4095_v29 = vrot.slane %v4093_v46, 5 }
 0x1ff   : > { %11131 = vmatprep.mubr.bf16.mxu0 %v9989_v63  ;;  %11160 = vmatpush3.bf16.msra.mxu0 %v12269_v47  ;;  %v14297_v47 = vrot.slane %v4107_v41, 5  ;;  %v4067_v63 = vrot.slane %v4066_v22, 4  ;;  %v4090_v9 = vor.u32 %v4089_v11, %v14295_v51  ;;  %v4146_v28 = vshrl.u32 %v9961_v42, 16 }
 0x200   : > { %11161 = vmatprep.subr.bf16.mxu0 %v12270_v43  ;;  %v4062_v38 = vsel %vm12578_vm2, %v4057_v45, %v14271_v8  ;;  %v4149_v54 = vshll.u32 %v9961_v42, 16  ;;  %v4155_v48 = vshll.u32 %v14120_v12, 16  ;;  %v4159_v53 = vshrl.u32 %v14120_v12, 16 }
 0x201   : > { %v4114_v20 = vor.u32 %v4113_v21, %v14297_v47  ;;  %v4072_v62 = vsel %vm12578_vm2, %v4067_v63, %v4071_v16  ;;  %v4091_v19 = vrot.slane %v4090_v9, 4  ;;  %v4105_v32 = vrot.slane %v4104_v44, 4 }
 0x202   : > { %v4119_v35 = vrot.slane %v4117_v57, 5  ;;  %v4124_v41 = vrot.slane %v4122_v10, 4  ;;  %v4127_v8 = vrot.slane %v4125_v14, 5  ;;  %v4133_v3 = vrot.slane %v4131_v27, 5 }
 0x203   : > { %11162 = vmatpush3.bf16.msra.mxu0 %v12270_v43  ;;  %v4081_v43 = vrot.slane %v4080_v49, 4  ;;  %v4115_v52 = vrot.slane %v4114_v20, 4  ;;  %v4137_v22 = vrot.slane %v4135_v25, 4  ;;  %v9993_v33 = vcombine.low %v4062_v38, %v4072_v62 }
 0x204   : > { %11163 = vmatprep.subr.bf16.mxu0 %v12271_v61  ;;  %v4148_v39 = vrot.slane %v4146_v28, 4  ;;  %v4157_v59 = vrot.slane %v4155_v48, 5  ;;  %v4161_v13 = vrot.slane %v4159_v53, 4  ;;  %v4096_v11 = vsel %vm12578_vm2, %v4091_v19, %v4095_v29  ;;  %v10007_v48 = vld [vmem:[%s12546_s26 + $0x18] sm:$0xe] }
 0x205   : > { %v4086_v12 = vsel %vm12578_vm2, %v4081_v43, %v14295_v51  ;;  %v4141_v58 = vshll.u32 %v14063_v30, 16  ;;  %v4110_v2 = vsel %vm12578_vm2, %v4105_v32, %v14297_v47  ;;  %v4128_v16 = vor.u32 %v4127_v8, %v4124_v41 }
 0x206   : > { %11132 = vmatmul.mubr.bf16.gmra.mrb[12].mxu0 %v9990_v24  ;;  %v4151_v24 = vrot.slane %v4149_v54, 5  ;;  %v4138_v21 = vor.u32 %v4137_v22, %v4133_v3  ;;  %v4179_v51 = vshll.u32 %v14126_v50, 16  ;;  %v4183_v63 = vshrl.u32 %v14126_v50, 16 }
 0x207   : > { %11135 = vmatprep.mubr.bf16.mxu0 %v9991_v36  ;;  %11164 = vmatpush3.bf16.msra.mxu0 %v12271_v61  ;;  %v9964_v61 = vld [vmem:[%s12546_s26 + $0xcc] sm:$0xf]  ;;  %v4120_v36 = vsel %vm12578_vm2, %v4115_v52, %v4119_v35  ;;  %v4162_v46 = vor.u32 %v4161_v13, %v4157_v59  ;;  %v4165_v30 = vshll.u32 %v14123_v23, 16  ;;  %v4129_v9 = vrot.slane %v4128_v16, 4 }
 0x208   : > { %11165 = vmatprep.subr.bf16.mxu0 %v12272_v0  ;;  %v4170_v17 = vshrl.u32 %v9964_v61, 16  ;;  %v4173_v45 = vshll.u32 %v9964_v61, 16  ;;  %v4152_v49 = vor.u32 %v4151_v24, %v4148_v39  ;;  %v4139_v47 = vrot.slane %v4138_v21, 4  ;;  %v10008_v24 = vld [vmem:[%s12546_s26 + $0x24] sm:$0xe] }
 0x209   : > { %v4143_v44 = vrot.slane %v4141_v58, 5  ;;  %v4181_v42 = vrot.slane %v4179_v51, 5  ;;  %v4185_v20 = vrot.slane %v4183_v63, 4  ;;  %v4163_v27 = vrot.slane %v4162_v46, 4 }
 0x20a   : > { %v4172_v57 = vrot.slane %v4170_v17, 4  ;;  %v4175_v10 = vrot.slane %v4173_v45, 5  ;;  %v4153_v14 = vrot.slane %v4152_v49, 4  ;;  %v4167_v25 = vrot.slane %v4165_v30, 5  ;;  %v10010_v45 = vld [vmem:[%s12546_s26 + $0x3c] sm:$0xe] }
 0x20b   : > { %11166 = vmatpush3.bf16.msra.mxu0 %v12272_v0  ;;  %v9995_v0 = vcombine.low %v4110_v2, %v4120_v36  ;;  %v4134_v50 = vsel %vm12578_vm2, %v4129_v9, %v4133_v3  ;;  %v4144_v23 = vsel %vm12578_vm2, %v4139_v47, %v4143_v44  ;;  %v4186_v62 = vor.u32 %v4185_v20, %v4181_v42  ;;  %v16265_v20 = vld [vmem:[#allocation19_spill] sm:$0xff] }
 0x20c   : > { %v4176_v38 = vor.u32 %v4175_v10, %v4172_v57  ;;  %v4189_v43 = vshll.u32 %v14134_v26, 16  ;;  %v4158_v29 = vsel %vm12578_vm2, %v4153_v14, %v4157_v59  ;;  %v4168_v28 = vsel %vm12578_vm2, %v4163_v27, %v4167_v25  ;;  %v10013_v27 = vld [vmem:[%s12546_s26 + $0x60] sm:$0xe] }
 0x20d   : > { %v4581_v54 = vrot.slane %v13865_v5, 5  ;;  %v9996_v53 = vcombine.low %v4134_v50, %v4144_v23  ;;  %v9997_v19 = vcombine.low %v4158_v29, %v4168_v28  ;;  %v4187_v35 = vrot.slane %v4186_v62, 4 }
 0x20e   : > { %11136 = vmatmul.mubr.bf16.gmra.mrb[16].mxu0 %v9992_v15  ;;  %v9994_v15 = vcombine.low %v4086_v12, %v4096_v11  ;;  %v4177_v32 = vrot.slane %v4176_v38, 4  ;;  %v4191_v41 = vrot.slane %v4189_v43, 5  ;;  %v10023_v52 = vrot.slane %v10007_v48, 9 }
 0x20f   : > { %11139 = vmatprep.mubr.bf16.mxu0 %v9993_v33  ;;  %v4583_v8 = vrot.slane %v4581_v54, 4  ;;  %v4584_v26 = vrot.slane %v13905_v18, 5  ;;  %v4588_v22 = vrot.slane %v13881_v40, 5  ;;  %v4595_v59 = vrot.slane %v13946_v60, 5  ;;  %v10009_v18 = vld [vmem:[%s12546_s26 + $0x30] sm:$0xe] }
 0x210   : > { %v4182_v3 = vsel %vm12578_vm2, %v4177_v32, %v4181_v42  ;;  %v4192_v5 = vsel %vm12578_vm2, %v4187_v35, %v4191_v41  ;;  %v4582_v33 = vsel %vm12911_vm5, %v10023_v52, %v4581_v54  ;;  %v10024_v12 = vrot.slane %v10008_v24, 9  ;;  %v10015_v54 = vld [vmem:[%s12546_s26 + $0x78] sm:$0xe]  ;;  %v16266_v35 = vld [vmem:[#allocation5_spill] sm:$0xff]  ;;  %v16276_v24 = vld [vmem:[#allocation3_spill] sm:$0xff] }
 0x211   : > { %v4585_v39 = vsel %vm12911_vm5, %v4583_v8, %v4584_v26  ;;  %v9998_v13 = vcombine.low %v4182_v3, %v4192_v5  ;;  %v4590_v11 = vrot.slane %v4588_v22, 4  ;;  %v4591_v58 = vrot.slane %v13913_v37, 5  ;;  %v16267_v41 = vld [vmem:[#allocation9_spill] sm:$0xff]  ;;  %v16269_v3 = vld [vmem:[#allocation6_spill] sm:$0xff] }
 0x212   : > { %v10055_v61 = vcombine.low %v4582_v33, %v4585_v39  ;;  %v10025_v2 = vrot.slane %v10009_v18, 9  ;;  %v4597_v40 = vrot.slane %v4595_v59, 4  ;;  %v4598_v36 = vrot.slane %v13982_v6, 5  ;;  %v10011_v6 = vld [vmem:[%s12546_s26 + $0x48] sm:$0xe]  ;;  %v16275_v39 = vld [vmem:[#allocation4_spill] sm:$0xff] }
 0x213   : > { %v4589_v16 = vsel %vm12911_vm5, %v10024_v12, %v4588_v22  ;;  %v4592_v60 = vsel %vm12911_vm5, %v4590_v11, %v4591_v58  ;;  %v4602_v21 = vrot.slane %v13977_v56, 5  ;;  %v4609_v51 = vrot.slane %v14039_v31, 5  ;;  %v16264_v56 = vld [vmem:[#allocation18_spill] sm:$0xff]  ;;  %v16272_v22 = vld [vmem:[#allocation8_spill] sm:$0xff]  ;;  %v16282_v12 = vld [vmem:[#allocation15_spill] sm:$0xff] }
 0x214   : > { %v4596_v17 = vsel %vm12911_vm5, %v10025_v2, %v4595_v59  ;;  %v4599_v37 = vsel %vm12911_vm5, %v4597_v40, %v4598_v36  ;;  %v10056_v63 = vcombine.low %v4589_v16, %v4592_v60  ;;  %v10026_v46 = vrot.slane %v10010_v45, 9  ;;  %v16273_v33 = vld [vmem:[#allocation10_spill] sm:$0xff]  ;;  %v16278_v18 = vld [vmem:[#allocation12_spill] sm:$0xff]  ;;  %v16285_v2 = vld [vmem:[#allocation17_spill] sm:$0xff] }
 0x215   : > { %v10057_v49 = vcombine.low %v4596_v17, %v4599_v37  ;;  %v4604_v30 = vrot.slane %v4602_v21, 4  ;;  %v10027_v9 = vrot.slane %v10011_v6, 9  ;;  %v4611_v47 = vrot.slane %v4609_v51, 4  ;;  %v16284_v58 = vld [vmem:[#allocation16_spill] sm:$0xff]  ;;  %v16288_v16 = vld [vmem:[#allocation21_spill] sm:$0xff]  ;;  %v16291_v17 = vld [vmem:[#allocation23_spill] sm:$0xff] }
 0x216   : > { %11140 = vmatmul.mubr.bf16.gmra.mrb[20].mxu0 %v9994_v15  ;;  %v16263_v15 = vld [vmem:[#allocation11_spill] sm:$0xff]  ;;  %v4612_v44 = vrot.slane %v16264_v56, 5  ;;  %v4603_v57 = vsel %vm12911_vm5, %v10026_v46, %v4602_v21  ;;  %v4623_v14 = vrot.slane %v16265_v20, 5  ;;  %v10029_v23 = vrot.slane %v10013_v27, 9  ;;  %v16287_v36 = vld [vmem:[#allocation20_spill] sm:$0xff]  ;;  %v16290_v21 = vld [vmem:[#allocation22_spill] sm:$0xff] }
 0x217   : > { %11143 = vmatprep.mubr.bf16.mxu0 %v9995_v0  ;;  %v4605_v0 = vrot.slane %v16263_v15, 5  ;;  %v4610_v10 = vsel %vm12911_vm5, %v10027_v9, %v4609_v51  ;;  %v4626_v62 = vrot.slane %v14188_v4, 5  ;;  %v4637_v28 = vrot.slane %v14206_v34, 5  ;;  %v16270_v34 = vld [vmem:[#allocation7_spill] sm:$0xff] }
 0x218   : > { %v4613_v42 = vsel %vm12911_vm5, %v4611_v47, %v4612_v44  ;;  %v4625_v38 = vrot.slane %v4623_v14, 4  ;;  %v4624_v43 = vsel %vm12911_vm5, %v10029_v23, %v4623_v14  ;;  %v4640_v32 = vrot.slane %v14245_v7, 5 }
 0x219   : > { %v4606_v31 = vsel %vm12911_vm5, %v4604_v30, %v4605_v0  ;;  %v10059_v50 = vcombine.low %v4610_v10, %v4613_v42  ;;  %v16268_v52 = vcombine.low %v16266_v35, %v16267_v41  ;;  %v16271_v5 = vcombine.low %v16269_v3, %v16270_v34 }
 0x21a   : > { %v10058_v25 = vcombine.low %v4603_v57, %v4606_v31  ;;  %v4627_v29 = vsel %vm12911_vm5, %v4625_v38, %v4626_v62  ;;  %v16274_v7 = vcombine.low %v16272_v22, %v16273_v33  ;;  %v16277_v59 = vcombine.low %v16275_v39, %v16276_v24 }
 0x21b   : > { %v10061_v48 = vcombine.low %v4624_v43, %v4627_v29  ;;  %v16283_v11 = vcombine.low %v16281_v55, %v16282_v12  ;;  %v16286_v40 = vcombine.low %v16284_v58, %v16285_v2  ;;  %v16289_v60 = vcombine.low %v16287_v36, %v16288_v16 }
 0x21c   : > { %v16292_v37 = vcombine.low %v16290_v21, %v16291_v17  ;;  %v12497_v45 = vmov 0.0   ;;  %v199_v51 = vlaneseq }
 0x21d   : > { %5572 = vst [vmem:[#allocation2] sm:$0xff] %v12497_v45  ;;  %5573 = vst [vmem:[#allocation2 + $0x8] sm:$0xff] %v12497_v45 }
 0x21e   : > { %11144 = vmatmul.mubr.bf16.gmra.mrb[24].mxu0 %v9996_v53  ;;  %v10031_v53 = vrot.slane %v10015_v54, 9  ;;  %5574 = vst [vmem:[#allocation2 + $0x10] sm:$0x3] %v12497_v45  ;;  %5575 = vst [vmem:[#allocation2 + $0x18] sm:$0xff] %v12497_v45  ;;  %v200_v6 = vand.u32 127, %v199_v51 }
 0x21f   : > { %11147 = vmatprep.mubr.bf16.mxu0 %v9997_v19  ;;  %v4639_v19 = vrot.slane %v4637_v28, 4  ;;  %5576 = vst [vmem:[#allocation2 + $0x20] sm:$0xff] %v12497_v45  ;;  %5577 = vst [vmem:[#allocation2 + $0x28] sm:$0x3] %v12497_v45 }
 0x220   : > { %v4638_v4 = vsel %vm12911_vm5, %v10031_v53, %v4637_v28  ;;  %5578 = vst [vmem:[#allocation2 + $0x30] sm:$0xff] %v12497_v45  ;;  %5579 = vst [vmem:[#allocation2 + $0x38] sm:$0xff] %v12497_v45  ;;  %vm201_vm6 = vcmp.lt.s32.totalorder %v200_v6, 16 }
 0x221   : > { %v4641_v8 = vsel %vm12911_vm5, %v4639_v19, %v4640_v32  ;;  %5580 = vst [vmem:[#allocation2 + $0x40] sm:$0x3] %v12497_v45  ;;  %5581 = vst [vmem:[#allocation2 + $0x48] sm:$0xff] %v12497_v45  ;;  %v14426_v46 = vsel %vm201_vm6, 1.0, %v12497_v45 }
 0x222   : > { %v10063_v26 = vcombine.low %v4638_v4, %v4641_v8  ;;  %5582 = vst [vmem:[#allocation2 + $0x50] sm:$0xff] %v12497_v45  ;;  %5583 = vst [vmem:[#allocation2 + $0x58] sm:$0x3] %v12497_v45 }
 0x223   : > { %5584 = vst [vmem:[#allocation2 + $0x60] sm:$0xff] %v12497_v45  ;;  %5585 = vst [vmem:[#allocation2 + $0x68] sm:$0xff] %v12497_v45 }
 0x224   : > { %5586 = vst [vmem:[#allocation2 + $0x70] sm:$0x3] %v12497_v45  ;;  %5587 = vst [vmem:[#allocation2 + $0x78] sm:$0xff] %v12497_v45 }
 0x225   : > { %5588 = vst [vmem:[#allocation2 + $0x80] sm:$0xff] %v12497_v45  ;;  %5589 = vst [vmem:[#allocation2 + $0x88] sm:$0x3] %v12497_v45 }
 0x226   : > { %11148 = vmatmul.mubr.bf16.gmra.mrb[28].mxu0 %v9998_v13  ;;  %v16279_v13 = vld [vmem:[#allocation13_spill] sm:$0xff]  ;;  %5590 = vst [vmem:[#allocation2 + $0x90] sm:$0xff] %v12497_v45  ;;  %5591 = vst [vmem:[#allocation2 + $0x98] sm:$0xff] %v12497_v45 }
 0x227   : > { %11167 = vmatprep.mubr.bf16.mxu0 %v10055_v61  ;;  %v16280_v61 = vcombine.low %v16278_v18, %v16279_v13  ;;  %5592 = vst [vmem:[#allocation2 + $0xa0] sm:$0x3] %v12497_v45  ;;  %5593 = vst [vmem:[#allocation2 + $0xa8] sm:$0xff] %v12497_v45 }
 0x228   : > { %5594 = vst [vmem:[#allocation2 + $0xb0] sm:$0xff] %v12497_v45  ;;  %5595 = vst [vmem:[#allocation2 + $0xb8] sm:$0x3] %v12497_v45 }
 0x229   : > { %5596 = vst [vmem:[#allocation2 + $0xc0] sm:$0xff] %v12497_v45  ;;  %5597 = vst [vmem:[#allocation2 + $0xc8] sm:$0xff] %v12497_v45 }
 0x22a   : > { %5598 = vst [vmem:[#allocation2 + $0xd0] sm:$0x3] %v12497_v45  ;;  %5599 = vst [vmem:[#allocation2 + $0xd8] sm:$0xff] %v12497_v45 }
 0x22b   : > { %5600 = vst [vmem:[#allocation2 + $0xe0] sm:$0xff] %v12497_v45  ;;  %5601 = vst [vmem:[#allocation2 + $0xe8] sm:$0x3] %v12497_v45 }
 0x22c   : > { %5602 = vst [vmem:[#allocation2 + $0xf0] sm:$0xff] %v12497_v45  ;;  %5603 = vst [vmem:[#allocation2 + $0xf8] sm:$0xff] %v12497_v45 }
 0x22d   : > { %5604 = vst [vmem:[#allocation2 + $0x100] sm:$0x3] %v12497_v45  ;;  %5605 = vst [vmem:[#allocation2 + $0x108] sm:$0xff] %v12497_v45 }
 0x22e   : > { %11168 = vmatmul.mubr.bf16.vlgmr.msra.gmra.mrb[0].mxu0 %v10056_v63  ;;  %5606 = vst [vmem:[#allocation2 + $0x110] sm:$0xff] %v12497_v45  ;;  %5607 = vst [vmem:[#allocation2 + $0x118] sm:$0x3] %v12497_v45  ;;  %v14424_v63 = vld [vmem:[%s16093_s3] ss:$0 sm:$0xff] }
 0x22f   : > { %11171 = vmatprep.mubr.bf16.mxu0 %v10057_v49  ;;  %5608 = vst [vmem:[#allocation2 + $0x120] sm:$0xff] %v12497_v45  ;;  %5609 = vst [vmem:[#allocation2 + $0x128] sm:$0xff] %v12497_v45 }
 0x230   : > { %5610 = vst [vmem:[#allocation2 + $0x130] sm:$0x3] %v12497_v45  ;;  %5611 = vst [vmem:[#allocation2 + $0x138] sm:$0xff] %v12497_v45 }
 0x231   : > { %5612 = vst [vmem:[#allocation2 + $0x140] sm:$0xff] %v12497_v45  ;;  %5613 = vst [vmem:[#allocation2 + $0x148] sm:$0x3] %v12497_v45 }
 0x232   : > { %5614 = vst [vmem:[#allocation2 + $0x150] sm:$0xff] %v12497_v45  ;;  %5615 = vst [vmem:[#allocation2 + $0x158] sm:$0xff] %v12497_v45 }
 0x233   : > { %5616 = vst [vmem:[#allocation2 + $0x160] sm:$0x3] %v12497_v45  ;;  %5617 = vst [vmem:[#allocation2 + $0x168] sm:$0xff] %v12497_v45 }
 0x234   : > { %5618 = vst [vmem:[#allocation2 + $0x170] sm:$0xff] %v12497_v45  ;;  %5619 = vst [vmem:[#allocation2 + $0x178] sm:$0x3] %v12497_v45 }
 0x235   : > { %5620 = vst [vmem:[#allocation2 + $0x180] sm:$0xff] %v12497_v45  ;;  %5621 = vst [vmem:[#allocation2 + $0x188] sm:$0xff] %v12497_v45 }
 0x236   : > { %11172 = vmatmul.mubr.bf16.gmra.mrb[4].mxu0 %v10058_v25  ;;  %5622 = vst [vmem:[#allocation2 + $0x190] sm:$0x3] %v12497_v45  ;;  %5623 = vst [vmem:[#allocation2 + $0x198] sm:$0xff] %v12497_v45 }
 0x237   : > { %11175 = vmatprep.mubr.bf16.mxu0 %v10059_v50  ;;  %5624 = vst [vmem:[#allocation2 + $0x1a0] sm:$0xff] %v12497_v45  ;;  %5625 = vst [vmem:[#allocation2 + $0x1a8] sm:$0x3] %v12497_v45 }
 0x23e   : > { %11176 = vmatmul.mubr.bf16.gmra.mrb[8].mxu0 %v16268_v52 }
 0x23f   : > { %11179 = vmatprep.mubr.bf16.mxu0 %v10061_v48 }
 0x246   : > { %11180 = vmatmul.mubr.bf16.gmra.mrb[12].mxu0 %v16271_v5 }
 0x247   : > { %11183 = vmatprep.mubr.bf16.mxu0 %v10063_v26 }
 0x24e   : > { %11184 = vmatmul.mubr.bf16.gmra.mrb[16].mxu0 %v16274_v7 }
 0x24f   : > { %11187 = vmatprep.mubr.bf16.mxu0 %v16277_v59 }
 0x256   : > { %11188 = vmatmul.mubr.bf16.gmra.mrb[20].mxu0 %v16280_v61 }
 0x257   : > { %11191 = vmatprep.mubr.bf16.mxu0 %v16283_v11 }
 0x25e   : > { %11192 = vmatmul.mubr.bf16.gmra.mrb[24].mxu0 %v16286_v40 }
 0x25f   : > { %11195 = vmatprep.mubr.bf16.mxu0 %v16289_v60 }
 0x266   : > { %11196 = vmatmul.mubr.bf16.gmra.mrb[28].mxu0 %v16292_v37 }
 0x301   : > { %v11169_v49 = vpop.f32.mrb[0].mxu0 }
 0x302   : > { %v14429_v30 = vadd.f32 %v11169_v49, %v14424_v63  ;;  %v4854_v15 = vpop.f32.mrb[1].mxu0 }
 0x303   : > { %v14432_v0 = vadd.f32 %v14424_v63, %v4854_v15  ;;  %v11170_v9 = vpop.f32.mrb[2].mxu0 }
 0x304   : > { %v14435_v47 = vadd.f32 %v11170_v9, %v14424_v63  ;;  %v4857_v56 = vpop.f32.mrb[3].mxu0  ;;  %v5054_v44 = vmul.f32 %v14426_v46, %v14429_v30 }
 0x305   : > { %v14440_v57 = vadd.f32 %v14424_v63, %v4857_v56  ;;  %v5052_v31 = vmul.f32 %v14426_v46, %v14432_v0 }
 0x306   : > { %5088 = vadd.xlane.f32.xlu1 %v5054_v44  ;;  %v5055_v10 = vmul.f32 %v14426_v46, %v14435_v47 }
 0x307   : > { %5084 = vadd.xlane.f32.xlu0 %v5052_v31  ;;  %v5053_v20 = vmul.f32 %v14426_v46, %v14440_v57 }
 0x309   : > { %v11173_v42 = vpop.f32.mrb[4].mxu0 }
 0x30a   : > { %5090 = vadd.xlane.f32.xlu1 %v5055_v10  ;;  %v4870_v14 = vpop.f32.mrb[5].mxu0  ;;  %v14452_v23 = vadd.f32 %v11173_v42, %v14424_v63 }
 0x30b   : > { %v14449_v27 = vadd.f32 %v14424_v63, %v4870_v14  ;;  %5086 = vadd.xlane.f32.xlu0 %v5053_v20  ;;  %v11174_v25 = vpop.f32.mrb[6].mxu0 }
 0x30c   : > { %v4873_v50 = vpop.f32.mrb[7].mxu0  ;;  %v14460_v43 = vadd.f32 %v11174_v25, %v14424_v63  ;;  %v5058_v54 = vmul.f32 %v14426_v46, %v14452_v23 }
 0x30d   : > { %v14455_v38 = vadd.f32 %v14424_v63, %v4873_v50  ;;  %v5056_v62 = vmul.f32 %v14426_v46, %v14449_v27 }
 0x30e   : > { %v5059_v32 = vmul.f32 %v14426_v46, %v14460_v43 }
 0x30f   : > { %5092 = vadd.xlane.f32.xlu0 %v5056_v62  ;;  %v5057_v29 = vmul.f32 %v14426_v46, %v14455_v38 }
 0x311   : > { %5094 = vadd.xlane.f32.xlu1 %v5057_v29  ;;  %v11177_v28 = vpop.f32.mrb[8].mxu0 }
 0x312   : > { %v4886_v48 = vpop.f32.mrb[9].mxu0  ;;  %v14472_v41 = vadd.f32 %v11177_v28, %v14424_v63 }
 0x313   : > { %v14467_v53 = vadd.f32 %v14424_v63, %v4886_v48  ;;  %5096 = vadd.xlane.f32.xlu0 %v5058_v54  ;;  %v11178_v19 = vpop.f32.mrb[10].mxu0 }
 0x314   : > { %v4889_v35 = vpop.f32.mrb[11].mxu0  ;;  %v14480_v8 = vadd.f32 %v11178_v19, %v14424_v63  ;;  %v5062_v34 = vmul.f32 %v14426_v46, %v14472_v41 }
 0x315   : > { %v14475_v52 = vadd.f32 %v14424_v63, %v4889_v35  ;;  %5098 = vadd.xlane.f32.xlu1 %v5059_v32  ;;  %v5060_v4 = vmul.f32 %v14426_v46, %v14467_v53 }
 0x316   : > { %v5063_v7 = vmul.f32 %v14426_v46, %v14480_v8 }
 0x317   : > { %5100 = vadd.xlane.f32.xlu0 %v5060_v4  ;;  %v5061_v26 = vmul.f32 %v14426_v46, %v14475_v52 }
 0x319   : > { %5102 = vadd.xlane.f32.xlu1 %v5061_v26  ;;  %v11181_v3 = vpop.f32.mrb[12].mxu0 }
 0x31a   : > { %v4902_v5 = vpop.f32.mrb[13].mxu0  ;;  %v14492_v24 = vadd.f32 %v11181_v3, %v14424_v63 }
 0x31b   : > { %v14487_v22 = vadd.f32 %v14424_v63, %v4902_v5  ;;  %5104 = vadd.xlane.f32.xlu0 %v5062_v34  ;;  %v11182_v33 = vpop.f32.mrb[14].mxu0 }
 0x31c   : > { %v4905_v39 = vpop.f32.mrb[15].mxu0  ;;  %v14500_v13 = vadd.f32 %v11182_v33, %v14424_v63  ;;  %v5066_v12 = vmul.f32 %v14426_v46, %v14492_v24 }
 0x31d   : > { %v14495_v59 = vadd.f32 %v14424_v63, %v4905_v39  ;;  %5106 = vadd.xlane.f32.xlu1 %v5063_v7  ;;  %v5064_v18 = vmul.f32 %v14426_v46, %v14487_v22 }
 0x31e   : > { %v5067_v40 = vmul.f32 %v14426_v46, %v14500_v13 }
 0x31f   : > { %5108 = vadd.xlane.f32.xlu0 %v5064_v18  ;;  %v5065_v61 = vmul.f32 %v14426_v46, %v14495_v59 }
 0x321   : > { %5110 = vadd.xlane.f32.xlu1 %v5065_v61  ;;  %v11185_v55 = vpop.f32.mrb[16].mxu0 }
 0x322   : > { %v4918_v11 = vpop.f32.mrb[17].mxu0  ;;  %v14512_v16 = vadd.f32 %v11185_v55, %v14424_v63 }
 0x323   : > { %v14507_v58 = vadd.f32 %v14424_v63, %v4918_v11  ;;  %5112 = vadd.xlane.f32.xlu0 %v5066_v12  ;;  %v11186_v2 = vpop.f32.mrb[18].mxu0 }
 0x324   : > { %v4921_v36 = vpop.f32.mrb[19].mxu0  ;;  %v14520_v17 = vadd.f32 %v11186_v2, %v14424_v63  ;;  %v5070_v51 = vmul.f32 %v14426_v46, %v14512_v16 }
 0x325   : > { %v14515_v60 = vadd.f32 %v14424_v63, %v4921_v36  ;;  %5114 = vadd.xlane.f32.xlu1 %v5067_v40  ;;  %v5068_v21 = vmul.f32 %v14426_v46, %v14507_v58 }
 0x326   : > { %v5071_v9 = vmul.f32 %v14426_v46, %v14520_v17 }
 0x327   : > { %5116 = vadd.xlane.f32.xlu0 %v5068_v21  ;;  %v5069_v37 = vmul.f32 %v14426_v46, %v14515_v60 }
 0x329   : > { %5118 = vadd.xlane.f32.xlu1 %v5069_v37  ;;  %v11189_v45 = vpop.f32.mrb[20].mxu0 }
 0x32a   : > { %v4934_v6 = vpop.f32.mrb[21].mxu0  ;;  %v14532_v44 = vadd.f32 %v11189_v45, %v14424_v63 }
 0x32b   : > { %v14527_v49 = vadd.f32 %v14424_v63, %v4934_v6  ;;  %5120 = vadd.xlane.f32.xlu0 %v5070_v51  ;;  %v11190_v15 = vpop.f32.mrb[22].mxu0 }
 0x32c   : > { %v4937_v56 = vpop.f32.mrb[23].mxu0  ;;  %v14540_v42 = vadd.f32 %v11190_v15, %v14424_v63  ;;  %v5074_v25 = vmul.f32 %v14426_v46, %v14532_v44 }
 0x32d   : > { %v14535_v31 = vadd.f32 %v14424_v63, %v4937_v56  ;;  %5122 = vadd.xlane.f32.xlu1 %v5071_v9  ;;  %v5072_v10 = vmul.f32 %v14426_v46, %v14527_v49 }
 0x32e   : > { %v5075_v28 = vmul.f32 %v14426_v46, %v14540_v42 }
 0x32f   : > { %5124 = vadd.xlane.f32.xlu0 %v5072_v10  ;;  %v5073_v20 = vmul.f32 %v14426_v46, %v14535_v31 }
 0x331   : > { %5126 = vadd.xlane.f32.xlu1 %v5073_v20  ;;  %v11193_v14 = vpop.f32.mrb[24].mxu0 }
 0x332   : > { %v4950_v50 = vpop.f32.mrb[25].mxu0  ;;  %v14552_v48 = vadd.f32 %v11193_v14, %v14424_v63 }
 0x333   : > { %v14547_v62 = vadd.f32 %v14424_v63, %v4950_v50  ;;  %5128 = vadd.xlane.f32.xlu0 %v5074_v25  ;;  %v11194_v29 = vpop.f32.mrb[26].mxu0 }
 0x334   : > { %v4953_v54 = vpop.f32.mrb[27].mxu0  ;;  %v14560_v35 = vadd.f32 %v11194_v29, %v14424_v63  ;;  %v5078_v3 = vmul.f32 %v14426_v46, %v14552_v48 }
 0x335   : > { %v14555_v19 = vadd.f32 %v14424_v63, %v4953_v54  ;;  %5130 = vadd.xlane.f32.xlu1 %v5075_v28  ;;  %v5076_v32 = vmul.f32 %v14426_v46, %v14547_v62 }
 0x336   : > { %v5079_v39 = vmul.f32 %v14426_v46, %v14560_v35 }
 0x337   : > { %5132 = vadd.xlane.f32.xlu0 %v5076_v32  ;;  %v5077_v4 = vmul.f32 %v14426_v46, %v14555_v19 }
 0x339   : > { %5134 = vadd.xlane.f32.xlu1 %v5077_v4  ;;  %v11197_v26 = vpop.f32.mrb[28].mxu0 }
 0x33a   : > { %v14567_v34 = vadd.f32 %v11197_v26, %v14424_v63  ;;  %v4966_v5 = vpop.f32.mrb[29].mxu0 }
 0x33b   : > { %v14570_v33 = vadd.f32 %v14424_v63, %v4966_v5  ;;  %5136 = vadd.xlane.f32.xlu0 %v5078_v3  ;;  %v11198_v7 = vpop.f32.mrb[30].mxu0 }
 0x33c   : > { %v14575_v18 = vadd.f32 %v11198_v7, %v14424_v63  ;;  %v4969_v61 = vpop.f32.mrb[31].mxu0 }
 0x33d   : > { %v14578_v55 = vadd.f32 %v14424_v63, %v4969_v61  ;;  %5138 = vadd.xlane.f32.xlu1 %v5079_v39  ;;  %v5080_v12 = vmul.f32 %v14426_v46, %v14570_v33 }
 0x33f   : > { %5140 = vadd.xlane.f32.xlu0 %v5080_v12  ;;  %v5081_v11 = vmul.f32 %v14426_v46, %v14578_v55 }
 0x341   : > { %5142 = vadd.xlane.f32.xlu1 %v5081_v11 }
 0x393   : > { %v5089_v2 = vpop.xlane.xlu1 %5088 }
 0x394   : > { %v5150_v40 = vmul.f32 0.0625, %v5089_v2  ;;  %v5085_v36 = vpop.xlane.xlu0 %5084 }
 0x395   : > { %v5148_v21 = vmul.f32 0.0625, %v5085_v36 }
 0x396   : > { %v14585_v37 = vsub.f32 %v14429_v30, %v5150_v40 }
 0x397   : > { %v14588_v45 = vsub.f32 %v14432_v0, %v5148_v21  ;;  %v5091_v63 = vpop.xlane.xlu1 %5090 }
 0x398   : > { %v5151_v51 = vmul.f32 0.0625, %v5091_v63  ;;  %v5087_v6 = vpop.xlane.xlu0 %5086  ;;  %v5214_v30 = vmul.f32 %v14585_v37, %v14585_v37 }
 0x399   : > { %v5149_v15 = vmul.f32 0.0625, %v5087_v6  ;;  %v5212_v9 = vmul.f32 %v14588_v45, %v14588_v45 }
 0x39a   : > { %v14593_v56 = vsub.f32 %v14435_v47, %v5151_v51  ;;  %v5246_v28 = vmul.f32 %v14426_v46, %v5214_v30 }
 0x39b   : > { %v14596_v10 = vsub.f32 %v14440_v57, %v5149_v15  ;;  %v5244_v20 = vmul.f32 %v14426_v46, %v5212_v9 }
 0x39c   : > { %v5093_v0 = vpop.xlane.xlu0 %5092  ;;  %v5215_v29 = vmul.f32 %v14593_v56, %v14593_v56 }
 0x39d   : > { %v5152_v14 = vmul.f32 0.0625, %v5093_v0  ;;  %5276 = vadd.xlane.f32.xlu0 %v5244_v20  ;;  %v5213_v25 = vmul.f32 %v14596_v10, %v14596_v10 }
 0x39e   : > { %v5095_v50 = vpop.xlane.xlu1 %5094  ;;  %v5247_v7 = vmul.f32 %v14426_v46, %v5215_v29  ;;  %v12274_v29 = vld [vmem:[%s16092_s2 + $0x48] sm:$0xff]  }
 0x39f   : > { %v14606_v47 = vsub.f32 %v14449_v27, %v5152_v14  ;;  %v5153_v57 = vmul.f32 0.0625, %v5095_v50  ;;  %v5245_v54 = vmul.f32 %v14426_v46, %v5213_v25 }
 0x3a0   : > { %v5097_v32 = vpop.xlane.xlu0 %5096 }
 0x3a1   : > { %v14611_v4 = vsub.f32 %v14455_v38, %v5153_v57  ;;  %v5154_v26 = vmul.f32 0.0625, %v5097_v32  ;;  %5280 = vadd.xlane.f32.xlu0 %v5246_v28  ;;  %5278 = vadd.xlane.f32.xlu1 %v5245_v54  ;;  %v5216_v3 = vmul.f32 %v14606_v47, %v14606_v47 }
 0x3a2   : > { %v5099_v5 = vpop.xlane.xlu1 %5098 }
 0x3a3   : > { %v14617_v27 = vsub.f32 %v14452_v23, %v5154_v26  ;;  %v5155_v39 = vmul.f32 0.0625, %v5099_v5  ;;  %v5248_v61 = vmul.f32 %v14426_v46, %v5216_v3  ;;  %v5217_v12 = vmul.f32 %v14611_v4, %v14611_v4 }
 0x3a4   : > { %v5101_v38 = vpop.xlane.xlu0 %5100 }
 0x3a5   : > { %v14623_v11 = vsub.f32 %v14460_v43, %v5155_v39  ;;  %v5156_v2 = vmul.f32 0.0625, %v5101_v38  ;;  %5284 = vadd.xlane.f32.xlu0 %v5248_v61  ;;  %5282 = vadd.xlane.f32.xlu1 %v5247_v7  ;;  %v5218_v40 = vmul.f32 %v14617_v27, %v14617_v27  ;;  %v5249_v23 = vmul.f32 %v14426_v46, %v5217_v12  ;;  %v12273_v43 = vld [vmem:[%s16092_s2 + $0x40] sm:$0xff]   ;;  %v12275_v39 = vld [vmem:[%s16092_s2 + $0x50] sm:$0xff]  }
 0x3a6   : > { %v5103_v36 = vpop.xlane.xlu1 %5102  ;;  %11199 = vmatprep.subr.bf16.mxu1 %v12273_v43 }
 0x3a7   : > { %v14629_v21 = vsub.f32 %v14467_v53, %v5156_v2  ;;  %v5157_v63 = vmul.f32 0.0625, %v5103_v36  ;;  %v5250_v51 = vmul.f32 %v14426_v46, %v5218_v40  ;;  %v5219_v6 = vmul.f32 %v14623_v11, %v14623_v11  ;;  %11200 = vmatpush3.bf16.msra.mxu1 %v12273_v43 }
 0x3a8   : > { %v5105_v15 = vpop.xlane.xlu0 %5104  ;;  %11201 = vmatprep.subr.bf16.mxu1 %v12274_v29 }
 0x3a9   : > { %v14638_v9 = vsub.f32 %v14475_v52, %v5157_v63  ;;  %v5158_v20 = vmul.f32 0.0625, %v5105_v15  ;;  %5288 = vadd.xlane.f32.xlu0 %v5250_v51  ;;  %5286 = vadd.xlane.f32.xlu1 %v5249_v23  ;;  %v5220_v53 = vmul.f32 %v14629_v21, %v14629_v21  ;;  %v5251_v0 = vmul.f32 %v14426_v46, %v5219_v6  ;;  %v12276_v51 = vld [vmem:[%s16092_s2 + $0x58] sm:$0xff]  }
 0x3aa   : > { %v5107_v30 = vpop.xlane.xlu1 %5106 }
 0x3ab   : > { %v14644_v14 = vsub.f32 %v14472_v41, %v5158_v20  ;;  %v5159_v25 = vmul.f32 0.0625, %v5107_v30  ;;  %v5252_v50 = vmul.f32 %v14426_v46, %v5220_v53  ;;  %v5221_v52 = vmul.f32 %v14638_v9, %v14638_v9  ;;  %11202 = vmatpush3.bf16.msra.mxu1 %v12274_v29 }
 0x3ac   : > { %v5109_v57 = vpop.xlane.xlu0 %5108  ;;  %11203 = vmatprep.subr.bf16.mxu1 %v12275_v39 }
 0x3ad   : > { %v14653_v28 = vsub.f32 %v14480_v8, %v5159_v25  ;;  %v5160_v54 = vmul.f32 0.0625, %v5109_v57  ;;  %5292 = vadd.xlane.f32.xlu0 %v5252_v50  ;;  %5290 = vadd.xlane.f32.xlu1 %v5251_v0  ;;  %v5222_v41 = vmul.f32 %v14644_v14, %v14644_v14  ;;  %v5253_v26 = vmul.f32 %v14426_v46, %v5221_v52  ;;  %v12277_v50 = vld [vmem:[%s16092_s2 + $0x60] sm:$0xff]  }
 0x3ae   : > { %v5111_v32 = vpop.xlane.xlu1 %5110 }
 0x3af   : > { %v14659_v3 = vsub.f32 %v14487_v22, %v5160_v54  ;;  %v5161_v5 = vmul.f32 0.0625, %v5111_v32  ;;  %v5254_v7 = vmul.f32 %v14426_v46, %v5222_v41  ;;  %v5223_v8 = vmul.f32 %v14653_v28, %v14653_v28  ;;  %11204 = vmatpush3.bf16.msra.mxu1 %v12275_v39 }
 0x3b0   : > { %v5113_v61 = vpop.xlane.xlu0 %5112  ;;  %11205 = vmatprep.subr.bf16.mxu1 %v12276_v51 }
 0x3b1   : > { %v14668_v12 = vsub.f32 %v14495_v59, %v5161_v5  ;;  %v5162_v38 = vmul.f32 0.0625, %v5113_v61  ;;  %5296 = vadd.xlane.f32.xlu0 %v5254_v7  ;;  %5294 = vadd.xlane.f32.xlu1 %v5253_v26  ;;  %v5224_v22 = vmul.f32 %v14659_v3, %v14659_v3  ;;  %v5255_v40 = vmul.f32 %v14426_v46, %v5223_v8  ;;  %v12278_v7 = vld [vmem:[%s16092_s2 + $0x68] sm:$0xff]  }
 0x3b2   : > { %v5115_v2 = vpop.xlane.xlu1 %5114 }
 0x3b3   : > { %v14674_v36 = vsub.f32 %v14492_v24, %v5162_v38  ;;  %v5163_v23 = vmul.f32 0.0625, %v5115_v2  ;;  %v5256_v63 = vmul.f32 %v14426_v46, %v5224_v22  ;;  %v5225_v59 = vmul.f32 %v14668_v12, %v14668_v12  ;;  %11206 = vmatpush3.bf16.msra.mxu1 %v12276_v51 }
 0x3b4   : > { %v5117_v6 = vpop.xlane.xlu0 %5116  ;;  %11207 = vmatprep.subr.bf16.mxu1 %v12277_v50 }
 0x3b5   : > { %v14683_v43 = vsub.f32 %v14500_v13, %v5163_v23  ;;  %v5164_v15 = vmul.f32 0.0625, %v5117_v6  ;;  %5300 = vadd.xlane.f32.xlu0 %v5256_v63  ;;  %5298 = vadd.xlane.f32.xlu1 %v5255_v40  ;;  %v5226_v24 = vmul.f32 %v14674_v36, %v14674_v36  ;;  %v5257_v53 = vmul.f32 %v14426_v46, %v5225_v59  ;;  %v12279_v63 = vld [vmem:[%s16092_s2 + $0x70] sm:$0xff]  }
 0x3b6   : > { %v5119_v20 = vpop.xlane.xlu1 %5118 }
 0x3b7   : > { %v14689_v30 = vsub.f32 %v14507_v58, %v5164_v15  ;;  %v5165_v0 = vmul.f32 0.0625, %v5119_v20  ;;  %v5258_v25 = vmul.f32 %v14426_v46, %v5226_v24  ;;  %v5227_v13 = vmul.f32 %v14683_v43, %v14683_v43  ;;  %11208 = vmatpush3.bf16.msra.mxu1 %v12277_v50 }
 0x3b8   : > { %v5121_v52 = vpop.xlane.xlu0 %5120  ;;  %11209 = vmatprep.subr.bf16.mxu1 %v12278_v7 }
 0x3b9   : > { %v14698_v29 = vsub.f32 %v14515_v60, %v5165_v0  ;;  %v5166_v57 = vmul.f32 0.0625, %v5121_v52  ;;  %5304 = vadd.xlane.f32.xlu0 %v5258_v25  ;;  %5302 = vadd.xlane.f32.xlu1 %v5257_v53  ;;  %v5228_v58 = vmul.f32 %v14689_v30, %v14689_v30  ;;  %v5259_v41 = vmul.f32 %v14426_v46, %v5227_v13  ;;  %v12280_v25 = vld [vmem:[%s16092_s2 + $0x78] sm:$0xff]  }
 0x3ba   : > { %v5123_v54 = vpop.xlane.xlu1 %5122 }
 0x3bb   : > { %v14704_v32 = vsub.f32 %v14512_v16, %v5166_v57  ;;  %v5167_v26 = vmul.f32 0.0625, %v5123_v54  ;;  %v5260_v5 = vmul.f32 %v14426_v46, %v5228_v58  ;;  %v5229_v60 = vmul.f32 %v14698_v29, %v14698_v29  ;;  %11210 = vmatpush3.bf16.msra.mxu1 %v12278_v7  ;;  %v5723_v57 = vld [vmem:[#allocation2 + $0x1] sm:$0xff]  ;;  %v5724_v58 = vld [vmem:[#allocation2 + $0x9] sm:$0xff] }
 0x3bc   : > { %v5125_v8 = vpop.xlane.xlu0 %5124  ;;  %11211 = vmatprep.subr.bf16.mxu1 %v12279_v63 }
 0x3bd   : > { %v14713_v39 = vsub.f32 %v14520_v17, %v5167_v26  ;;  %v5168_v61 = vmul.f32 0.0625, %v5125_v8  ;;  %5308 = vadd.xlane.f32.xlu0 %v5260_v5  ;;  %5306 = vadd.xlane.f32.xlu1 %v5259_v41  ;;  %v5230_v16 = vmul.f32 %v14704_v32, %v14704_v32  ;;  %v5261_v22 = vmul.f32 %v14426_v46, %v5229_v60 }
 0x3be   : > { %v5127_v38 = vpop.xlane.xlu1 %5126  ;;  %v5755_v26 = vpack.c.bf16 %v5724_v58, %v5723_v57  ;;  %v5083_v57 = vmul.f32 %v14426_v46, %v14575_v18  ;;  %v14795_v58 = vld [vmem:[%s16092_s2] sm:$0xff]  }
 0x3bf   : > { %v14719_v2 = vsub.f32 %v14527_v49, %v5168_v61  ;;  %v5169_v40 = vmul.f32 0.0625, %v5127_v38  ;;  %v5262_v23 = vmul.f32 %v14426_v46, %v5230_v16  ;;  %v5231_v17 = vmul.f32 %v14713_v39, %v14713_v39  ;;  %11212 = vmatpush3.bf16.msra.mxu1 %v12279_v63 }
 0x3c0   : > { %v5129_v59 = vpop.xlane.xlu0 %5128  ;;  %11213 = vmatprep.subr.bf16.mxu1 %v12280_v25  ;;  %11215 = vmatprep.mubr.bf16.mxu1 %v5755_v26 }
 0x3c1   : > { %v14728_v51 = vsub.f32 %v14535_v31, %v5169_v40  ;;  %v5170_v6 = vmul.f32 0.0625, %v5129_v59  ;;  %5312 = vadd.xlane.f32.xlu0 %v5262_v23  ;;  %5310 = vadd.xlane.f32.xlu1 %v5261_v22  ;;  %v5232_v49 = vmul.f32 %v14719_v2, %v14719_v2  ;;  %v5263_v24 = vmul.f32 %v14426_v46, %v5231_v17 }
 0x3c2   : > { %v5131_v15 = vpop.xlane.xlu1 %5130 }
 0x3c3   : > { %v14734_v20 = vsub.f32 %v14532_v44, %v5170_v6  ;;  %v5171_v53 = vmul.f32 0.0625, %v5131_v15  ;;  %v5264_v0 = vmul.f32 %v14426_v46, %v5232_v49  ;;  %v5233_v31 = vmul.f32 %v14728_v51, %v14728_v51  ;;  %11214 = vmatpush3.bf16.msra.mxu1 %v12280_v25 }
 0x3c4   : > { %v5133_v13 = vpop.xlane.xlu0 %5132  ;;  %11247 = vmatprep.subr.bf16.mxu1 %v14795_v58 }
 0x3c5   : > { %v14743_v50 = vsub.f32 %v14540_v42, %v5171_v53  ;;  %v5172_v52 = vmul.f32 0.0625, %v5133_v13  ;;  %5316 = vadd.xlane.f32.xlu0 %v5264_v0  ;;  %5314 = vadd.xlane.f32.xlu1 %v5263_v24  ;;  %v5234_v44 = vmul.f32 %v14734_v20, %v14734_v20  ;;  %v5265_v41 = vmul.f32 %v14426_v46, %v5233_v31 }
 0x3c6   : > { %v5135_v54 = vpop.xlane.xlu1 %5134 }
 0x3c7   : > { %v14749_v5 = vsub.f32 %v14547_v62, %v5172_v52  ;;  %v5173_v60 = vmul.f32 0.0625, %v5135_v54  ;;  %v5266_v42 = vmul.f32 %v14426_v46, %v5234_v44  ;;  %v5235_v7 = vmul.f32 %v14743_v50, %v14743_v50 }
 0x3c8   : > { %v5137_v8 = vpop.xlane.xlu0 %5136  ;;  %v5082_v44 = vmul.f32 %v14426_v46, %v14567_v34 }
 0x3c9   : > { %v14755_v61 = vsub.f32 %v14555_v19, %v5173_v60  ;;  %v5174_v16 = vmul.f32 0.0625, %v5137_v8  ;;  %5320 = vadd.xlane.f32.xlu0 %v5266_v42  ;;  %5318 = vadd.xlane.f32.xlu1 %v5265_v41  ;;  %v5236_v38 = vmul.f32 %v14749_v5, %v14749_v5  ;;  %v5267_v22 = vmul.f32 %v14426_v46, %v5235_v7 }
 0x3ca   : > { %v5139_v62 = vpop.xlane.xlu1 %5138 }
 0x3cb   : > { %v14761_v40 = vsub.f32 %v14552_v48, %v5174_v16  ;;  %v5175_v23 = vmul.f32 0.0625, %v5139_v62  ;;  %v5268_v17 = vmul.f32 %v14426_v46, %v5236_v38  ;;  %v5237_v63 = vmul.f32 %v14755_v61, %v14755_v61 }
 0x3cc   : > { %v5141_v19 = vpop.xlane.xlu0 %5140 }
 0x3cd   : > { %v14767_v59 = vsub.f32 %v14560_v35, %v5175_v23  ;;  %v5176_v6 = vmul.f32 0.0625, %v5141_v19  ;;  %5324 = vadd.xlane.f32.xlu0 %v5268_v17  ;;  %5322 = vadd.xlane.f32.xlu1 %v5267_v22  ;;  %v5238_v49 = vmul.f32 %v14761_v40, %v14761_v40  ;;  %v5269_v48 = vmul.f32 %v14426_v46, %v5237_v63 }
 0x3ce   : > { %v5143_v15 = vpop.xlane.xlu1 %5142 }
 0x3cf   : > { %v14773_v24 = vsub.f32 %v14570_v33, %v5176_v6  ;;  %v5177_v53 = vmul.f32 0.0625, %v5143_v15  ;;  %v5270_v0 = vmul.f32 %v14426_v46, %v5238_v49  ;;  %v5239_v31 = vmul.f32 %v14767_v59, %v14767_v59 }
 0x3d1   : > { %v14779_v35 = vsub.f32 %v14578_v55, %v5177_v53  ;;  %5328 = vadd.xlane.f32.xlu0 %v5270_v0  ;;  %5326 = vadd.xlane.f32.xlu1 %v5269_v48  ;;  %v5240_v25 = vmul.f32 %v14773_v24, %v14773_v24  ;;  %v5271_v52 = vmul.f32 %v14426_v46, %v5239_v31  ;;  %v14801_v0 = vld [vmem:[%s16093_s3 + $0x1] ss:$0 sm:$0xff] }
 0x3d3   : > { %v5272_v13 = vmul.f32 %v14426_v46, %v5240_v25  ;;  %v5241_v33 = vmul.f32 %v14779_v35, %v14779_v35 }
 0x3d5   : > { %5332 = vadd.xlane.f32.xlu0 %v5272_v13  ;;  %5330 = vadd.xlane.f32.xlu1 %v5271_v52  ;;  %v5273_v55 = vmul.f32 %v14426_v46, %v5241_v33 }
 0x3d9   : > { %5144 = vadd.xlane.f32.xlu0 %v5082_v44  ;;  %5334 = vadd.xlane.f32.xlu1 %v5273_v55  ;;  %v14807_v44 = vld [vmem:[%s16093_s3 + $0x2] ss:$0 sm:$0xff] }
 0x3dd   : > { %5146 = vadd.xlane.f32.xlu1 %v5083_v57 }
 0x42a   : > { %v5277_v54 = vpop.xlane.xlu0 %5276 }
 0x42b   : > { %v5340_v41 = vmul.f32 0.0625, %v5277_v54 }
 0x42d   : > { %v5372_v26 = vadd.f32 1e-05, %v5340_v41 }
 0x42e   : > { %v5281_v60 = vpop.xlane.xlu0 %5280  ;;  %v5279_v42 = vpop.xlane.xlu1 %5278 }
 0x42f   : > { %12345 = vrsqrt.f32 %v5372_v26  ;;  %v5342_v7 = vmul.f32 0.0625, %v5281_v60  ;;  %v5341_v8 = vmul.f32 0.0625, %v5279_v42 }
 0x431   : > { %v5374_v16 = vadd.f32 1e-05, %v5342_v7  ;;  %v5373_v38 = vadd.f32 1e-05, %v5341_v8 }
 0x432   : > { %v5285_v62 = vpop.xlane.xlu0 %5284  ;;  %v5283_v22 = vpop.xlane.xlu1 %5282 }
 0x433   : > { %12347 = vrsqrt.f32 %v5374_v16  ;;  %v5344_v23 = vmul.f32 0.0625, %v5285_v62  ;;  %v5343_v17 = vmul.f32 0.0625, %v5283_v22 }
 0x434   : > { %12349 = vrsqrt.f32 %v5373_v38 }
 0x435   : > { %v5376_v63 = vadd.f32 1e-05, %v5344_v23  ;;  %v5375_v19 = vadd.f32 1e-05, %v5343_v17 }
 0x436   : > { %v5289_v6 = vpop.xlane.xlu0 %5288  ;;  %v5287_v49 = vpop.xlane.xlu1 %5286 }
 0x437   : > { %12351 = vrsqrt.f32 %v5376_v63  ;;  %v5346_v15 = vmul.f32 0.0625, %v5289_v6  ;;  %v5345_v48 = vmul.f32 0.0625, %v5287_v49 }
 0x438   : > { %12353 = vrsqrt.f32 %v5375_v19 }
 0x439   : > { %v12346_v53 = vpop.eup %12345  ;;  %v5378_v31 = vadd.f32 1e-05, %v5346_v15  ;;  %v5377_v25 = vadd.f32 1e-05, %v5345_v48 }
 0x43a   : > { %v5436_v13 = vmul.f32 %v12346_v53, %v14588_v45  ;;  %v5293_v52 = vpop.xlane.xlu0 %5292  ;;  %v5291_v33 = vpop.xlane.xlu1 %5290 }
 0x43b   : > { %12355 = vrsqrt.f32 %v5378_v31  ;;  %v5348_v55 = vmul.f32 0.0625, %v5293_v52  ;;  %v5347_v57 = vmul.f32 0.0625, %v5291_v33 }
 0x43c   : > { %v5472_v54 = vmul.f32 %v14801_v0, %v5436_v13  ;;  %12357 = vrsqrt.f32 %v5377_v25 }
 0x43d   : > { %v12348_v41 = vpop.eup %12347  ;;  %v5380_v26 = vadd.f32 1e-05, %v5348_v55  ;;  %v5379_v60 = vadd.f32 1e-05, %v5347_v57 }
 0x43e   : > { %v12350_v42 = vpop.eup %12349  ;;  %v5508_v7 = vadd.f32 %v14807_v44, %v5472_v54  ;;  %v5438_v45 = vmul.f32 %v12348_v41, %v14585_v37  ;;  %v5297_v8 = vpop.xlane.xlu0 %5296 }
 0x43f   : > { %v5295_v16 = vpop.xlane.xlu1 %5294  ;;  %v5437_v38 = vmul.f32 %v12350_v42, %v14596_v10  ;;  %12359 = vrsqrt.f32 %v5380_v26  ;;  %v5350_v62 = vmul.f32 0.0625, %v5297_v8 }
 0x440   : > { %v5349_v22 = vmul.f32 0.0625, %v5295_v16  ;;  %v5540_v23 = vmax.f32 %v5508_v7, 0.0  ;;  %v5474_v17 = vmul.f32 %v14801_v0, %v5438_v45  ;;  %12361 = vrsqrt.f32 %v5379_v60 }
 0x441   : > { %v12352_v63 = vpop.eup %12351  ;;  %v5473_v19 = vmul.f32 %v14801_v0, %v5437_v38  ;;  %v5382_v6 = vadd.f32 1e-05, %v5350_v62 }
 0x442   : > { %v5381_v49 = vadd.f32 1e-05, %v5349_v22  ;;  %v12354_v15 = vpop.eup %12353  ;;  %5627 = vst [vmem:[#allocation2 + $0x19] sm:$0xff] %v5540_v23  ;;  %v5510_v37 = vadd.f32 %v14807_v44, %v5474_v17  ;;  %v5440_v48 = vmul.f32 %v12352_v63, %v14606_v47  ;;  %v5301_v53 = vpop.xlane.xlu0 %5300 }
 0x443   : > { %v5299_v10 = vpop.xlane.xlu1 %5298  ;;  %v5509_v31 = vadd.f32 %v14807_v44, %v5473_v19  ;;  %v5439_v25 = vmul.f32 %v12354_v15, %v14593_v56  ;;  %12363 = vrsqrt.f32 %v5382_v6  ;;  %v5352_v13 = vmul.f32 0.0625, %v5301_v53  ;;  %v12282_v15 = vld [vmem:[%s16092_s2 + $0x8] sm:$0xff]  }
 0x444   : > { %v5542_v52 = vmax.f32 %v5510_v37, 0.0  ;;  %v5476_v33 = vmul.f32 %v14801_v0, %v5440_v48  ;;  %12365 = vrsqrt.f32 %v5381_v49  ;;  %v5351_v55 = vmul.f32 0.0625, %v5299_v10 }
 0x445   : > { %v12356_v57 = vpop.eup %12355  ;;  %v5541_v54 = vmax.f32 %v5509_v31, 0.0  ;;  %v5475_v41 = vmul.f32 %v14801_v0, %v5439_v25  ;;  %v5384_v26 = vadd.f32 1e-05, %v5352_v13 }
 0x446   : > { %v12358_v60 = vpop.eup %12357  ;;  %5629 = vst [vmem:[#allocation2 + $0x31] sm:$0xff] %v5542_v52  ;;  %v14822_v47 = vadd.f32 %v14807_v44, %v5476_v33  ;;  %v5442_v42 = vmul.f32 %v12356_v57, %v14617_v27  ;;  %v5383_v56 = vadd.f32 1e-05, %v5351_v55  ;;  %v5305_v7 = vpop.xlane.xlu0 %5304 }
 0x447   : > { %v5303_v45 = vpop.xlane.xlu1 %5302  ;;  %5628 = vst [vmem:[#allocation2 + $0x21] sm:$0xff] %v5541_v54  ;;  %v5511_v8 = vadd.f32 %v14807_v44, %v5475_v41  ;;  %v5441_v16 = vmul.f32 %v12358_v60, %v14611_v4  ;;  %12367 = vrsqrt.f32 %v5384_v26  ;;  %v5354_v38 = vmul.f32 0.0625, %v5305_v7 }
 0x448   : > { %v5544_v62 = vmax.f32 %v14822_v47, 0.0  ;;  %v5478_v22 = vmul.f32 %v14801_v0, %v5442_v42  ;;  %12369 = vrsqrt.f32 %v5383_v56  ;;  %v5353_v17 = vmul.f32 0.0625, %v5303_v45 }
 0x449   : > { %v12360_v63 = vpop.eup %12359  ;;  %v5543_v19 = vmax.f32 %v5511_v8, 0.0  ;;  %v5477_v27 = vmul.f32 %v14801_v0, %v5441_v16  ;;  %v5386_v6 = vadd.f32 1e-05, %v5354_v38  ;;  %v5756_v49 = vpack.c.bf16 %v5541_v54, %v5540_v23 }
 0x44a   : > { %v12362_v37 = vpop.eup %12361  ;;  %5631 = vst [vmem:[#allocation2 + $0x49] sm:$0xff] %v5544_v62  ;;  %v14834_v4 = vadd.f32 %v14807_v44, %v5478_v22  ;;  %v5444_v48 = vmul.f32 %v12360_v63, %v14629_v21  ;;  %v5385_v53 = vadd.f32 1e-05, %v5353_v17  ;;  %v5309_v10 = vpop.xlane.xlu0 %5308 }
 0x44b   : > { %v5307_v31 = vpop.xlane.xlu1 %5306  ;;  %5630 = vst [vmem:[#allocation2 + $0x39] sm:$0xff] %v5543_v19  ;;  %v5513_v25 = vadd.f32 %v14807_v44, %v5477_v27  ;;  %v5443_v13 = vmul.f32 %v12362_v37, %v14623_v11  ;;  %12371 = vrsqrt.f32 %v5386_v6  ;;  %v5356_v23 = vmul.f32 0.0625, %v5309_v10  ;;  %11216 = vmatmul.mubr.bf16.vlgmr.msra.gmra.mrb[0].mxu1 %v5756_v49  ;;  %v12283_v11 = vld [vmem:[%s16092_s2 + $0x10] sm:$0xff]  }
 0x44c   : > { %v5546_v33 = vmax.f32 %v14834_v4, 0.0  ;;  %v5480_v55 = vmul.f32 %v14801_v0, %v5444_v48  ;;  %12373 = vrsqrt.f32 %v5385_v53  ;;  %v5355_v57 = vmul.f32 0.0625, %v5307_v31  ;;  %11248 = vmatpush3.bf16.msra.mxu1 %v14795_v58 }
 0x44d   : > { %v12364_v21 = vpop.eup %12363  ;;  %v5545_v54 = vmax.f32 %v5513_v25, 0.0  ;;  %v5479_v41 = vmul.f32 %v14801_v0, %v5443_v13  ;;  %v5388_v26 = vadd.f32 1e-05, %v5356_v23  ;;  %v5757_v60 = vpack.c.bf16 %v5543_v19, %v5542_v52  ;;  %11249 = vmatprep.subr.bf16.mxu1 %v12282_v15 }
 0x44e   : > { %v12366_v47 = vpop.eup %12365  ;;  %5633 = vst [vmem:[#allocation2 + $0x61] sm:$0xff] %v5546_v33  ;;  %v14847_v42 = vadd.f32 %v14807_v44, %v5480_v55  ;;  %v5446_v56 = vmul.f32 %v12364_v21, %v14644_v14  ;;  %v5387_v7 = vadd.f32 1e-05, %v5355_v57  ;;  %v5313_v58 = vpop.xlane.xlu0 %5312 }
 0x44f   : > { %v5311_v45 = vpop.xlane.xlu1 %5310  ;;  %5632 = vst [vmem:[#allocation2 + $0x51] sm:$0xff] %v5545_v54  ;;  %v5515_v8 = vadd.f32 %v14807_v44, %v5479_v41  ;;  %v5445_v52 = vmul.f32 %v12366_v47, %v14638_v9  ;;  %12375 = vrsqrt.f32 %v5388_v26  ;;  %v5358_v16 = vmul.f32 0.0625, %v5313_v58  ;;  %11219 = vmatprep.mubr.bf16.mxu1 %v5757_v60  ;;  %v12284_v9 = vld [vmem:[%s16092_s2 + $0x18] sm:$0xff]  }
 0x450   : > { %v5548_v38 = vmax.f32 %v14847_v42, 0.0  ;;  %v5482_v22 = vmul.f32 %v14801_v0, %v5446_v56  ;;  %12377 = vrsqrt.f32 %v5387_v7  ;;  %v5357_v17 = vmul.f32 0.0625, %v5311_v45  ;;  %11250 = vmatpush3.bf16.msra.mxu1 %v12282_v15 }
 0x451   : > { %v12368_v63 = vpop.eup %12367  ;;  %v5547_v14 = vmax.f32 %v5515_v8, 0.0  ;;  %v5481_v19 = vmul.f32 %v14801_v0, %v5445_v52  ;;  %v5390_v27 = vadd.f32 1e-05, %v5358_v16  ;;  %v5758_v6 = vpack.c.bf16 %v5545_v54, %v5544_v62  ;;  %11251 = vmatprep.subr.bf16.mxu1 %v12283_v11 }
 0x452   : > { %v12370_v49 = vpop.eup %12369  ;;  %5635 = vst [vmem:[#allocation2 + $0x79] sm:$0xff] %v5548_v38  ;;  %v14859_v37 = vadd.f32 %v14807_v44, %v5482_v22  ;;  %v5448_v4 = vmul.f32 %v12368_v63, %v14659_v3  ;;  %v5389_v48 = vadd.f32 1e-05, %v5357_v17  ;;  %v5317_v15 = vpop.xlane.xlu0 %5316 }
 0x453   : > { %v5315_v53 = vpop.xlane.xlu1 %5314  ;;  %5634 = vst [vmem:[#allocation2 + $0x69] sm:$0xff] %v5547_v14  ;;  %v5517_v10 = vadd.f32 %v14807_v44, %v5481_v19  ;;  %v5447_v62 = vmul.f32 %v12370_v49, %v14653_v28  ;;  %12379 = vrsqrt.f32 %v5390_v27  ;;  %v5360_v31 = vmul.f32 0.0625, %v5317_v15  ;;  %11220 = vmatmul.mubr.bf16.gmra.mrb[4].mxu1 %v5758_v6  ;;  %v12285_v28 = vld [vmem:[%s16092_s2 + $0x20] sm:$0xff]  }
 0x454   : > { %v5550_v25 = vmax.f32 %v14859_v37, 0.0  ;;  %v5484_v13 = vmul.f32 %v14801_v0, %v5448_v4  ;;  %12381 = vrsqrt.f32 %v5389_v48  ;;  %v5359_v23 = vmul.f32 0.0625, %v5315_v53  ;;  %11252 = vmatpush3.bf16.msra.mxu1 %v12283_v11 }
 0x455   : > { %v12372_v55 = vpop.eup %12371  ;;  %v5549_v3 = vmax.f32 %v5517_v10, 0.0  ;;  %v5483_v57 = vmul.f32 %v14801_v0, %v5447_v62  ;;  %v5392_v21 = vadd.f32 1e-05, %v5360_v31  ;;  %v5759_v54 = vpack.c.bf16 %v5547_v14, %v5546_v33  ;;  %11253 = vmatprep.subr.bf16.mxu1 %v12284_v9 }
 0x456   : > { %v12374_v41 = vpop.eup %12373  ;;  %5637 = vst [vmem:[#allocation2 + $0x91] sm:$0xff] %v5550_v25  ;;  %v14871_v26 = vadd.f32 %v14807_v44, %v5484_v13  ;;  %v5450_v60 = vmul.f32 %v12372_v55, %v14674_v36  ;;  %v5391_v47 = vadd.f32 1e-05, %v5359_v23  ;;  %v5321_v11 = vpop.xlane.xlu0 %5320 }
 0x457   : > { %v5319_v42 = vpop.xlane.xlu1 %5318  ;;  %5636 = vst [vmem:[#allocation2 + $0x81] sm:$0xff] %v5549_v3  ;;  %v5519_v56 = vadd.f32 %v14807_v44, %v5483_v57  ;;  %v5449_v33 = vmul.f32 %v12374_v41, %v14668_v12  ;;  %12383 = vrsqrt.f32 %v5392_v21  ;;  %v5362_v7 = vmul.f32 0.0625, %v5321_v11  ;;  %11223 = vmatprep.mubr.bf16.mxu1 %v5759_v54  ;;  %v12286_v12 = vld [vmem:[%s16092_s2 + $0x28] sm:$0xff]  }
 0x458   : > { %v5552_v58 = vmax.f32 %v14871_v26, 0.0  ;;  %v5486_v45 = vmul.f32 %v14801_v0, %v5450_v60  ;;  %12385 = vrsqrt.f32 %v5391_v47  ;;  %v5361_v8 = vmul.f32 0.0625, %v5319_v42  ;;  %11254 = vmatpush3.bf16.msra.mxu1 %v12284_v9 }
 0x459   : > { %v12376_v52 = vpop.eup %12375  ;;  %v5551_v36 = vmax.f32 %v5519_v56, 0.0  ;;  %v5485_v16 = vmul.f32 %v14801_v0, %v5449_v33  ;;  %v5394_v22 = vadd.f32 1e-05, %v5362_v7  ;;  %v5760_v17 = vpack.c.bf16 %v5549_v3, %v5548_v38  ;;  %11255 = vmatprep.subr.bf16.mxu1 %v12285_v28 }
 0x45a   : > { %v12378_v63 = vpop.eup %12377  ;;  %5639 = vst [vmem:[#allocation2 + $0xa9] sm:$0xff] %v5552_v58  ;;  %v14883_v14 = vadd.f32 %v14807_v44, %v5486_v45  ;;  %v5452_v19 = vmul.f32 %v12376_v52, %v14689_v30  ;;  %v5393_v27 = vadd.f32 1e-05, %v5361_v8  ;;  %v5325_v6 = vpop.xlane.xlu0 %5324 }
 0x45b   : > { %v5323_v9 = vpop.xlane.xlu1 %5322  ;;  %5638 = vst [vmem:[#allocation2 + $0x99] sm:$0xff] %v5551_v36  ;;  %v5521_v49 = vadd.f32 %v14807_v44, %v5485_v16  ;;  %v5451_v38 = vmul.f32 %v12378_v63, %v14683_v43  ;;  %12387 = vrsqrt.f32 %v5394_v22  ;;  %v5364_v37 = vmul.f32 0.0625, %v5325_v6  ;;  %11224 = vmatmul.mubr.bf16.gmra.mrb[8].mxu1 %v5760_v17  ;;  %v12287_v43 = vld [vmem:[%s16092_s2 + $0x30] sm:$0xff]  }
 0x45c   : > { %v5554_v4 = vmax.f32 %v14883_v14, 0.0  ;;  %v5488_v48 = vmul.f32 %v14801_v0, %v5452_v19  ;;  %12389 = vrsqrt.f32 %v5393_v27  ;;  %v5363_v15 = vmul.f32 0.0625, %v5323_v9  ;;  %11256 = vmatpush3.bf16.msra.mxu1 %v12285_v28 }
 0x45d   : > { %v12380_v53 = vpop.eup %12379  ;;  %v5553_v30 = vmax.f32 %v5521_v49, 0.0  ;;  %v5487_v10 = vmul.f32 %v14801_v0, %v5451_v38  ;;  %v5396_v62 = vadd.f32 1e-05, %v5364_v37  ;;  %v5761_v31 = vpack.c.bf16 %v5551_v36, %v5550_v25  ;;  %11257 = vmatprep.subr.bf16.mxu1 %v12286_v12 }
 0x45e   : > { %v12382_v13 = vpop.eup %12381  ;;  %5641 = vst [vmem:[#allocation2 + $0xc1] sm:$0xff] %v5554_v4  ;;  %v14895_v23 = vadd.f32 %v14807_v44, %v5488_v48  ;;  %v5454_v55 = vmul.f32 %v12380_v53, %v14704_v32  ;;  %v5395_v3 = vadd.f32 1e-05, %v5363_v15  ;;  %v5329_v57 = vpop.xlane.xlu0 %5328 }
 0x45f   : > { %v5327_v21 = vpop.xlane.xlu1 %5326  ;;  %5640 = vst [vmem:[#allocation2 + $0xb1] sm:$0xff] %v5553_v30  ;;  %v5523_v54 = vadd.f32 %v14807_v44, %v5487_v10  ;;  %v5453_v25 = vmul.f32 %v12382_v13, %v14698_v29  ;;  %12391 = vrsqrt.f32 %v5396_v62  ;;  %v5366_v28 = vmul.f32 0.0625, %v5329_v57  ;;  %11227 = vmatprep.mubr.bf16.mxu1 %v5761_v31  ;;  %v12288_v29 = vld [vmem:[%s16092_s2 + $0x38] sm:$0xff]  }
 0x460   : > { %v5556_v41 = vmax.f32 %v14895_v23, 0.0  ;;  %v5490_v26 = vmul.f32 %v14801_v0, %v5454_v55  ;;  %12393 = vrsqrt.f32 %v5395_v3  ;;  %v5365_v60 = vmul.f32 0.0625, %v5327_v21  ;;  %11258 = vmatpush3.bf16.msra.mxu1 %v12286_v12 }
 0x461   : > { %v12384_v47 = vpop.eup %12383  ;;  %v5555_v32 = vmax.f32 %v5523_v54, 0.0  ;;  %v5489_v11 = vmul.f32 %v14801_v0, %v5453_v25  ;;  %v5398_v42 = vadd.f32 1e-05, %v5366_v28  ;;  %v5762_v56 = vpack.c.bf16 %v5553_v30, %v5552_v58  ;;  %11259 = vmatprep.subr.bf16.mxu1 %v12287_v43 }
 0x462   : > { %v12386_v33 = vpop.eup %12385  ;;  %5643 = vst [vmem:[#allocation2 + $0xd9] sm:$0xff] %v5556_v41  ;;  %v14907_v7 = vadd.f32 %v14807_v44, %v5490_v26  ;;  %v5456_v45 = vmul.f32 %v12384_v47, %v14719_v2  ;;  %v5397_v8 = vadd.f32 1e-05, %v5365_v60  ;;  %v5333_v52 = vpop.xlane.xlu0 %5332 }
 0x463   : > { %v5331_v36 = vpop.xlane.xlu1 %5330  ;;  %5642 = vst [vmem:[#allocation2 + $0xc9] sm:$0xff] %v5555_v32  ;;  %v5525_v16 = vadd.f32 %v14807_v44, %v5489_v11  ;;  %v5455_v58 = vmul.f32 %v12386_v33, %v14713_v39  ;;  %12395 = vrsqrt.f32 %v5398_v42  ;;  %v5368_v22 = vmul.f32 0.0625, %v5333_v52  ;;  %11228 = vmatmul.mubr.bf16.gmra.mrb[12].mxu1 %v5762_v56  ;;  %v14918_v39 = vld [vmem:[%s16092_s2 + $0x80] sm:$0xff]  }
 0x464   : > { %v5558_v17 = vmax.f32 %v14907_v7, 0.0  ;;  %v5492_v12 = vmul.f32 %v14801_v0, %v5456_v45  ;;  %12397 = vrsqrt.f32 %v5397_v8  ;;  %v5367_v63 = vmul.f32 0.0625, %v5331_v36  ;;  %11260 = vmatpush3.bf16.msra.mxu1 %v12287_v43 }
 0x465   : > { %v12388_v14 = vpop.eup %12387  ;;  %v5557_v2 = vmax.f32 %v5525_v16, 0.0  ;;  %v5491_v19 = vmul.f32 %v14801_v0, %v5455_v58  ;;  %v5400_v27 = vadd.f32 1e-05, %v5368_v22  ;;  %v5763_v6 = vpack.c.bf16 %v5555_v32, %v5554_v4  ;;  %11261 = vmatprep.subr.bf16.mxu1 %v12288_v29 }
 0x466   : > { %v12390_v9 = vpop.eup %12389  ;;  %5645 = vst [vmem:[#allocation2 + $0xf1] sm:$0xff] %v5558_v17  ;;  %v5528_v49 = vadd.f32 %v14807_v44, %v5492_v12  ;;  %v5458_v38 = vmul.f32 %v12388_v14, %v14734_v20  ;;  %v5399_v37 = vadd.f32 1e-05, %v5367_v63  ;;  %v5145_v48 = vpop.xlane.xlu0 %5144 }
 0x467   : > { %v5335_v15 = vpop.xlane.xlu1 %5334  ;;  %5644 = vst [vmem:[#allocation2 + $0xe1] sm:$0xff] %v5557_v2  ;;  %v5527_v53 = vadd.f32 %v14807_v44, %v5491_v19  ;;  %v5457_v4 = vmul.f32 %v12390_v9, %v14728_v51  ;;  %12399 = vrsqrt.f32 %v5400_v27  ;;  %v5178_v30 = vmul.f32 0.0625, %v5145_v48  ;;  %11231 = vmatprep.mubr.bf16.mxu1 %v5763_v6 }
 0x468   : > { %v5560_v10 = vmax.f32 %v5528_v49, 0.0  ;;  %v5494_v62 = vmul.f32 %v14801_v0, %v5458_v38  ;;  %12401 = vrsqrt.f32 %v5399_v37  ;;  %v5369_v31 = vmul.f32 0.0625, %v5335_v15  ;;  %11262 = vmatpush3.bf16.msra.mxu1 %v12288_v29 }
 0x469   : > { %v12392_v43 = vpop.eup %12391  ;;  %v5559_v13 = vmax.f32 %v5527_v53, 0.0  ;;  %v5493_v20 = vmul.f32 %v14801_v0, %v5457_v4  ;;  %v14927_v23 = vsub.f32 %v14567_v34, %v5178_v30  ;;  %v5764_v55 = vpack.c.bf16 %v5557_v2, %v5556_v41  ;;  %11295 = vmatprep.subr.bf16.mxu1 %v14918_v39 }
 0x46a   : > { %v12394_v51 = vpop.eup %12393  ;;  %5647 = vst [vmem:[#allocation2 + $0x109] sm:$0xff] %v5560_v10  ;;  %v5530_v3 = vadd.f32 %v14807_v44, %v5494_v62  ;;  %v5460_v57 = vmul.f32 %v12392_v43, %v14749_v5  ;;  %v5401_v21 = vadd.f32 1e-05, %v5369_v31  ;;  %v12486_v62 = vld [vmem:[#allocation2] sm:$0xff]  ;;  %v5664_v43 = vld [vmem:[#allocation2 + $0x38] sm:$0xff] }
 0x46b   : > { %v5147_v54 = vpop.xlane.xlu1 %5146  ;;  %5646 = vst [vmem:[#allocation2 + $0xf9] sm:$0xff] %v5559_v13  ;;  %v5529_v25 = vadd.f32 %v14807_v44, %v5493_v20  ;;  %v5459_v28 = vmul.f32 %v12394_v51, %v14743_v50  ;;  %v5242_v34 = vmul.f32 %v14927_v23, %v14927_v23  ;;  %11232 = vmatmul.mubr.bf16.gmra.mrb[16].mxu1 %v5764_v55  ;;  %v5663_v20 = vld [vmem:[#allocation2 + $0x30] sm:$0xff]  ;;  %v12290_v55 = vld [vmem:[%s16092_s2 + $0x88] sm:$0xff]  }
 0x46c   : > { %v5179_v26 = vmul.f32 0.0625, %v5147_v54  ;;  %v5562_v41 = vmax.f32 %v5530_v3, 0.0  ;;  %v5496_v60 = vmul.f32 %v14801_v0, %v5460_v57  ;;  %12403 = vrsqrt.f32 %v5401_v21  ;;  %v12291_v3 = vld [vmem:[%s16092_s2 + $0x90] sm:$0xff]   ;;  %v5668_v21 = vld [vmem:[#allocation2 + $0x68] sm:$0xff] }
 0x46d   : > { %v5765_v47 = vpack.c.bf16 %v5559_v13, %v5558_v17  ;;  %v12396_v32 = vpop.eup %12395  ;;  %v5561_v11 = vmax.f32 %v5529_v25, 0.0  ;;  %v5495_v5 = vmul.f32 %v14801_v0, %v5459_v28  ;;  %v5274_v56 = vmul.f32 %v14426_v46, %v5242_v34  ;;  %v5661_v13 = vld [vmem:[#allocation2 + $0x18] sm:$0xff]  ;;  %v5666_v57 = vld [vmem:[#allocation2 + $0x50] sm:$0xff]  ;;  %v5665_v54 = vld [vmem:[#allocation2 + $0x48] sm:$0xff] }
 0x46e   : > { %v14939_v42 = vsub.f32 %v14575_v18, %v5179_v26  ;;  %v12398_v50 = vpop.eup %12397  ;;  %5649 = vst [vmem:[#allocation2 + $0x121] sm:$0xff] %v5562_v41  ;;  %v5532_v29 = vadd.f32 %v14807_v44, %v5496_v60  ;;  %v5462_v33 = vmul.f32 %v12396_v32, %v14761_v40  ;;  %v14970_v31 = vpack.c.bf16 %v12486_v62, %v12486_v62  ;;  %v5667_v28 = vld [vmem:[#allocation2 + $0x60] sm:$0xff]  ;;  %v12292_v26 = vld [vmem:[%s16092_s2 + $0x98] sm:$0xff]  }
 0x46f   : > { %11235 = vmatprep.mubr.bf16.mxu1 %v5765_v47  ;;  %5648 = vst [vmem:[#allocation2 + $0x111] sm:$0xff] %v5561_v11  ;;  %v5531_v7 = vadd.f32 %v14807_v44, %v5495_v5  ;;  %v5461_v45 = vmul.f32 %v12398_v50, %v14755_v61  ;;  %5336 = vadd.xlane.f32.xlu0 %v5274_v56  ;;  %v5672_v60 = vld [vmem:[#allocation2 + $0x98] sm:$0xff]  ;;  %v12294_v5 = vld [vmem:[%s16092_s2 + $0xa8] sm:$0xff]   ;;  %v12295_v50 = vld [vmem:[%s16092_s2 + $0xb0] sm:$0xff]  }
 0x470   : > { %v5243_v8 = vmul.f32 %v14939_v42, %v14939_v42  ;;  %v5766_v18 = vpack.c.bf16 %v5561_v11, %v5560_v10  ;;  %v5564_v52 = vmax.f32 %v5532_v29, 0.0  ;;  %v5498_v36 = vmul.f32 %v14801_v0, %v5462_v33  ;;  %v5669_v47 = vld [vmem:[#allocation2 + $0x78] sm:$0xff]  ;;  %v5671_v11 = vld [vmem:[#allocation2 + $0x90] sm:$0xff]  ;;  %v5676_v33 = vld [vmem:[#allocation2 + $0xc8] sm:$0xff] }
 0x471   : > { %v12400_v16 = vpop.eup %12399  ;;  %v5563_v58 = vmax.f32 %v5531_v7, 0.0  ;;  %v5497_v22 = vmul.f32 %v14801_v0, %v5461_v45  ;;  %v14978_v51 = vpack.c.bf16 %v5664_v43, %v5663_v20  ;;  %v14986_v25 = vpack.c.bf16 %v5666_v57, %v5665_v54  ;;  %v5674_v29 = vld [vmem:[#allocation2 + $0xb0] sm:$0xff]  ;;  %v5673_v7 = vld [vmem:[#allocation2 + $0xa8] sm:$0xff]  ;;  %v6208_v62 = vld [vmem:[#allocation2 + $0x1a] sm:$0xff] }
 0x472   : > { %v5275_v40 = vmul.f32 %v14426_v46, %v5243_v8  ;;  %v12402_v17 = vpop.eup %12401  ;;  %5651 = vst [vmem:[#allocation2 + $0x139] sm:$0xff] %v5564_v52  ;;  %v5534_v12 = vadd.f32 %v14807_v44, %v5498_v36  ;;  %v5464_v61 = vmul.f32 %v12400_v16, %v14773_v24  ;;  %v14991_v34 = vpack.c.bf16 %v5668_v21, %v5667_v28  ;;  %v5675_v8 = vld [vmem:[#allocation2 + $0xc0] sm:$0xff]  ;;  %v6210_v43 = vld [vmem:[#allocation2 + $0x32] sm:$0xff]  ;;  %v6212_v21 = vld [vmem:[#allocation2 + $0x4a] sm:$0xff] }
 0x473   : > { %5650 = vst [vmem:[#allocation2 + $0x129] sm:$0xff] %v5563_v58  ;;  %v5533_v63 = vadd.f32 %v14807_v44, %v5497_v22  ;;  %v5463_v14 = vmul.f32 %v12402_v17, %v14767_v59  ;;  %11236 = vmatmul.mubr.bf16.gmra.mrb[20].mxu1 %v5766_v18  ;;  %v5767_v2 = vpack.c.bf16 %v5563_v58, %v5562_v41  ;;  %v5670_v41 = vld [vmem:[#allocation2 + $0x80] sm:$0xff]  ;;  %v12296_v18 = vld [vmem:[%s16092_s2 + $0xb8] sm:$0xff]   ;;  %v5679_v17 = vld [vmem:[#allocation2 + $0xf0] sm:$0xff] }
 0x474   : > { %5338 = vadd.xlane.f32.xlu1 %v5275_v40  ;;  %v5566_v19 = vmax.f32 %v5534_v12, 0.0  ;;  %v5500_v27 = vmul.f32 %v14801_v0, %v5464_v61  ;;  %v14998_v32 = vpack.c.bf16 %v5670_v41, %v5669_v47  ;;  %v15003_v56 = vpack.c.bf16 %v5672_v60, %v5671_v11  ;;  %v12297_v36 = vld [vmem:[%s16092_s2 + $0xc0] sm:$0xff]   ;;  %v5680_v58 = vld [vmem:[#allocation2 + $0xf8] sm:$0xff]  ;;  %v12299_v57 = vld [vmem:[%s16092_s2 + $0xd0] sm:$0xff]  }
 0x475   : > { %v5565_v6 = vmax.f32 %v5533_v63, 0.0  ;;  %v5499_v9 = vmul.f32 %v14801_v0, %v5463_v14  ;;  %11239 = vmatprep.mubr.bf16.mxu1 %v5767_v2  ;;  %v15010_v45 = vpack.c.bf16 %v5674_v29, %v5673_v7  ;;  %v5678_v16 = vld [vmem:[#allocation2 + $0xe0] sm:$0xff]  ;;  %v5677_v22 = vld [vmem:[#allocation2 + $0xd8] sm:$0xff]  ;;  %v15024_v12 = vpack.c.bf16 %v5680_v58, %v5679_v17  ;;  %v5681_v14 = vld [vmem:[#allocation2 + $0x108] sm:$0xff] }
 0x476   : > { %v12404_v49 = vpop.eup %12403  ;;  %5653 = vst [vmem:[#allocation2 + $0x151] sm:$0xff] %v5566_v19  ;;  %v5536_v38 = vadd.f32 %v14807_v44, %v5500_v27  ;;  %v15022_v40 = vpack.c.bf16 %v5678_v16, %v5677_v22  ;;  %v5682_v61 = vld [vmem:[#allocation2 + $0x110] sm:$0xff]  ;;  %v6214_v28 = vld [vmem:[#allocation2 + $0x62] sm:$0xff]  ;;  %v12300_v41 = vld [vmem:[%s16092_s2 + $0xd8] sm:$0xff]  }
 0x477   : > { %5652 = vst [vmem:[#allocation2 + $0x141] sm:$0xff] %v5565_v6  ;;  %v5535_v24 = vadd.f32 %v14807_v44, %v5499_v9  ;;  %v5465_v37 = vmul.f32 %v12404_v49, %v14779_v35  ;;  %v5768_v59 = vpack.c.bf16 %v5565_v6, %v5564_v52  ;;  %v15015_v52 = vpack.c.bf16 %v5676_v33, %v5675_v8  ;;  %v6213_v54 = vld [vmem:[#allocation2 + $0x52] sm:$0xff]  ;;  %v12301_v47 = vld [vmem:[%s16092_s2 + $0xe0] sm:$0xff]   ;;  %v12302_v7 = vld [vmem:[%s16092_s2 + $0xe8] sm:$0xff]  }
 0x478   : > { %v5568_v48 = vmax.f32 %v5536_v38, 0.0  ;;  %v15028_v2 = vpack.c.bf16 %v5682_v61, %v5681_v14  ;;  %v6216_v11 = vld [vmem:[#allocation2 + $0x7a] sm:$0xff]  ;;  %v6221_v16 = vld [vmem:[#allocation2 + $0xb2] sm:$0xff]  ;;  %v6222_v58 = vld [vmem:[#allocation2 + $0xc2] sm:$0xff] }
 0x479   : > { %v14960_v15 = vmax.f32 %v5535_v24, 0.0  ;;  %v5501_v53 = vmul.f32 %v14801_v0, %v5465_v37  ;;  %v5662_v0 = vld [vmem:[#allocation2 + $0x20] sm:$0xff]  ;;  %v5685_v49 = vld [vmem:[#allocation2 + $0x138] sm:$0xff]  ;;  %v6223_v22 = vld [vmem:[#allocation2 + $0xca] sm:$0xff] }
 0x47a   : > { %5655 = vst [vmem:[#allocation2 + $0x169] sm:$0xff] %v5568_v48  ;;  %v5684_v63 = vld [vmem:[#allocation2 + $0x128] sm:$0xff]  ;;  %v6219_v29 = vld [vmem:[#allocation2 + $0x9a] sm:$0xff] }
 0x47b   : > { %5654 = vst [vmem:[#allocation2 + $0x159] sm:$0xff] %v14960_v15  ;;  %v5537_v4 = vadd.f32 %v14807_v44, %v5501_v53  ;;  %11240 = vmatmul.mubr.bf16.gmra.mrb[24].mxu1 %v5768_v59  ;;  %v5769_v30 = vpack.c.bf16 %v14960_v15, %v5566_v19  ;;  %v14973_v44 = vpack.c.bf16 %v5662_v0, %v5661_v13  ;;  %v5683_v19 = vld [vmem:[#allocation2 + $0x120] sm:$0xff]  ;;  %v12304_v61 = vld [vmem:[%s16092_s2 + $0xf8] sm:$0xff]  }
 0x47c   : > { %v15030_v27 = vpack.c.bf16 %v5684_v63, %v5683_v19  ;;  %v6206_v59 = vld [vmem:[#allocation2 + $0x2] sm:$0xff]  ;;  %v6211_v13 = vld [vmem:[#allocation2 + $0x3a] sm:$0xff]  ;;  %v15084_v63 = vpack.c.bf16 %v6223_v22, %v6222_v58  ;;  %v12307_v58 = vld [vmem:[%s16092_s2 + $0x110] sm:$0xff]  }
 0x47d   : > { %v14966_v10 = vmax.f32 %v5537_v4, 0.0  ;;  %11243 = vmatprep.mubr.bf16.mxu1 %v5769_v30  ;;  %v5687_v24 = vld [vmem:[#allocation2 + $0x150] sm:$0xff]  ;;  %v6209_v0 = vld [vmem:[#allocation2 + $0x22] sm:$0xff]  ;;  %v6224_v19 = vld [vmem:[#allocation2 + $0xda] sm:$0xff] }
 0x47e   : > { %v5686_v6 = vld [vmem:[#allocation2 + $0x140] sm:$0xff]  ;;  %v15043_v20 = vpack.c.bf16 %v6209_v0, %v6208_v62 }
 0x47f   : > { %5656 = vst [vmem:[#allocation2 + $0x171] sm:$0xff] %v14966_v10  ;;  %v5770_v35 = vpack.c.bf16 %v14966_v10, %v5568_v48  ;;  %v15034_v38 = vpack.c.bf16 %v5686_v6, %v5685_v49  ;;  %v6207_v48 = vld [vmem:[#allocation2 + $0xa] sm:$0xff]  ;;  %v12305_v14 = vld [vmem:[%s16092_s2 + $0x100] sm:$0xff]  }
 0x480   : > { %v6238_v30 = vpack.c.bf16 %v6207_v48, %v6206_v59  ;;  %v6225_v6 = vld [vmem:[#allocation2 + $0xe2] sm:$0xff]  ;;  %v6227_v49 = vld [vmem:[#allocation2 + $0xfa] sm:$0xff]  ;;  %v6228_v48 = vld [vmem:[#allocation2 + $0x10a] sm:$0xff] }
 0x481   : > { %v5689_v4 = vld [vmem:[#allocation2 + $0x168] sm:$0xff] }
 0x482   : > { %v5688_v9 = vld [vmem:[#allocation2 + $0x158] sm:$0xff] }
 0x483   : > { %11244 = vmatmul.mubr.bf16.gmra.mrb[28].mxu1 %v5770_v35  ;;  %v15036_v37 = vpack.c.bf16 %v5688_v9, %v5687_v24  ;;  %v6226_v9 = vld [vmem:[#allocation2 + $0xf2] sm:$0xff]  ;;  %v15091_v24 = vpack.c.bf16 %v6225_v6, %v6224_v19 }
 0x484   : > { %11263 = vmatprep.mubr.bf16.mxu1 %v14970_v31  ;;  %v15093_v59 = vpack.c.bf16 %v6227_v49, %v6226_v9 }
 0x486   : > { %v5690_v53 = vld [vmem:[#allocation2 + $0x170] sm:$0xff] }
 0x487   : > { %v15040_v35 = vpack.c.bf16 %v5690_v53, %v5689_v4  ;;  %v6229_v53 = vld [vmem:[#allocation2 + $0x112] sm:$0xff]  ;;  %v6230_v4 = vld [vmem:[#allocation2 + $0x122] sm:$0xff] }
 0x488   : > { %v15097_v62 = vpack.c.bf16 %v6229_v53, %v6228_v48  ;;  %v12312_v53 = vld [vmem:[%s16092_s2 + $0x138] sm:$0xff]  }
 0x48b   : > { %11264 = vmatmul.mubr.bf16.vlgmr.msra.gmra.mrb[0].mxu1 %v14973_v44 }
 0x48c   : > { %11267 = vmatprep.mubr.bf16.mxu1 %v14978_v51  ;;  %11296 = vmatpush3.bf16.msra.mxu1 %v14918_v39  ;;  %v12293_v39 = vld [vmem:[%s16092_s2 + $0xa0] sm:$0xff]  }
 0x48d   : > { %11297 = vmatprep.subr.bf16.mxu1 %v12290_v55 }
 0x490   : > { %11298 = vmatpush3.bf16.msra.mxu1 %v12290_v55  ;;  %v12298_v55 = vld [vmem:[%s16092_s2 + $0xc8] sm:$0xff]  }
 0x491   : > { %11299 = vmatprep.subr.bf16.mxu1 %v12291_v3 }
 0x493   : > { %11268 = vmatmul.mubr.bf16.gmra.mrb[4].mxu1 %v14986_v25 }
 0x494   : > { %11271 = vmatprep.mubr.bf16.mxu1 %v14991_v34  ;;  %11300 = vmatpush3.bf16.msra.mxu1 %v12291_v3  ;;  %v15048_v3 = vpack.c.bf16 %v6211_v13, %v6210_v43  ;;  %v6232_v43 = vld [vmem:[#allocation2 + $0x13a] sm:$0xff]  ;;  %v6233_v13 = vld [vmem:[#allocation2 + $0x142] sm:$0xff] }
 0x495   : > { %11301 = vmatprep.subr.bf16.mxu1 %v12292_v26 }
 0x498   : > { %11302 = vmatpush3.bf16.msra.mxu1 %v12292_v26  ;;  %v6215_v26 = vld [vmem:[#allocation2 + $0x6a] sm:$0xff] }
 0x499   : > { %11303 = vmatprep.subr.bf16.mxu1 %v12293_v39  ;;  %v15060_v60 = vpack.c.bf16 %v6215_v26, %v6214_v28 }
 0x49b   : > { %11272 = vmatmul.mubr.bf16.gmra.mrb[8].mxu1 %v14998_v32 }
 0x49c   : > { %11275 = vmatprep.mubr.bf16.mxu1 %v15003_v56  ;;  %11304 = vmatpush3.bf16.msra.mxu1 %v12293_v39  ;;  %v15055_v39 = vpack.c.bf16 %v6213_v54, %v6212_v21  ;;  %v15103_v21 = vpack.c.bf16 %v6233_v13, %v6232_v43  ;;  %v6820_v13 = vld [vmem:[#allocation2 + $0x31] sm:$0xff] }
 0x49d   : > { %11305 = vmatprep.subr.bf16.mxu1 %v12294_v5 }
 0x4a0   : > { %11306 = vmatpush3.bf16.msra.mxu1 %v12294_v5  ;;  %v6217_v5 = vld [vmem:[#allocation2 + $0x82] sm:$0xff] }
 0x4a1   : > { %11307 = vmatprep.subr.bf16.mxu1 %v12295_v50  ;;  %v15067_v33 = vpack.c.bf16 %v6217_v5, %v6216_v11 }
 0x4a3   : > { %11276 = vmatmul.mubr.bf16.gmra.mrb[12].mxu1 %v15010_v45 }
 0x4a4   : > { %11279 = vmatprep.mubr.bf16.mxu1 %v15015_v52  ;;  %11308 = vmatpush3.bf16.msra.mxu1 %v12295_v50  ;;  %v6218_v50 = vld [vmem:[#allocation2 + $0x92] sm:$0xff] }
 0x4a5   : > { %11309 = vmatprep.subr.bf16.mxu1 %v12296_v18  ;;  %v15072_v8 = vpack.c.bf16 %v6219_v29, %v6218_v50 }
 0x4a8   : > { %11310 = vmatpush3.bf16.msra.mxu1 %v12296_v18  ;;  %v12303_v18 = vld [vmem:[%s16092_s2 + $0xf0] sm:$0xff]  }
 0x4a9   : > { %11343 = vmatprep.subr.bf16.mxu1 %v12297_v36 }
 0x4ab   : > { %11280 = vmatmul.mubr.bf16.gmra.mrb[16].mxu1 %v15022_v40 }
 0x4ac   : > { %11283 = vmatprep.mubr.bf16.mxu1 %v15024_v12 }
 0x4b3   : > { %11284 = vmatmul.mubr.bf16.gmra.mrb[20].mxu1 %v15028_v2 }
 0x4b4   : > { %11287 = vmatprep.mubr.bf16.mxu1 %v15030_v27 }
 0x4bb   : > { %11288 = vmatmul.mubr.bf16.gmra.mrb[24].mxu1 %v15034_v38 }
 0x4bc   : > { %11291 = vmatprep.mubr.bf16.mxu1 %v15036_v37 }
 0x4c3   : > { %11292 = vmatmul.mubr.bf16.gmra.mrb[28].mxu1 %v15040_v35 }
 0x4c4   : > { %11311 = vmatprep.mubr.bf16.mxu1 %v6238_v30  ;;  %v6231_v30 = vld [vmem:[#allocation2 + $0x12a] sm:$0xff] }
 0x4c5   : > { %v15099_v0 = vpack.c.bf16 %v6231_v30, %v6230_v4  ;;  %v6818_v30 = vld [vmem:[#allocation2 + $0x19] sm:$0xff] }
 0x4cb   : > { %11312 = vmatmul.mubr.bf16.vlgmr.msra.gmra.mrb[0].mxu1 %v15043_v20 }
 0x4cc   : > { %11315 = vmatprep.mubr.bf16.mxu1 %v15048_v3  ;;  %11344 = vmatpush3.bf16.msra.mxu1 %v12297_v36  ;;  %v6220_v36 = vld [vmem:[#allocation2 + $0xaa] sm:$0xff] }
 0x4cd   : > { %11345 = vmatprep.subr.bf16.mxu1 %v12298_v55  ;;  %v15079_v17 = vpack.c.bf16 %v6221_v16, %v6220_v36 }
 0x4d0   : > { %11346 = vmatpush3.bf16.msra.mxu1 %v12298_v55  ;;  %v6234_v55 = vld [vmem:[#allocation2 + $0x152] sm:$0xff] }
 0x4d1   : > { %11347 = vmatprep.subr.bf16.mxu1 %v12299_v57 }
 0x4d3   : > { %11316 = vmatmul.mubr.bf16.gmra.mrb[4].mxu1 %v15055_v39 }
 0x4d4   : > { %11319 = vmatprep.mubr.bf16.mxu1 %v15060_v60  ;;  %11348 = vmatpush3.bf16.msra.mxu1 %v12299_v57  ;;  %v6235_v57 = vld [vmem:[#allocation2 + $0x15a] sm:$0xff] }
 0x4d5   : > { %11349 = vmatprep.subr.bf16.mxu1 %v12300_v41  ;;  %v15105_v54 = vpack.c.bf16 %v6235_v57, %v6234_v55  ;;  %v12315_v55 = vld [vmem:[%s16092_s2 + $0x150] sm:$0xff]  }
 0x4d6   : > { %v6825_v57 = vld [vmem:[#allocation2 + $0x69] sm:$0xff] }
 0x4d8   : > { %11350 = vmatpush3.bf16.msra.mxu1 %v12300_v41  ;;  %v6236_v41 = vld [vmem:[#allocation2 + $0x16a] sm:$0xff] }
 0x4d9   : > { %11351 = vmatprep.subr.bf16.mxu1 %v12301_v47 }
 0x4db   : > { %11320 = vmatmul.mubr.bf16.gmra.mrb[8].mxu1 %v15067_v33 }
 0x4dc   : > { %11323 = vmatprep.mubr.bf16.mxu1 %v15072_v8  ;;  %11352 = vmatpush3.bf16.msra.mxu1 %v12301_v47  ;;  %v6237_v47 = vld [vmem:[#allocation2 + $0x172] sm:$0xff] }
 0x4dd   : > { %11353 = vmatprep.subr.bf16.mxu1 %v12302_v7  ;;  %v15109_v29 = vpack.c.bf16 %v6237_v47, %v6236_v41  ;;  %v6826_v47 = vld [vmem:[#allocation2 + $0x79] sm:$0xff] }
 0x4e0   : > { %11354 = vmatpush3.bf16.msra.mxu1 %v12302_v7 }
 0x4e1   : > { %11355 = vmatprep.subr.bf16.mxu1 %v12303_v18 }
 0x4e3   : > { %11324 = vmatmul.mubr.bf16.gmra.mrb[12].mxu1 %v15079_v17 }
 0x4e4   : > { %11327 = vmatprep.mubr.bf16.mxu1 %v15084_v63  ;;  %11356 = vmatpush3.bf16.msra.mxu1 %v12303_v18  ;;  %v12306_v18 = vld [vmem:[%s16092_s2 + $0x108] sm:$0xff]  }
 0x4e5   : > { %11357 = vmatprep.subr.bf16.mxu1 %v12304_v61 }
 0x4e8   : > { %11358 = vmatpush3.bf16.msra.mxu1 %v12304_v61 }
 0x4e9   : > { %11391 = vmatprep.subr.bf16.mxu1 %v12305_v14 }
 0x4eb   : > { %11328 = vmatmul.mubr.bf16.gmra.mrb[16].mxu1 %v15091_v24 }
 0x4ec   : > { %11331 = vmatprep.mubr.bf16.mxu1 %v15093_v59 }
 0x4f3   : > { %11332 = vmatmul.mubr.bf16.gmra.mrb[20].mxu1 %v15097_v62 }
 0x4f4   : > { %11335 = vmatprep.mubr.bf16.mxu1 %v15099_v0 }
 0x4fb   : > { %11336 = vmatmul.mubr.bf16.gmra.mrb[24].mxu1 %v15103_v21 }
 0x4fc   : > { %v5337_v28 = vpop.xlane.xlu0 %5336  ;;  %11339 = vmatprep.mubr.bf16.mxu1 %v15105_v54 }
 0x4fd   : > { %v5370_v26 = vmul.f32 0.0625, %v5337_v28  ;;  %v6827_v28 = vld [vmem:[#allocation2 + $0x81] sm:$0xff] }
 0x4ff   : > { %v5402_v11 = vadd.f32 1e-05, %v5370_v26  ;;  %v6824_v26 = vld [vmem:[#allocation2 + $0x61] sm:$0xff] }
 0x500   : > { %v15176_v41 = vpack.c.bf16 %v6825_v57, %v6824_v26  ;;  %v12322_v57 = vld [vmem:[%s16092_s2 + $0x188] sm:$0xff]  }
 0x501   : > { %v5339_v5 = vpop.xlane.xlu1 %5338  ;;  %12405 = vrsqrt.f32 %v5402_v11  ;;  %v12316_v11 = vld [vmem:[%s16092_s2 + $0x158] sm:$0xff]   ;;  %v7433_v26 = vld [vmem:[#allocation2 + $0x48] sm:$0xff] }
 0x502   : > { %v5371_v50 = vmul.f32 0.0625, %v5339_v5  ;;  %v15181_v5 = vpack.c.bf16 %v6827_v28, %v6826_v47  ;;  %v7435_v47 = vld [vmem:[#allocation2 + $0x60] sm:$0xff] }
 0x503   : > { %11340 = vmatmul.mubr.bf16.gmra.mrb[28].mxu1 %v15109_v29 }
 0x504   : > { %v5403_v7 = vadd.f32 1e-05, %v5371_v50  ;;  %11359 = vmatprep.mubr.bf16.mxu1 %v14973_v44  ;;  %v12487_v44 = vld [vmem:[%s16093_s3 + $0x1] ss:$0 sm:$0xff] }
 0x505   : > { %v12317_v50 = vld [vmem:[%s16092_s2 + $0x160] sm:$0xff]  }
 0x506   : > { %12407 = vrsqrt.f32 %v5403_v7  ;;  %v6829_v7 = vld [vmem:[#allocation2 + $0x99] sm:$0xff] }
 0x50b   : > { %v12406_v36 = vpop.eup %12405  ;;  %11360 = vmatmul.mubr.bf16.vlgmr.msra.gmra.mrb[0].mxu1 %v14978_v51  ;;  %v12488_v51 = vld [vmem:[%s16093_s3 + $0x2] ss:$0 sm:$0xff] }
 0x50c   : > { %v5466_v16 = vmul.f32 %v12406_v36, %v14927_v23  ;;  %11363 = vmatprep.mubr.bf16.mxu1 %v14986_v25  ;;  %11392 = vmatpush3.bf16.msra.mxu1 %v12305_v14  ;;  %v12308_v25 = vld [vmem:[%s16092_s2 + $0x118] sm:$0xff]  }
 0x50d   : > { %11393 = vmatprep.subr.bf16.mxu1 %v12306_v18  ;;  %v6828_v36 = vld [vmem:[#allocation2 + $0x91] sm:$0xff] }
 0x50e   : > { %v5502_v22 = vmul.f32 %v12487_v44, %v5466_v16  ;;  %v15188_v16 = vpack.c.bf16 %v6829_v7, %v6828_v36  ;;  %v7437_v7 = vld [vmem:[#allocation2 + $0x78] sm:$0xff]  ;;  %v7439_v36 = vld [vmem:[#allocation2 + $0x90] sm:$0xff] }
 0x510   : > { %v12408_v61 = vpop.eup %12407  ;;  %v5538_v19 = vadd.f32 %v12488_v51, %v5502_v22  ;;  %11394 = vmatpush3.bf16.msra.mxu1 %v12306_v18  ;;  %v6831_v18 = vld [vmem:[#allocation2 + $0xb1] sm:$0xff] }
 0x511   : > { %v5467_v23 = vmul.f32 %v12408_v61, %v14939_v42  ;;  %11395 = vmatprep.subr.bf16.mxu1 %v12307_v58  ;;  %v12309_v42 = vld [vmem:[%s16092_s2 + $0x120] sm:$0xff]   ;;  %v12319_v61 = vld [vmem:[%s16092_s2 + $0x170] sm:$0xff]  }
 0x512   : > { %v5570_v14 = vmax.f32 %v5538_v19, 0.0  ;;  %v6835_v19 = vld [vmem:[#allocation2 + $0xe1] sm:$0xff] }
 0x513   : > { %v5503_v6 = vmul.f32 %v12487_v44, %v5467_v23  ;;  %11364 = vmatmul.mubr.bf16.gmra.mrb[4].mxu1 %v14991_v34  ;;  %v12310_v34 = vld [vmem:[%s16092_s2 + $0x128] sm:$0xff]  }
 0x514   : > { %5657 = vst [vmem:[#allocation2 + $0x181] sm:$0xff] %v5570_v14  ;;  %11367 = vmatprep.mubr.bf16.mxu1 %v14998_v32  ;;  %11396 = vmatpush3.bf16.msra.mxu1 %v12307_v58  ;;  %v12311_v32 = vld [vmem:[%s16092_s2 + $0x130] sm:$0xff]   ;;  %v12318_v44 = vld [vmem:[%s16092_s2 + $0x168] sm:$0xff]  }
 0x515   : > { %v5539_v9 = vadd.f32 %v12488_v51, %v5503_v6  ;;  %11397 = vmatprep.subr.bf16.mxu1 %v12308_v25  ;;  %v6830_v58 = vld [vmem:[#allocation2 + $0xa9] sm:$0xff]  ;;  %v6832_v23 = vld [vmem:[#allocation2 + $0xc1] sm:$0xff]  ;;  %v12320_v6 = vld [vmem:[%s16092_s2 + $0x178] sm:$0xff]  }
 0x516   : > { %v15193_v22 = vpack.c.bf16 %v6831_v18, %v6830_v58  ;;  %v6833_v51 = vld [vmem:[#allocation2 + $0xc9] sm:$0xff]  ;;  %v12332_v58 = vld [vmem:[%s16092_s2 + $0x1d8] sm:$0xff]  }
 0x517   : > { %v5571_v49 = vmax.f32 %v5539_v9, 0.0 }
 0x518   : > { %11398 = vmatpush3.bf16.msra.mxu1 %v12308_v25  ;;  %v15200_v25 = vpack.c.bf16 %v6833_v51, %v6832_v23  ;;  %v7442_v51 = vld [vmem:[#allocation2 + $0xb0] sm:$0xff]  ;;  %v7441_v23 = vld [vmem:[#allocation2 + $0xa8] sm:$0xff] }
 0x519   : > { %5658 = vst [vmem:[#allocation2 + $0x189] sm:$0xff] %v5571_v49  ;;  %v15137_v48 = vpack.c.bf16 %v5571_v49, %v5570_v14  ;;  %11399 = vmatprep.subr.bf16.mxu1 %v12309_v42  ;;  %v6834_v14 = vld [vmem:[#allocation2 + $0xd9] sm:$0xff] }
 0x51a   : > { %v15205_v9 = vpack.c.bf16 %v6835_v19, %v6834_v14  ;;  %v6837_v49 = vld [vmem:[#allocation2 + $0xf9] sm:$0xff]  ;;  %v7444_v19 = vld [vmem:[#allocation2 + $0xc8] sm:$0xff]  ;;  %v7468_v14 = vpack.c.bf16 %v7442_v51, %v7441_v23 }
 0x51b   : > { %11368 = vmatmul.mubr.bf16.gmra.mrb[8].mxu1 %v15003_v56  ;;  %v12313_v56 = vld [vmem:[%s16092_s2 + $0x140] sm:$0xff]   ;;  %v8053_v23 = vld [vmem:[#allocation2 + $0xaa] sm:$0xff] }
 0x51c   : > { %11371 = vmatprep.mubr.bf16.mxu1 %v15010_v45  ;;  %11400 = vmatpush3.bf16.msra.mxu1 %v12309_v42  ;;  %v12321_v42 = vld [vmem:[%s16092_s2 + $0x180] sm:$0xff]  }
 0x51d   : > { %11401 = vmatprep.subr.bf16.mxu1 %v12310_v34 }
 0x520   : > { %11402 = vmatpush3.bf16.msra.mxu1 %v12310_v34  ;;  %v6543_v45 = vld [vmem:[#allocation2 + $0x188] sm:$0xff]  ;;  %v6839_v34 = vld [vmem:[#allocation2 + $0x111] sm:$0xff] }
 0x521   : > { %11403 = vmatprep.subr.bf16.mxu1 %v12311_v32 }
 0x523   : > { %11372 = vmatmul.mubr.bf16.gmra.mrb[12].mxu1 %v15015_v52  ;;  %v6819_v52 = vld [vmem:[#allocation2 + $0x21] sm:$0xff] }
 0x524   : > { %11375 = vmatprep.mubr.bf16.mxu1 %v15022_v40  ;;  %11404 = vmatpush3.bf16.msra.mxu1 %v12311_v32  ;;  %v6542_v40 = vld [vmem:[#allocation2 + $0x180] sm:$0xff]  ;;  %v6850_v43 = vpack.c.bf16 %v6819_v52, %v6818_v30  ;;  %v6836_v32 = vld [vmem:[#allocation2 + $0xf1] sm:$0xff]  ;;  %v6841_v52 = vld [vmem:[#allocation2 + $0x129] sm:$0xff] }
 0x525   : > { %11405 = vmatprep.subr.bf16.mxu1 %v12312_v53  ;;  %v15161_v4 = vpack.c.bf16 %v6543_v45, %v6542_v40  ;;  %v6843_v40 = vld [vmem:[#allocation2 + $0x141] sm:$0xff] }
 0x526   : > { %v6840_v30 = vld [vmem:[#allocation2 + $0x121] sm:$0xff] }
 0x528   : > { %11406 = vmatpush3.bf16.msra.mxu1 %v12312_v53  ;;  %v15212_v53 = vpack.c.bf16 %v6837_v49, %v6836_v32  ;;  %v7446_v32 = vld [vmem:[#allocation2 + $0xe0] sm:$0xff] }
 0x529   : > { %11439 = vmatprep.subr.bf16.mxu1 %v12313_v56 }
 0x52b   : > { %11376 = vmatmul.mubr.bf16.gmra.mrb[16].mxu1 %v15024_v12  ;;  %v6821_v12 = vld [vmem:[#allocation2 + $0x39] sm:$0xff] }
 0x52c   : > { %11379 = vmatprep.mubr.bf16.mxu1 %v15028_v2  ;;  %v6823_v2 = vld [vmem:[#allocation2 + $0x51] sm:$0xff] }
 0x533   : > { %11380 = vmatmul.mubr.bf16.gmra.mrb[20].mxu1 %v15030_v27  ;;  %v15164_v27 = vpack.c.bf16 %v6821_v12, %v6820_v13  ;;  %v6842_v12 = vld [vmem:[#allocation2 + $0x139] sm:$0xff]  ;;  %v15224_v13 = vld [vmem:[#allocation2 + $0x151] sm:$0xff] }
 0x534   : > { %11383 = vmatprep.mubr.bf16.mxu1 %v15034_v38  ;;  %v6822_v38 = vld [vmem:[#allocation2 + $0x49] sm:$0xff] }
 0x53b   : > { %11384 = vmatmul.mubr.bf16.gmra.mrb[24].mxu1 %v15036_v37  ;;  %v12314_v37 = vld [vmem:[%s16092_s2 + $0x148] sm:$0xff]  }
 0x53c   : > { %11387 = vmatprep.mubr.bf16.mxu1 %v15040_v35  ;;  %v15169_v35 = vpack.c.bf16 %v6823_v2, %v6822_v38  ;;  %v15220_v2 = vpack.c.bf16 %v6843_v40, %v6842_v12  ;;  %v15226_v38 = vld [vmem:[#allocation2 + $0x169] sm:$0xff]  ;;  %v12336_v12 = vld [vmem:[%s16092_s2 + $0x1f8] sm:$0xff]  }
 0x543   : > { %11388 = vmatmul.mubr.bf16.gmra.mrb[28].mxu1 %v15161_v4 }
 0x544   : > { %11407 = vmatprep.mubr.bf16.mxu1 %v6850_v43  ;;  %v15218_v43 = vpack.c.bf16 %v6841_v52, %v6840_v30  ;;  %v7445_v52 = vld [vmem:[#allocation2 + $0xd8] sm:$0xff]  ;;  %v7447_v30 = vld [vmem:[#allocation2 + $0xf0] sm:$0xff] }
 0x545   : > { %v7470_v40 = vpack.c.bf16 %v7446_v32, %v7445_v52  ;;  %v8057_v32 = vld [vmem:[#allocation2 + $0xda] sm:$0xff]  ;;  %v8059_v52 = vld [vmem:[#allocation2 + $0xf2] sm:$0xff] }
 0x54b   : > { %11408 = vmatmul.mubr.bf16.vlgmr.msra.gmra.mrb[0].mxu1 %v15164_v27 }
 0x54c   : > { %11411 = vmatprep.mubr.bf16.mxu1 %v15169_v35  ;;  %11440 = vmatpush3.bf16.msra.mxu1 %v12313_v56  ;;  %v6838_v56 = vld [vmem:[#allocation2 + $0x109] sm:$0xff] }
 0x54d   : > { %11441 = vmatprep.subr.bf16.mxu1 %v12314_v37  ;;  %v15214_v45 = vpack.c.bf16 %v6839_v34, %v6838_v56  ;;  %v12335_v34 = vld [vmem:[%s16092_s2 + $0x1f0] sm:$0xff]   ;;  %v7448_v56 = vld [vmem:[#allocation2 + $0xf8] sm:$0xff] }
 0x550   : > { %11442 = vmatpush3.bf16.msra.mxu1 %v12314_v37  ;;  %v6863_v37 = vpack.c.bf16 %v14960_v15, %v15224_v13  ;;  %v12323_v15 = vld [vmem:[%s16092_s2 + $0x190] sm:$0xff]  }
 0x551   : > { %11443 = vmatprep.subr.bf16.mxu1 %v12315_v55 }
 0x553   : > { %11412 = vmatmul.mubr.bf16.gmra.mrb[4].mxu1 %v15176_v41 }
 0x554   : > { %11415 = vmatprep.mubr.bf16.mxu1 %v15181_v5  ;;  %11444 = vmatpush3.bf16.msra.mxu1 %v12315_v55  ;;  %v6864_v55 = vpack.c.bf16 %v14966_v10, %v15226_v38  ;;  %v12324_v10 = vld [vmem:[%s16092_s2 + $0x198] sm:$0xff]  }
 0x555   : > { %11445 = vmatprep.subr.bf16.mxu1 %v12316_v11 }
 0x558   : > { %11446 = vmatpush3.bf16.msra.mxu1 %v12316_v11  ;;  %v7438_v11 = vld [vmem:[#allocation2 + $0x80] sm:$0xff] }
 0x559   : > { %11447 = vmatprep.subr.bf16.mxu1 %v12317_v50  ;;  %v7466_v18 = vpack.c.bf16 %v7438_v11, %v7437_v7  ;;  %v8044_v11 = vld [vmem:[#allocation2 + $0x3a] sm:$0xff]  ;;  %v8048_v7 = vld [vmem:[#allocation2 + $0x6a] sm:$0xff] }
 0x55b   : > { %11416 = vmatmul.mubr.bf16.gmra.mrb[8].mxu1 %v15188_v16 }
 0x55c   : > { %11419 = vmatprep.mubr.bf16.mxu1 %v15193_v22  ;;  %11448 = vmatpush3.bf16.msra.mxu1 %v12317_v50  ;;  %v7440_v50 = vld [vmem:[#allocation2 + $0x98] sm:$0xff] }
 0x55d   : > { %11449 = vmatprep.subr.bf16.mxu1 %v12318_v44 }
 0x560   : > { %11450 = vmatpush3.bf16.msra.mxu1 %v12318_v44  ;;  %v7467_v44 = vpack.c.bf16 %v7440_v50, %v7439_v36  ;;  %v8046_v50 = vld [vmem:[#allocation2 + $0x52] sm:$0xff] }
 0x561   : > { %11451 = vmatprep.subr.bf16.mxu1 %v12319_v61 }
 0x563   : > { %11420 = vmatmul.mubr.bf16.gmra.mrb[12].mxu1 %v15200_v25 }
 0x564   : > { %11423 = vmatprep.mubr.bf16.mxu1 %v15205_v9  ;;  %11452 = vmatpush3.bf16.msra.mxu1 %v12319_v61  ;;  %v12333_v61 = vld [vmem:[%s16092_s2 + $0x1e0] sm:$0xff]  }
 0x565   : > { %11453 = vmatprep.subr.bf16.mxu1 %v12320_v6 }
 0x568   : > { %11454 = vmatpush3.bf16.msra.mxu1 %v12320_v6  ;;  %v7443_v6 = vld [vmem:[#allocation2 + $0xc0] sm:$0xff] }
 0x569   : > { %11487 = vmatprep.subr.bf16.mxu1 %v12321_v42  ;;  %v7469_v49 = vpack.c.bf16 %v7444_v19, %v7443_v6  ;;  %v8055_v6 = vld [vmem:[#allocation2 + $0xc2] sm:$0xff] }
 0x56b   : > { %11424 = vmatmul.mubr.bf16.gmra.mrb[16].mxu1 %v15212_v53 }
 0x56c   : > { %11427 = vmatprep.mubr.bf16.mxu1 %v15214_v45 }
 0x573   : > { %11428 = vmatmul.mubr.bf16.gmra.mrb[20].mxu1 %v15218_v43 }
 0x574   : > { %11431 = vmatprep.mubr.bf16.mxu1 %v15220_v2 }
 0x57b   : > { %11432 = vmatmul.mubr.bf16.gmra.mrb[24].mxu1 %v6863_v37  ;;  %v7471_v37 = vpack.c.bf16 %v7448_v56, %v7447_v30  ;;  %v8058_v56 = vld [vmem:[#allocation2 + $0xe2] sm:$0xff] }
 0x57c   : > { %11435 = vmatprep.mubr.bf16.mxu1 %v6864_v55  ;;  %v12337_v55 = vld [vmem:[%s16092_s2 + $0x200] sm:$0xff]   ;;  %v8082_v30 = vpack.c.bf16 %v8058_v56, %v8057_v32 }
 0x583   : > { %11436 = vmatmul.mubr.bf16.gmra.mrb[28].mxu1 %v15137_v48  ;;  %v7431_v48 = vld [vmem:[#allocation2 + $0x30] sm:$0xff] }
 0x584   : > { %11455 = vmatprep.mubr.bf16.mxu1 %v15043_v20  ;;  %v12325_v20 = vld [vmem:[%s16092_s2 + $0x1a0] sm:$0xff]  }
 0x58b   : > { %11456 = vmatmul.mubr.bf16.vlgmr.msra.gmra.mrb[0].mxu1 %v15048_v3  ;;  %v12326_v3 = vld [vmem:[%s16092_s2 + $0x1a8] sm:$0xff]  }
 0x58c   : > { %11459 = vmatprep.mubr.bf16.mxu1 %v15055_v39  ;;  %11488 = vmatpush3.bf16.msra.mxu1 %v12321_v42  ;;  %v12327_v39 = vld [vmem:[%s16092_s2 + $0x1b0] sm:$0xff]   ;;  %v12334_v42 = vld [vmem:[%s16092_s2 + $0x1e8] sm:$0xff]  }
 0x58d   : > { %11489 = vmatprep.subr.bf16.mxu1 %v12322_v57 }
 0x590   : > { %11490 = vmatpush3.bf16.msra.mxu1 %v12322_v57  ;;  %v7450_v57 = vld [vmem:[#allocation2 + $0x110] sm:$0xff] }
 0x591   : > { %11491 = vmatprep.subr.bf16.mxu1 %v12323_v15 }
 0x593   : > { %11460 = vmatmul.mubr.bf16.gmra.mrb[4].mxu1 %v15060_v60  ;;  %v12328_v60 = vld [vmem:[%s16092_s2 + $0x1b8] sm:$0xff]  }
 0x594   : > { %11463 = vmatprep.mubr.bf16.mxu1 %v15067_v33  ;;  %11492 = vmatpush3.bf16.msra.mxu1 %v12323_v15  ;;  %v12329_v33 = vld [vmem:[%s16092_s2 + $0x1c0] sm:$0xff]   ;;  %v7452_v15 = vld [vmem:[#allocation2 + $0x128] sm:$0xff] }
 0x595   : > { %11493 = vmatprep.subr.bf16.mxu1 %v12324_v10 }
 0x598   : > { %11494 = vmatpush3.bf16.msra.mxu1 %v12324_v10  ;;  %v7449_v10 = vld [vmem:[#allocation2 + $0x108] sm:$0xff] }
 0x599   : > { %11495 = vmatprep.subr.bf16.mxu1 %v12325_v20 }
 0x59b   : > { %11464 = vmatmul.mubr.bf16.gmra.mrb[8].mxu1 %v15072_v8  ;;  %v7154_v8 = vld [vmem:[#allocation2 + $0x182] sm:$0xff] }
 0x59c   : > { %11467 = vmatprep.mubr.bf16.mxu1 %v15079_v17  ;;  %11496 = vmatpush3.bf16.msra.mxu1 %v12325_v20  ;;  %v7155_v17 = vld [vmem:[#allocation2 + $0x18a] sm:$0xff]  ;;  %v7472_v20 = vpack.c.bf16 %v7450_v57, %v7449_v10  ;;  %v8063_v57 = vld [vmem:[#allocation2 + $0x122] sm:$0xff] }
 0x59d   : > { %11497 = vmatprep.subr.bf16.mxu1 %v12326_v3 }
 0x5a0   : > { %11498 = vmatpush3.bf16.msra.mxu1 %v12326_v3  ;;  %v7451_v3 = vld [vmem:[#allocation2 + $0x120] sm:$0xff] }
 0x5a1   : > { %11499 = vmatprep.subr.bf16.mxu1 %v12327_v39 }
 0x5a3   : > { %11468 = vmatmul.mubr.bf16.gmra.mrb[12].mxu1 %v15084_v63  ;;  %v7432_v63 = vld [vmem:[#allocation2 + $0x38] sm:$0xff] }
 0x5a4   : > { %11471 = vmatprep.mubr.bf16.mxu1 %v15091_v24  ;;  %11500 = vmatpush3.bf16.msra.mxu1 %v12327_v39  ;;  %v15272_v24 = vpack.c.bf16 %v7155_v17, %v7154_v8  ;;  %v7463_v28 = vpack.c.bf16 %v7432_v63, %v7431_v48  ;;  %v7473_v39 = vpack.c.bf16 %v7452_v15, %v7451_v3  ;;  %v7453_v8 = vld [vmem:[#allocation2 + $0x138] sm:$0xff]  ;;  %v7455_v63 = vld [vmem:[#allocation2 + $0x150] sm:$0xff] }
 0x5a5   : > { %11501 = vmatprep.subr.bf16.mxu1 %v12328_v60  ;;  %v8064_v15 = vld [vmem:[#allocation2 + $0x12a] sm:$0xff]  ;;  %v8065_v3 = vld [vmem:[#allocation2 + $0x13a] sm:$0xff] }
 0x5a8   : > { %11502 = vmatpush3.bf16.msra.mxu1 %v12328_v60  ;;  %v7454_v60 = vld [vmem:[#allocation2 + $0x140] sm:$0xff] }
 0x5a9   : > { %11535 = vmatprep.subr.bf16.mxu1 %v12329_v33  ;;  %v7474_v17 = vpack.c.bf16 %v7454_v60, %v7453_v8  ;;  %v8067_v60 = vld [vmem:[#allocation2 + $0x152] sm:$0xff] }
 0x5ab   : > { %11472 = vmatmul.mubr.bf16.gmra.mrb[16].mxu1 %v15093_v59  ;;  %v7434_v59 = vld [vmem:[#allocation2 + $0x50] sm:$0xff] }
 0x5ac   : > { %11475 = vmatprep.mubr.bf16.mxu1 %v15097_v62  ;;  %v7436_v62 = vld [vmem:[#allocation2 + $0x68] sm:$0xff] }
 0x5b3   : > { %11476 = vmatmul.mubr.bf16.gmra.mrb[20].mxu1 %v15099_v0  ;;  %v7464_v0 = vpack.c.bf16 %v7434_v59, %v7433_v26  ;;  %v7457_v59 = vld [vmem:[#allocation2 + $0x168] sm:$0xff] }
 0x5b4   : > { %11479 = vmatprep.mubr.bf16.mxu1 %v15103_v21  ;;  %v12330_v21 = vld [vmem:[%s16092_s2 + $0x1c8] sm:$0xff]  }
 0x5b5   : > { %v12338_v26 = vld [vmem:[%s16092_s2 + $0x208] sm:$0xff]  }
 0x5bb   : > { %11480 = vmatmul.mubr.bf16.gmra.mrb[24].mxu1 %v15105_v54  ;;  %v7465_v54 = vpack.c.bf16 %v7436_v62, %v7435_v47 }
 0x5bc   : > { %11483 = vmatprep.mubr.bf16.mxu1 %v15109_v29  ;;  %v12331_v29 = vld [vmem:[%s16092_s2 + $0x1d0] sm:$0xff]  }
 0x5c3   : > { %11484 = vmatmul.mubr.bf16.gmra.mrb[28].mxu1 %v15272_v24 }
 0x5c4   : > { %11503 = vmatprep.mubr.bf16.mxu1 %v7463_v28  ;;  %v7458_v28 = vld [vmem:[#allocation2 + $0x170] sm:$0xff] }
 0x5c5   : > { %v7476_v62 = vpack.c.bf16 %v7458_v28, %v7457_v59  ;;  %v8073_v59 = vld [vmem:[#allocation2 + $0x19a] sm:$0xff] }
 0x5cb   : > { %11504 = vmatmul.mubr.bf16.vlgmr.msra.gmra.mrb[0].mxu1 %v7464_v0  ;;  %v12339_v0 = vld [vmem:[%s16092_s2 + $0x210] sm:$0xff]  }
 0x5cc   : > { %11507 = vmatprep.mubr.bf16.mxu1 %v7465_v54  ;;  %11536 = vmatpush3.bf16.msra.mxu1 %v12329_v33  ;;  %v7456_v33 = vld [vmem:[#allocation2 + $0x158] sm:$0xff]  ;;  %v7768_v54 = vld [vmem:[#allocation2 + $0x1a1] sm:$0xff] }
 0x5cd   : > { %11537 = vmatprep.subr.bf16.mxu1 %v12330_v21  ;;  %v7475_v48 = vpack.c.bf16 %v7456_v33, %v7455_v63  ;;  %v8068_v33 = vld [vmem:[#allocation2 + $0x15a] sm:$0xff]  ;;  %v8069_v63 = vld [vmem:[#allocation2 + $0x16a] sm:$0xff] }
 0x5d0   : > { %11538 = vmatpush3.bf16.msra.mxu1 %v12330_v21 }
 0x5d1   : > { %11539 = vmatprep.subr.bf16.mxu1 %v12331_v29 }
 0x5d3   : > { %11508 = vmatmul.mubr.bf16.gmra.mrb[4].mxu1 %v7466_v18 }
 0x5d4   : > { %11511 = vmatprep.mubr.bf16.mxu1 %v7467_v44  ;;  %11540 = vmatpush3.bf16.msra.mxu1 %v12331_v29  ;;  %v8051_v44 = vld [vmem:[#allocation2 + $0x92] sm:$0xff] }
 0x5d5   : > { %11541 = vmatprep.subr.bf16.mxu1 %v12332_v58 }
 0x5d8   : > { %11542 = vmatpush3.bf16.msra.mxu1 %v12332_v58  ;;  %v8050_v58 = vld [vmem:[#allocation2 + $0x82] sm:$0xff] }
 0x5d9   : > { %11543 = vmatprep.subr.bf16.mxu1 %v12333_v61 }
 0x5db   : > { %11512 = vmatmul.mubr.bf16.gmra.mrb[8].mxu1 %v7468_v14  ;;  %v8054_v14 = vld [vmem:[#allocation2 + $0xb2] sm:$0xff] }
 0x5dc   : > { %11515 = vmatprep.mubr.bf16.mxu1 %v7469_v49  ;;  %11544 = vmatpush3.bf16.msra.mxu1 %v12333_v61  ;;  %v8052_v61 = vld [vmem:[#allocation2 + $0x9a] sm:$0xff]  ;;  %v8080_v49 = vpack.c.bf16 %v8054_v14, %v8053_v23 }
 0x5dd   : > { %11545 = vmatprep.subr.bf16.mxu1 %v12334_v42  ;;  %v8079_v19 = vpack.c.bf16 %v8052_v61, %v8051_v44 }
 0x5e0   : > { %11546 = vmatpush3.bf16.msra.mxu1 %v12334_v42  ;;  %v8056_v42 = vld [vmem:[#allocation2 + $0xca] sm:$0xff] }
 0x5e1   : > { %11547 = vmatprep.subr.bf16.mxu1 %v12335_v34 }
 0x5e3   : > { %11516 = vmatmul.mubr.bf16.gmra.mrb[12].mxu1 %v7470_v40  ;;  %v8060_v40 = vld [vmem:[#allocation2 + $0xfa] sm:$0xff] }
 0x5e4   : > { %11519 = vmatprep.mubr.bf16.mxu1 %v7471_v37  ;;  %11548 = vmatpush3.bf16.msra.mxu1 %v12335_v34  ;;  %v8081_v34 = vpack.c.bf16 %v8056_v42, %v8055_v6  ;;  %v8061_v37 = vld [vmem:[#allocation2 + $0x10a] sm:$0xff] }
 0x5e5   : > { %11549 = vmatprep.subr.bf16.mxu1 %v12336_v12 }
 0x5e8   : > { %11550 = vmatpush3.bf16.msra.mxu1 %v12336_v12  ;;  %v8083_v12 = vpack.c.bf16 %v8060_v40, %v8059_v52 }
 0x5e9   : > { %11583 = vmatprep.subr.bf16.mxu1 %v12337_v55 }
 0x5eb   : > { %11520 = vmatmul.mubr.bf16.gmra.mrb[16].mxu1 %v7472_v20  ;;  %v8085_v20 = vpack.c.bf16 %v8064_v15, %v8063_v57 }
 0x5ec   : > { %11523 = vmatprep.mubr.bf16.mxu1 %v7473_v39  ;;  %v8066_v39 = vld [vmem:[#allocation2 + $0x142] sm:$0xff] }
 0x5ed   : > { %v8086_v8 = vpack.c.bf16 %v8066_v39, %v8065_v3 }
 0x5f3   : > { %11524 = vmatmul.mubr.bf16.gmra.mrb[20].mxu1 %v7474_v17  ;;  %v8087_v17 = vpack.c.bf16 %v8068_v33, %v8067_v60 }
 0x5f4   : > { %11527 = vmatprep.mubr.bf16.mxu1 %v7475_v48  ;;  %v8070_v48 = vld [vmem:[#allocation2 + $0x172] sm:$0xff] }
 0x5f5   : > { %v8088_v28 = vpack.c.bf16 %v8070_v48, %v8069_v63 }
 0x5fb   : > { %11528 = vmatmul.mubr.bf16.gmra.mrb[24].mxu1 %v7476_v62  ;;  %v8074_v62 = vld [vmem:[#allocation2 + $0x1a2] sm:$0xff] }
 0x5fc   : > { %11531 = vmatprep.mubr.bf16.mxu1 %v15161_v4  ;;  %v12341_v4 = vld [vmem:[%s16092_s2 + $0x220] sm:$0xff]  }
 0x603   : > { %11532 = vmatmul.mubr.bf16.gmra.mrb[28].mxu1 %v14970_v31  ;;  %v12340_v31 = vld [vmem:[%s16092_s2 + $0x218] sm:$0xff]  }
 0x604   : > { %11551 = vmatprep.mubr.bf16.mxu1 %v15164_v27  ;;  %v12342_v27 = vld [vmem:[%s16092_s2 + $0x228] sm:$0xff]  }
 0x60b   : > { %11552 = vmatmul.mubr.bf16.vlgmr.msra.gmra.mrb[0].mxu1 %v15169_v35  ;;  %v12343_v35 = vld [vmem:[%s16092_s2 + $0x230] sm:$0xff]  }
 0x60c   : > { %11555 = vmatprep.mubr.bf16.mxu1 %v15176_v41  ;;  %11584 = vmatpush3.bf16.msra.mxu1 %v12337_v55  ;;  %v12344_v41 = vld [vmem:[%s16092_s2 + $0x238] sm:$0xff]  }
 0x60d   : > { %11585 = vmatprep.subr.bf16.mxu1 %v12338_v26  ;;  %v8062_v55 = vld [vmem:[#allocation2 + $0x112] sm:$0xff] }
 0x60e   : > { %v8084_v10 = vpack.c.bf16 %v8062_v55, %v8061_v37 }
 0x610   : > { %11586 = vmatpush3.bf16.msra.mxu1 %v12338_v26  ;;  %v8090_v26 = vpack.c.bf16 %v8074_v62, %v8073_v59 }
 0x611   : > { %11587 = vmatprep.subr.bf16.mxu1 %v12339_v0 }
 0x613   : > { %11556 = vmatmul.mubr.bf16.gmra.mrb[4].mxu1 %v15181_v5  ;;  %v7762_v5 = vld [vmem:[#allocation2 + $0x159] sm:$0xff] }
 0x614   : > { %11559 = vmatprep.mubr.bf16.mxu1 %v15188_v16  ;;  %11588 = vmatpush3.bf16.msra.mxu1 %v12339_v0  ;;  %v7781_v16 = vpack.c.bf16 %v7762_v5, %v15224_v13  ;;  %v8045_v13 = vld [vmem:[#allocation2 + $0x4a] sm:$0xff] }
 0x615   : > { %11589 = vmatprep.subr.bf16.mxu1 %v12340_v31  ;;  %v8076_v18 = vpack.c.bf16 %v8046_v50, %v8045_v13 }
 0x618   : > { %11590 = vmatpush3.bf16.msra.mxu1 %v12340_v31 }
 0x619   : > { %11591 = vmatprep.subr.bf16.mxu1 %v12341_v4 }
 0x61b   : > { %11560 = vmatmul.mubr.bf16.gmra.mrb[8].mxu1 %v15193_v22  ;;  %v7764_v22 = vld [vmem:[#allocation2 + $0x171] sm:$0xff] }
 0x61c   : > { %11563 = vmatprep.mubr.bf16.mxu1 %v15200_v25  ;;  %11592 = vmatpush3.bf16.msra.mxu1 %v12341_v4  ;;  %v7766_v25 = vld [vmem:[#allocation2 + $0x189] sm:$0xff]  ;;  %v7782_v47 = vpack.c.bf16 %v7764_v22, %v15226_v38  ;;  %v8049_v38 = vld [vmem:[#allocation2 + $0x7a] sm:$0xff] }
 0x61d   : > { %11593 = vmatprep.subr.bf16.mxu1 %v12342_v27  ;;  %v8078_v51 = vpack.c.bf16 %v8050_v58, %v8049_v38 }
 0x620   : > { %11594 = vmatpush3.bf16.msra.mxu1 %v12342_v27 }
 0x621   : > { %11595 = vmatprep.subr.bf16.mxu1 %v12343_v35 }
 0x623   : > { %11564 = vmatmul.mubr.bf16.gmra.mrb[12].mxu1 %v15205_v9  ;;  %v7765_v9 = vld [vmem:[#allocation2 + $0x181] sm:$0xff] }
 0x624   : > { %11567 = vmatprep.mubr.bf16.mxu1 %v15212_v53  ;;  %11596 = vmatpush3.bf16.msra.mxu1 %v12343_v35  ;;  %v7783_v21 = vpack.c.bf16 %v7766_v25, %v7765_v9  ;;  %v7767_v53 = vld [vmem:[#allocation2 + $0x199] sm:$0xff] }
 0x625   : > { %11597 = vmatprep.subr.bf16.mxu1 %v12344_v41  ;;  %v7784_v29 = vpack.c.bf16 %v7768_v54, %v7767_v53 }
 0x628   : > { %11598 = vmatpush3.bf16.msra.mxu1 %v12344_v41 }
 0x62b   : > { %11568 = vmatmul.mubr.bf16.gmra.mrb[16].mxu1 %v15214_v45  ;;  %v8043_v45 = vld [vmem:[#allocation2 + $0x32] sm:$0xff] }
 0x62c   : > { %11571 = vmatprep.mubr.bf16.mxu1 %v15218_v43  ;;  %v8075_v43 = vpack.c.bf16 %v8044_v11, %v8043_v45 }
 0x633   : > { %11572 = vmatmul.mubr.bf16.gmra.mrb[20].mxu1 %v15220_v2  ;;  %v8047_v2 = vld [vmem:[#allocation2 + $0x62] sm:$0xff] }
 0x634   : > { %11575 = vmatprep.mubr.bf16.mxu1 %v7781_v16  ;;  %v8077_v36 = vpack.c.bf16 %v8048_v7, %v8047_v2 }
 0x63b   : > { %11576 = vmatmul.mubr.bf16.gmra.mrb[24].mxu1 %v7782_v47 }
 0x63c   : > { %11579 = vmatprep.mubr.bf16.mxu1 %v7783_v21 }
 0x643   : > { %11580 = vmatmul.mubr.bf16.gmra.mrb[28].mxu1 %v7784_v29 }
 0x644   : > { %11599 = vmatprep.mubr.bf16.mxu1 %v8075_v43 }
 0x64b   : > { %11600 = vmatmul.mubr.bf16.vlgmr.msra.gmra.mrb[0].mxu1 %v8076_v18 }
 0x64c   : > { %11603 = vmatprep.mubr.bf16.mxu1 %v8077_v36 }
 0x653   : > { %11604 = vmatmul.mubr.bf16.gmra.mrb[4].mxu1 %v8078_v51 }
 0x654   : > { %11607 = vmatprep.mubr.bf16.mxu1 %v8079_v19 }
 0x65b   : > { %11608 = vmatmul.mubr.bf16.gmra.mrb[8].mxu1 %v8080_v49 }
 0x65c   : > { %11611 = vmatprep.mubr.bf16.mxu1 %v8081_v34 }
 0x663   : > { %11612 = vmatmul.mubr.bf16.gmra.mrb[12].mxu1 %v8082_v30 }
 0x664   : > { %11615 = vmatprep.mubr.bf16.mxu1 %v8083_v12 }
 0x66b   : > { %11616 = vmatmul.mubr.bf16.gmra.mrb[16].mxu1 %v8084_v10 }
 0x66c   : > { %11619 = vmatprep.mubr.bf16.mxu1 %v8085_v20 }
 0x673   : > { %11620 = vmatmul.mubr.bf16.gmra.mrb[20].mxu1 %v8086_v8 }
 0x674   : > { %11623 = vmatprep.mubr.bf16.mxu1 %v8087_v17 }
 0x67b   : > { %11624 = vmatmul.mubr.bf16.gmra.mrb[24].mxu1 %v8088_v28 }
 0x67c   : > { %11627 = vmatprep.mubr.bf16.mxu1 %v15272_v24 }
 0x683   : > { %11628 = vmatmul.mubr.bf16.gmra.mrb[28].mxu1 %v8090_v26 }
 0x71e   : > { %v15337_v0 = vpop.f32.mrb[0].mxu1 }
 0x71f   : > { %v15339_v31 = vpop.f32.mrb[1].mxu1  ;;  %v8353_v4 = vmul.f32 %v15337_v0, %v14426_v46 }
 0x720   : > { %v15343_v27 = vpop.f32.mrb[2].mxu1  ;;  %v8351_v24 = vmul.f32 %v14426_v46, %v15339_v31 }
 0x721   : > { %8387 = vadd.xlane.f32.xlu0 %v8353_v4  ;;  %v15345_v35 = vpop.f32.mrb[3].mxu1  ;;  %v8354_v41 = vmul.f32 %v15343_v27, %v14426_v46 }
 0x722   : > { %v8352_v5 = vmul.f32 %v14426_v46, %v15345_v35 }
 0x723   : > { %8389 = vadd.xlane.f32.xlu1 %v8354_v41 }
 0x725   : > { %8383 = vadd.xlane.f32.xlu0 %v8351_v24 }
 0x726   : > { %v15353_v16 = vpop.f32.mrb[4].mxu1 }
 0x727   : > { %8385 = vadd.xlane.f32.xlu1 %v8352_v5  ;;  %v15355_v22 = vpop.f32.mrb[5].mxu1  ;;  %v8357_v25 = vmul.f32 %v15353_v16, %v14426_v46 }
 0x728   : > { %v15359_v47 = vpop.f32.mrb[6].mxu1  ;;  %v8355_v53 = vmul.f32 %v14426_v46, %v15355_v22 }
 0x729   : > { %8395 = vadd.xlane.f32.xlu0 %v8357_v25  ;;  %v15361_v9 = vpop.f32.mrb[7].mxu1  ;;  %v8358_v21 = vmul.f32 %v15359_v47, %v14426_v46 }
 0x72a   : > { %v8356_v54 = vmul.f32 %v14426_v46, %v15361_v9 }
 0x72b   : > { %8397 = vadd.xlane.f32.xlu1 %v8358_v21 }
 0x72d   : > { %8391 = vadd.xlane.f32.xlu0 %v8355_v53 }
 0x72e   : > { %v15369_v29 = vpop.f32.mrb[8].mxu1 }
 0x72f   : > { %8393 = vadd.xlane.f32.xlu1 %v8356_v54  ;;  %v15371_v45 = vpop.f32.mrb[9].mxu1  ;;  %v8361_v11 = vmul.f32 %v15369_v29, %v14426_v46 }
 0x730   : > { %v15375_v43 = vpop.f32.mrb[10].mxu1  ;;  %v8359_v2 = vmul.f32 %v14426_v46, %v15371_v45 }
 0x731   : > { %8403 = vadd.xlane.f32.xlu0 %v8361_v11  ;;  %v15377_v13 = vpop.f32.mrb[11].mxu1  ;;  %v8362_v50 = vmul.f32 %v15375_v43, %v14426_v46 }
 0x732   : > { %v8360_v7 = vmul.f32 %v14426_v46, %v15377_v13 }
 0x733   : > { %8405 = vadd.xlane.f32.xlu1 %v8362_v50 }
 0x735   : > { %8399 = vadd.xlane.f32.xlu0 %v8359_v2 }
 0x736   : > { %v15385_v18 = vpop.f32.mrb[12].mxu1 }
 0x737   : > { %8401 = vadd.xlane.f32.xlu1 %v8360_v7  ;;  %v15387_v36 = vpop.f32.mrb[13].mxu1  ;;  %v8365_v38 = vmul.f32 %v15385_v18, %v14426_v46 }
 0x738   : > { %v15391_v58 = vpop.f32.mrb[14].mxu1  ;;  %v8363_v51 = vmul.f32 %v14426_v46, %v15387_v36 }
 0x739   : > { %8411 = vadd.xlane.f32.xlu0 %v8365_v38  ;;  %v15393_v44 = vpop.f32.mrb[15].mxu1  ;;  %v8366_v61 = vmul.f32 %v15391_v58, %v14426_v46 }
 0x73a   : > { %v8364_v19 = vmul.f32 %v14426_v46, %v15393_v44 }
 0x73b   : > { %8413 = vadd.xlane.f32.xlu1 %v8366_v61 }
 0x73d   : > { %8407 = vadd.xlane.f32.xlu0 %v8363_v51 }
 0x73e   : > { %v15401_v23 = vpop.f32.mrb[16].mxu1 }
 0x73f   : > { %8409 = vadd.xlane.f32.xlu1 %v8364_v19  ;;  %v15403_v14 = vpop.f32.mrb[17].mxu1  ;;  %v8369_v6 = vmul.f32 %v15401_v23, %v14426_v46 }
 0x740   : > { %v15407_v42 = vpop.f32.mrb[18].mxu1  ;;  %v8367_v32 = vmul.f32 %v14426_v46, %v15403_v14 }
 0x741   : > { %8419 = vadd.xlane.f32.xlu0 %v8369_v6  ;;  %v15409_v49 = vpop.f32.mrb[19].mxu1  ;;  %v8370_v34 = vmul.f32 %v15407_v42, %v14426_v46 }
 0x742   : > { %v8368_v56 = vmul.f32 %v14426_v46, %v15409_v49 }
 0x743   : > { %8421 = vadd.xlane.f32.xlu1 %v8370_v34 }
 0x745   : > { %8415 = vadd.xlane.f32.xlu0 %v8367_v32 }
 0x746   : > { %v15417_v52 = vpop.f32.mrb[20].mxu1 }
 0x747   : > { %8417 = vadd.xlane.f32.xlu1 %v8368_v56  ;;  %v15419_v40 = vpop.f32.mrb[21].mxu1  ;;  %v8373_v30 = vmul.f32 %v15417_v52, %v14426_v46 }
 0x748   : > { %v15423_v12 = vpop.f32.mrb[22].mxu1  ;;  %v8371_v57 = vmul.f32 %v14426_v46, %v15419_v40 }
 0x749   : > { %8427 = vadd.xlane.f32.xlu0 %v8373_v30  ;;  %v15425_v37 = vpop.f32.mrb[23].mxu1  ;;  %v8374_v55 = vmul.f32 %v15423_v12, %v14426_v46 }
 0x74a   : > { %v8372_v15 = vmul.f32 %v14426_v46, %v15425_v37 }
 0x74b   : > { %8429 = vadd.xlane.f32.xlu1 %v8374_v55 }
 0x74d   : > { %8423 = vadd.xlane.f32.xlu0 %v8371_v57 }
 0x74e   : > { %v15433_v10 = vpop.f32.mrb[24].mxu1 }
 0x74f   : > { %8425 = vadd.xlane.f32.xlu1 %v8372_v15  ;;  %v15435_v20 = vpop.f32.mrb[25].mxu1  ;;  %v8377_v3 = vmul.f32 %v15433_v10, %v14426_v46 }
 0x750   : > { %v15439_v39 = vpop.f32.mrb[26].mxu1  ;;  %v8375_v8 = vmul.f32 %v14426_v46, %v15435_v20 }
 0x751   : > { %8435 = vadd.xlane.f32.xlu0 %v8377_v3  ;;  %v15441_v60 = vpop.f32.mrb[27].mxu1  ;;  %v8378_v33 = vmul.f32 %v15439_v39, %v14426_v46 }
 0x752   : > { %v8376_v17 = vmul.f32 %v14426_v46, %v15441_v60 }
 0x753   : > { %8437 = vadd.xlane.f32.xlu1 %v8378_v33 }
 0x755   : > { %8431 = vadd.xlane.f32.xlu0 %v8375_v8 }
 0x756   : > { %v15449_v63 = vpop.f32.mrb[28].mxu1 }
 0x757   : > { %8433 = vadd.xlane.f32.xlu1 %v8376_v17  ;;  %v15451_v48 = vpop.f32.mrb[29].mxu1  ;;  %v8381_v4 = vmul.f32 %v15449_v63, %v14426_v46 }
 0x758   : > { %v15453_v28 = vpop.f32.mrb[30].mxu1  ;;  %v8379_v59 = vmul.f32 %v14426_v46, %v15451_v48 }
 0x759   : > { %v15457_v62 = vpop.f32.mrb[31].mxu1  ;;  %v8382_v41 = vmul.f32 %v15453_v28, %v14426_v46 }
 0x75a   : > { %v8380_v26 = vmul.f32 %v14426_v46, %v15457_v62  ;;  %8439 = vadd.xlane.f32.xlu0 %v8379_v59 }
 0x75c   : > { %8441 = vadd.xlane.f32.xlu1 %v8380_v26 }
 0x75e   : > { %8443 = vadd.xlane.f32.xlu0 %v8381_v4 }
 0x760   : > { %8445 = vadd.xlane.f32.xlu1 %v8382_v41 }
 0x7ae   : > { %v8388_v24 = vpop.xlane.xlu0 %8387 }
 0x7af   : > { %v8449_v5 = vmul.f32 0.0625, %v8388_v24 }
 0x7b0   : > { %v8390_v25 = vpop.xlane.xlu1 %8389 }
 0x7b1   : > { %v15466_v21 = vsub.f32 %v15337_v0, %v8449_v5  ;;  %v8450_v53 = vmul.f32 0.0625, %v8390_v25 }
 0x7b2   : > { %v8384_v54 = vpop.xlane.xlu0 %8383 }
 0x7b3   : > { %v15469_v11 = vsub.f32 %v15343_v27, %v8450_v53  ;;  %v8447_v50 = vmul.f32 0.0625, %v8384_v54  ;;  %v8513_v2 = vmul.f32 %v15466_v21, %v15466_v21 }
 0x7b4   : > { %v8386_v7 = vpop.xlane.xlu1 %8385 }
 0x7b5   : > { %v15474_v38 = vsub.f32 %v15339_v31, %v8447_v50  ;;  %v8448_v61 = vmul.f32 0.0625, %v8386_v7  ;;  %v8545_v51 = vmul.f32 %v14426_v46, %v8513_v2  ;;  %v8514_v0 = vmul.f32 %v15469_v11, %v15469_v11 }
 0x7b6   : > { %v8396_v19 = vpop.xlane.xlu0 %8395 }
 0x7b7   : > { %v8511_v6 = vmul.f32 %v15474_v38, %v15474_v38  ;;  %v15482_v27 = vsub.f32 %v15345_v35, %v8448_v61  ;;  %v8453_v34 = vmul.f32 0.0625, %v8396_v19  ;;  %8579 = vadd.xlane.f32.xlu0 %v8545_v51  ;;  %v8546_v32 = vmul.f32 %v14426_v46, %v8514_v0 }
 0x7b8   : > { %v8398_v56 = vpop.xlane.xlu1 %8397 }
 0x7b9   : > { %v8512_v31 = vmul.f32 %v15482_v27, %v15482_v27  ;;  %v15488_v30 = vsub.f32 %v15353_v16, %v8453_v34  ;;  %v8454_v55 = vmul.f32 0.0625, %v8398_v56  ;;  %8581 = vadd.xlane.f32.xlu1 %v8546_v32  ;;  %v8543_v57 = vmul.f32 %v14426_v46, %v8511_v6 }
 0x7ba   : > { %v8392_v15 = vpop.xlane.xlu0 %8391 }
 0x7bb   : > { %v8517_v35 = vmul.f32 %v15488_v30, %v15488_v30  ;;  %v15494_v3 = vsub.f32 %v15359_v47, %v8454_v55  ;;  %v8451_v33 = vmul.f32 0.0625, %v8392_v15  ;;  %8575 = vadd.xlane.f32.xlu0 %v8543_v57  ;;  %v8544_v8 = vmul.f32 %v14426_v46, %v8512_v31 }
 0x7bc   : > { %v8394_v17 = vpop.xlane.xlu1 %8393 }
 0x7bd   : > { %v8518_v16 = vmul.f32 %v15494_v3, %v15494_v3  ;;  %v15500_v59 = vsub.f32 %v15355_v22, %v8451_v33  ;;  %v8452_v26 = vmul.f32 0.0625, %v8394_v17  ;;  %8577 = vadd.xlane.f32.xlu1 %v8544_v8  ;;  %v8549_v4 = vmul.f32 %v14426_v46, %v8517_v35 }
 0x7be   : > { %v8404_v41 = vpop.xlane.xlu0 %8403 }
 0x7bf   : > { %v8515_v47 = vmul.f32 %v15500_v59, %v15500_v59  ;;  %v15506_v24 = vsub.f32 %v15361_v9, %v8452_v26  ;;  %v8457_v5 = vmul.f32 0.0625, %v8404_v41  ;;  %8587 = vadd.xlane.f32.xlu0 %v8549_v4  ;;  %v8550_v25 = vmul.f32 %v14426_v46, %v8518_v16 }
 0x7c0   : > { %v8406_v53 = vpop.xlane.xlu1 %8405 }
 0x7c1   : > { %v8516_v22 = vmul.f32 %v15506_v24, %v15506_v24  ;;  %v15512_v54 = vsub.f32 %v15369_v29, %v8457_v5  ;;  %v8458_v50 = vmul.f32 0.0625, %v8406_v53  ;;  %8589 = vadd.xlane.f32.xlu1 %v8550_v25  ;;  %v8547_v2 = vmul.f32 %v14426_v46, %v8515_v47 }
 0x7c2   : > { %v8400_v7 = vpop.xlane.xlu0 %8399 }
 0x7c3   : > { %v8521_v9 = vmul.f32 %v15512_v54, %v15512_v54  ;;  %v15518_v61 = vsub.f32 %v15375_v43, %v8458_v50  ;;  %v8455_v51 = vmul.f32 0.0625, %v8400_v7  ;;  %8583 = vadd.xlane.f32.xlu0 %v8547_v2  ;;  %v8548_v0 = vmul.f32 %v14426_v46, %v8516_v22 }
 0x7c4   : > { %v8402_v19 = vpop.xlane.xlu1 %8401 }
 0x7c5   : > { %v8522_v29 = vmul.f32 %v15518_v61, %v15518_v61  ;;  %v15524_v6 = vsub.f32 %v15371_v45, %v8455_v51  ;;  %v8456_v34 = vmul.f32 0.0625, %v8402_v19  ;;  %8585 = vadd.xlane.f32.xlu1 %v8548_v0  ;;  %v8553_v32 = vmul.f32 %v14426_v46, %v8521_v9 }
 0x7c6   : > { %v8412_v56 = vpop.xlane.xlu0 %8411 }
 0x7c7   : > { %v8519_v43 = vmul.f32 %v15524_v6, %v15524_v6  ;;  %v15530_v31 = vsub.f32 %v15377_v13, %v8456_v34  ;;  %v8461_v55 = vmul.f32 0.0625, %v8412_v56  ;;  %8595 = vadd.xlane.f32.xlu0 %v8553_v32  ;;  %v8554_v57 = vmul.f32 %v14426_v46, %v8522_v29 }
 0x7c8   : > { %v8414_v15 = vpop.xlane.xlu1 %8413 }
 0x7c9   : > { %v8520_v45 = vmul.f32 %v15530_v31, %v15530_v31  ;;  %v15536_v35 = vsub.f32 %v15385_v18, %v8461_v55  ;;  %v8462_v33 = vmul.f32 0.0625, %v8414_v15  ;;  %8597 = vadd.xlane.f32.xlu1 %v8554_v57  ;;  %v8551_v8 = vmul.f32 %v14426_v46, %v8519_v43 }
 0x7ca   : > { %v8408_v17 = vpop.xlane.xlu0 %8407 }
 0x7cb   : > { %v8525_v13 = vmul.f32 %v15536_v35, %v15536_v35  ;;  %v15542_v16 = vsub.f32 %v15391_v58, %v8462_v33  ;;  %v8459_v26 = vmul.f32 0.0625, %v8408_v17  ;;  %8591 = vadd.xlane.f32.xlu0 %v8551_v8  ;;  %v8552_v4 = vmul.f32 %v14426_v46, %v8520_v45 }
 0x7cc   : > { %v8410_v41 = vpop.xlane.xlu1 %8409 }
 0x7cd   : > { %v8526_v18 = vmul.f32 %v15542_v16, %v15542_v16  ;;  %v15548_v47 = vsub.f32 %v15387_v36, %v8459_v26  ;;  %v8460_v5 = vmul.f32 0.0625, %v8410_v41  ;;  %8593 = vadd.xlane.f32.xlu1 %v8552_v4  ;;  %v8557_v25 = vmul.f32 %v14426_v46, %v8525_v13 }
 0x7ce   : > { %v8420_v53 = vpop.xlane.xlu0 %8419 }
 0x7cf   : > { %16293 = vst [vmem:[#allocation11_spill] sm:$0xff] %v15548_v47  ;;  %v8523_v58 = vmul.f32 %v15548_v47, %v15548_v47  ;;  %v15554_v22 = vsub.f32 %v15393_v44, %v8460_v5  ;;  %v8465_v50 = vmul.f32 0.0625, %v8420_v53  ;;  %8603 = vadd.xlane.f32.xlu0 %v8557_v25  ;;  %v8558_v2 = vmul.f32 %v14426_v46, %v8526_v18 }
 0x7d0   : > { %v8422_v7 = vpop.xlane.xlu1 %8421 }
 0x7d1   : > { %16294 = vst [vmem:[#allocation18_spill] sm:$0xff] %v15554_v22  ;;  %v8524_v36 = vmul.f32 %v15554_v22, %v15554_v22  ;;  %v15560_v9 = vsub.f32 %v15401_v23, %v8465_v50  ;;  %v8466_v51 = vmul.f32 0.0625, %v8422_v7  ;;  %8605 = vadd.xlane.f32.xlu1 %v8558_v2  ;;  %v8555_v0 = vmul.f32 %v14426_v46, %v8523_v58  ;;  %v10316_v22 = vld [vmem:[%s12546_s26 + $0x8c] sm:$0x1] }
 0x7d2   : > { %v8416_v19 = vpop.xlane.xlu0 %8415 }
 0x7d3   : > { %16295 = vst [vmem:[#allocation19_spill] sm:$0xff] %v15560_v9  ;;  %v8529_v44 = vmul.f32 %v15560_v9, %v15560_v9  ;;  %v15566_v29 = vsub.f32 %v15407_v42, %v8466_v51  ;;  %v8463_v34 = vmul.f32 0.0625, %v8416_v19  ;;  %8599 = vadd.xlane.f32.xlu0 %v8555_v0  ;;  %v8556_v32 = vmul.f32 %v14426_v46, %v8524_v36  ;;  %v10324_v9 = vld [vmem:[%s12546_s26 + $0xac] sm:$0xf] }
 0x7d4   : > { %v8418_v56 = vpop.xlane.xlu1 %8417 }
 0x7d5   : > { %16296 = vst [vmem:[#allocation5_spill] sm:$0xff] %v15566_v29  ;;  %v8530_v23 = vmul.f32 %v15566_v29, %v15566_v29  ;;  %v15572_v43 = vsub.f32 %v15403_v14, %v8463_v34  ;;  %v8464_v55 = vmul.f32 0.0625, %v8418_v56  ;;  %8601 = vadd.xlane.f32.xlu1 %v8556_v32  ;;  %v8561_v57 = vmul.f32 %v14426_v46, %v8529_v44 }
 0x7d6   : > { %v8428_v15 = vpop.xlane.xlu0 %8427 }
 0x7d7   : > { %16297 = vst [vmem:[#allocation9_spill] sm:$0xff] %v15572_v43  ;;  %v8527_v42 = vmul.f32 %v15572_v43, %v15572_v43  ;;  %v15578_v45 = vsub.f32 %v15409_v49, %v8464_v55  ;;  %v8469_v33 = vmul.f32 0.0625, %v8428_v15  ;;  %8611 = vadd.xlane.f32.xlu0 %v8561_v57  ;;  %v8562_v8 = vmul.f32 %v14426_v46, %v8530_v23 }
 0x7d8   : > { %v8430_v17 = vpop.xlane.xlu1 %8429 }
 0x7d9   : > { %16298 = vst [vmem:[#allocation6_spill] sm:$0xff] %v15578_v45  ;;  %v8528_v14 = vmul.f32 %v15578_v45, %v15578_v45  ;;  %v15584_v13 = vsub.f32 %v15417_v52, %v8469_v33  ;;  %v8470_v26 = vmul.f32 0.0625, %v8430_v17  ;;  %8613 = vadd.xlane.f32.xlu1 %v8562_v8  ;;  %v8559_v4 = vmul.f32 %v14426_v46, %v8527_v42 }
 0x7da   : > { %v8424_v41 = vpop.xlane.xlu0 %8423 }
 0x7db   : > { %16299 = vst [vmem:[#allocation7_spill] sm:$0xff] %v15584_v13  ;;  %v8533_v49 = vmul.f32 %v15584_v13, %v15584_v13  ;;  %v15590_v18 = vsub.f32 %v15423_v12, %v8470_v26  ;;  %v8467_v5 = vmul.f32 0.0625, %v8424_v41  ;;  %8607 = vadd.xlane.f32.xlu0 %v8559_v4  ;;  %v8560_v25 = vmul.f32 %v14426_v46, %v8528_v14 }
 0x7dc   : > { %v8426_v53 = vpop.xlane.xlu1 %8425 }
 0x7dd   : > { %16300 = vst [vmem:[#allocation8_spill] sm:$0xff] %v15590_v18  ;;  %v8534_v52 = vmul.f32 %v15590_v18, %v15590_v18  ;;  %v15596_v58 = vsub.f32 %v15419_v40, %v8467_v5  ;;  %v8468_v50 = vmul.f32 0.0625, %v8426_v53  ;;  %8609 = vadd.xlane.f32.xlu1 %v8560_v25  ;;  %v8565_v2 = vmul.f32 %v14426_v46, %v8533_v49 }
 0x7de   : > { %v8436_v7 = vpop.xlane.xlu0 %8435 }
 0x7df   : > { %16301 = vst [vmem:[#allocation10_spill] sm:$0xff] %v15596_v58  ;;  %v8531_v12 = vmul.f32 %v15596_v58, %v15596_v58  ;;  %v15602_v36 = vsub.f32 %v15425_v37, %v8468_v50  ;;  %v8473_v51 = vmul.f32 0.0625, %v8436_v7  ;;  %8619 = vadd.xlane.f32.xlu0 %v8565_v2  ;;  %v8566_v0 = vmul.f32 %v14426_v46, %v8534_v52 }
 0x7e0   : > { %v8438_v19 = vpop.xlane.xlu1 %8437 }
 0x7e1   : > { %16302 = vst [vmem:[#allocation4_spill] sm:$0xff] %v15602_v36  ;;  %v8532_v40 = vmul.f32 %v15602_v36, %v15602_v36  ;;  %v15608_v44 = vsub.f32 %v15433_v10, %v8473_v51  ;;  %v8474_v34 = vmul.f32 0.0625, %v8438_v19  ;;  %8621 = vadd.xlane.f32.xlu1 %v8566_v0  ;;  %v8563_v32 = vmul.f32 %v14426_v46, %v8531_v12 }
 0x7e2   : > { %v8432_v56 = vpop.xlane.xlu0 %8431 }
 0x7e3   : > { %16303 = vst [vmem:[#allocation3_spill] sm:$0xff] %v15608_v44  ;;  %v8537_v37 = vmul.f32 %v15608_v44, %v15608_v44  ;;  %v15614_v23 = vsub.f32 %v15439_v39, %v8474_v34  ;;  %v8471_v55 = vmul.f32 0.0625, %v8432_v56  ;;  %8615 = vadd.xlane.f32.xlu0 %v8563_v32  ;;  %v8564_v57 = vmul.f32 %v14426_v46, %v8532_v40  ;;  %v10287_v56 = vld [vmem:[%s12546_s26 + $0x18] sm:$0xf]  ;;  %v10302_v44 = vld [vmem:[%s12546_s26 + $0x54] sm:$0xf] }
 0x7e4   : > { %v8434_v15 = vpop.xlane.xlu1 %8433 }
 0x7e5   : > { %16304 = vst [vmem:[#allocation12_spill] sm:$0xff] %v15614_v23  ;;  %v8538_v10 = vmul.f32 %v15614_v23, %v15614_v23  ;;  %v15620_v42 = vsub.f32 %v15435_v20, %v8471_v55  ;;  %v8472_v33 = vmul.f32 0.0625, %v8434_v15  ;;  %8617 = vadd.xlane.f32.xlu1 %v8564_v57  ;;  %v8569_v8 = vmul.f32 %v14426_v46, %v8537_v37  ;;  %v10288_v37 = vld [vmem:[%s12546_s26 + $0x1c] sm:$0xf]  ;;  %v10298_v23 = vld [vmem:[%s12546_s26 + $0x44] sm:$0x1] }
 0x7e6   : > { %v8912_v55 = vshrl.u32 %v10287_v56, 16  ;;  %v8921_v57 = vshll.u32 %v10288_v37, 16  ;;  %v8925_v15 = vshrl.u32 %v10288_v37, 16 }
 0x7e7   : > { %16305 = vst [vmem:[#allocation13_spill] sm:$0xff] %v15620_v42  ;;  %v8535_v17 = vmul.f32 %v15620_v42, %v15620_v42  ;;  %v15626_v39 = vsub.f32 %v15441_v60, %v8472_v33  ;;  %8627 = vadd.xlane.f32.xlu0 %v8569_v8  ;;  %v8440_v14 = vpop.xlane.xlu0 %8439  ;;  %v8570_v26 = vmul.f32 %v14426_v46, %v8538_v10  ;;  %v10284_v10 = vld [vmem:[%s12546_s26 + $0xc] sm:$0xf] }
 0x7e8   : > { %v8475_v4 = vmul.f32 0.0625, %v8440_v14  ;;  %v8914_v33 = vrot.slane %v8912_v55, 4  ;;  %v8888_v14 = vshrl.u32 %v10284_v10, 16 }
 0x7e9   : > { %16306 = vst [vmem:[#allocation14_spill] sm:$0xff] %v15626_v39  ;;  %v8536_v41 = vmul.f32 %v15626_v39, %v15626_v39  ;;  %8629 = vadd.xlane.f32.xlu1 %v8570_v26  ;;  %v8442_v20 = vpop.xlane.xlu1 %8441  ;;  %v8567_v49 = vmul.f32 %v14426_v46, %v8535_v17  ;;  %v10285_v17 = vld [vmem:[%s12546_s26 + $0x10] sm:$0xf]  ;;  %v8891_v26 = vshll.u32 %v10284_v10, 16 }
 0x7ea   : > { %v15633_v5 = vsub.f32 %v15451_v48, %v8475_v4  ;;  %v8476_v25 = vmul.f32 0.0625, %v8442_v20  ;;  %v8923_v4 = vrot.slane %v8921_v57, 5  ;;  %v10289_v20 = vld [vmem:[%s12546_s26 + $0x20] sm:$0x1] }
 0x7eb   : > { %8623 = vadd.xlane.f32.xlu0 %v8567_v49  ;;  %v8444_v53 = vpop.xlane.xlu0 %8443  ;;  %v8568_v60 = vmul.f32 %v14426_v46, %v8536_v41  ;;  %v8927_v41 = vrot.slane %v8925_v15, 4  ;;  %v8901_v49 = vshrl.u32 %v10285_v17, 16 }
 0x7ec   : > { %16307 = vst [vmem:[#allocation15_spill] sm:$0xff] %v15633_v5  ;;  %v8539_v52 = vmul.f32 %v15633_v5, %v15633_v5  ;;  %v15639_v50 = vsub.f32 %v15457_v62, %v8476_v25  ;;  %v8477_v2 = vmul.f32 0.0625, %v8444_v53  ;;  %v8890_v53 = vrot.slane %v8888_v14, 4 }
 0x7ed   : > { %8625 = vadd.xlane.f32.xlu1 %v8568_v60  ;;  %v8446_v7 = vpop.xlane.xlu1 %8445  ;;  %v8893_v60 = vrot.slane %v8891_v26, 5  ;;  %v10290_v26 = vld [vmem:[%s12546_s26 + $0x24] sm:$0xf] }
 0x7ee   : > { %16308 = vst [vmem:[#allocation16_spill] sm:$0xff] %v15639_v50  ;;  %v8540_v48 = vmul.f32 %v15639_v50, %v15639_v50  ;;  %v15644_v12 = vsub.f32 %v15449_v63, %v8477_v2  ;;  %v8478_v51 = vmul.f32 0.0625, %v8446_v7  ;;  %v8571_v0 = vmul.f32 %v14426_v46, %v8539_v52 }
 0x7ef   : > { %v8928_v52 = vor.u32 %v8927_v41, %v8923_v4  ;;  %v8931_v2 = vshll.u32 %v10289_v20, 16  ;;  %v10291_v41 = vld [vmem:[%s12546_s26 + $0x28] sm:$0xf] }
 0x7f0   : > { %16309 = vst [vmem:[#allocation17_spill] sm:$0xff] %v15644_v12  ;;  %v8541_v19 = vmul.f32 %v15644_v12, %v15644_v12  ;;  %v15650_v62 = vsub.f32 %v15453_v28, %v8478_v51  ;;  %8631 = vadd.xlane.f32.xlu0 %v8571_v0  ;;  %v8572_v40 = vmul.f32 %v14426_v46, %v8540_v48  ;;  %v8915_v28 = vshll.u32 %v10287_v56, 16  ;;  %v10293_v51 = vld [vmem:[%s12546_s26 + $0x30] sm:$0xf] }
 0x7f1   : > { %v8903_v48 = vrot.slane %v8901_v49, 4  ;;  %v8960_v56 = vshrl.u32 %v10293_v51, 16  ;;  %v8963_v37 = vshll.u32 %v10293_v51, 16  ;;  %v10296_v51 = vld [vmem:[%s12546_s26 + $0x3c] sm:$0xf] }
 0x7f2   : > { %16310 = vst [vmem:[#allocation20_spill] sm:$0xff] %v15650_v62  ;;  %v8542_v34 = vmul.f32 %v15650_v62, %v15650_v62  ;;  %8633 = vadd.xlane.f32.xlu1 %v8572_v40  ;;  %v8573_v63 = vmul.f32 %v14426_v46, %v8541_v19  ;;  %v8917_v8 = vrot.slane %v8915_v28, 5  ;;  %v8894_v19 = vor.u32 %v8893_v60, %v8890_v53  ;;  %v10286_v40 = vld [vmem:[%s12546_s26 + $0x14] sm:$0x1]  ;;  %v10299_v53 = vld [vmem:[%s12546_s26 + $0x48] sm:$0xf] }
 0x7f3   : > { %v8907_v28 = vshll.u32 %v10286_v40, 16  ;;  %v8965_v14 = vrot.slane %v8963_v37, 5  ;;  %v8945_v40 = vshll.u32 %v10291_v41, 16  ;;  %v9008_v37 = vshrl.u32 %v10299_v53, 16 }
 0x7f4   : > { %8635 = vadd.xlane.f32.xlu0 %v8573_v63  ;;  %v8574_v32 = vmul.f32 %v14426_v46, %v8542_v34  ;;  %v8897_v46 = vshll.u32 %v10285_v17, 16  ;;  %v8918_v25 = vor.u32 %v8917_v8, %v8914_v33  ;;  %v8929_v34 = vrot.slane %v8928_v52, 4 }
 0x7f5   : > { %v8933_v63 = vrot.slane %v8931_v2, 5  ;;  %v8895_v15 = vrot.slane %v8894_v19, 4  ;;  %v8962_v17 = vrot.slane %v8960_v56, 4  ;;  %v8909_v49 = vrot.slane %v8907_v28, 5 }
 0x7f6   : > { %8637 = vadd.xlane.f32.xlu1 %v8574_v32  ;;  %v15662_v7 = vrot.slane %v8897_v46, 5  ;;  %v8919_v0 = vrot.slane %v8918_v25, 4  ;;  %v10294_v32 = vld [vmem:[%s12546_s26 + $0x34] sm:$0xf]  ;;  %v10295_v25 = vld [vmem:[%s12546_s26 + $0x38] sm:$0x1] }
 0x7f7   : > { %v8969_v10 = vshll.u32 %v10294_v32, 16  ;;  %v8973_v33 = vshrl.u32 %v10294_v32, 16  ;;  %v8934_v8 = vsel %vm12578_vm2, %v8929_v34, %v8933_v63  ;;  %v8939_v19 = vshll.u32 %v10290_v26, 16  ;;  %v10297_v63 = vld [vmem:[%s12546_s26 + $0x40] sm:$0xf] }
 0x7f8   : > { %v8904_v55 = vor.u32 %v8903_v48, %v15662_v7  ;;  %v8924_v57 = vsel %vm12578_vm2, %v8919_v0, %v8923_v4  ;;  %v15678_v4 = vunpack.c.l.bf16 %v8934_v8  ;;  %v8900_v60 = vsel %vm12578_vm2, %v8895_v15, %v15662_v7  ;;  %v10300_v48 = vld [vmem:[%s12546_s26 + $0x4c] sm:$0xf]  ;;  %v10305_v15 = vld [vmem:[%s12546_s26 + $0x60] sm:$0xf] }
 0x7f9   : > { %v15674_v20 = vunpack.c.l.bf16 %v8924_v57  ;;  %v15683_v52 = vrot.slane %v8969_v10, 5  ;;  %v8975_v2 = vrot.slane %v8973_v33, 4  ;;  %v8936_v0 = vshrl.u32 %v10290_v26, 16 }
 0x7fa   : > { %v8905_v46 = vrot.slane %v8904_v55, 4  ;;  %v8949_v34 = vshrl.u32 %v10291_v41, 16  ;;  %v8966_v32 = vor.u32 %v8965_v14, %v8962_v17  ;;  %v8979_v56 = vshll.u32 %v10295_v25, 16  ;;  %v10292_v25 = vld [vmem:[%s12546_s26 + $0x2c] sm:$0x1] }
 0x7fb   : > { %v9011_v55 = vshll.u32 %v10299_v53, 16  ;;  %v9017_v28 = vshll.u32 %v10300_v48, 16  ;;  %v9021_v57 = vshrl.u32 %v10300_v48, 16  ;;  %v8984_v8 = vshrl.u32 %v10296_v51, 16 }
 0x7fc   : > { %v8987_v7 = vshll.u32 %v10296_v51, 16  ;;  %v8910_v10 = vsel %vm12578_vm2, %v8905_v46, %v8909_v49  ;;  %v8976_v33 = vor.u32 %v8975_v2, %v15683_v52  ;;  %v8993_v62 = vshll.u32 %v10297_v63, 16 }
 0x7fd   : > { %v8997_v26 = vshrl.u32 %v10297_v63, 16  ;;  %v8938_v41 = vrot.slane %v8936_v0, 4  ;;  %v8941_v12 = vrot.slane %v8939_v19, 5  ;;  %v15692_v17 = vrot.slane %v8945_v40, 5  ;;  %v10301_v0 = vld [vmem:[%s12546_s26 + $0x50] sm:$0x1] }
 0x7fe   : > { %v8951_v14 = vrot.slane %v8949_v34, 4  ;;  %v9010_v53 = vrot.slane %v9008_v37, 4  ;;  %v9013_v50 = vrot.slane %v9011_v55, 5  ;;  %v9056_v48 = vshrl.u32 %v10305_v15, 16 }
 0x7ff   : > { %v9059_v51 = vshll.u32 %v10305_v15, 16  ;;  %v15695_v5 = vrot.slane %v9017_v28, 5  ;;  %v9023_v46 = vrot.slane %v9021_v57, 4  ;;  %v8986_v49 = vrot.slane %v8984_v8, 4  ;;  %v10306_v15 = vld [vmem:[%s12546_s26 + $0x64] sm:$0xf] }
 0x800   : > { %v8989_v2 = vrot.slane %v8987_v7, 5  ;;  %v8967_v63 = vrot.slane %v8966_v32, 4  ;;  %v8981_v39 = vrot.slane %v8979_v56, 5  ;;  %v15698_v19 = vrot.slane %v8993_v62, 5 }
 0x801   : > { %v8999_v40 = vrot.slane %v8997_v26, 4  ;;  %v15700_v34 = vunpack.c.l.bf16 %v8900_v60  ;;  %v15702_v37 = vunpack.c.l.bf16 %v8910_v10  ;;  %v8977_v55 = vrot.slane %v8976_v33, 4 }
 0x802   : > { %v8955_v42 = vshll.u32 %v10292_v25, 16  ;;  %v8942_v28 = vor.u32 %v8941_v12, %v8938_v41  ;;  %v8952_v57 = vor.u32 %v8951_v14, %v15692_v17  ;;  %v9058_v8 = vrot.slane %v9056_v48, 4 }
 0x803   : > { %v9061_v7 = vrot.slane %v9059_v51, 5  ;;  %v9014_v32 = vor.u32 %v9013_v50, %v9010_v53  ;;  %v9024_v62 = vor.u32 %v9023_v46, %v15695_v5  ;;  %v9027_v56 = vshll.u32 %v10301_v0, 16 }
 0x804   : > { %v8990_v26 = vor.u32 %v8989_v2, %v8986_v49  ;;  %v9000_v60 = vor.u32 %v8999_v40, %v15698_v19  ;;  %v9003_v10 = vshll.u32 %v10298_v23, 16  ;;  %v9065_v33 = vshll.u32 %v10306_v15, 16  ;;  %v10303_v49 = vld [vmem:[%s12546_s26 + $0x58] sm:$0xf] }
 0x805   : > { %v9069_v25 = vshrl.u32 %v10306_v15, 16  ;;  %v8972_v12 = vsel %vm12578_vm2, %v8967_v63, %v15683_v52  ;;  %v8982_v41 = vsel %vm12578_vm2, %v8977_v55, %v8981_v39  ;;  %v9032_v14 = vshrl.u32 %v10302_v44, 16  ;;  %v10311_v15 = vld [vmem:[%s12546_s26 + $0x78] sm:$0xf]  ;;  %v10307_v63 = vld [vmem:[%s12546_s26 + $0x68] sm:$0x1] }
 0x806   : > { %v9035_v50 = vshll.u32 %v10302_v44, 16  ;;  %v8943_v53 = vrot.slane %v8942_v28, 4  ;;  %v8953_v48 = vrot.slane %v8952_v57, 4  ;;  %v8957_v51 = vrot.slane %v8955_v42, 5 }
 0x807   : > { %v9062_v46 = vor.u32 %v9061_v7, %v9058_v8  ;;  %v9015_v2 = vrot.slane %v9014_v32, 4  ;;  %v9025_v23 = vrot.slane %v9024_v62, 4  ;;  %v9029_v0 = vrot.slane %v9027_v56, 5 }
 0x808   : > { %v8991_v40 = vrot.slane %v8990_v26, 4  ;;  %v9001_v36 = vrot.slane %v9000_v60, 4  ;;  %v9005_v58 = vrot.slane %v9003_v10, 5  ;;  %v9067_v18 = vrot.slane %v9065_v33, 5 }
 0x809   : > { %v9071_v52 = vrot.slane %v9069_v25, 4  ;;  %v9034_v13 = vrot.slane %v9032_v14, 4  ;;  %v9037_v39 = vrot.slane %v9035_v50, 5  ;;  %v9041_v55 = vshll.u32 %v10303_v49, 16  ;;  %v10312_v50 = vld [vmem:[%s12546_s26 + $0x7c] sm:$0xf] }
 0x80a   : > { %v9045_v45 = vshrl.u32 %v10303_v49, 16  ;;  %v15718_v44 = vunpack.c.l.bf16 %v8972_v12  ;;  %v9063_v42 = vrot.slane %v9062_v46, 4  ;;  %v9104_v28 = vshrl.u32 %v10311_v15, 16  ;;  %v10304_v12 = vld [vmem:[%s12546_s26 + $0x5c] sm:$0x1] }
 0x80b   : > { %v9107_v57 = vshll.u32 %v10311_v15, 16  ;;  %v15720_v8 = vunpack.c.l.bf16 %v8982_v41  ;;  %v8948_v7 = vsel %vm12578_vm2, %v8943_v53, %v15692_v17  ;;  %v8958_v32 = vsel %vm12578_vm2, %v8953_v48, %v8957_v51 }
 0x80c   : > { %v9020_v62 = vsel %vm12578_vm2, %v9015_v2, %v15695_v5  ;;  %v9030_v56 = vsel %vm12578_vm2, %v9025_v23, %v9029_v0  ;;  %v8996_v26 = vsel %vm12578_vm2, %v8991_v40, %v15698_v19  ;;  %v9072_v60 = vor.u32 %v9071_v52, %v9067_v18  ;;  %v10317_v23 = vld [vmem:[%s12546_s26 + $0x90] sm:$0xf] }
 0x80d   : > { %v9075_v10 = vshll.u32 %v10307_v63, 16  ;;  %v9006_v17 = vsel %vm12578_vm2, %v9001_v36, %v9005_v58  ;;  %v9038_v33 = vor.u32 %v9037_v39, %v9034_v13  ;;  %v9043_v25 = vrot.slane %v9041_v55, 5  ;;  %v10309_v58 = vld [vmem:[%s12546_s26 + $0x70] sm:$0xf]  ;;  %v10318_v63 = vld [vmem:[%s12546_s26 + $0x94] sm:$0xf] }
 0x80e   : > { %v9047_v41 = vrot.slane %v9045_v45, 4  ;;  %v15738_v5 = vunpack.c.l.bf16 %v8948_v7  ;;  %v9068_v14 = vsel %vm12578_vm2, %v9063_v42, %v9067_v18  ;;  %v9106_v53 = vrot.slane %v9104_v28, 4  ;;  %v10308_v45 = vld [vmem:[%s12546_s26 + $0x6c] sm:$0xf]  ;;  %v10313_v42 = vld [vmem:[%s12546_s26 + $0x80] sm:$0x1] }
 0x80f   : > { %v9109_v19 = vrot.slane %v9107_v57, 5  ;;  %v15743_v48 = vunpack.c.l.bf16 %v8958_v32  ;;  %v15745_v51 = vunpack.c.l.bf16 %v9020_v62  ;;  %v15747_v46 = vunpack.c.l.bf16 %v9030_v56 }
 0x810   : > { %v15749_v13 = vunpack.c.l.bf16 %v8996_v26  ;;  %v15753_v36 = vunpack.c.l.bf16 %v9006_v17  ;;  %v9073_v49 = vrot.slane %v9072_v60, 4  ;;  %v9077_v2 = vrot.slane %v9075_v10, 5 }
 0x811   : > { %v9051_v18 = vshll.u32 %v10304_v12, 16  ;;  %v15756_v0 = vunpack.c.l.bf16 %v9068_v14  ;;  %v9039_v40 = vrot.slane %v9038_v33, 4  ;;  %v9048_v15 = vor.u32 %v9047_v41, %v9043_v25 }
 0x812   : > { %16311 = vst [vmem:[#allocation21_spill] sm:$0xff] %v15753_v36  ;;  %v9113_v52 = vshll.u32 %v10312_v50, 16  ;;  %v9110_v39 = vor.u32 %v9109_v19, %v9106_v53  ;;  %v9117_v55 = vshrl.u32 %v10312_v50, 16  ;;  %v9080_v28 = vshrl.u32 %v10308_v45, 16  ;;  %v10314_v50 = vld [vmem:[%s12546_s26 + $0x84] sm:$0xf] }
 0x813   : > { %16312 = vst [vmem:[#allocation22_spill] sm:$0xff] %v15756_v0  ;;  %v9083_v57 = vshll.u32 %v10308_v45, 16  ;;  %v9089_v7 = vshll.u32 %v10309_v58, 16  ;;  %v9093_v32 = vshrl.u32 %v10309_v58, 16  ;;  %v9152_v62 = vshrl.u32 %v10317_v23, 16 }
 0x814   : > { %v9155_v56 = vshll.u32 %v10317_v23, 16  ;;  %v9078_v26 = vsel %vm12578_vm2, %v9073_v49, %v9077_v2  ;;  %v15762_v60 = vrot.slane %v9051_v18, 5  ;;  %v9161_v10 = vshll.u32 %v10318_v63, 16  ;;  %v10315_v23 = vld [vmem:[%s12546_s26 + $0x88] sm:$0xf] }
 0x815   : > { %v9165_v17 = vshrl.u32 %v10318_v63, 16  ;;  %v9044_v33 = vsel %vm12578_vm2, %v9039_v40, %v9043_v25  ;;  %v9049_v12 = vrot.slane %v9048_v15, 4  ;;  %v9115_v41 = vrot.slane %v9113_v52, 5  ;;  %v10310_v49 = vld [vmem:[%s12546_s26 + $0x74] sm:$0x1] }
 0x816   : > { %v9123_v14 = vshll.u32 %v10313_v42, 16  ;;  %v9111_v53 = vrot.slane %v9110_v39, 4  ;;  %v9119_v19 = vrot.slane %v9117_v55, 4  ;;  %v9082_v45 = vrot.slane %v9080_v28, 4  ;;  %v10319_v25 = vld [vmem:[%s12546_s26 + $0x98] sm:$0x1] }
 0x817   : > { %v9085_v58 = vrot.slane %v9083_v57, 5  ;;  %v15768_v43 = vrot.slane %v9089_v7, 5  ;;  %v9095_v2 = vrot.slane %v9093_v32, 4  ;;  %v9154_v18 = vrot.slane %v9152_v62, 4 }
 0x818   : > { %v9157_v63 = vrot.slane %v9155_v56, 5  ;;  %v15771_v29 = vrot.slane %v9161_v10, 5  ;;  %v9167_v40 = vrot.slane %v9165_v17, 4  ;;  %v9128_v15 = vshrl.u32 %v10314_v50, 16  ;;  %v10323_v56 = vld [vmem:[%s12546_s26 + $0xa8] sm:$0xf] }
 0x819   : > { %v9131_v52 = vshll.u32 %v10314_v50, 16  ;;  %v15774_v42 = vunpack.c.l.bf16 %v9078_v26  ;;  %v15776_v39 = vunpack.c.l.bf16 %v9044_v33  ;;  %v9137_v55 = vshll.u32 %v10315_v23, 16 }
 0x81a   : > { %v9141_v28 = vshrl.u32 %v10315_v23, 16  ;;  %v9054_v57 = vsel %vm12578_vm2, %v9049_v12, %v15762_v60  ;;  %v9120_v7 = vor.u32 %v9119_v19, %v9115_v41  ;;  %v9125_v32 = vrot.slane %v9123_v14, 5 }
 0x81b   : > { %16313 = vst [vmem:[#allocation23_spill] sm:$0xff] %v15774_v42  ;;  %16314 = vst [vmem:[#allocation24_spill] sm:$0xff] %v15776_v39  ;;  %v9099_v62 = vshll.u32 %v10310_v49, 16  ;;  %v9086_v10 = vor.u32 %v9085_v58, %v9082_v45  ;;  %v9096_v17 = vor.u32 %v9095_v2, %v15768_v43  ;;  %v9158_v50 = vor.u32 %v9157_v63, %v9154_v18  ;;  %v10320_v49 = vld [vmem:[%s12546_s26 + $0x9c] sm:$0xf] }
 0x81c   : > { %v9171_v26 = vshll.u32 %v10319_v25, 16  ;;  %v9116_v33 = vsel %vm12578_vm2, %v9111_v53, %v9115_v41  ;;  %v9168_v23 = vor.u32 %v9167_v40, %v15771_v29  ;;  %v9130_v39 = vrot.slane %v9128_v15, 4 }
 0x81d   : > { %v9133_v42 = vrot.slane %v9131_v52, 5  ;;  %v15788_v60 = vrot.slane %v9137_v55, 5  ;;  %v9143_v12 = vrot.slane %v9141_v28, 4  ;;  %v9200_v14 = vshrl.u32 %v10323_v56, 16 }
 0x81e   : > { %v9203_v19 = vshll.u32 %v10323_v56, 16  ;;  %v9121_v45 = vrot.slane %v9120_v7, 4  ;;  %v9101_v58 = vrot.slane %v9099_v62, 5  ;;  %v9209_v2 = vshll.u32 %v10324_v9, 16  ;;  %v10325_v62 = vld [vmem:[%s12546_s26 + $0xb0] sm:$0x1] }
 0x81f   : > { %v9213_v18 = vshrl.u32 %v10324_v9, 16  ;;  %v9087_v63 = vrot.slane %v9086_v10, 4  ;;  %v9097_v25 = vrot.slane %v9096_v17, 4  ;;  %v9159_v0 = vrot.slane %v9158_v50, 4 }
 0x820   : > { %v9173_v41 = vrot.slane %v9171_v26, 5  ;;  %v9169_v53 = vrot.slane %v9168_v23, 4  ;;  %v9147_v40 = vshll.u32 %v10316_v22, 16  ;;  %v9176_v15 = vshrl.u32 %v10320_v49, 16  ;;  %v10321_v26 = vld [vmem:[%s12546_s26 + $0xa0] sm:$0xf] }
 0x821   : > { %v9179_v52 = vshll.u32 %v10320_v49, 16  ;;  %v9134_v55 = vor.u32 %v9133_v42, %v9130_v39  ;;  %v9144_v28 = vor.u32 %v9143_v12, %v15788_v60  ;;  %v9202_v47 = vrot.slane %v9200_v14, 4 }
 0x822   : > { %v9205_v56 = vrot.slane %v9203_v19, 5  ;;  %v15792_v36 = vunpack.c.l.bf16 %v9054_v57  ;;  %v15794_v7 = vunpack.c.l.bf16 %v9116_v33  ;;  %v15796_v9 = vrot.slane %v9209_v2, 5 }
 0x823   : > { %v9215_v10 = vrot.slane %v9213_v18, 4  ;;  %v9126_v17 = vsel %vm12578_vm2, %v9121_v45, %v9125_v32  ;;  %v9092_v22 = vsel %vm12578_vm2, %v9087_v63, %v15768_v43  ;;  %v9102_v42 = vsel %vm12578_vm2, %v9097_v25, %v9101_v58 }
 0x824   : > { %v9164_v39 = vsel %vm12578_vm2, %v9159_v0, %v15771_v29  ;;  %v9174_v57 = vsel %vm12578_vm2, %v9169_v53, %v9173_v41  ;;  %v9149_v50 = vrot.slane %v9147_v40, 5  ;;  %v9178_v33 = vrot.slane %v9176_v15, 4  ;;  %v10326_v15 = vld [vmem:[%s12546_s26 + $0xb4] sm:$0xf] }
 0x825   : > { %v9181_v23 = vrot.slane %v9179_v52, 5  ;;  %v9135_v32 = vrot.slane %v9134_v55, 4  ;;  %v9145_v14 = vrot.slane %v9144_v28, 4  ;;  %v9206_v19 = vor.u32 %v9205_v56, %v9202_v47 }
 0x826   : > { %v9219_v43 = vshll.u32 %v10325_v62, 16  ;;  %v15812_v45 = vunpack.c.l.bf16 %v9126_v17  ;;  %v15814_v58 = vunpack.c.l.bf16 %v9092_v22  ;;  %v9216_v29 = vor.u32 %v9215_v10, %v15796_v9 }
 0x827   : > { %v15817_v2 = vunpack.c.l.bf16 %v9102_v42  ;;  %v15819_v18 = vunpack.c.l.bf16 %v9164_v39  ;;  %v9185_v63 = vshll.u32 %v10321_v26, 16  ;;  %v9189_v25 = vshrl.u32 %v10321_v26, 16  ;;  %v10322_v42 = vld [vmem:[%s12546_s26 + $0xa4] sm:$0x1] }
 0x828   : > { %v15821_v40 = vunpack.c.l.bf16 %v9174_v57  ;;  %v9182_v47 = vor.u32 %v9181_v23, %v9178_v33  ;;  %v9140_v55 = vsel %vm12578_vm2, %v9135_v32, %v15788_v60  ;;  %v9150_v28 = vsel %vm12578_vm2, %v9145_v14, %v9149_v50  ;;  %v10327_v50 = vld [vmem:[%s12546_s26 + $0xb8] sm:$0xf] }
 0x829   : > { %v9207_v56 = vrot.slane %v9206_v19, 4  ;;  %v9221_v62 = vrot.slane %v9219_v43, 5  ;;  %v9217_v22 = vrot.slane %v9216_v29, 4  ;;  %v9187_v57 = vrot.slane %v9185_v63, 5 }
 0x82a   : > { %v9191_v26 = vrot.slane %v9189_v25, 4  ;;  %v9224_v33 = vshrl.u32 %v10326_v15, 16  ;;  %v9227_v23 = vshll.u32 %v10326_v15, 16  ;;  %v9183_v32 = vrot.slane %v9182_v47, 4 }
 0x82b   : > { %v15831_v19 = vunpack.c.l.bf16 %v9140_v55  ;;  %v15833_v43 = vunpack.c.l.bf16 %v9150_v28  ;;  %v9195_v29 = vshll.u32 %v10322_v42, 16  ;;  %v9233_v28 = vshll.u32 %v10327_v50, 16 }
 0x82c   : > { %v9192_v15 = vor.u32 %v9191_v26, %v9187_v57  ;;  %v9229_v55 = vrot.slane %v9227_v23, 5 }
 0x844   : > { %v8580_v12 = vpop.xlane.xlu0 %8579 }
 0x845   : > { %v8641_v49 = vmul.f32 0.0625, %v8580_v12 }
 0x846   : > { %v8582_v0 = vpop.xlane.xlu1 %8581 }
 0x847   : > { %v8673_v41 = vadd.f32 1e-05, %v8641_v49  ;;  %v8642_v53 = vmul.f32 0.0625, %v8582_v0  ;;  %v9212_v49 = vsel %vm12578_vm2, %v9207_v56, %v15796_v9  ;;  %v10328_v0 = vld [vmem:[%s12546_s26 + $0xbc] sm:$0x1]  ;;  %v9188_v9 = vsel %vm12578_vm2, %v9183_v32, %v9187_v57 }
 0x848   : > { %v8576_v52 = vpop.xlane.xlu0 %8575  ;;  %v15846_v42 = vunpack.c.l.bf16 %v9212_v49  ;;  %v15851_v23 = vunpack.c.l.bf16 %v9188_v9 }
 0x849   : > { %12409 = vrsqrt.f32 %v8673_v41  ;;  %v8674_v10 = vadd.f32 1e-05, %v8642_v53  ;;  %v8639_v17 = vmul.f32 0.0625, %v8576_v52  ;;  %v9222_v41 = vsel %vm12578_vm2, %v9217_v22, %v9221_v62  ;;  %v15842_v53 = vld [vmem:[%s12546_s26 + $0xc0] sm:$0xf] }
 0x84a   : > { %v8578_v39 = vpop.xlane.xlu1 %8577  ;;  %v9226_v52 = vrot.slane %v9224_v33, 4  ;;  %v9248_v62 = vshrl.u32 %v15842_v53, 16  ;;  %v15849_v26 = vunpack.c.l.bf16 %v9222_v41 }
 0x84b   : > { %12411 = vrsqrt.f32 %v8674_v10  ;;  %v8671_v60 = vadd.f32 1e-05, %v8639_v17  ;;  %v8640_v12 = vmul.f32 0.0625, %v8578_v39  ;;  %v9237_v39 = vshrl.u32 %v10327_v50, 16  ;;  %v15860_v50 = vld [vmem:[%s16093_s3 + $0x3] ss:$0 sm:$0xff] }
 0x84c   : > { %v8588_v14 = vpop.xlane.xlu0 %8587  ;;  %v9230_v57 = vor.u32 %v9229_v55, %v9226_v52  ;;  %v15872_v52 = vrot.slane %v9248_v62, 4 }
 0x84d   : > { %12413 = vrsqrt.f32 %v8671_v60  ;;  %v8672_v63 = vadd.f32 1e-05, %v8640_v12  ;;  %v8645_v25 = vmul.f32 0.0625, %v8588_v14  ;;  %v9243_v60 = vshll.u32 %v10328_v0, 16 }
 0x84e   : > { %v8590_v47 = vpop.xlane.xlu1 %8589  ;;  %v15853_v14 = vrot.slane %v9192_v15, 4 }
 0x84f   : > { %12415 = vrsqrt.f32 %v8672_v63  ;;  %v8677_v10 = vadd.f32 1e-05, %v8645_v25  ;;  %v8646_v17 = vmul.f32 0.0625, %v8590_v47  ;;  %v15855_v63 = vrot.slane %v9195_v29, 5  ;;  %v15870_v29 = vld [vmem:[%s12546_s26 + $0xc4] sm:$0xf] }
 0x850   : > { %v8584_v56 = vpop.xlane.xlu0 %8583  ;;  %v15862_v25 = vrot.slane %v9233_v28, 5  ;;  %v15867_v15 = vrot.slane %v9243_v60, 5 }
 0x851   : > { %12417 = vrsqrt.f32 %v8677_v10  ;;  %v8678_v22 = vadd.f32 1e-05, %v8646_v17  ;;  %v8643_v12 = vmul.f32 0.0625, %v8584_v56  ;;  %v15865_v10 = vrot.slane %v9237_v39, 4  ;;  %v15877_v17 = vld [vmem:[%s16093_s3 + $0x4] ss:$0 sm:$0xff] }
 0x852   : > { %v8586_v33 = vpop.xlane.xlu1 %8585 }
 0x853   : > { %v12410_v32 = vpop.eup %12409  ;;  %12419 = vrsqrt.f32 %v8678_v22  ;;  %v8675_v49 = vadd.f32 1e-05, %v8643_v12  ;;  %v8644_v0 = vmul.f32 0.0625, %v8586_v33  ;;  %v15886_v22 = vrot.slane %v9230_v57, 4 }
 0x854   : > { %v8737_v41 = vmul.f32 %v12410_v32, %v15466_v21  ;;  %v8596_v47 = vpop.xlane.xlu0 %8595  ;;  %v9251_v21 = vshll.u32 %v15842_v53, 16 }
 0x855   : > { %v12412_v55 = vpop.eup %12411  ;;  %12421 = vrsqrt.f32 %v8675_v49  ;;  %v8676_v28 = vadd.f32 1e-05, %v8644_v0  ;;  %v8649_v9 = vmul.f32 0.0625, %v8596_v47 }
 0x856   : > { %v8773_v56 = vmul.f32 %v15860_v50, %v8737_v41  ;;  %v8738_v39 = vmul.f32 %v12412_v55, %v15469_v11  ;;  %v8598_v60 = vpop.xlane.xlu1 %8597 }
 0x857   : > { %v12414_v12 = vpop.eup %12413  ;;  %12423 = vrsqrt.f32 %v8676_v28  ;;  %v8681_v33 = vadd.f32 1e-05, %v8649_v9  ;;  %v8650_v32 = vmul.f32 0.0625, %v8598_v60 }
 0x858   : > { %v8809_v53 = vadd.f32 %v15877_v17, %v8773_v56  ;;  %v8774_v0 = vmul.f32 %v15860_v50, %v8738_v39  ;;  %v8735_v11 = vmul.f32 %v12414_v12, %v15474_v38  ;;  %v8592_v41 = vpop.xlane.xlu0 %8591 }
 0x859   : > { %v12416_v55 = vpop.eup %12415  ;;  %12425 = vrsqrt.f32 %v8681_v33  ;;  %v8682_v57 = vadd.f32 1e-05, %v8650_v32  ;;  %v8647_v62 = vmul.f32 0.0625, %v8592_v41  ;;  %v15905_v32 = vrot.slane %v9251_v21, 5 }
 0x85a   : > { %v9337_v9 = vadd.f32 %v15674_v20, %v8809_v53  ;;  %v8810_v60 = vadd.f32 %v15877_v17, %v8774_v0  ;;  %v8771_v56 = vmul.f32 %v15860_v50, %v8735_v11  ;;  %v8736_v39 = vmul.f32 %v12416_v55, %v15482_v27  ;;  %v8594_v49 = vpop.xlane.xlu1 %8593 }
 0x85b   : > { %v12418_v38 = vpop.eup %12417  ;;  %12427 = vrsqrt.f32 %v8682_v57  ;;  %v8679_v12 = vadd.f32 1e-05, %v8647_v62  ;;  %v8648_v33 = vmul.f32 0.0625, %v8594_v49 }
 0x85c   : > { %v9369_v20 = vmax.f32 %v9337_v9, 0.0  ;;  %v9338_v53 = vadd.f32 %v15678_v4, %v8810_v60  ;;  %v8807_v0 = vadd.f32 %v15877_v17, %v8771_v56  ;;  %v8772_v27 = vmul.f32 %v15860_v50, %v8736_v39  ;;  %v8604_v11 = vpop.xlane.xlu0 %8603 }
 0x85d   : > { %v12420_v41 = vpop.eup %12419  ;;  %v8741_v55 = vmul.f32 %v12418_v38, %v15488_v30  ;;  %12429 = vrsqrt.f32 %v8679_v12  ;;  %v8680_v28 = vadd.f32 1e-05, %v8648_v33  ;;  %v8653_v47 = vmul.f32 0.0625, %v8604_v11 }
 0x85e   : > { %9401 = vst [vmem:[%s15903_s25 + $0x10] sm:$0xff] %v9369_v20  ;;  %v9370_v62 = vmax.f32 %v9338_v53, 0.0  ;;  %v9335_v21 = vadd.f32 %v15700_v34, %v8807_v0  ;;  %v8808_v49 = vadd.f32 %v15877_v17, %v8772_v27  ;;  %v8742_v4 = vmul.f32 %v12420_v41, %v15494_v3  ;;  %v8606_v57 = vpop.xlane.xlu1 %8605 }
 0x85f   : > { %v12422_v9 = vpop.eup %12421  ;;  %v8777_v60 = vmul.f32 %v15860_v50, %v8741_v55  ;;  %12431 = vrsqrt.f32 %v8680_v28  ;;  %v8685_v56 = vadd.f32 1e-05, %v8653_v47  ;;  %v8654_v39 = vmul.f32 0.0625, %v8606_v57 }
 0x860   : > { %9402 = vst [vmem:[%s15903_s25 + $0x18] sm:$0xff] %v9370_v62  ;;  %v9367_v30 = vmax.f32 %v9335_v21, 0.0  ;;  %v9336_v38 = vadd.f32 %v15702_v37, %v8808_v49  ;;  %v8778_v12 = vmul.f32 %v15860_v50, %v8742_v4  ;;  %v8739_v34 = vmul.f32 %v12422_v9, %v15500_v59  ;;  %v8600_v33 = vpop.xlane.xlu0 %8599 }
 0x861   : > { %v12424_v20 = vpop.eup %12423  ;;  %v8813_v3 = vadd.f32 %v15877_v17, %v8777_v60  ;;  %12433 = vrsqrt.f32 %v8685_v56  ;;  %v8686_v53 = vadd.f32 1e-05, %v8654_v39  ;;  %v8651_v0 = vmul.f32 0.0625, %v8600_v33 }
 0x862   : > { %9399 = vst [vmem:[%s15903_s25] sm:$0xff] %v9367_v30  ;;  %v9368_v28 = vmax.f32 %v9336_v38, 0.0  ;;  %v8814_v47 = vadd.f32 %v15877_v17, %v8778_v12  ;;  %v8775_v27 = vmul.f32 %v15860_v50, %v8739_v34  ;;  %v8740_v37 = vmul.f32 %v12424_v20, %v15506_v24  ;;  %v8602_v11 = vpop.xlane.xlu1 %8601 }
 0x863   : > { %v12426_v41 = vpop.eup %12425  ;;  %v9341_v59 = vadd.f32 %v15718_v44, %v8813_v3  ;;  %12435 = vrsqrt.f32 %v8686_v53  ;;  %v8683_v55 = vadd.f32 1e-05, %v8651_v0  ;;  %v8652_v62 = vmul.f32 0.0625, %v8602_v11 }
 0x864   : > { %9400 = vst [vmem:[%s15903_s25 + $0x8] sm:$0xff] %v9368_v28  ;;  %v9342_v21 = vadd.f32 %v15720_v8, %v8814_v47  ;;  %v8811_v49 = vadd.f32 %v15877_v17, %v8775_v27  ;;  %v8776_v4 = vmul.f32 %v15860_v50, %v8740_v37  ;;  %v8745_v57 = vmul.f32 %v12426_v41, %v15512_v54  ;;  %v8612_v9 = vpop.xlane.xlu0 %8611 }
 0x865   : > { %v12428_v60 = vpop.eup %12427  ;;  %v9373_v24 = vmax.f32 %v9341_v59, 0.0  ;;  %12437 = vrsqrt.f32 %v8683_v55  ;;  %v8684_v56 = vadd.f32 1e-05, %v8652_v62  ;;  %v8657_v44 = vmul.f32 0.0625, %v8612_v9 }
 0x866   : > { %v9374_v39 = vmax.f32 %v9342_v21, 0.0  ;;  %v9339_v30 = vadd.f32 %v15738_v5, %v8811_v49  ;;  %v8812_v38 = vadd.f32 %v15877_v17, %v8776_v4  ;;  %v8781_v8 = vmul.f32 %v15860_v50, %v8745_v57  ;;  %v8614_v12 = vpop.xlane.xlu1 %8613 }
 0x867   : > { %v12430_v34 = vpop.eup %12429  ;;  %9405 = vst [vmem:[%s15903_s25 + $0x30] sm:$0xff] %v9373_v24  ;;  %v8746_v54 = vmul.f32 %v12428_v60, %v15518_v61  ;;  %12439 = vrsqrt.f32 %v8684_v56  ;;  %v8689_v33 = vadd.f32 1e-05, %v8657_v44  ;;  %v8658_v20 = vmul.f32 0.0625, %v8614_v12 }
 0x868   : > { %9406 = vst [vmem:[%s15903_s25 + $0x38] sm:$0xff] %v9374_v39  ;;  %v9371_v3 = vmax.f32 %v9339_v30, 0.0  ;;  %v9340_v53 = vadd.f32 %v15743_v48, %v8812_v38  ;;  %v8817_v0 = vadd.f32 %v15877_v17, %v8781_v8  ;;  %v8743_v5 = vmul.f32 %v12430_v34, %v15524_v6  ;;  %v8608_v28 = vpop.xlane.xlu0 %8607 }
 0x869   : > { %v12432_v47 = vpop.eup %12431  ;;  %v8782_v27 = vmul.f32 %v15860_v50, %v8746_v54  ;;  %12441 = vrsqrt.f32 %v8689_v33  ;;  %v8690_v37 = vadd.f32 1e-05, %v8658_v20  ;;  %v8655_v11 = vmul.f32 0.0625, %v8608_v28  ;;  %v16315_v20 = vld [vmem:[#allocation21_spill] sm:$0xff]  ;;  %v16316_v28 = vld [vmem:[#allocation11_spill] sm:$0xff] }
 0x86a   : > { %9403 = vst [vmem:[%s15903_s25 + $0x20] sm:$0xff] %v9371_v3  ;;  %v9372_v61 = vmax.f32 %v9340_v53, 0.0  ;;  %v9345_v41 = vadd.f32 %v15745_v51, %v8817_v0  ;;  %v8779_v59 = vmul.f32 %v15860_v50, %v8743_v5  ;;  %v8744_v48 = vmul.f32 %v12432_v47, %v15530_v31  ;;  %v8610_v55 = vpop.xlane.xlu1 %8609 }
 0x86b   : > { %v12434_v62 = vpop.eup %12433  ;;  %v8818_v6 = vadd.f32 %v15877_v17, %v8782_v27  ;;  %12443 = vrsqrt.f32 %v8690_v37  ;;  %v8687_v21 = vadd.f32 1e-05, %v8655_v11  ;;  %v8656_v49 = vmul.f32 0.0625, %v8610_v55  ;;  %v16317_v11 = vld [vmem:[#allocation22_spill] sm:$0xff] }
 0x86c   : > { %9404 = vst [vmem:[%s15903_s25 + $0x28] sm:$0xff] %v9372_v61  ;;  %v9377_v4 = vmax.f32 %v9345_v41, 0.0  ;;  %v8815_v57 = vadd.f32 %v15877_v17, %v8779_v59  ;;  %v8780_v9 = vmul.f32 %v15860_v50, %v8744_v48  ;;  %v8749_v51 = vmul.f32 %v12434_v62, %v15536_v35  ;;  %v8620_v60 = vpop.xlane.xlu0 %8619  ;;  %v16318_v59 = vld [vmem:[#allocation18_spill] sm:$0xff] }
 0x86d   : > { %v12436_v24 = vpop.eup %12435  ;;  %v9346_v31 = vadd.f32 %v15747_v46, %v8818_v6  ;;  %12445 = vrsqrt.f32 %v8687_v21  ;;  %v8688_v56 = vadd.f32 1e-05, %v8656_v49  ;;  %v8661_v44 = vmul.f32 0.0625, %v8620_v60  ;;  %v16320_v60 = vld [vmem:[#allocation19_spill] sm:$0xff] }
 0x86e   : > { %9409 = vst [vmem:[%s15903_s25 + $0x50] sm:$0xff] %v9377_v4  ;;  %v9343_v39 = vadd.f32 %v15749_v13, %v8815_v57  ;;  %v8816_v30 = vadd.f32 %v15877_v17, %v8780_v9  ;;  %v8785_v38 = vmul.f32 %v15860_v50, %v8749_v51  ;;  %v8750_v8 = vmul.f32 %v12436_v24, %v15542_v16  ;;  %v8622_v12 = vpop.xlane.xlu1 %8621  ;;  %v16319_v57 = vld [vmem:[#allocation23_spill] sm:$0xff] }
 0x86f   : > { %v12438_v34 = vpop.eup %12437  ;;  %v9378_v35 = vmax.f32 %v9346_v31, 0.0  ;;  %12447 = vrsqrt.f32 %v8688_v56  ;;  %v8693_v54 = vadd.f32 1e-05, %v8661_v44  ;;  %v8662_v46 = vmul.f32 0.0625, %v8622_v12 }
 0x870   : > { %v9375_v33 = vmax.f32 %v9343_v39, 0.0  ;;  %v9344_v3 = vadd.f32 %v16315_v20, %v8816_v30  ;;  %v8821_v53 = vadd.f32 %v15877_v17, %v8785_v38  ;;  %v8786_v13 = vmul.f32 %v15860_v50, %v8750_v8  ;;  %v8616_v0 = vpop.xlane.xlu0 %8615 }
 0x871   : > { %v12440_v5 = vpop.eup %12439  ;;  %9410 = vst [vmem:[%s15903_s25 + $0x58] sm:$0xff] %v9378_v35  ;;  %v8747_v16 = vmul.f32 %v12438_v34, %v16316_v28  ;;  %12449 = vrsqrt.f32 %v8693_v54  ;;  %v8694_v47 = vadd.f32 1e-05, %v8662_v46  ;;  %v8659_v27 = vmul.f32 0.0625, %v8616_v0  ;;  %v16321_v34 = vld [vmem:[#allocation5_spill] sm:$0xff] }
 0x872   : > { %9407 = vst [vmem:[%s15903_s25 + $0x40] sm:$0xff] %v9375_v33  ;;  %v9376_v37 = vmax.f32 %v9344_v3, 0.0  ;;  %v9349_v61 = vadd.f32 %v16317_v11, %v8821_v53  ;;  %v8822_v41 = vadd.f32 %v15877_v17, %v8786_v13  ;;  %v8748_v48 = vmul.f32 %v12440_v5, %v16318_v59  ;;  %v8618_v55 = vpop.xlane.xlu1 %8617  ;;  %v16322_v33 = vld [vmem:[#allocation24_spill] sm:$0xff]  ;;  %v16323_v28 = vld [vmem:[#allocation9_spill] sm:$0xff] }
 0x873   : > { %v12442_v62 = vpop.eup %12441  ;;  %v8783_v6 = vmul.f32 %v15860_v50, %v8747_v16  ;;  %12451 = vrsqrt.f32 %v8694_v47  ;;  %v8691_v21 = vadd.f32 1e-05, %v8659_v27  ;;  %v8660_v49 = vmul.f32 0.0625, %v8618_v55 }
 0x874   : > { %9408 = vst [vmem:[%s15903_s25 + $0x48] sm:$0xff] %v9376_v37  ;;  %v9381_v4 = vmax.f32 %v9349_v61, 0.0  ;;  %v9350_v9 = vadd.f32 %v16319_v57, %v8822_v41  ;;  %v8784_v51 = vmul.f32 %v15860_v50, %v8748_v48  ;;  %v8753_v24 = vmul.f32 %v12442_v62, %v16320_v60  ;;  %v8628_v31 = vpop.xlane.xlu0 %8627  ;;  %v15985_v62 = vld [vmem:[%s12546_s26 + $0xc8] sm:$0x1]  ;;  %v16325_v60 = vld [vmem:[#allocation7_spill] sm:$0xff] }
 0x875   : > { %v12444_v56 = vpop.eup %12443  ;;  %v8819_v44 = vadd.f32 %v15877_v17, %v8783_v6  ;;  %12453 = vrsqrt.f32 %v8691_v21  ;;  %v8692_v39 = vadd.f32 1e-05, %v8660_v49  ;;  %v8665_v30 = vmul.f32 0.0625, %v8628_v31  ;;  %v16324_v21 = vld [vmem:[#allocation6_spill] sm:$0xff] }
 0x876   : > { %9413 = vst [vmem:[%s15903_s25 + $0x70] sm:$0xff] %v9381_v4  ;;  %v9382_v38 = vmax.f32 %v9350_v9, 0.0  ;;  %v8820_v8 = vadd.f32 %v15877_v17, %v8784_v51  ;;  %v8789_v12 = vmul.f32 %v15860_v50, %v8753_v24  ;;  %v8754_v35 = vmul.f32 %v12444_v56, %v16321_v34  ;;  %v8630_v54 = vpop.xlane.xlu1 %8629 }
 0x877   : > { %v12446_v46 = vpop.eup %12445  ;;  %v9347_v20 = vadd.f32 %v16322_v33, %v8819_v44  ;;  %12455 = vrsqrt.f32 %v8692_v39  ;;  %v8697_v3 = vadd.f32 1e-05, %v8665_v30  ;;  %v8666_v53 = vmul.f32 0.0625, %v8630_v54 }
 0x878   : > { %9414 = vst [vmem:[%s15903_s25 + $0x78] sm:$0xff] %v9382_v38  ;;  %v9348_v13 = vadd.f32 %v15792_v36, %v8820_v8  ;;  %v8825_v0 = vadd.f32 %v15877_v17, %v8789_v12  ;;  %v8790_v5 = vmul.f32 %v15860_v50, %v8754_v35  ;;  %v8751_v16 = vmul.f32 %v12446_v46, %v16323_v28  ;;  %v8624_v47 = vpop.xlane.xlu0 %8623 }
 0x879   : > { %v12448_v27 = vpop.eup %12447  ;;  %v9379_v37 = vmax.f32 %v9347_v20, 0.0  ;;  %12457 = vrsqrt.f32 %v8697_v3  ;;  %v8698_v11 = vadd.f32 1e-05, %v8666_v53  ;;  %v8663_v61 = vmul.f32 0.0625, %v8624_v47 }
 0x87a   : > { %v9380_v41 = vmax.f32 %v9348_v13, 0.0  ;;  %v9353_v59 = vadd.f32 %v15794_v7, %v8825_v0  ;;  %v8826_v48 = vadd.f32 %v15877_v17, %v8790_v5  ;;  %v8787_v36 = vmul.f32 %v15860_v50, %v8751_v16  ;;  %v8626_v55 = vpop.xlane.xlu1 %8625  ;;  %v16328_v0 = vld [vmem:[#allocation10_spill] sm:$0xff] }
 0x87b   : > { %v12450_v6 = vpop.eup %12449  ;;  %9411 = vst [vmem:[%s15903_s25 + $0x60] sm:$0xff] %v9379_v37  ;;  %v8752_v49 = vmul.f32 %v12448_v27, %v16324_v21  ;;  %12459 = vrsqrt.f32 %v8698_v11  ;;  %v8695_v4 = vadd.f32 1e-05, %v8663_v61  ;;  %v8664_v57 = vmul.f32 0.0625, %v8626_v55 }
 0x87c   : > { %9412 = vst [vmem:[%s15903_s25 + $0x68] sm:$0xff] %v9380_v41  ;;  %v9385_v9 = vmax.f32 %v9353_v59, 0.0  ;;  %v9354_v51 = vadd.f32 %v15812_v45, %v8826_v48  ;;  %v8823_v7 = vadd.f32 %v15877_v17, %v8787_v36  ;;  %v8757_v24 = vmul.f32 %v12450_v6, %v16325_v60  ;;  %v16326_v45 = vld [vmem:[#allocation8_spill] sm:$0xff] }
 0x87d   : > { %v12452_v31 = vpop.eup %12451  ;;  %v8788_v56 = vmul.f32 %v15860_v50, %v8752_v49  ;;  %12461 = vrsqrt.f32 %v8695_v4  ;;  %v8696_v44 = vadd.f32 1e-05, %v8664_v57  ;;  %v8632_v39 = vpop.xlane.xlu0 %8631  ;;  %v9267_v30 = vshll.u32 %v15985_v62, 16  ;;  %v16330_v36 = vld [vmem:[#allocation4_spill] sm:$0xff] }
 0x87e   : > { %9417 = vst [vmem:[%s15903_s25 + $0x90] sm:$0xff] %v9385_v9  ;;  %v9386_v38 = vmax.f32 %v9354_v51, 0.0  ;;  %v9351_v8 = vadd.f32 %v15814_v58, %v8823_v7  ;;  %v8793_v12 = vmul.f32 %v15860_v50, %v8757_v24  ;;  %v8758_v34 = vmul.f32 %v12452_v31, %v16326_v45  ;;  %v16331_v7 = vld [vmem:[#allocation3_spill] sm:$0xff] }
 0x87f   : > { %v12454_v35 = vpop.eup %12453  ;;  %v8824_v54 = vadd.f32 %v15877_v17, %v8788_v56  ;;  %12463 = vrsqrt.f32 %v8696_v44  ;;  %v8667_v46 = vmul.f32 0.0625, %v8632_v39  ;;  %v8634_v33 = vpop.xlane.xlu1 %8633  ;;  %v16327_v20 = vshll.u32 %v15870_v29, 16 }
 0x880   : > { %9418 = vst [vmem:[%s15903_s25 + $0x98] sm:$0xff] %v9386_v38  ;;  %v9383_v53 = vmax.f32 %v9351_v8, 0.0  ;;  %v8829_v13 = vadd.f32 %v15877_v17, %v8793_v12  ;;  %v8794_v58 = vmul.f32 %v15860_v50, %v8758_v34  ;;  %v8755_v5 = vmul.f32 %v12454_v35, %v16328_v0  ;;  %v16332_v38 = vld [vmem:[#allocation12_spill] sm:$0xff] }
 0x881   : > { %v16002_v3 = vrot.slane %v16327_v20, 5  ;;  %v12456_v28 = vpop.eup %12455  ;;  %v9352_v16 = vadd.f32 %v15817_v2, %v8824_v54  ;;  %v8699_v47 = vadd.f32 1e-05, %v8667_v46  ;;  %v8668_v27 = vmul.f32 0.0625, %v8634_v33  ;;  %v8636_v37 = vpop.xlane.xlu0 %8635  ;;  %v16333_v46 = vld [vmem:[#allocation13_spill] sm:$0xff] }
 0x882   : > { %v16329_v11 = vshrl.u32 %v15870_v29, 16  ;;  %9415 = vst [vmem:[%s15903_s25 + $0x80] sm:$0xff] %v9383_v53  ;;  %v9357_v41 = vadd.f32 %v15819_v18, %v8829_v13  ;;  %v8830_v59 = vadd.f32 %v15877_v17, %v8794_v58  ;;  %v8791_v48 = vmul.f32 %v15860_v50, %v8755_v5  ;;  %v16335_v5 = vld [vmem:[#allocation14_spill] sm:$0xff] }
 0x883   : > { %v8756_v55 = vmul.f32 %v12456_v28, %v16330_v36  ;;  %v12458_v6 = vpop.eup %12457  ;;  %v9384_v21 = vmax.f32 %v9352_v16, 0.0  ;;  %12465 = vrsqrt.f32 %v8699_v47  ;;  %v8700_v2 = vadd.f32 1e-05, %v8668_v27  ;;  %v8638_v4 = vpop.xlane.xlu1 %8637 }
 0x884   : > { %v9263_v61 = vrot.slane %v16329_v11, 4  ;;  %v8669_v49 = vmul.f32 0.0625, %v8636_v37  ;;  %v9389_v57 = vmax.f32 %v9357_v41, 0.0  ;;  %v9358_v29 = vadd.f32 %v15821_v40, %v8830_v59 }
 0x885   : > { %v8827_v9 = vadd.f32 %v15877_v17, %v8791_v48  ;;  %v8792_v18 = vmul.f32 %v15860_v50, %v8756_v55  ;;  %v12460_v51 = vpop.eup %12459  ;;  %9416 = vst [vmem:[%s15903_s25 + $0x88] sm:$0xff] %v9384_v21  ;;  %v8761_v60 = vmul.f32 %v12458_v6, %v16331_v7  ;;  %12467 = vrsqrt.f32 %v8700_v2  ;;  %v16337_v6 = vld [vmem:[#allocation15_spill] sm:$0xff] }
 0x886   : > { %v8701_v24 = vadd.f32 1e-05, %v8669_v49  ;;  %v8670_v31 = vmul.f32 0.0625, %v8638_v4  ;;  %9421 = vst [vmem:[%s15903_s25 + $0xb0] sm:$0xff] %v9389_v57  ;;  %v9390_v56 = vmax.f32 %v9358_v29, 0.0  ;;  %v8762_v40 = vmul.f32 %v12460_v51, %v16332_v38  ;;  %v16338_v49 = vld [vmem:[#allocation16_spill] sm:$0xff] }
 0x887   : > { %v9355_v44 = vadd.f32 %v15831_v19, %v8827_v9  ;;  %v8828_v39 = vadd.f32 %v15877_v17, %v8792_v18  ;;  %v12462_v8 = vpop.eup %12461  ;;  %v8797_v12 = vmul.f32 %v15860_v50, %v8761_v60  ;;  %v9254_v45 = vor.u32 %v15905_v32, %v15872_v52  ;;  %v16339_v51 = vld [vmem:[#allocation17_spill] sm:$0xff] }
 0x888   : > { %12469 = vrsqrt.f32 %v8701_v24  ;;  %v8702_v34 = vadd.f32 1e-05, %v8670_v31  ;;  %9422 = vst [vmem:[%s15903_s25 + $0xb8] sm:$0xff] %v9390_v56  ;;  %v8798_v19 = vmul.f32 %v15860_v50, %v8762_v40  ;;  %v8759_v33 = vmul.f32 %v12462_v8, %v16333_v46 }
 0x889   : > { %v9387_v35 = vmax.f32 %v9355_v44, 0.0  ;;  %v9356_v54 = vadd.f32 %v15833_v43, %v8828_v39  ;;  %v12464_v20 = vpop.eup %12463  ;;  %v8833_v53 = vadd.f32 %v15877_v17, %v8797_v12  ;;  %v16334_v13 = vor.u32 %v15865_v10, %v15862_v25  ;;  %v16340_v44 = vld [vmem:[#allocation20_spill] sm:$0xff] }
 0x88a   : > { %v9264_v52 = vor.u32 %v9263_v61, %v16002_v3  ;;  %12471 = vrsqrt.f32 %v8702_v34  ;;  %v8834_v0 = vadd.f32 %v15877_v17, %v8798_v19  ;;  %v8795_v43 = vmul.f32 %v15860_v50, %v8759_v33 }
 0x88b   : > { %v9241_v58 = vrot.slane %v16334_v13, 4  ;;  %9419 = vst [vmem:[%s15903_s25 + $0xa0] sm:$0xff] %v9387_v35  ;;  %v9388_v32 = vmax.f32 %v9356_v54, 0.0  ;;  %v8760_v28 = vmul.f32 %v12464_v20, %v16335_v5  ;;  %v9361_v16 = vadd.f32 %v15846_v42, %v8833_v53 }
 0x88c   : > { %v16336_v47 = vsel %vm12578_vm2, %v15853_v14, %v15855_v63  ;;  %v9255_v27 = vrot.slane %v9254_v45, 4  ;;  %v9362_v37 = vadd.f32 %v15849_v26, %v8834_v0  ;;  %v8831_v11 = vadd.f32 %v15877_v17, %v8795_v43 }
 0x88d   : > { %v9328_v10 = vunpack.c.l.bf16 %v16336_v47  ;;  %9420 = vst [vmem:[%s15903_s25 + $0xa8] sm:$0xff] %v9388_v32  ;;  %v8796_v61 = vmul.f32 %v15860_v50, %v8760_v28  ;;  %v9236_v42 = vsel %vm12578_vm2, %v15886_v22, %v15862_v25  ;;  %v12466_v41 = vpop.eup %12465  ;;  %v9393_v59 = vmax.f32 %v9361_v16, 0.0 }
 0x88e   : > { %v9246_v14 = vsel %vm12578_vm2, %v9241_v58, %v15867_v15  ;;  %v9265_v63 = vrot.slane %v9264_v52, 4  ;;  %v9269_v26 = vrot.slane %v9267_v30, 5  ;;  %v9394_v48 = vmax.f32 %v9362_v37, 0.0 }
 0x88f   : > { %v9359_v36 = vadd.f32 %v15851_v23, %v8831_v11  ;;  %v8832_v55 = vadd.f32 %v15877_v17, %v8796_v61  ;;  %v8763_v21 = vmul.f32 %v12466_v41, %v16337_v6  ;;  %v12468_v2 = vpop.eup %12467  ;;  %9425 = vst [vmem:[%s15903_s25 + $0xd0] sm:$0xff] %v9393_v59  ;;  %v9331_v25 = vunpack.c.l.bf16 %v9236_v42 }
 0x890   : > { %v9260_v22 = vsel %vm12578_vm2, %v9255_v27, %v16002_v3  ;;  %9426 = vst [vmem:[%s15903_s25 + $0xd8] sm:$0xff] %v9394_v48  ;;  %v8764_v4 = vmul.f32 %v12468_v2, %v16338_v49  ;;  %v9332_v57 = vunpack.c.l.bf16 %v9246_v14  ;;  %v9270_v29 = vsel %vm12578_vm2, %v9265_v63, %v9269_v26 }
 0x891   : > { %v9391_v15 = vmax.f32 %v9359_v36, 0.0  ;;  %v9360_v62 = vadd.f32 %v9328_v10, %v8832_v55  ;;  %v8799_v30 = vmul.f32 %v15860_v50, %v8763_v21  ;;  %v9333_v24 = vunpack.c.l.bf16 %v9260_v22 }
 0x892   : > { %v12470_v23 = vpop.eup %12469  ;;  %v8800_v3 = vmul.f32 %v15860_v50, %v8764_v4  ;;  %v9334_v38 = vunpack.c.l.bf16 %v9270_v29 }
 0x893   : > { %9423 = vst [vmem:[%s15903_s25 + $0xc0] sm:$0xff] %v9391_v15  ;;  %v9392_v9 = vmax.f32 %v9360_v62, 0.0  ;;  %v8835_v18 = vadd.f32 %v15877_v17, %v8799_v30  ;;  %v8765_v7 = vmul.f32 %v12470_v23, %v16339_v51 }
 0x894   : > { %v12472_v60 = vpop.eup %12471  ;;  %v8836_v56 = vadd.f32 %v15877_v17, %v8800_v3 }
 0x895   : > { %9424 = vst [vmem:[%s15903_s25 + $0xc8] sm:$0xff] %v9392_v9  ;;  %v9363_v31 = vadd.f32 %v9331_v25, %v8835_v18  ;;  %v8801_v1 = vmul.f32 %v15860_v50, %v8765_v7  ;;  %v8766_v39 = vmul.f32 %v12472_v60, %v16340_v44 }
 0x896   : > { %v9364_v8 = vadd.f32 %v9332_v57, %v8836_v56 }
 0x897   : > { %v9395_v40 = vmax.f32 %v9363_v31, 0.0  ;;  %v8837_v12 = vadd.f32 %v15877_v17, %v8801_v1  ;;  %v8802_v45 = vmul.f32 %v15860_v50, %v8766_v39 }
 0x898   : > { %v9396_v34 = vmax.f32 %v9364_v8, 0.0 }
 0x899   : > { %9427 = vst [vmem:[%s15903_s25 + $0xe0] sm:$0xff] %v9395_v40  ;;  %v9365_v35 = vadd.f32 %v9333_v24, %v8837_v12  ;;  %v8838_v54 = vadd.f32 %v15877_v17, %v8802_v45 }
 0x89a   : > { %9428 = vst [vmem:[%s15903_s25 + $0xe8] sm:$0xff] %v9396_v34 }
 0x89b   : > { %v9397_v19 = vmax.f32 %v9365_v35, 0.0  ;;  %v9366_v46 = vadd.f32 %v9334_v38, %v8838_v54 }
 0x89d   : > { %9429 = vst [vmem:[%s15903_s25 + $0xf0] sm:$0xff] %v9397_v19  ;;  %v9398_v33 = vmax.f32 %v9366_v46, 0.0 }
 0x89f   : > { %9430 = vst [vmem:[%s15903_s25 + $0xf8] sm:$0xff] %v9398_v33 }
 0x8a0 PF: > { %s14_s15 = sadd.s32 1, %s12495_s15  }
 0x8a1   : > { %p11_p4 = scmp.ge.s32.totalorder %s14_s15, 4  }
 0x8a3   :  { %13 = sbr.rel (!%p11_p4) target bundleno = 1 (0x1), region = 86 }

</bundles_post_ra>
